<compile_context>
chip_gen: v7x
topology: tpu7x:2x2x1
jax: 0.10.0
libtpu: 0.0.40
codegen_flags: <defaults>
</compile_context>

<pallas_src>
import functools

import jax
import jax.numpy as jnp
from jax.experimental import pallas as pl
from jax.experimental.pallas import tpu as pltpu


# ------------------------------------------------------------------------ gate helpers
def _g_lane_mask(H):
    """Boolean [1, 4H] lane mask selecting the 'g' gate lanes [2H, 3H)."""
    lane = jax.lax.broadcasted_iota(jnp.int32, (1, 4 * H), 1)
    return (lane >= 2 * H) & (lane < 3 * H)


def _gate_act(gates, g_mask):
    """Single-EUP-pass gate nonlinearity over a [*, 4H] pre-activation array.

    i/f/o lanes -> sigmoid(x); g lanes -> tanh(x) = 2*sigmoid(2*x) - 1, so one
    sigmoid over the full width plus a cheap VPU fix-up replaces sigmoid + tanh.
    """
    pre = jnp.where(g_mask, 2.0 * gates, gates)
    s = jax.nn.sigmoid(pre)
    return jnp.where(g_mask, 2.0 * s - 1.0, s)


def _lstm_update(gates, c, H, g_mask):
    """LSTM cell update from pre-activations [*, 4H] (PyTorch gate order i,f,g,o)."""
    act = _gate_act(gates, g_mask)
    i = act[:, 0:H]
    f = act[:, H:2 * H]
    g = act[:, 2 * H:3 * H]
    o = act[:, 3 * H:4 * H]
    c_new = f * c + i * g
    h_new = o * jnp.tanh(c_new)
    return h_new, c_new


def _vmem_spec():
    return pl.BlockSpec(memory_space=pltpu.MemorySpace.VMEM)


# -------------------------------------------------------------- fused encoder+decoder
def make_fused_kernel(num_layers, L, B, H, T):
    """One kernel: StackedBRNN encoder (all layers) + attention RNN decoder.

    Input refs (all VMEM):
      x        [L*B, E]   time-major flattened embeddings (row = t*B + b)
      mask     [B, L]     1.0 == padding
      per encoder layer:  w_in_cat [Din, 8H], w_h_blockdiag [2H, 8H], b_cat [1, 8H]
      wa_t     [2H, H]    (attention bilinear weight, transposed)
      wi0 [2H, 4H], wh0 [H, 4H], b0 [1, 4H]            (decoder cell 0)
      per decoder cell k>=1: w_cat [2H, 4H], b [1, 4H]  (fused [Wi ; Wh])
      wout [H, 2H], bout [1, 2H]
    Output ref: out [T*B, 2H] time-major (row = t*B + b)
    Scratch:    act [L*B, 2H] encoder states, htop [T*B, H] decoder top hiddens
    """
    H2, H4, H8 = 2 * H, 4 * H, 8 * H
    n_enc = 3 * num_layers
    n_dec_hi = 2 * (num_layers - 1)

    def kernel(*refs):
        x_ref = refs[0]
        mask_ref = refs[1]
        enc_w = refs[2:2 + n_enc]
        idx = 2 + n_enc
        wa_t_ref = refs[idx]
        wi0_ref = refs[idx + 1]
        wh0_ref = refs[idx + 2]
        b0_ref = refs[idx + 3]
        idx += 4
        dec_hi = refs[idx:idx + n_dec_hi]
        idx += n_dec_hi
        wout_ref = refs[idx]
        bout_ref = refs[idx + 1]
        out_ref = refs[idx + 2]
        act_ref = refs[idx + 3]
        htop_ref = refs[idx + 4]

        g_mask = _g_lane_mask(H)               # hoisted: built once, reused everywhere

        # ----------------------- StackedBRNN encoder (all layers fused) -------------
        x_cur = x_ref[...]                     # [L*B, Din] current layer input (value)
        for k in range(num_layers):
            w_in = enc_w[3 * k][...]           # [Din, 8H]  (fwd lanes 0:4H, bwd 4H:8H)
            w_hbd = enc_w[3 * k + 1][...]      # [2H, 8H]   block-diagonal hidden weight
            b_cat = enc_w[3 * k + 2][...]      # [1, 8H]

            # Hoisted input projection: ONE MXU matmul covers both directions and all
            # timesteps -> only the block-diag h @ W_h matmul stays on the chain.
            proj = jnp.dot(x_cur, w_in, preferred_element_type=jnp.float32) + b_cat

            h2 = jnp.zeros((B, H2), jnp.float32)      # [h_f | h_b]
            c_f = jnp.zeros((B, H), jnp.float32)
            c_b = jnp.zeros((B, H), jnp.float32)

            # Interleaved fwd/bwd recurrence, fully unrolled (L small & static).
            for s in range(L):
                tf = s
                tb = L - 1 - s
                pf = proj[tf * B:(tf + 1) * B, 0:H4]
                pb = proj[tb * B:(tb + 1) * B, H4:H8]
                if s == 0:
                    g_f, g_b = pf, pb          # h == 0 at step 0: skip the matmul
                else:
                    mm = jnp.dot(h2, w_hbd, preferred_element_type=jnp.float32)
                    g_f = mm[:, 0:H4] + pf
                    g_b = mm[:, H4:H8] + pb
                h_f, c_f = _lstm_update(g_f, c_f, H, g_mask)
                h_b, c_b = _lstm_update(g_b, c_b, H, g_mask)
                act_ref[tf * B:(tf + 1) * B, 0:H] = h_f
                act_ref[tb * B:(tb + 1) * B, H:H2] = h_b
                h2 = jnp.concatenate([h_f, h_b], axis=1)

            x_cur = act_ref[...]               # [L*B, 2H] -> next layer's input

        enc2d = x_cur                          # final encoder states (stay in VMEM)

        # --------------------------- AttentionRNNDecoder_hall -----------------------
        # Hoisted off the serial decode chain: mask bias, attention projection of the
        # encoder states, and cell-0's input projection of the encoder states
        # (ctx @ Wi0 == sum_l alpha_l * (enc_l @ Wi0), since sum_l alpha_l == 1).
        bias = jnp.where(mask_ref[...] > 0.5, jnp.float32(-1e30), jnp.float32(0.0))  # [B,L]
        enc_wa = jnp.dot(enc2d, wa_t_ref[...],
                         preferred_element_type=jnp.float32)                  # [L*B, H]
        enc_wi0 = jnp.dot(enc2d, wi0_ref[...],
                          preferred_element_type=jnp.float32)                 # [L*B, 4H]

        wh0 = wh0_ref[...]
        b0 = b0_ref[...]
        dec_ws = [(dec_hi[2 * j][...], dec_hi[2 * j + 1][...])
                  for j in range(num_layers - 1)]

        hs = [jnp.zeros((B, H), jnp.float32) for _ in range(num_layers)]
        cs = [jnp.zeros((B, H), jnp.float32) for _ in range(num_layers)]

        # Fully unrolled decode loop (T small & static).
        for t in range(T):
            h_top = hs[-1]

            # Bilinear masked attention over L encoder positions, unrolled over L
            # (no in-kernel reshape; VPU/XLU/EUP work that overlaps with cell matmuls).
            s_l = [jnp.sum(enc_wa[l * B:(l + 1) * B, :] * h_top,
                           axis=-1, keepdims=True) + bias[:, l:l + 1]
                   for l in range(L)]                                         # L x [B,1]
            m = s_l[0]
            for l in range(1, L):
                m = jnp.maximum(m, s_l[l])
            e_l = [jnp.exp(s_l[l] - m) for l in range(L)]
            denom = e_l[0]
            for l in range(1, L):
                denom = denom + e_l[l]
            inv = pl.reciprocal(denom, approx=True)                           # [B, 1]

            # ctx @ Wi0, computed as the alpha-weighted sum of the hoisted enc_wi0.
            ctx_p = (e_l[0] * inv) * enc_wi0[0:B, :]
            for l in range(1, L):
                ctx_p = ctx_p + (e_l[l] * inv) * enc_wi0[l * B:(l + 1) * B, :]  # [B,4H]

            # Cell 0: only h @ W_h remains on the chain (input proj was hoisted).
            g0 = ctx_p + jnp.dot(hs[0], wh0, preferred_element_type=jnp.float32) + b0
            hs[0], cs[0] = _lstm_update(g0, cs[0], H, g_mask)

            # Cells k>=1: fused [inp | h] @ [Wi ; Wh] -> one MXU push per cell.
            for k in range(1, num_layers):
                w_cat, b_k = dec_ws[k - 1]
                xk = jnp.concatenate([hs[k - 1], hs[k]], axis=1)              # [B, 2H]
                gk = jnp.dot(xk, w_cat, preferred_element_type=jnp.float32) + b_k
                hs[k], cs[k] = _lstm_update(gk, cs[k], H, g_mask)

            # One [B, H] time-major store per step (no per-batch-row scatter).
            htop_ref[t * B:(t + 1) * B, :] = hs[-1]

        # Deferred output head: one MXU matmul + one wide store after the loop.
        out_ref[...] = (jnp.dot(htop_ref[...], wout_ref[...],
                                preferred_element_type=jnp.float32) + bout_ref[...])

    return kernel


def fused_forward_call(x2d, mask, enc_flat, dec_flat, *, num_layers, L, B, H, T):
    n_in = 2 + len(enc_flat) + len(dec_flat)
    return pl.pallas_call(
        make_fused_kernel(num_layers, L, B, H, T),
        out_shape=jax.ShapeDtypeStruct((T * B, 2 * H), jnp.float32),
        in_specs=[_vmem_spec() for _ in range(n_in)],
        out_specs=_vmem_spec(),
        scratch_shapes=[pltpu.VMEM((L * B, 2 * H), jnp.float32),
                        pltpu.VMEM((T * B, H), jnp.float32)],
    )(x2d, mask, *enc_flat, *dec_flat)


# ---------------------------------------------------------------------- params & model
def init_params(key, emb_dim, hidden, num_layers):
    def nxt():
        nonlocal key
        key, sub = jax.random.split(key)
        return sub

    params = {"encoder": [], "decoder": {}}
    d_in = emb_dim
    for _ in range(num_layers):
        layer = {}
        for prefix in ("f", "b"):
            layer[prefix + "_wi"] = 0.1 * jax.random.normal(
                nxt(), (d_in, 4 * hidden), jnp.float32)
            layer[prefix + "_wh"] = 0.1 * jax.random.normal(
                nxt(), (hidden, 4 * hidden), jnp.float32)
            layer[prefix + "_b"] = jnp.zeros((1, 4 * hidden), jnp.float32)
        params["encoder"].append(layer)
        d_in = 2 * hidden

    dec_layers = []
    din = 2 * hidden                      # decoder_input_size = hidden_size * 2
    for _ in range(num_layers):
        wi = 0.1 * jax.random.normal(nxt(), (din, 4 * hidden), jnp.float32)
        wh = 0.1 * jax.random.normal(nxt(), (hidden, 4 * hidden), jnp.float32)
        b = jnp.zeros((1, 4 * hidden), jnp.float32)
        dec_layers.append((wi, wh, b))
        din = hidden
    params["decoder"]["layers"] = dec_layers
    params["decoder"]["wa"] = 0.1 * jax.random.normal(nxt(), (hidden, 2 * hidden), jnp.float32)
    params["decoder"]["wout"] = 0.1 * jax.random.normal(nxt(), (hidden, 2 * hidden), jnp.float32)
    params["decoder"]["bout"] = jnp.zeros((1, 2 * hidden), jnp.float32)
    return params


@functools.partial(jax.jit, static_argnames=("max_seqlen",))
def hallucination_net_forward(x2_emb, x2_mask, params, max_seqlen):
    B, L, E = x2_emb.shape
    H = params["encoder"][0]["f_wh"].shape[0]
    num_layers = len(params["encoder"])
    T = max_seqlen

    # ---- weight packing for the fused kernel (tiny XLA concats under jit) ----
    enc_flat = []
    zeros_blk = jnp.zeros((H, 4 * H), jnp.float32)
    for lp in params["encoder"]:
        w_in_cat = jnp.concatenate([lp["f_wi"], lp["b_wi"]], axis=1)          # [Din, 8H]
        w_h_bd = jnp.concatenate(
            [jnp.concatenate([lp["f_wh"], zeros_blk], axis=1),
             jnp.concatenate([zeros_blk, lp["b_wh"]], axis=1)], axis=0)        # [2H, 8H]
        b_cat = jnp.concatenate([lp["f_b"], lp["b_b"]], axis=1)               # [1, 8H]
        enc_flat += [w_in_cat, w_h_bd, b_cat]

    dec = params["decoder"]
    wi0, wh0, b0 = dec["layers"][0]
    dec_flat = [dec["wa"].T, wi0, wh0, b0]                                    # wa_t [2H,H]
    for (wi, wh, b) in dec["layers"][1:]:
        dec_flat += [jnp.concatenate([wi, wh], axis=0), b]                    # [2H,4H],[1,4H]
    dec_flat += [dec["wout"], dec["bout"]]

    # ---- time-major flatten (row = t*B + b) so per-timestep rows are contiguous ----
    x2d = jnp.swapaxes(x2_emb, 0, 1).reshape(L * B, E)

    out2d = fused_forward_call(
        x2d, x2_mask.astype(jnp.float32), enc_flat, dec_flat,
        num_layers=num_layers, L=L, B=B, H=H, T=T)                            # [T*B, 2H]

    # Trivial 3 KB batch-major reshape in the wrapper (cheaper than in-kernel scatter).
    return jnp.swapaxes(out2d.reshape(T, B, 2 * H), 0, 1)                     # [B, T, 2H]


# --------------------------------------------------------------------------------- main
if __name__ == "__main__":
    B, L, E, H, NUM_LAYERS, MAX_SEQLEN = 2, 8, 16, 32, 2, 6

    key = jax.random.PRNGKey(0)
    k_emb, k_par = jax.random.split(key)

    x2_emb = jax.random.normal(k_emb, (B, L, E), jnp.float32)
    lengths = jnp.array([8, 5], jnp.int32)                     # valid tokens per batch row
    x2_mask = (jnp.arange(L)[None, :] >= lengths[:, None]).astype(jnp.float32)  # 1.0 = pad

    params = init_params(k_par, E, H, NUM_LAYERS)

    out = hallucination_net_forward(x2_emb, x2_mask, params, max_seqlen=MAX_SEQLEN)
    out = jax.block_until_ready(out)
    assert out.shape == (B, MAX_SEQLEN, 2 * H) and out.dtype == jnp.float32
    assert bool(jnp.all(jnp.isfinite(out)))
    print("KERNEL_OK")
</pallas_src>

<mosaic_0001>
module attributes {stable_mosaic.version = 11 : i64} {
  func.func @kernel(%arg0: memref<16x16xf32, #tpu.memory_space<vmem>>, %arg1: memref<2x8xf32, #tpu.memory_space<vmem>>, %arg2: memref<16x256xf32, #tpu.memory_space<vmem>>, %arg3: memref<64x256xf32, #tpu.memory_space<vmem>>, %arg4: memref<1x256xf32, #tpu.memory_space<vmem>>, %arg5: memref<64x256xf32, #tpu.memory_space<vmem>>, %arg6: memref<64x256xf32, #tpu.memory_space<vmem>>, %arg7: memref<1x256xf32, #tpu.memory_space<vmem>>, %arg8: memref<64x32xf32, #tpu.memory_space<vmem>>, %arg9: memref<64x128xf32, #tpu.memory_space<vmem>>, %arg10: memref<32x128xf32, #tpu.memory_space<vmem>>, %arg11: memref<1x128xf32, #tpu.memory_space<vmem>>, %arg12: memref<64x128xf32, #tpu.memory_space<vmem>>, %arg13: memref<1x128xf32, #tpu.memory_space<vmem>>, %arg14: memref<32x64xf32, #tpu.memory_space<vmem>>, %arg15: memref<1x64xf32, #tpu.memory_space<vmem>>, %arg16: memref<12x64xf32, #tpu.memory_space<vmem>>, %arg17: memref<16x64xf32, #tpu.memory_space<vmem>>, %arg18: memref<12x32xf32, #tpu.memory_space<vmem>>) attributes {dimension_semantics = [], scalar_prefetch = 0 : i64, scratch_operands = 2 : i64, tpu.core_type = #tpu.core_type<tc>} {
    %0 = tpu.iota {dimensions = array<i32: 1>} : vector<1x128xi32>
    %c64_i32 = arith.constant 64 : i32
    %1 = vector.broadcast %c64_i32 : i32 to vector<1x128xi32>
    %2 = arith.cmpi sge, %0, %1 : vector<1x128xi32>
    %c96_i32 = arith.constant 96 : i32
    %3 = vector.broadcast %c96_i32 : i32 to vector<1x128xi32>
    %4 = arith.cmpi slt, %0, %3 : vector<1x128xi32>
    %5 = arith.andi %2, %4 : vector<1x128xi1>
    %c0 = arith.constant 0 : index
    %c0_0 = arith.constant 0 : index
    %6 = vector.load %arg0[%c0, %c0_0] : memref<16x16xf32, #tpu.memory_space<vmem>>, vector<16x16xf32>
    %c0_1 = arith.constant 0 : index
    %c0_2 = arith.constant 0 : index
    %7 = vector.load %arg2[%c0_1, %c0_2] : memref<16x256xf32, #tpu.memory_space<vmem>>, vector<16x256xf32>
    %c0_3 = arith.constant 0 : index
    %c0_4 = arith.constant 0 : index
    %8 = vector.load %arg3[%c0_3, %c0_4] : memref<64x256xf32, #tpu.memory_space<vmem>>, vector<64x256xf32>
    %c0_5 = arith.constant 0 : index
    %c0_6 = arith.constant 0 : index
    %9 = vector.load %arg4[%c0_5, %c0_6] : memref<1x256xf32, #tpu.memory_space<vmem>>, vector<1x256xf32>
    %cst = arith.constant dense<0.000000e+00> : vector<16x256xf32>
    %10 = tpu.matmul %6, %7, %cst {dimension_numbers = #tpu.dot_dimension_numbers<[1], [0], [0], [1], [0, 0, 1, 1], [], []>} : vector<16x16xf32>, vector<16x256xf32>, vector<16x256xf32> -> vector<16x256xf32>
    %11 = vector.broadcast %9 : vector<1x256xf32> to vector<16x256xf32>
    %12 = arith.addf %10, %11 : vector<16x256xf32>
    %cst_7 = arith.constant 0.000000e+00 : f32
    %13 = vector.broadcast %cst_7 : f32 to vector<2x32xf32>
    %cst_8 = arith.constant 0.000000e+00 : f32
    %14 = vector.broadcast %cst_8 : f32 to vector<2x32xf32>
    %15 = vector.extract_strided_slice %12 {offsets = [0, 0], sizes = [2, 128], strides = [1, 1]} : vector<16x256xf32> to vector<2x128xf32>
    %16 = vector.extract_strided_slice %12 {offsets = [14, 128], sizes = [2, 128], strides = [1, 1]} : vector<16x256xf32> to vector<2x128xf32>
    %cst_9 = arith.constant 2.000000e+00 : f32
    %17 = vector.broadcast %cst_9 : f32 to vector<2x128xf32>
    %18 = arith.mulf %17, %15 : vector<2x128xf32>
    %19 = vector.shape_cast %5 : vector<1x128xi1> to vector<1x128xi1>
    %20 = vector.broadcast %19 : vector<1x128xi1> to vector<2x128xi1>
    %21 = arith.select %20, %18, %15 : vector<2x128xi1>, vector<2x128xf32>
    %22 = arith.negf %21 : vector<2x128xf32>
    %23 = math.exp %22 : vector<2x128xf32>
    %cst_10 = arith.constant 1.000000e+00 : f32
    %24 = vector.broadcast %cst_10 : f32 to vector<2x128xf32>
    %25 = arith.addf %24, %23 : vector<2x128xf32>
    %26 = arith.divf %24, %25 : vector<2x128xf32>
    %cst_11 = arith.constant 2.000000e+00 : f32
    %27 = vector.broadcast %cst_11 : f32 to vector<2x128xf32>
    %28 = arith.mulf %27, %26 : vector<2x128xf32>
    %cst_12 = arith.constant 1.000000e+00 : f32
    %29 = vector.broadcast %cst_12 : f32 to vector<2x128xf32>
    %30 = arith.subf %28, %29 : vector<2x128xf32>
    %31 = vector.shape_cast %5 : vector<1x128xi1> to vector<1x128xi1>
    %32 = vector.broadcast %31 : vector<1x128xi1> to vector<2x128xi1>
    %33 = arith.select %32, %30, %26 : vector<2x128xi1>, vector<2x128xf32>
    %34 = vector.extract_strided_slice %33 {offsets = [0, 0], sizes = [2, 32], strides = [1, 1]} : vector<2x128xf32> to vector<2x32xf32>
    %35 = vector.extract_strided_slice %33 {offsets = [0, 32], sizes = [2, 32], strides = [1, 1]} : vector<2x128xf32> to vector<2x32xf32>
    %36 = vector.extract_strided_slice %33 {offsets = [0, 64], sizes = [2, 32], strides = [1, 1]} : vector<2x128xf32> to vector<2x32xf32>
    %37 = vector.extract_strided_slice %33 {offsets = [0, 96], sizes = [2, 32], strides = [1, 1]} : vector<2x128xf32> to vector<2x32xf32>
    %38 = arith.mulf %35, %13 : vector<2x32xf32>
    %39 = arith.mulf %34, %36 : vector<2x32xf32>
    %40 = arith.addf %38, %39 : vector<2x32xf32>
    %41 = math.tanh %40 : vector<2x32xf32>
    %42 = arith.mulf %37, %41 : vector<2x32xf32>
    %cst_13 = arith.constant 2.000000e+00 : f32
    %43 = vector.broadcast %cst_13 : f32 to vector<2x128xf32>
    %44 = arith.mulf %43, %16 : vector<2x128xf32>
    %45 = vector.shape_cast %5 : vector<1x128xi1> to vector<1x128xi1>
    %46 = vector.broadcast %45 : vector<1x128xi1> to vector<2x128xi1>
    %47 = arith.select %46, %44, %16 : vector<2x128xi1>, vector<2x128xf32>
    %48 = arith.negf %47 : vector<2x128xf32>
    %49 = math.exp %48 : vector<2x128xf32>
    %cst_14 = arith.constant 1.000000e+00 : f32
    %50 = vector.broadcast %cst_14 : f32 to vector<2x128xf32>
    %51 = arith.addf %50, %49 : vector<2x128xf32>
    %52 = arith.divf %50, %51 : vector<2x128xf32>
    %cst_15 = arith.constant 2.000000e+00 : f32
    %53 = vector.broadcast %cst_15 : f32 to vector<2x128xf32>
    %54 = arith.mulf %53, %52 : vector<2x128xf32>
    %cst_16 = arith.constant 1.000000e+00 : f32
    %55 = vector.broadcast %cst_16 : f32 to vector<2x128xf32>
    %56 = arith.subf %54, %55 : vector<2x128xf32>
    %57 = vector.shape_cast %5 : vector<1x128xi1> to vector<1x128xi1>
    %58 = vector.broadcast %57 : vector<1x128xi1> to vector<2x128xi1>
    %59 = arith.select %58, %56, %52 : vector<2x128xi1>, vector<2x128xf32>
    %60 = vector.extract_strided_slice %59 {offsets = [0, 0], sizes = [2, 32], strides = [1, 1]} : vector<2x128xf32> to vector<2x32xf32>
    %61 = vector.extract_strided_slice %59 {offsets = [0, 32], sizes = [2, 32], strides = [1, 1]} : vector<2x128xf32> to vector<2x32xf32>
    %62 = vector.extract_strided_slice %59 {offsets = [0, 64], sizes = [2, 32], strides = [1, 1]} : vector<2x128xf32> to vector<2x32xf32>
    %63 = vector.extract_strided_slice %59 {offsets = [0, 96], sizes = [2, 32], strides = [1, 1]} : vector<2x128xf32> to vector<2x32xf32>
    %64 = arith.mulf %61, %14 : vector<2x32xf32>
    %65 = arith.mulf %60, %62 : vector<2x32xf32>
    %66 = arith.addf %64, %65 : vector<2x32xf32>
    %67 = math.tanh %66 : vector<2x32xf32>
    %68 = arith.mulf %63, %67 : vector<2x32xf32>
    %c0_17 = arith.constant 0 : index
    %c0_18 = arith.constant 0 : index
    %69 = vector.load %arg17[%c0_17, %c0_18] : memref<16x64xf32, #tpu.memory_space<vmem>>, vector<2x32xf32>
    tpu.vector_store %arg17[%c0_17, %c0_18], %42 {strides = array<i32>} : memref<16x64xf32, #tpu.memory_space<vmem>>, vector<2x32xf32>,
    %c14 = arith.constant 14 : index
    %c32 = arith.constant 32 : index
    %70 = vector.load %arg17[%c14, %c32] : memref<16x64xf32, #tpu.memory_space<vmem>>, vector<2x32xf32>
    tpu.vector_store %arg17[%c14, %c32], %68 {strides = array<i32>} : memref<16x64xf32, #tpu.memory_space<vmem>>, vector<2x32xf32>,
    %71 = tpu.concatenate %42, %68 in 1 : vector<2x32xf32>, vector<2x32xf32> -> vector<2x64xf32>
    %72 = vector.extract_strided_slice %12 {offsets = [2, 0], sizes = [2, 128], strides = [1, 1]} : vector<16x256xf32> to vector<2x128xf32>
    %73 = vector.extract_strided_slice %12 {offsets = [12, 128], sizes = [2, 128], strides = [1, 1]} : vector<16x256xf32> to vector<2x128xf32>
    %cst_19 = arith.constant dense<0.000000e+00> : vector<2x256xf32>
    %74 = tpu.matmul %71, %8, %cst_19 {dimension_numbers = #tpu.dot_dimension_numbers<[1], [0], [0], [1], [0, 0, 1, 1], [], []>} : vector<2x64xf32>, vector<64x256xf32>, vector<2x256xf32> -> vector<2x256xf32>
    %75 = vector.extract_strided_slice %74 {offsets = [0, 0], sizes = [2, 128], strides = [1, 1]} : vector<2x256xf32> to vector<2x128xf32>
    %76 = arith.addf %75, %72 : vector<2x128xf32>
    %77 = vector.extract_strided_slice %74 {offsets = [0, 128], sizes = [2, 128], strides = [1, 1]} : vector<2x256xf32> to vector<2x128xf32>
    %78 = arith.addf %77, %73 : vector<2x128xf32>
    %cst_20 = arith.constant 2.000000e+00 : f32
    %79 = vector.broadcast %cst_20 : f32 to vector<2x128xf32>
    %80 = arith.mulf %79, %76 : vector<2x128xf32>
    %81 = vector.shape_cast %5 : vector<1x128xi1> to vector<1x128xi1>
    %82 = vector.broadcast %81 : vector<1x128xi1> to vector<2x128xi1>
    %83 = arith.select %82, %80, %76 : vector<2x128xi1>, vector<2x128xf32>
    %84 = arith.negf %83 : vector<2x128xf32>
    %85 = math.exp %84 : vector<2x128xf32>
    %cst_21 = arith.constant 1.000000e+00 : f32
    %86 = vector.broadcast %cst_21 : f32 to vector<2x128xf32>
    %87 = arith.addf %86, %85 : vector<2x128xf32>
    %88 = arith.divf %86, %87 : vector<2x128xf32>
    %cst_22 = arith.constant 2.000000e+00 : f32
    %89 = vector.broadcast %cst_22 : f32 to vector<2x128xf32>
    %90 = arith.mulf %89, %88 : vector<2x128xf32>
    %cst_23 = arith.constant 1.000000e+00 : f32
    %91 = vector.broadcast %cst_23 : f32 to vector<2x128xf32>
    %92 = arith.subf %90, %91 : vector<2x128xf32>
    %93 = vector.shape_cast %5 : vector<1x128xi1> to vector<1x128xi1>
    %94 = vector.broadcast %93 : vector<1x128xi1> to vector<2x128xi1>
    %95 = arith.select %94, %92, %88 : vector<2x128xi1>, vector<2x128xf32>
    %96 = vector.extract_strided_slice %95 {offsets = [0, 0], sizes = [2, 32], strides = [1, 1]} : vector<2x128xf32> to vector<2x32xf32>
    %97 = vector.extract_strided_slice %95 {offsets = [0, 32], sizes = [2, 32], strides = [1, 1]} : vector<2x128xf32> to vector<2x32xf32>
    %98 = vector.extract_strided_slice %95 {offsets = [0, 64], sizes = [2, 32], strides = [1, 1]} : vector<2x128xf32> to vector<2x32xf32>
    %99 = vector.extract_strided_slice %95 {offsets = [0, 96], sizes = [2, 32], strides = [1, 1]} : vector<2x128xf32> to vector<2x32xf32>
    %100 = arith.mulf %97, %40 : vector<2x32xf32>
    %101 = arith.mulf %96, %98 : vector<2x32xf32>
    %102 = arith.addf %100, %101 : vector<2x32xf32>
    %103 = math.tanh %102 : vector<2x32xf32>
    %104 = arith.mulf %99, %103 : vector<2x32xf32>
    %cst_24 = arith.constant 2.000000e+00 : f32
    %105 = vector.broadcast %cst_24 : f32 to vector<2x128xf32>
    %106 = arith.mulf %105, %78 : vector<2x128xf32>
    %107 = vector.shape_cast %5 : vector<1x128xi1> to vector<1x128xi1>
    %108 = vector.broadcast %107 : vector<1x128xi1> to vector<2x128xi1>
    %109 = arith.select %108, %106, %78 : vector<2x128xi1>, vector<2x128xf32>
    %110 = arith.negf %109 : vector<2x128xf32>
    %111 = math.exp %110 : vector<2x128xf32>
    %cst_25 = arith.constant 1.000000e+00 : f32
    %112 = vector.broadcast %cst_25 : f32 to vector<2x128xf32>
    %113 = arith.addf %112, %111 : vector<2x128xf32>
    %114 = arith.divf %112, %113 : vector<2x128xf32>
    %cst_26 = arith.constant 2.000000e+00 : f32
    %115 = vector.broadcast %cst_26 : f32 to vector<2x128xf32>
    %116 = arith.mulf %115, %114 : vector<2x128xf32>
    %cst_27 = arith.constant 1.000000e+00 : f32
    %117 = vector.broadcast %cst_27 : f32 to vector<2x128xf32>
    %118 = arith.subf %116, %117 : vector<2x128xf32>
    %119 = vector.shape_cast %5 : vector<1x128xi1> to vector<1x128xi1>
    %120 = vector.broadcast %119 : vector<1x128xi1> to vector<2x128xi1>
    %121 = arith.select %120, %118, %114 : vector<2x128xi1>, vector<2x128xf32>
    %122 = vector.extract_strided_slice %121 {offsets = [0, 0], sizes = [2, 32], strides = [1, 1]} : vector<2x128xf32> to vector<2x32xf32>
    %123 = vector.extract_strided_slice %121 {offsets = [0, 32], sizes = [2, 32], strides = [1, 1]} : vector<2x128xf32> to vector<2x32xf32>
    %124 = vector.extract_strided_slice %121 {offsets = [0, 64], sizes = [2, 32], strides = [1, 1]} : vector<2x128xf32> to vector<2x32xf32>
    %125 = vector.extract_strided_slice %121 {offsets = [0, 96], sizes = [2, 32], strides = [1, 1]} : vector<2x128xf32> to vector<2x32xf32>
    %126 = arith.mulf %123, %66 : vector<2x32xf32>
    %127 = arith.mulf %122, %124 : vector<2x32xf32>
    %128 = arith.addf %126, %127 : vector<2x32xf32>
    %129 = math.tanh %128 : vector<2x32xf32>
    %130 = arith.mulf %125, %129 : vector<2x32xf32>
    %c2 = arith.constant 2 : index
    %c0_28 = arith.constant 0 : index
    %131 = vector.load %arg17[%c2, %c0_28] : memref<16x64xf32, #tpu.memory_space<vmem>>, vector<2x32xf32>
    tpu.vector_store %arg17[%c2, %c0_28], %104 {strides = array<i32>} : memref<16x64xf32, #tpu.memory_space<vmem>>, vector<2x32xf32>,
    %c12 = arith.constant 12 : index
    %c32_29 = arith.constant 32 : index
    %132 = vector.load %arg17[%c12, %c32_29] : memref<16x64xf32, #tpu.memory_space<vmem>>, vector<2x32xf32>
    tpu.vector_store %arg17[%c12, %c32_29], %130 {strides = array<i32>} : memref<16x64xf32, #tpu.memory_space<vmem>>, vector<2x32xf32>,
    %133 = tpu.concatenate %104, %130 in 1 : vector<2x32xf32>, vector<2x32xf32> -> vector<2x64xf32>
    %134 = vector.extract_strided_slice %12 {offsets = [4, 0], sizes = [2, 128], strides = [1, 1]} : vector<16x256xf32> to vector<2x128xf32>
    %135 = vector.extract_strided_slice %12 {offsets = [10, 128], sizes = [2, 128], strides = [1, 1]} : vector<16x256xf32> to vector<2x128xf32>
    %cst_30 = arith.constant dense<0.000000e+00> : vector<2x256xf32>
    %136 = tpu.matmul %133, %8, %cst_30 {dimension_numbers = #tpu.dot_dimension_numbers<[1], [0], [0], [1], [0, 0, 1, 1], [], []>} : vector<2x64xf32>, vector<64x256xf32>, vector<2x256xf32> -> vector<2x256xf32>
    %137 = vector.extract_strided_slice %136 {offsets = [0, 0], sizes = [2, 128], strides = [1, 1]} : vector<2x256xf32> to vector<2x128xf32>
    %138 = arith.addf %137, %134 : vector<2x128xf32>
    %139 = vector.extract_strided_slice %136 {offsets = [0, 128], sizes = [2, 128], strides = [1, 1]} : vector<2x256xf32> to vector<2x128xf32>
    %140 = arith.addf %139, %135 : vector<2x128xf32>
    %cst_31 = arith.constant 2.000000e+00 : f32
    %141 = vector.broadcast %cst_31 : f32 to vector<2x128xf32>
    %142 = arith.mulf %141, %138 : vector<2x128xf32>
    %143 = vector.shape_cast %5 : vector<1x128xi1> to vector<1x128xi1>
    %144 = vector.broadcast %143 : vector<1x128xi1> to vector<2x128xi1>
    %145 = arith.select %144, %142, %138 : vector<2x128xi1>, vector<2x128xf32>
    %146 = arith.negf %145 : vector<2x128xf32>
    %147 = math.exp %146 : vector<2x128xf32>
    %cst_32 = arith.constant 1.000000e+00 : f32
    %148 = vector.broadcast %cst_32 : f32 to vector<2x128xf32>
    %149 = arith.addf %148, %147 : vector<2x128xf32>
    %150 = arith.divf %148, %149 : vector<2x128xf32>
    %cst_33 = arith.constant 2.000000e+00 : f32
    %151 = vector.broadcast %cst_33 : f32 to vector<2x128xf32>
    %152 = arith.mulf %151, %150 : vector<2x128xf32>
    %cst_34 = arith.constant 1.000000e+00 : f32
    %153 = vector.broadcast %cst_34 : f32 to vector<2x128xf32>
    %154 = arith.subf %152, %153 : vector<2x128xf32>
    %155 = vector.shape_cast %5 : vector<1x128xi1> to vector<1x128xi1>
    %156 = vector.broadcast %155 : vector<1x128xi1> to vector<2x128xi1>
    %157 = arith.select %156, %154, %150 : vector<2x128xi1>, vector<2x128xf32>
    %158 = vector.extract_strided_slice %157 {offsets = [0, 0], sizes = [2, 32], strides = [1, 1]} : vector<2x128xf32> to vector<2x32xf32>
    %159 = vector.extract_strided_slice %157 {offsets = [0, 32], sizes = [2, 32], strides = [1, 1]} : vector<2x128xf32> to vector<2x32xf32>
    %160 = vector.extract_strided_slice %157 {offsets = [0, 64], sizes = [2, 32], strides = [1, 1]} : vector<2x128xf32> to vector<2x32xf32>
    %161 = vector.extract_strided_slice %157 {offsets = [0, 96], sizes = [2, 32], strides = [1, 1]} : vector<2x128xf32> to vector<2x32xf32>
    %162 = arith.mulf %159, %102 : vector<2x32xf32>
    %163 = arith.mulf %158, %160 : vector<2x32xf32>
    %164 = arith.addf %162, %163 : vector<2x32xf32>
    %165 = math.tanh %164 : vector<2x32xf32>
    %166 = arith.mulf %161, %165 : vector<2x32xf32>
    %cst_35 = arith.constant 2.000000e+00 : f32
    %167 = vector.broadcast %cst_35 : f32 to vector<2x128xf32>
    %168 = arith.mulf %167, %140 : vector<2x128xf32>
    %169 = vector.shape_cast %5 : vector<1x128xi1> to vector<1x128xi1>
    %170 = vector.broadcast %169 : vector<1x128xi1> to vector<2x128xi1>
    %171 = arith.select %170, %168, %140 : vector<2x128xi1>, vector<2x128xf32>
    %172 = arith.negf %171 : vector<2x128xf32>
    %173 = math.exp %172 : vector<2x128xf32>
    %cst_36 = arith.constant 1.000000e+00 : f32
    %174 = vector.broadcast %cst_36 : f32 to vector<2x128xf32>
    %175 = arith.addf %174, %173 : vector<2x128xf32>
    %176 = arith.divf %174, %175 : vector<2x128xf32>
    %cst_37 = arith.constant 2.000000e+00 : f32
    %177 = vector.broadcast %cst_37 : f32 to vector<2x128xf32>
    %178 = arith.mulf %177, %176 : vector<2x128xf32>
    %cst_38 = arith.constant 1.000000e+00 : f32
    %179 = vector.broadcast %cst_38 : f32 to vector<2x128xf32>
    %180 = arith.subf %178, %179 : vector<2x128xf32>
    %181 = vector.shape_cast %5 : vector<1x128xi1> to vector<1x128xi1>
    %182 = vector.broadcast %181 : vector<1x128xi1> to vector<2x128xi1>
    %183 = arith.select %182, %180, %176 : vector<2x128xi1>, vector<2x128xf32>
    %184 = vector.extract_strided_slice %183 {offsets = [0, 0], sizes = [2, 32], strides = [1, 1]} : vector<2x128xf32> to vector<2x32xf32>
    %185 = vector.extract_strided_slice %183 {offsets = [0, 32], sizes = [2, 32], strides = [1, 1]} : vector<2x128xf32> to vector<2x32xf32>
    %186 = vector.extract_strided_slice %183 {offsets = [0, 64], sizes = [2, 32], strides = [1, 1]} : vector<2x128xf32> to vector<2x32xf32>
    %187 = vector.extract_strided_slice %183 {offsets = [0, 96], sizes = [2, 32], strides = [1, 1]} : vector<2x128xf32> to vector<2x32xf32>
    %188 = arith.mulf %185, %128 : vector<2x32xf32>
    %189 = arith.mulf %184, %186 : vector<2x32xf32>
    %190 = arith.addf %188, %189 : vector<2x32xf32>
    %191 = math.tanh %190 : vector<2x32xf32>
    %192 = arith.mulf %187, %191 : vector<2x32xf32>
    %c4 = arith.constant 4 : index
    %c0_39 = arith.constant 0 : index
    %193 = vector.load %arg17[%c4, %c0_39] : memref<16x64xf32, #tpu.memory_space<vmem>>, vector<2x32xf32>
    tpu.vector_store %arg17[%c4, %c0_39], %166 {strides = array<i32>} : memref<16x64xf32, #tpu.memory_space<vmem>>, vector<2x32xf32>,
    %c10 = arith.constant 10 : index
    %c32_40 = arith.constant 32 : index
    %194 = vector.load %arg17[%c10, %c32_40] : memref<16x64xf32, #tpu.memory_space<vmem>>, vector<2x32xf32>
    tpu.vector_store %arg17[%c10, %c32_40], %192 {strides = array<i32>} : memref<16x64xf32, #tpu.memory_space<vmem>>, vector<2x32xf32>,
    %195 = tpu.concatenate %166, %192 in 1 : vector<2x32xf32>, vector<2x32xf32> -> vector<2x64xf32>
    %196 = vector.extract_strided_slice %12 {offsets = [6, 0], sizes = [2, 128], strides = [1, 1]} : vector<16x256xf32> to vector<2x128xf32>
    %197 = vector.extract_strided_slice %12 {offsets = [8, 128], sizes = [2, 128], strides = [1, 1]} : vector<16x256xf32> to vector<2x128xf32>
    %cst_41 = arith.constant dense<0.000000e+00> : vector<2x256xf32>
    %198 = tpu.matmul %195, %8, %cst_41 {dimension_numbers = #tpu.dot_dimension_numbers<[1], [0], [0], [1], [0, 0, 1, 1], [], []>} : vector<2x64xf32>, vector<64x256xf32>, vector<2x256xf32> -> vector<2x256xf32>
    %199 = vector.extract_strided_slice %198 {offsets = [0, 0], sizes = [2, 128], strides = [1, 1]} : vector<2x256xf32> to vector<2x128xf32>
    %200 = arith.addf %199, %196 : vector<2x128xf32>
    %201 = vector.extract_strided_slice %198 {offsets = [0, 128], sizes = [2, 128], strides = [1, 1]} : vector<2x256xf32> to vector<2x128xf32>
    %202 = arith.addf %201, %197 : vector<2x128xf32>
    %cst_42 = arith.constant 2.000000e+00 : f32
    %203 = vector.broadcast %cst_42 : f32 to vector<2x128xf32>
    %204 = arith.mulf %203, %200 : vector<2x128xf32>
    %205 = vector.shape_cast %5 : vector<1x128xi1> to vector<1x128xi1>
    %206 = vector.broadcast %205 : vector<1x128xi1> to vector<2x128xi1>
    %207 = arith.select %206, %204, %200 : vector<2x128xi1>, vector<2x128xf32>
    %208 = arith.negf %207 : vector<2x128xf32>
    %209 = math.exp %208 : vector<2x128xf32>
    %cst_43 = arith.constant 1.000000e+00 : f32
    %210 = vector.broadcast %cst_43 : f32 to vector<2x128xf32>
    %211 = arith.addf %210, %209 : vector<2x128xf32>
    %212 = arith.divf %210, %211 : vector<2x128xf32>
    %cst_44 = arith.constant 2.000000e+00 : f32
    %213 = vector.broadcast %cst_44 : f32 to vector<2x128xf32>
    %214 = arith.mulf %213, %212 : vector<2x128xf32>
    %cst_45 = arith.constant 1.000000e+00 : f32
    %215 = vector.broadcast %cst_45 : f32 to vector<2x128xf32>
    %216 = arith.subf %214, %215 : vector<2x128xf32>
    %217 = vector.shape_cast %5 : vector<1x128xi1> to vector<1x128xi1>
    %218 = vector.broadcast %217 : vector<1x128xi1> to vector<2x128xi1>
    %219 = arith.select %218, %216, %212 : vector<2x128xi1>, vector<2x128xf32>
    %220 = vector.extract_strided_slice %219 {offsets = [0, 0], sizes = [2, 32], strides = [1, 1]} : vector<2x128xf32> to vector<2x32xf32>
    %221 = vector.extract_strided_slice %219 {offsets = [0, 32], sizes = [2, 32], strides = [1, 1]} : vector<2x128xf32> to vector<2x32xf32>
    %222 = vector.extract_strided_slice %219 {offsets = [0, 64], sizes = [2, 32], strides = [1, 1]} : vector<2x128xf32> to vector<2x32xf32>
    %223 = vector.extract_strided_slice %219 {offsets = [0, 96], sizes = [2, 32], strides = [1, 1]} : vector<2x128xf32> to vector<2x32xf32>
    %224 = arith.mulf %221, %164 : vector<2x32xf32>
    %225 = arith.mulf %220, %222 : vector<2x32xf32>
    %226 = arith.addf %224, %225 : vector<2x32xf32>
    %227 = math.tanh %226 : vector<2x32xf32>
    %228 = arith.mulf %223, %227 : vector<2x32xf32>
    %cst_46 = arith.constant 2.000000e+00 : f32
    %229 = vector.broadcast %cst_46 : f32 to vector<2x128xf32>
    %230 = arith.mulf %229, %202 : vector<2x128xf32>
    %231 = vector.shape_cast %5 : vector<1x128xi1> to vector<1x128xi1>
    %232 = vector.broadcast %231 : vector<1x128xi1> to vector<2x128xi1>
    %233 = arith.select %232, %230, %202 : vector<2x128xi1>, vector<2x128xf32>
    %234 = arith.negf %233 : vector<2x128xf32>
    %235 = math.exp %234 : vector<2x128xf32>
    %cst_47 = arith.constant 1.000000e+00 : f32
    %236 = vector.broadcast %cst_47 : f32 to vector<2x128xf32>
    %237 = arith.addf %236, %235 : vector<2x128xf32>
    %238 = arith.divf %236, %237 : vector<2x128xf32>
    %cst_48 = arith.constant 2.000000e+00 : f32
    %239 = vector.broadcast %cst_48 : f32 to vector<2x128xf32>
    %240 = arith.mulf %239, %238 : vector<2x128xf32>
    %cst_49 = arith.constant 1.000000e+00 : f32
    %241 = vector.broadcast %cst_49 : f32 to vector<2x128xf32>
    %242 = arith.subf %240, %241 : vector<2x128xf32>
    %243 = vector.shape_cast %5 : vector<1x128xi1> to vector<1x128xi1>
    %244 = vector.broadcast %243 : vector<1x128xi1> to vector<2x128xi1>
    %245 = arith.select %244, %242, %238 : vector<2x128xi1>, vector<2x128xf32>
    %246 = vector.extract_strided_slice %245 {offsets = [0, 0], sizes = [2, 32], strides = [1, 1]} : vector<2x128xf32> to vector<2x32xf32>
    %247 = vector.extract_strided_slice %245 {offsets = [0, 32], sizes = [2, 32], strides = [1, 1]} : vector<2x128xf32> to vector<2x32xf32>
    %248 = vector.extract_strided_slice %245 {offsets = [0, 64], sizes = [2, 32], strides = [1, 1]} : vector<2x128xf32> to vector<2x32xf32>
    %249 = vector.extract_strided_slice %245 {offsets = [0, 96], sizes = [2, 32], strides = [1, 1]} : vector<2x128xf32> to vector<2x32xf32>
    %250 = arith.mulf %247, %190 : vector<2x32xf32>
    %251 = arith.mulf %246, %248 : vector<2x32xf32>
    %252 = arith.addf %250, %251 : vector<2x32xf32>
    %253 = math.tanh %252 : vector<2x32xf32>
    %254 = arith.mulf %249, %253 : vector<2x32xf32>
    %c6 = arith.constant 6 : index
    %c0_50 = arith.constant 0 : index
    %255 = vector.load %arg17[%c6, %c0_50] : memref<16x64xf32, #tpu.memory_space<vmem>>, vector<2x32xf32>
    tpu.vector_store %arg17[%c6, %c0_50], %228 {strides = array<i32>} : memref<16x64xf32, #tpu.memory_space<vmem>>, vector<2x32xf32>,
    %c8 = arith.constant 8 : index
    %c32_51 = arith.constant 32 : index
    %256 = vector.load %arg17[%c8, %c32_51] : memref<16x64xf32, #tpu.memory_space<vmem>>, vector<2x32xf32>
    tpu.vector_store %arg17[%c8, %c32_51], %254 {strides = array<i32>} : memref<16x64xf32, #tpu.memory_space<vmem>>, vector<2x32xf32>,
    %257 = tpu.concatenate %228, %254 in 1 : vector<2x32xf32>, vector<2x32xf32> -> vector<2x64xf32>
    %258 = vector.extract_strided_slice %12 {offsets = [8, 0], sizes = [2, 128], strides = [1, 1]} : vector<16x256xf32> to vector<2x128xf32>
    %259 = vector.extract_strided_slice %12 {offsets = [6, 128], sizes = [2, 128], strides = [1, 1]} : vector<16x256xf32> to vector<2x128xf32>
    %cst_52 = arith.constant dense<0.000000e+00> : vector<2x256xf32>
    %260 = tpu.matmul %257, %8, %cst_52 {dimension_numbers = #tpu.dot_dimension_numbers<[1], [0], [0], [1], [0, 0, 1, 1], [], []>} : vector<2x64xf32>, vector<64x256xf32>, vector<2x256xf32> -> vector<2x256xf32>
    %261 = vector.extract_strided_slice %260 {offsets = [0, 0], sizes = [2, 128], strides = [1, 1]} : vector<2x256xf32> to vector<2x128xf32>
    %262 = arith.addf %261, %258 : vector<2x128xf32>
    %263 = vector.extract_strided_slice %260 {offsets = [0, 128], sizes = [2, 128], strides = [1, 1]} : vector<2x256xf32> to vector<2x128xf32>
    %264 = arith.addf %263, %259 : vector<2x128xf32>
    %cst_53 = arith.constant 2.000000e+00 : f32
    %265 = vector.broadcast %cst_53 : f32 to vector<2x128xf32>
    %266 = arith.mulf %265, %262 : vector<2x128xf32>
    %267 = vector.shape_cast %5 : vector<1x128xi1> to vector<1x128xi1>
    %268 = vector.broadcast %267 : vector<1x128xi1> to vector<2x128xi1>
    %269 = arith.select %268, %266, %262 : vector<2x128xi1>, vector<2x128xf32>
    %270 = arith.negf %269 : vector<2x128xf32>
    %271 = math.exp %270 : vector<2x128xf32>
    %cst_54 = arith.constant 1.000000e+00 : f32
    %272 = vector.broadcast %cst_54 : f32 to vector<2x128xf32>
    %273 = arith.addf %272, %271 : vector<2x128xf32>
    %274 = arith.divf %272, %273 : vector<2x128xf32>
    %cst_55 = arith.constant 2.000000e+00 : f32
    %275 = vector.broadcast %cst_55 : f32 to vector<2x128xf32>
    %276 = arith.mulf %275, %274 : vector<2x128xf32>
    %cst_56 = arith.constant 1.000000e+00 : f32
    %277 = vector.broadcast %cst_56 : f32 to vector<2x128xf32>
    %278 = arith.subf %276, %277 : vector<2x128xf32>
    %279 = vector.shape_cast %5 : vector<1x128xi1> to vector<1x128xi1>
    %280 = vector.broadcast %279 : vector<1x128xi1> to vector<2x128xi1>
    %281 = arith.select %280, %278, %274 : vector<2x128xi1>, vector<2x128xf32>
    %282 = vector.extract_strided_slice %281 {offsets = [0, 0], sizes = [2, 32], strides = [1, 1]} : vector<2x128xf32> to vector<2x32xf32>
    %283 = vector.extract_strided_slice %281 {offsets = [0, 32], sizes = [2, 32], strides = [1, 1]} : vector<2x128xf32> to vector<2x32xf32>
    %284 = vector.extract_strided_slice %281 {offsets = [0, 64], sizes = [2, 32], strides = [1, 1]} : vector<2x128xf32> to vector<2x32xf32>
    %285 = vector.extract_strided_slice %281 {offsets = [0, 96], sizes = [2, 32], strides = [1, 1]} : vector<2x128xf32> to vector<2x32xf32>
    %286 = arith.mulf %283, %226 : vector<2x32xf32>
    %287 = arith.mulf %282, %284 : vector<2x32xf32>
    %288 = arith.addf %286, %287 : vector<2x32xf32>
    %289 = math.tanh %288 : vector<2x32xf32>
    %290 = arith.mulf %285, %289 : vector<2x32xf32>
    %cst_57 = arith.constant 2.000000e+00 : f32
    %291 = vector.broadcast %cst_57 : f32 to vector<2x128xf32>
    %292 = arith.mulf %291, %264 : vector<2x128xf32>
    %293 = vector.shape_cast %5 : vector<1x128xi1> to vector<1x128xi1>
    %294 = vector.broadcast %293 : vector<1x128xi1> to vector<2x128xi1>
    %295 = arith.select %294, %292, %264 : vector<2x128xi1>, vector<2x128xf32>
    %296 = arith.negf %295 : vector<2x128xf32>
    %297 = math.exp %296 : vector<2x128xf32>
    %cst_58 = arith.constant 1.000000e+00 : f32
    %298 = vector.broadcast %cst_58 : f32 to vector<2x128xf32>
    %299 = arith.addf %298, %297 : vector<2x128xf32>
    %300 = arith.divf %298, %299 : vector<2x128xf32>
    %cst_59 = arith.constant 2.000000e+00 : f32
    %301 = vector.broadcast %cst_59 : f32 to vector<2x128xf32>
    %302 = arith.mulf %301, %300 : vector<2x128xf32>
    %cst_60 = arith.constant 1.000000e+00 : f32
    %303 = vector.broadcast %cst_60 : f32 to vector<2x128xf32>
    %304 = arith.subf %302, %303 : vector<2x128xf32>
    %305 = vector.shape_cast %5 : vector<1x128xi1> to vector<1x128xi1>
    %306 = vector.broadcast %305 : vector<1x128xi1> to vector<2x128xi1>
    %307 = arith.select %306, %304, %300 : vector<2x128xi1>, vector<2x128xf32>
    %308 = vector.extract_strided_slice %307 {offsets = [0, 0], sizes = [2, 32], strides = [1, 1]} : vector<2x128xf32> to vector<2x32xf32>
    %309 = vector.extract_strided_slice %307 {offsets = [0, 32], sizes = [2, 32], strides = [1, 1]} : vector<2x128xf32> to vector<2x32xf32>
    %310 = vector.extract_strided_slice %307 {offsets = [0, 64], sizes = [2, 32], strides = [1, 1]} : vector<2x128xf32> to vector<2x32xf32>
    %311 = vector.extract_strided_slice %307 {offsets = [0, 96], sizes = [2, 32], strides = [1, 1]} : vector<2x128xf32> to vector<2x32xf32>
    %312 = arith.mulf %309, %252 : vector<2x32xf32>
    %313 = arith.mulf %308, %310 : vector<2x32xf32>
    %314 = arith.addf %312, %313 : vector<2x32xf32>
    %315 = math.tanh %314 : vector<2x32xf32>
    %316 = arith.mulf %311, %315 : vector<2x32xf32>
    %c8_61 = arith.constant 8 : index
    %c0_62 = arith.constant 0 : index
    %317 = vector.load %arg17[%c8_61, %c0_62] : memref<16x64xf32, #tpu.memory_space<vmem>>, vector<2x32xf32>
    tpu.vector_store %arg17[%c8_61, %c0_62], %290 {strides = array<i32>} : memref<16x64xf32, #tpu.memory_space<vmem>>, vector<2x32xf32>,
    %c6_63 = arith.constant 6 : index
    %c32_64 = arith.constant 32 : index
    %318 = vector.load %arg17[%c6_63, %c32_64] : memref<16x64xf32, #tpu.memory_space<vmem>>, vector<2x32xf32>
    tpu.vector_store %arg17[%c6_63, %c32_64], %316 {strides = array<i32>} : memref<16x64xf32, #tpu.memory_space<vmem>>, vector<2x32xf32>,
    %319 = tpu.concatenate %290, %316 in 1 : vector<2x32xf32>, vector<2x32xf32> -> vector<2x64xf32>
    %320 = vector.extract_strided_slice %12 {offsets = [10, 0], sizes = [2, 128], strides = [1, 1]} : vector<16x256xf32> to vector<2x128xf32>
    %321 = vector.extract_strided_slice %12 {offsets = [4, 128], sizes = [2, 128], strides = [1, 1]} : vector<16x256xf32> to vector<2x128xf32>
    %cst_65 = arith.constant dense<0.000000e+00> : vector<2x256xf32>
    %322 = tpu.matmul %319, %8, %cst_65 {dimension_numbers = #tpu.dot_dimension_numbers<[1], [0], [0], [1], [0, 0, 1, 1], [], []>} : vector<2x64xf32>, vector<64x256xf32>, vector<2x256xf32> -> vector<2x256xf32>
    %323 = vector.extract_strided_slice %322 {offsets = [0, 0], sizes = [2, 128], strides = [1, 1]} : vector<2x256xf32> to vector<2x128xf32>
    %324 = arith.addf %323, %320 : vector<2x128xf32>
    %325 = vector.extract_strided_slice %322 {offsets = [0, 128], sizes = [2, 128], strides = [1, 1]} : vector<2x256xf32> to vector<2x128xf32>
    %326 = arith.addf %325, %321 : vector<2x128xf32>
    %cst_66 = arith.constant 2.000000e+00 : f32
    %327 = vector.broadcast %cst_66 : f32 to vector<2x128xf32>
    %328 = arith.mulf %327, %324 : vector<2x128xf32>
    %329 = vector.shape_cast %5 : vector<1x128xi1> to vector<1x128xi1>
    %330 = vector.broadcast %329 : vector<1x128xi1> to vector<2x128xi1>
    %331 = arith.select %330, %328, %324 : vector<2x128xi1>, vector<2x128xf32>
    %332 = arith.negf %331 : vector<2x128xf32>
    %333 = math.exp %332 : vector<2x128xf32>
    %cst_67 = arith.constant 1.000000e+00 : f32
    %334 = vector.broadcast %cst_67 : f32 to vector<2x128xf32>
    %335 = arith.addf %334, %333 : vector<2x128xf32>
    %336 = arith.divf %334, %335 : vector<2x128xf32>
    %cst_68 = arith.constant 2.000000e+00 : f32
    %337 = vector.broadcast %cst_68 : f32 to vector<2x128xf32>
    %338 = arith.mulf %337, %336 : vector<2x128xf32>
    %cst_69 = arith.constant 1.000000e+00 : f32
    %339 = vector.broadcast %cst_69 : f32 to vector<2x128xf32>
    %340 = arith.subf %338, %339 : vector<2x128xf32>
    %341 = vector.shape_cast %5 : vector<1x128xi1> to vector<1x128xi1>
    %342 = vector.broadcast %341 : vector<1x128xi1> to vector<2x128xi1>
    %343 = arith.select %342, %340, %336 : vector<2x128xi1>, vector<2x128xf32>
    %344 = vector.extract_strided_slice %343 {offsets = [0, 0], sizes = [2, 32], strides = [1, 1]} : vector<2x128xf32> to vector<2x32xf32>
    %345 = vector.extract_strided_slice %343 {offsets = [0, 32], sizes = [2, 32], strides = [1, 1]} : vector<2x128xf32> to vector<2x32xf32>
    %346 = vector.extract_strided_slice %343 {offsets = [0, 64], sizes = [2, 32], strides = [1, 1]} : vector<2x128xf32> to vector<2x32xf32>
    %347 = vector.extract_strided_slice %343 {offsets = [0, 96], sizes = [2, 32], strides = [1, 1]} : vector<2x128xf32> to vector<2x32xf32>
    %348 = arith.mulf %345, %288 : vector<2x32xf32>
    %349 = arith.mulf %344, %346 : vector<2x32xf32>
    %350 = arith.addf %348, %349 : vector<2x32xf32>
    %351 = math.tanh %350 : vector<2x32xf32>
    %352 = arith.mulf %347, %351 : vector<2x32xf32>
    %cst_70 = arith.constant 2.000000e+00 : f32
    %353 = vector.broadcast %cst_70 : f32 to vector<2x128xf32>
    %354 = arith.mulf %353, %326 : vector<2x128xf32>
    %355 = vector.shape_cast %5 : vector<1x128xi1> to vector<1x128xi1>
    %356 = vector.broadcast %355 : vector<1x128xi1> to vector<2x128xi1>
    %357 = arith.select %356, %354, %326 : vector<2x128xi1>, vector<2x128xf32>
    %358 = arith.negf %357 : vector<2x128xf32>
    %359 = math.exp %358 : vector<2x128xf32>
    %cst_71 = arith.constant 1.000000e+00 : f32
    %360 = vector.broadcast %cst_71 : f32 to vector<2x128xf32>
    %361 = arith.addf %360, %359 : vector<2x128xf32>
    %362 = arith.divf %360, %361 : vector<2x128xf32>
    %cst_72 = arith.constant 2.000000e+00 : f32
    %363 = vector.broadcast %cst_72 : f32 to vector<2x128xf32>
    %364 = arith.mulf %363, %362 : vector<2x128xf32>
    %cst_73 = arith.constant 1.000000e+00 : f32
    %365 = vector.broadcast %cst_73 : f32 to vector<2x128xf32>
    %366 = arith.subf %364, %365 : vector<2x128xf32>
    %367 = vector.shape_cast %5 : vector<1x128xi1> to vector<1x128xi1>
    %368 = vector.broadcast %367 : vector<1x128xi1> to vector<2x128xi1>
    %369 = arith.select %368, %366, %362 : vector<2x128xi1>, vector<2x128xf32>
    %370 = vector.extract_strided_slice %369 {offsets = [0, 0], sizes = [2, 32], strides = [1, 1]} : vector<2x128xf32> to vector<2x32xf32>
    %371 = vector.extract_strided_slice %369 {offsets = [0, 32], sizes = [2, 32], strides = [1, 1]} : vector<2x128xf32> to vector<2x32xf32>
    %372 = vector.extract_strided_slice %369 {offsets = [0, 64], sizes = [2, 32], strides = [1, 1]} : vector<2x128xf32> to vector<2x32xf32>
    %373 = vector.extract_strided_slice %369 {offsets = [0, 96], sizes = [2, 32], strides = [1, 1]} : vector<2x128xf32> to vector<2x32xf32>
    %374 = arith.mulf %371, %314 : vector<2x32xf32>
    %375 = arith.mulf %370, %372 : vector<2x32xf32>
    %376 = arith.addf %374, %375 : vector<2x32xf32>
    %377 = math.tanh %376 : vector<2x32xf32>
    %378 = arith.mulf %373, %377 : vector<2x32xf32>
    %c10_74 = arith.constant 10 : index
    %c0_75 = arith.constant 0 : index
    %379 = vector.load %arg17[%c10_74, %c0_75] : memref<16x64xf32, #tpu.memory_space<vmem>>, vector<2x32xf32>
    tpu.vector_store %arg17[%c10_74, %c0_75], %352 {strides = array<i32>} : memref<16x64xf32, #tpu.memory_space<vmem>>, vector<2x32xf32>,
    %c4_76 = arith.constant 4 : index
    %c32_77 = arith.constant 32 : index
    %380 = vector.load %arg17[%c4_76, %c32_77] : memref<16x64xf32, #tpu.memory_space<vmem>>, vector<2x32xf32>
    tpu.vector_store %arg17[%c4_76, %c32_77], %378 {strides = array<i32>} : memref<16x64xf32, #tpu.memory_space<vmem>>, vector<2x32xf32>,
    %381 = tpu.concatenate %352, %378 in 1 : vector<2x32xf32>, vector<2x32xf32> -> vector<2x64xf32>
    %382 = vector.extract_strided_slice %12 {offsets = [12, 0], sizes = [2, 128], strides = [1, 1]} : vector<16x256xf32> to vector<2x128xf32>
    %383 = vector.extract_strided_slice %12 {offsets = [2, 128], sizes = [2, 128], strides = [1, 1]} : vector<16x256xf32> to vector<2x128xf32>
    %cst_78 = arith.constant dense<0.000000e+00> : vector<2x256xf32>
    %384 = tpu.matmul %381, %8, %cst_78 {dimension_numbers = #tpu.dot_dimension_numbers<[1], [0], [0], [1], [0, 0, 1, 1], [], []>} : vector<2x64xf32>, vector<64x256xf32>, vector<2x256xf32> -> vector<2x256xf32>
    %385 = vector.extract_strided_slice %384 {offsets = [0, 0], sizes = [2, 128], strides = [1, 1]} : vector<2x256xf32> to vector<2x128xf32>
    %386 = arith.addf %385, %382 : vector<2x128xf32>
    %387 = vector.extract_strided_slice %384 {offsets = [0, 128], sizes = [2, 128], strides = [1, 1]} : vector<2x256xf32> to vector<2x128xf32>
    %388 = arith.addf %387, %383 : vector<2x128xf32>
    %cst_79 = arith.constant 2.000000e+00 : f32
    %389 = vector.broadcast %cst_79 : f32 to vector<2x128xf32>
    %390 = arith.mulf %389, %386 : vector<2x128xf32>
    %391 = vector.shape_cast %5 : vector<1x128xi1> to vector<1x128xi1>
    %392 = vector.broadcast %391 : vector<1x128xi1> to vector<2x128xi1>
    %393 = arith.select %392, %390, %386 : vector<2x128xi1>, vector<2x128xf32>
    %394 = arith.negf %393 : vector<2x128xf32>
    %395 = math.exp %394 : vector<2x128xf32>
    %cst_80 = arith.constant 1.000000e+00 : f32
    %396 = vector.broadcast %cst_80 : f32 to vector<2x128xf32>
    %397 = arith.addf %396, %395 : vector<2x128xf32>
    %398 = arith.divf %396, %397 : vector<2x128xf32>
    %cst_81 = arith.constant 2.000000e+00 : f32
    %399 = vector.broadcast %cst_81 : f32 to vector<2x128xf32>
    %400 = arith.mulf %399, %398 : vector<2x128xf32>
    %cst_82 = arith.constant 1.000000e+00 : f32
    %401 = vector.broadcast %cst_82 : f32 to vector<2x128xf32>
    %402 = arith.subf %400, %401 : vector<2x128xf32>
    %403 = vector.shape_cast %5 : vector<1x128xi1> to vector<1x128xi1>
    %404 = vector.broadcast %403 : vector<1x128xi1> to vector<2x128xi1>
    %405 = arith.select %404, %402, %398 : vector<2x128xi1>, vector<2x128xf32>
    %406 = vector.extract_strided_slice %405 {offsets = [0, 0], sizes = [2, 32], strides = [1, 1]} : vector<2x128xf32> to vector<2x32xf32>
    %407 = vector.extract_strided_slice %405 {offsets = [0, 32], sizes = [2, 32], strides = [1, 1]} : vector<2x128xf32> to vector<2x32xf32>
    %408 = vector.extract_strided_slice %405 {offsets = [0, 64], sizes = [2, 32], strides = [1, 1]} : vector<2x128xf32> to vector<2x32xf32>
    %409 = vector.extract_strided_slice %405 {offsets = [0, 96], sizes = [2, 32], strides = [1, 1]} : vector<2x128xf32> to vector<2x32xf32>
    %410 = arith.mulf %407, %350 : vector<2x32xf32>
    %411 = arith.mulf %406, %408 : vector<2x32xf32>
    %412 = arith.addf %410, %411 : vector<2x32xf32>
    %413 = math.tanh %412 : vector<2x32xf32>
    %414 = arith.mulf %409, %413 : vector<2x32xf32>
    %cst_83 = arith.constant 2.000000e+00 : f32
    %415 = vector.broadcast %cst_83 : f32 to vector<2x128xf32>
    %416 = arith.mulf %415, %388 : vector<2x128xf32>
    %417 = vector.shape_cast %5 : vector<1x128xi1> to vector<1x128xi1>
    %418 = vector.broadcast %417 : vector<1x128xi1> to vector<2x128xi1>
    %419 = arith.select %418, %416, %388 : vector<2x128xi1>, vector<2x128xf32>
    %420 = arith.negf %419 : vector<2x128xf32>
    %421 = math.exp %420 : vector<2x128xf32>
    %cst_84 = arith.constant 1.000000e+00 : f32
    %422 = vector.broadcast %cst_84 : f32 to vector<2x128xf32>
    %423 = arith.addf %422, %421 : vector<2x128xf32>
    %424 = arith.divf %422, %423 : vector<2x128xf32>
    %cst_85 = arith.constant 2.000000e+00 : f32
    %425 = vector.broadcast %cst_85 : f32 to vector<2x128xf32>
    %426 = arith.mulf %425, %424 : vector<2x128xf32>
    %cst_86 = arith.constant 1.000000e+00 : f32
    %427 = vector.broadcast %cst_86 : f32 to vector<2x128xf32>
    %428 = arith.subf %426, %427 : vector<2x128xf32>
    %429 = vector.shape_cast %5 : vector<1x128xi1> to vector<1x128xi1>
    %430 = vector.broadcast %429 : vector<1x128xi1> to vector<2x128xi1>
    %431 = arith.select %430, %428, %424 : vector<2x128xi1>, vector<2x128xf32>
    %432 = vector.extract_strided_slice %431 {offsets = [0, 0], sizes = [2, 32], strides = [1, 1]} : vector<2x128xf32> to vector<2x32xf32>
    %433 = vector.extract_strided_slice %431 {offsets = [0, 32], sizes = [2, 32], strides = [1, 1]} : vector<2x128xf32> to vector<2x32xf32>
    %434 = vector.extract_strided_slice %431 {offsets = [0, 64], sizes = [2, 32], strides = [1, 1]} : vector<2x128xf32> to vector<2x32xf32>
    %435 = vector.extract_strided_slice %431 {offsets = [0, 96], sizes = [2, 32], strides = [1, 1]} : vector<2x128xf32> to vector<2x32xf32>
    %436 = arith.mulf %433, %376 : vector<2x32xf32>
    %437 = arith.mulf %432, %434 : vector<2x32xf32>
    %438 = arith.addf %436, %437 : vector<2x32xf32>
    %439 = math.tanh %438 : vector<2x32xf32>
    %440 = arith.mulf %435, %439 : vector<2x32xf32>
    %c12_87 = arith.constant 12 : index
    %c0_88 = arith.constant 0 : index
    %441 = vector.load %arg17[%c12_87, %c0_88] : memref<16x64xf32, #tpu.memory_space<vmem>>, vector<2x32xf32>
    tpu.vector_store %arg17[%c12_87, %c0_88], %414 {strides = array<i32>} : memref<16x64xf32, #tpu.memory_space<vmem>>, vector<2x32xf32>,
    %c2_89 = arith.constant 2 : index
    %c32_90 = arith.constant 32 : index
    %442 = vector.load %arg17[%c2_89, %c32_90] : memref<16x64xf32, #tpu.memory_space<vmem>>, vector<2x32xf32>
    tpu.vector_store %arg17[%c2_89, %c32_90], %440 {strides = array<i32>} : memref<16x64xf32, #tpu.memory_space<vmem>>, vector<2x32xf32>,
    %443 = tpu.concatenate %414, %440 in 1 : vector<2x32xf32>, vector<2x32xf32> -> vector<2x64xf32>
    %444 = vector.extract_strided_slice %12 {offsets = [14, 0], sizes = [2, 128], strides = [1, 1]} : vector<16x256xf32> to vector<2x128xf32>
    %445 = vector.extract_strided_slice %12 {offsets = [0, 128], sizes = [2, 128], strides = [1, 1]} : vector<16x256xf32> to vector<2x128xf32>
    %cst_91 = arith.constant dense<0.000000e+00> : vector<2x256xf32>
    %446 = tpu.matmul %443, %8, %cst_91 {dimension_numbers = #tpu.dot_dimension_numbers<[1], [0], [0], [1], [0, 0, 1, 1], [], []>} : vector<2x64xf32>, vector<64x256xf32>, vector<2x256xf32> -> vector<2x256xf32>
    %447 = vector.extract_strided_slice %446 {offsets = [0, 0], sizes = [2, 128], strides = [1, 1]} : vector<2x256xf32> to vector<2x128xf32>
    %448 = arith.addf %447, %444 : vector<2x128xf32>
    %449 = vector.extract_strided_slice %446 {offsets = [0, 128], sizes = [2, 128], strides = [1, 1]} : vector<2x256xf32> to vector<2x128xf32>
    %450 = arith.addf %449, %445 : vector<2x128xf32>
    %cst_92 = arith.constant 2.000000e+00 : f32
    %451 = vector.broadcast %cst_92 : f32 to vector<2x128xf32>
    %452 = arith.mulf %451, %448 : vector<2x128xf32>
    %453 = vector.shape_cast %5 : vector<1x128xi1> to vector<1x128xi1>
    %454 = vector.broadcast %453 : vector<1x128xi1> to vector<2x128xi1>
    %455 = arith.select %454, %452, %448 : vector<2x128xi1>, vector<2x128xf32>
    %456 = arith.negf %455 : vector<2x128xf32>
    %457 = math.exp %456 : vector<2x128xf32>
    %cst_93 = arith.constant 1.000000e+00 : f32
    %458 = vector.broadcast %cst_93 : f32 to vector<2x128xf32>
    %459 = arith.addf %458, %457 : vector<2x128xf32>
    %460 = arith.divf %458, %459 : vector<2x128xf32>
    %cst_94 = arith.constant 2.000000e+00 : f32
    %461 = vector.broadcast %cst_94 : f32 to vector<2x128xf32>
    %462 = arith.mulf %461, %460 : vector<2x128xf32>
    %cst_95 = arith.constant 1.000000e+00 : f32
    %463 = vector.broadcast %cst_95 : f32 to vector<2x128xf32>
    %464 = arith.subf %462, %463 : vector<2x128xf32>
    %465 = vector.shape_cast %5 : vector<1x128xi1> to vector<1x128xi1>
    %466 = vector.broadcast %465 : vector<1x128xi1> to vector<2x128xi1>
    %467 = arith.select %466, %464, %460 : vector<2x128xi1>, vector<2x128xf32>
    %468 = vector.extract_strided_slice %467 {offsets = [0, 0], sizes = [2, 32], strides = [1, 1]} : vector<2x128xf32> to vector<2x32xf32>
    %469 = vector.extract_strided_slice %467 {offsets = [0, 32], sizes = [2, 32], strides = [1, 1]} : vector<2x128xf32> to vector<2x32xf32>
    %470 = vector.extract_strided_slice %467 {offsets = [0, 64], sizes = [2, 32], strides = [1, 1]} : vector<2x128xf32> to vector<2x32xf32>
    %471 = vector.extract_strided_slice %467 {offsets = [0, 96], sizes = [2, 32], strides = [1, 1]} : vector<2x128xf32> to vector<2x32xf32>
    %472 = arith.mulf %469, %412 : vector<2x32xf32>
    %473 = arith.mulf %468, %470 : vector<2x32xf32>
    %474 = arith.addf %472, %473 : vector<2x32xf32>
    %475 = math.tanh %474 : vector<2x32xf32>
    %476 = arith.mulf %471, %475 : vector<2x32xf32>
    %cst_96 = arith.constant 2.000000e+00 : f32
    %477 = vector.broadcast %cst_96 : f32 to vector<2x128xf32>
    %478 = arith.mulf %477, %450 : vector<2x128xf32>
    %479 = vector.shape_cast %5 : vector<1x128xi1> to vector<1x128xi1>
    %480 = vector.broadcast %479 : vector<1x128xi1> to vector<2x128xi1>
    %481 = arith.select %480, %478, %450 : vector<2x128xi1>, vector<2x128xf32>
    %482 = arith.negf %481 : vector<2x128xf32>
    %483 = math.exp %482 : vector<2x128xf32>
    %cst_97 = arith.constant 1.000000e+00 : f32
    %484 = vector.broadcast %cst_97 : f32 to vector<2x128xf32>
    %485 = arith.addf %484, %483 : vector<2x128xf32>
    %486 = arith.divf %484, %485 : vector<2x128xf32>
    %cst_98 = arith.constant 2.000000e+00 : f32
    %487 = vector.broadcast %cst_98 : f32 to vector<2x128xf32>
    %488 = arith.mulf %487, %486 : vector<2x128xf32>
    %cst_99 = arith.constant 1.000000e+00 : f32
    %489 = vector.broadcast %cst_99 : f32 to vector<2x128xf32>
    %490 = arith.subf %488, %489 : vector<2x128xf32>
    %491 = vector.shape_cast %5 : vector<1x128xi1> to vector<1x128xi1>
    %492 = vector.broadcast %491 : vector<1x128xi1> to vector<2x128xi1>
    %493 = arith.select %492, %490, %486 : vector<2x128xi1>, vector<2x128xf32>
    %494 = vector.extract_strided_slice %493 {offsets = [0, 0], sizes = [2, 32], strides = [1, 1]} : vector<2x128xf32> to vector<2x32xf32>
    %495 = vector.extract_strided_slice %493 {offsets = [0, 32], sizes = [2, 32], strides = [1, 1]} : vector<2x128xf32> to vector<2x32xf32>
    %496 = vector.extract_strided_slice %493 {offsets = [0, 64], sizes = [2, 32], strides = [1, 1]} : vector<2x128xf32> to vector<2x32xf32>
    %497 = vector.extract_strided_slice %493 {offsets = [0, 96], sizes = [2, 32], strides = [1, 1]} : vector<2x128xf32> to vector<2x32xf32>
    %498 = arith.mulf %495, %438 : vector<2x32xf32>
    %499 = arith.mulf %494, %496 : vector<2x32xf32>
    %500 = arith.addf %498, %499 : vector<2x32xf32>
    %501 = math.tanh %500 : vector<2x32xf32>
    %502 = arith.mulf %497, %501 : vector<2x32xf32>
    %c14_100 = arith.constant 14 : index
    %c0_101 = arith.constant 0 : index
    %503 = vector.load %arg17[%c14_100, %c0_101] : memref<16x64xf32, #tpu.memory_space<vmem>>, vector<2x32xf32>
    tpu.vector_store %arg17[%c14_100, %c0_101], %476 {strides = array<i32>} : memref<16x64xf32, #tpu.memory_space<vmem>>, vector<2x32xf32>,
    %c0_102 = arith.constant 0 : index
    %c32_103 = arith.constant 32 : index
    %504 = vector.load %arg17[%c0_102, %c32_103] : memref<16x64xf32, #tpu.memory_space<vmem>>, vector<2x32xf32>
    tpu.vector_store %arg17[%c0_102, %c32_103], %502 {strides = array<i32>} : memref<16x64xf32, #tpu.memory_space<vmem>>, vector<2x32xf32>,
    %c0_104 = arith.constant 0 : index
    %c0_105 = arith.constant 0 : index
    %505 = vector.load %arg17[%c0_104, %c0_105] : memref<16x64xf32, #tpu.memory_space<vmem>>, vector<16x64xf32>
    %c0_106 = arith.constant 0 : index
    %c0_107 = arith.constant 0 : index
    %506 = vector.load %arg5[%c0_106, %c0_107] : memref<64x256xf32, #tpu.memory_space<vmem>>, vector<64x256xf32>
    %c0_108 = arith.constant 0 : index
    %c0_109 = arith.constant 0 : index
    %507 = vector.load %arg6[%c0_108, %c0_109] : memref<64x256xf32, #tpu.memory_space<vmem>>, vector<64x256xf32>
    %c0_110 = arith.constant 0 : index
    %c0_111 = arith.constant 0 : index
    %508 = vector.load %arg7[%c0_110, %c0_111] : memref<1x256xf32, #tpu.memory_space<vmem>>, vector<1x256xf32>
    %cst_112 = arith.constant dense<0.000000e+00> : vector<16x256xf32>
    %509 = tpu.matmul %505, %506, %cst_112 {dimension_numbers = #tpu.dot_dimension_numbers<[1], [0], [0], [1], [0, 0, 1, 1], [], []>} : vector<16x64xf32>, vector<64x256xf32>, vector<16x256xf32> -> vector<16x256xf32>
    %510 = vector.broadcast %508 : vector<1x256xf32> to vector<16x256xf32>
    %511 = arith.addf %509, %510 : vector<16x256xf32>
    %cst_113 = arith.constant 0.000000e+00 : f32
    %512 = vector.broadcast %cst_113 : f32 to vector<2x32xf32>
    %cst_114 = arith.constant 0.000000e+00 : f32
    %513 = vector.broadcast %cst_114 : f32 to vector<2x32xf32>
    %514 = vector.extract_strided_slice %511 {offsets = [0, 0], sizes = [2, 128], strides = [1, 1]} : vector<16x256xf32> to vector<2x128xf32>
    %515 = vector.extract_strided_slice %511 {offsets = [14, 128], sizes = [2, 128], strides = [1, 1]} : vector<16x256xf32> to vector<2x128xf32>
    %cst_115 = arith.constant 2.000000e+00 : f32
    %516 = vector.broadcast %cst_115 : f32 to vector<2x128xf32>
    %517 = arith.mulf %516, %514 : vector<2x128xf32>
    %518 = vector.shape_cast %5 : vector<1x128xi1> to vector<1x128xi1>
    %519 = vector.broadcast %518 : vector<1x128xi1> to vector<2x128xi1>
    %520 = arith.select %519, %517, %514 : vector<2x128xi1>, vector<2x128xf32>
    %521 = arith.negf %520 : vector<2x128xf32>
    %522 = math.exp %521 : vector<2x128xf32>
    %cst_116 = arith.constant 1.000000e+00 : f32
    %523 = vector.broadcast %cst_116 : f32 to vector<2x128xf32>
    %524 = arith.addf %523, %522 : vector<2x128xf32>
    %525 = arith.divf %523, %524 : vector<2x128xf32>
    %cst_117 = arith.constant 2.000000e+00 : f32
    %526 = vector.broadcast %cst_117 : f32 to vector<2x128xf32>
    %527 = arith.mulf %526, %525 : vector<2x128xf32>
    %cst_118 = arith.constant 1.000000e+00 : f32
    %528 = vector.broadcast %cst_118 : f32 to vector<2x128xf32>
    %529 = arith.subf %527, %528 : vector<2x128xf32>
    %530 = vector.shape_cast %5 : vector<1x128xi1> to vector<1x128xi1>
    %531 = vector.broadcast %530 : vector<1x128xi1> to vector<2x128xi1>
    %532 = arith.select %531, %529, %525 : vector<2x128xi1>, vector<2x128xf32>
    %533 = vector.extract_strided_slice %532 {offsets = [0, 0], sizes = [2, 32], strides = [1, 1]} : vector<2x128xf32> to vector<2x32xf32>
    %534 = vector.extract_strided_slice %532 {offsets = [0, 32], sizes = [2, 32], strides = [1, 1]} : vector<2x128xf32> to vector<2x32xf32>
    %535 = vector.extract_strided_slice %532 {offsets = [0, 64], sizes = [2, 32], strides = [1, 1]} : vector<2x128xf32> to vector<2x32xf32>
    %536 = vector.extract_strided_slice %532 {offsets = [0, 96], sizes = [2, 32], strides = [1, 1]} : vector<2x128xf32> to vector<2x32xf32>
    %537 = arith.mulf %534, %512 : vector<2x32xf32>
    %538 = arith.mulf %533, %535 : vector<2x32xf32>
    %539 = arith.addf %537, %538 : vector<2x32xf32>
    %540 = math.tanh %539 : vector<2x32xf32>
    %541 = arith.mulf %536, %540 : vector<2x32xf32>
    %cst_119 = arith.constant 2.000000e+00 : f32
    %542 = vector.broadcast %cst_119 : f32 to vector<2x128xf32>
    %543 = arith.mulf %542, %515 : vector<2x128xf32>
    %544 = vector.shape_cast %5 : vector<1x128xi1> to vector<1x128xi1>
    %545 = vector.broadcast %544 : vector<1x128xi1> to vector<2x128xi1>
    %546 = arith.select %545, %543, %515 : vector<2x128xi1>, vector<2x128xf32>
    %547 = arith.negf %546 : vector<2x128xf32>
    %548 = math.exp %547 : vector<2x128xf32>
    %cst_120 = arith.constant 1.000000e+00 : f32
    %549 = vector.broadcast %cst_120 : f32 to vector<2x128xf32>
    %550 = arith.addf %549, %548 : vector<2x128xf32>
    %551 = arith.divf %549, %550 : vector<2x128xf32>
    %cst_121 = arith.constant 2.000000e+00 : f32
    %552 = vector.broadcast %cst_121 : f32 to vector<2x128xf32>
    %553 = arith.mulf %552, %551 : vector<2x128xf32>
    %cst_122 = arith.constant 1.000000e+00 : f32
    %554 = vector.broadcast %cst_122 : f32 to vector<2x128xf32>
    %555 = arith.subf %553, %554 : vector<2x128xf32>
    %556 = vector.shape_cast %5 : vector<1x128xi1> to vector<1x128xi1>
    %557 = vector.broadcast %556 : vector<1x128xi1> to vector<2x128xi1>
    %558 = arith.select %557, %555, %551 : vector<2x128xi1>, vector<2x128xf32>
    %559 = vector.extract_strided_slice %558 {offsets = [0, 0], sizes = [2, 32], strides = [1, 1]} : vector<2x128xf32> to vector<2x32xf32>
    %560 = vector.extract_strided_slice %558 {offsets = [0, 32], sizes = [2, 32], strides = [1, 1]} : vector<2x128xf32> to vector<2x32xf32>
    %561 = vector.extract_strided_slice %558 {offsets = [0, 64], sizes = [2, 32], strides = [1, 1]} : vector<2x128xf32> to vector<2x32xf32>
    %562 = vector.extract_strided_slice %558 {offsets = [0, 96], sizes = [2, 32], strides = [1, 1]} : vector<2x128xf32> to vector<2x32xf32>
    %563 = arith.mulf %560, %513 : vector<2x32xf32>
    %564 = arith.mulf %559, %561 : vector<2x32xf32>
    %565 = arith.addf %563, %564 : vector<2x32xf32>
    %566 = math.tanh %565 : vector<2x32xf32>
    %567 = arith.mulf %562, %566 : vector<2x32xf32>
    %c0_123 = arith.constant 0 : index
    %c0_124 = arith.constant 0 : index
    %568 = vector.load %arg17[%c0_123, %c0_124] : memref<16x64xf32, #tpu.memory_space<vmem>>, vector<2x32xf32>
    tpu.vector_store %arg17[%c0_123, %c0_124], %541 {strides = array<i32>} : memref<16x64xf32, #tpu.memory_space<vmem>>, vector<2x32xf32>,
    %c14_125 = arith.constant 14 : index
    %c32_126 = arith.constant 32 : index
    %569 = vector.load %arg17[%c14_125, %c32_126] : memref<16x64xf32, #tpu.memory_space<vmem>>, vector<2x32xf32>
    tpu.vector_store %arg17[%c14_125, %c32_126], %567 {strides = array<i32>} : memref<16x64xf32, #tpu.memory_space<vmem>>, vector<2x32xf32>,
    %570 = tpu.concatenate %541, %567 in 1 : vector<2x32xf32>, vector<2x32xf32> -> vector<2x64xf32>
    %571 = vector.extract_strided_slice %511 {offsets = [2, 0], sizes = [2, 128], strides = [1, 1]} : vector<16x256xf32> to vector<2x128xf32>
    %572 = vector.extract_strided_slice %511 {offsets = [12, 128], sizes = [2, 128], strides = [1, 1]} : vector<16x256xf32> to vector<2x128xf32>
    %cst_127 = arith.constant dense<0.000000e+00> : vector<2x256xf32>
    %573 = tpu.matmul %570, %507, %cst_127 {dimension_numbers = #tpu.dot_dimension_numbers<[1], [0], [0], [1], [0, 0, 1, 1], [], []>} : vector<2x64xf32>, vector<64x256xf32>, vector<2x256xf32> -> vector<2x256xf32>
    %574 = vector.extract_strided_slice %573 {offsets = [0, 0], sizes = [2, 128], strides = [1, 1]} : vector<2x256xf32> to vector<2x128xf32>
    %575 = arith.addf %574, %571 : vector<2x128xf32>
    %576 = vector.extract_strided_slice %573 {offsets = [0, 128], sizes = [2, 128], strides = [1, 1]} : vector<2x256xf32> to vector<2x128xf32>
    %577 = arith.addf %576, %572 : vector<2x128xf32>
    %cst_128 = arith.constant 2.000000e+00 : f32
    %578 = vector.broadcast %cst_128 : f32 to vector<2x128xf32>
    %579 = arith.mulf %578, %575 : vector<2x128xf32>
    %580 = vector.shape_cast %5 : vector<1x128xi1> to vector<1x128xi1>
    %581 = vector.broadcast %580 : vector<1x128xi1> to vector<2x128xi1>
    %582 = arith.select %581, %579, %575 : vector<2x128xi1>, vector<2x128xf32>
    %583 = arith.negf %582 : vector<2x128xf32>
    %584 = math.exp %583 : vector<2x128xf32>
    %cst_129 = arith.constant 1.000000e+00 : f32
    %585 = vector.broadcast %cst_129 : f32 to vector<2x128xf32>
    %586 = arith.addf %585, %584 : vector<2x128xf32>
    %587 = arith.divf %585, %586 : vector<2x128xf32>
    %cst_130 = arith.constant 2.000000e+00 : f32
    %588 = vector.broadcast %cst_130 : f32 to vector<2x128xf32>
    %589 = arith.mulf %588, %587 : vector<2x128xf32>
    %cst_131 = arith.constant 1.000000e+00 : f32
    %590 = vector.broadcast %cst_131 : f32 to vector<2x128xf32>
    %591 = arith.subf %589, %590 : vector<2x128xf32>
    %592 = vector.shape_cast %5 : vector<1x128xi1> to vector<1x128xi1>
    %593 = vector.broadcast %592 : vector<1x128xi1> to vector<2x128xi1>
    %594 = arith.select %593, %591, %587 : vector<2x128xi1>, vector<2x128xf32>
    %595 = vector.extract_strided_slice %594 {offsets = [0, 0], sizes = [2, 32], strides = [1, 1]} : vector<2x128xf32> to vector<2x32xf32>
    %596 = vector.extract_strided_slice %594 {offsets = [0, 32], sizes = [2, 32], strides = [1, 1]} : vector<2x128xf32> to vector<2x32xf32>
    %597 = vector.extract_strided_slice %594 {offsets = [0, 64], sizes = [2, 32], strides = [1, 1]} : vector<2x128xf32> to vector<2x32xf32>
    %598 = vector.extract_strided_slice %594 {offsets = [0, 96], sizes = [2, 32], strides = [1, 1]} : vector<2x128xf32> to vector<2x32xf32>
    %599 = arith.mulf %596, %539 : vector<2x32xf32>
    %600 = arith.mulf %595, %597 : vector<2x32xf32>
    %601 = arith.addf %599, %600 : vector<2x32xf32>
    %602 = math.tanh %601 : vector<2x32xf32>
    %603 = arith.mulf %598, %602 : vector<2x32xf32>
    %cst_132 = arith.constant 2.000000e+00 : f32
    %604 = vector.broadcast %cst_132 : f32 to vector<2x128xf32>
    %605 = arith.mulf %604, %577 : vector<2x128xf32>
    %606 = vector.shape_cast %5 : vector<1x128xi1> to vector<1x128xi1>
    %607 = vector.broadcast %606 : vector<1x128xi1> to vector<2x128xi1>
    %608 = arith.select %607, %605, %577 : vector<2x128xi1>, vector<2x128xf32>
    %609 = arith.negf %608 : vector<2x128xf32>
    %610 = math.exp %609 : vector<2x128xf32>
    %cst_133 = arith.constant 1.000000e+00 : f32
    %611 = vector.broadcast %cst_133 : f32 to vector<2x128xf32>
    %612 = arith.addf %611, %610 : vector<2x128xf32>
    %613 = arith.divf %611, %612 : vector<2x128xf32>
    %cst_134 = arith.constant 2.000000e+00 : f32
    %614 = vector.broadcast %cst_134 : f32 to vector<2x128xf32>
    %615 = arith.mulf %614, %613 : vector<2x128xf32>
    %cst_135 = arith.constant 1.000000e+00 : f32
    %616 = vector.broadcast %cst_135 : f32 to vector<2x128xf32>
    %617 = arith.subf %615, %616 : vector<2x128xf32>
    %618 = vector.shape_cast %5 : vector<1x128xi1> to vector<1x128xi1>
    %619 = vector.broadcast %618 : vector<1x128xi1> to vector<2x128xi1>
    %620 = arith.select %619, %617, %613 : vector<2x128xi1>, vector<2x128xf32>
    %621 = vector.extract_strided_slice %620 {offsets = [0, 0], sizes = [2, 32], strides = [1, 1]} : vector<2x128xf32> to vector<2x32xf32>
    %622 = vector.extract_strided_slice %620 {offsets = [0, 32], sizes = [2, 32], strides = [1, 1]} : vector<2x128xf32> to vector<2x32xf32>
    %623 = vector.extract_strided_slice %620 {offsets = [0, 64], sizes = [2, 32], strides = [1, 1]} : vector<2x128xf32> to vector<2x32xf32>
    %624 = vector.extract_strided_slice %620 {offsets = [0, 96], sizes = [2, 32], strides = [1, 1]} : vector<2x128xf32> to vector<2x32xf32>
    %625 = arith.mulf %622, %565 : vector<2x32xf32>
    %626 = arith.mulf %621, %623 : vector<2x32xf32>
    %627 = arith.addf %625, %626 : vector<2x32xf32>
    %628 = math.tanh %627 : vector<2x32xf32>
    %629 = arith.mulf %624, %628 : vector<2x32xf32>
    %c2_136 = arith.constant 2 : index
    %c0_137 = arith.constant 0 : index
    %630 = vector.load %arg17[%c2_136, %c0_137] : memref<16x64xf32, #tpu.memory_space<vmem>>, vector<2x32xf32>
    tpu.vector_store %arg17[%c2_136, %c0_137], %603 {strides = array<i32>} : memref<16x64xf32, #tpu.memory_space<vmem>>, vector<2x32xf32>,
    %c12_138 = arith.constant 12 : index
    %c32_139 = arith.constant 32 : index
    %631 = vector.load %arg17[%c12_138, %c32_139] : memref<16x64xf32, #tpu.memory_space<vmem>>, vector<2x32xf32>
    tpu.vector_store %arg17[%c12_138, %c32_139], %629 {strides = array<i32>} : memref<16x64xf32, #tpu.memory_space<vmem>>, vector<2x32xf32>,
    %632 = tpu.concatenate %603, %629 in 1 : vector<2x32xf32>, vector<2x32xf32> -> vector<2x64xf32>
    %633 = vector.extract_strided_slice %511 {offsets = [4, 0], sizes = [2, 128], strides = [1, 1]} : vector<16x256xf32> to vector<2x128xf32>
    %634 = vector.extract_strided_slice %511 {offsets = [10, 128], sizes = [2, 128], strides = [1, 1]} : vector<16x256xf32> to vector<2x128xf32>
    %cst_140 = arith.constant dense<0.000000e+00> : vector<2x256xf32>
    %635 = tpu.matmul %632, %507, %cst_140 {dimension_numbers = #tpu.dot_dimension_numbers<[1], [0], [0], [1], [0, 0, 1, 1], [], []>} : vector<2x64xf32>, vector<64x256xf32>, vector<2x256xf32> -> vector<2x256xf32>
    %636 = vector.extract_strided_slice %635 {offsets = [0, 0], sizes = [2, 128], strides = [1, 1]} : vector<2x256xf32> to vector<2x128xf32>
    %637 = arith.addf %636, %633 : vector<2x128xf32>
    %638 = vector.extract_strided_slice %635 {offsets = [0, 128], sizes = [2, 128], strides = [1, 1]} : vector<2x256xf32> to vector<2x128xf32>
    %639 = arith.addf %638, %634 : vector<2x128xf32>
    %cst_141 = arith.constant 2.000000e+00 : f32
    %640 = vector.broadcast %cst_141 : f32 to vector<2x128xf32>
    %641 = arith.mulf %640, %637 : vector<2x128xf32>
    %642 = vector.shape_cast %5 : vector<1x128xi1> to vector<1x128xi1>
    %643 = vector.broadcast %642 : vector<1x128xi1> to vector<2x128xi1>
    %644 = arith.select %643, %641, %637 : vector<2x128xi1>, vector<2x128xf32>
    %645 = arith.negf %644 : vector<2x128xf32>
    %646 = math.exp %645 : vector<2x128xf32>
    %cst_142 = arith.constant 1.000000e+00 : f32
    %647 = vector.broadcast %cst_142 : f32 to vector<2x128xf32>
    %648 = arith.addf %647, %646 : vector<2x128xf32>
    %649 = arith.divf %647, %648 : vector<2x128xf32>
    %cst_143 = arith.constant 2.000000e+00 : f32
    %650 = vector.broadcast %cst_143 : f32 to vector<2x128xf32>
    %651 = arith.mulf %650, %649 : vector<2x128xf32>
    %cst_144 = arith.constant 1.000000e+00 : f32
    %652 = vector.broadcast %cst_144 : f32 to vector<2x128xf32>
    %653 = arith.subf %651, %652 : vector<2x128xf32>
    %654 = vector.shape_cast %5 : vector<1x128xi1> to vector<1x128xi1>
    %655 = vector.broadcast %654 : vector<1x128xi1> to vector<2x128xi1>
    %656 = arith.select %655, %653, %649 : vector<2x128xi1>, vector<2x128xf32>
    %657 = vector.extract_strided_slice %656 {offsets = [0, 0], sizes = [2, 32], strides = [1, 1]} : vector<2x128xf32> to vector<2x32xf32>
    %658 = vector.extract_strided_slice %656 {offsets = [0, 32], sizes = [2, 32], strides = [1, 1]} : vector<2x128xf32> to vector<2x32xf32>
    %659 = vector.extract_strided_slice %656 {offsets = [0, 64], sizes = [2, 32], strides = [1, 1]} : vector<2x128xf32> to vector<2x32xf32>
    %660 = vector.extract_strided_slice %656 {offsets = [0, 96], sizes = [2, 32], strides = [1, 1]} : vector<2x128xf32> to vector<2x32xf32>
    %661 = arith.mulf %658, %601 : vector<2x32xf32>
    %662 = arith.mulf %657, %659 : vector<2x32xf32>
    %663 = arith.addf %661, %662 : vector<2x32xf32>
    %664 = math.tanh %663 : vector<2x32xf32>
    %665 = arith.mulf %660, %664 : vector<2x32xf32>
    %cst_145 = arith.constant 2.000000e+00 : f32
    %666 = vector.broadcast %cst_145 : f32 to vector<2x128xf32>
    %667 = arith.mulf %666, %639 : vector<2x128xf32>
    %668 = vector.shape_cast %5 : vector<1x128xi1> to vector<1x128xi1>
    %669 = vector.broadcast %668 : vector<1x128xi1> to vector<2x128xi1>
    %670 = arith.select %669, %667, %639 : vector<2x128xi1>, vector<2x128xf32>
    %671 = arith.negf %670 : vector<2x128xf32>
    %672 = math.exp %671 : vector<2x128xf32>
    %cst_146 = arith.constant 1.000000e+00 : f32
    %673 = vector.broadcast %cst_146 : f32 to vector<2x128xf32>
    %674 = arith.addf %673, %672 : vector<2x128xf32>
    %675 = arith.divf %673, %674 : vector<2x128xf32>
    %cst_147 = arith.constant 2.000000e+00 : f32
    %676 = vector.broadcast %cst_147 : f32 to vector<2x128xf32>
    %677 = arith.mulf %676, %675 : vector<2x128xf32>
    %cst_148 = arith.constant 1.000000e+00 : f32
    %678 = vector.broadcast %cst_148 : f32 to vector<2x128xf32>
    %679 = arith.subf %677, %678 : vector<2x128xf32>
    %680 = vector.shape_cast %5 : vector<1x128xi1> to vector<1x128xi1>
    %681 = vector.broadcast %680 : vector<1x128xi1> to vector<2x128xi1>
    %682 = arith.select %681, %679, %675 : vector<2x128xi1>, vector<2x128xf32>
    %683 = vector.extract_strided_slice %682 {offsets = [0, 0], sizes = [2, 32], strides = [1, 1]} : vector<2x128xf32> to vector<2x32xf32>
    %684 = vector.extract_strided_slice %682 {offsets = [0, 32], sizes = [2, 32], strides = [1, 1]} : vector<2x128xf32> to vector<2x32xf32>
    %685 = vector.extract_strided_slice %682 {offsets = [0, 64], sizes = [2, 32], strides = [1, 1]} : vector<2x128xf32> to vector<2x32xf32>
    %686 = vector.extract_strided_slice %682 {offsets = [0, 96], sizes = [2, 32], strides = [1, 1]} : vector<2x128xf32> to vector<2x32xf32>
    %687 = arith.mulf %684, %627 : vector<2x32xf32>
    %688 = arith.mulf %683, %685 : vector<2x32xf32>
    %689 = arith.addf %687, %688 : vector<2x32xf32>
    %690 = math.tanh %689 : vector<2x32xf32>
    %691 = arith.mulf %686, %690 : vector<2x32xf32>
    %c4_149 = arith.constant 4 : index
    %c0_150 = arith.constant 0 : index
    %692 = vector.load %arg17[%c4_149, %c0_150] : memref<16x64xf32, #tpu.memory_space<vmem>>, vector<2x32xf32>
    tpu.vector_store %arg17[%c4_149, %c0_150], %665 {strides = array<i32>} : memref<16x64xf32, #tpu.memory_space<vmem>>, vector<2x32xf32>,
    %c10_151 = arith.constant 10 : index
    %c32_152 = arith.constant 32 : index
    %693 = vector.load %arg17[%c10_151, %c32_152] : memref<16x64xf32, #tpu.memory_space<vmem>>, vector<2x32xf32>
    tpu.vector_store %arg17[%c10_151, %c32_152], %691 {strides = array<i32>} : memref<16x64xf32, #tpu.memory_space<vmem>>, vector<2x32xf32>,
    %694 = tpu.concatenate %665, %691 in 1 : vector<2x32xf32>, vector<2x32xf32> -> vector<2x64xf32>
    %695 = vector.extract_strided_slice %511 {offsets = [6, 0], sizes = [2, 128], strides = [1, 1]} : vector<16x256xf32> to vector<2x128xf32>
    %696 = vector.extract_strided_slice %511 {offsets = [8, 128], sizes = [2, 128], strides = [1, 1]} : vector<16x256xf32> to vector<2x128xf32>
    %cst_153 = arith.constant dense<0.000000e+00> : vector<2x256xf32>
    %697 = tpu.matmul %694, %507, %cst_153 {dimension_numbers = #tpu.dot_dimension_numbers<[1], [0], [0], [1], [0, 0, 1, 1], [], []>} : vector<2x64xf32>, vector<64x256xf32>, vector<2x256xf32> -> vector<2x256xf32>
    %698 = vector.extract_strided_slice %697 {offsets = [0, 0], sizes = [2, 128], strides = [1, 1]} : vector<2x256xf32> to vector<2x128xf32>
    %699 = arith.addf %698, %695 : vector<2x128xf32>
    %700 = vector.extract_strided_slice %697 {offsets = [0, 128], sizes = [2, 128], strides = [1, 1]} : vector<2x256xf32> to vector<2x128xf32>
    %701 = arith.addf %700, %696 : vector<2x128xf32>
    %cst_154 = arith.constant 2.000000e+00 : f32
    %702 = vector.broadcast %cst_154 : f32 to vector<2x128xf32>
    %703 = arith.mulf %702, %699 : vector<2x128xf32>
    %704 = vector.shape_cast %5 : vector<1x128xi1> to vector<1x128xi1>
    %705 = vector.broadcast %704 : vector<1x128xi1> to vector<2x128xi1>
    %706 = arith.select %705, %703, %699 : vector<2x128xi1>, vector<2x128xf32>
    %707 = arith.negf %706 : vector<2x128xf32>
    %708 = math.exp %707 : vector<2x128xf32>
    %cst_155 = arith.constant 1.000000e+00 : f32
    %709 = vector.broadcast %cst_155 : f32 to vector<2x128xf32>
    %710 = arith.addf %709, %708 : vector<2x128xf32>
    %711 = arith.divf %709, %710 : vector<2x128xf32>
    %cst_156 = arith.constant 2.000000e+00 : f32
    %712 = vector.broadcast %cst_156 : f32 to vector<2x128xf32>
    %713 = arith.mulf %712, %711 : vector<2x128xf32>
    %cst_157 = arith.constant 1.000000e+00 : f32
    %714 = vector.broadcast %cst_157 : f32 to vector<2x128xf32>
    %715 = arith.subf %713, %714 : vector<2x128xf32>
    %716 = vector.shape_cast %5 : vector<1x128xi1> to vector<1x128xi1>
    %717 = vector.broadcast %716 : vector<1x128xi1> to vector<2x128xi1>
    %718 = arith.select %717, %715, %711 : vector<2x128xi1>, vector<2x128xf32>
    %719 = vector.extract_strided_slice %718 {offsets = [0, 0], sizes = [2, 32], strides = [1, 1]} : vector<2x128xf32> to vector<2x32xf32>
    %720 = vector.extract_strided_slice %718 {offsets = [0, 32], sizes = [2, 32], strides = [1, 1]} : vector<2x128xf32> to vector<2x32xf32>
    %721 = vector.extract_strided_slice %718 {offsets = [0, 64], sizes = [2, 32], strides = [1, 1]} : vector<2x128xf32> to vector<2x32xf32>
    %722 = vector.extract_strided_slice %718 {offsets = [0, 96], sizes = [2, 32], strides = [1, 1]} : vector<2x128xf32> to vector<2x32xf32>
    %723 = arith.mulf %720, %663 : vector<2x32xf32>
    %724 = arith.mulf %719, %721 : vector<2x32xf32>
    %725 = arith.addf %723, %724 : vector<2x32xf32>
    %726 = math.tanh %725 : vector<2x32xf32>
    %727 = arith.mulf %722, %726 : vector<2x32xf32>
    %cst_158 = arith.constant 2.000000e+00 : f32
    %728 = vector.broadcast %cst_158 : f32 to vector<2x128xf32>
    %729 = arith.mulf %728, %701 : vector<2x128xf32>
    %730 = vector.shape_cast %5 : vector<1x128xi1> to vector<1x128xi1>
    %731 = vector.broadcast %730 : vector<1x128xi1> to vector<2x128xi1>
    %732 = arith.select %731, %729, %701 : vector<2x128xi1>, vector<2x128xf32>
    %733 = arith.negf %732 : vector<2x128xf32>
    %734 = math.exp %733 : vector<2x128xf32>
    %cst_159 = arith.constant 1.000000e+00 : f32
    %735 = vector.broadcast %cst_159 : f32 to vector<2x128xf32>
    %736 = arith.addf %735, %734 : vector<2x128xf32>
    %737 = arith.divf %735, %736 : vector<2x128xf32>
    %cst_160 = arith.constant 2.000000e+00 : f32
    %738 = vector.broadcast %cst_160 : f32 to vector<2x128xf32>
    %739 = arith.mulf %738, %737 : vector<2x128xf32>
    %cst_161 = arith.constant 1.000000e+00 : f32
    %740 = vector.broadcast %cst_161 : f32 to vector<2x128xf32>
    %741 = arith.subf %739, %740 : vector<2x128xf32>
    %742 = vector.shape_cast %5 : vector<1x128xi1> to vector<1x128xi1>
    %743 = vector.broadcast %742 : vector<1x128xi1> to vector<2x128xi1>
    %744 = arith.select %743, %741, %737 : vector<2x128xi1>, vector<2x128xf32>
    %745 = vector.extract_strided_slice %744 {offsets = [0, 0], sizes = [2, 32], strides = [1, 1]} : vector<2x128xf32> to vector<2x32xf32>
    %746 = vector.extract_strided_slice %744 {offsets = [0, 32], sizes = [2, 32], strides = [1, 1]} : vector<2x128xf32> to vector<2x32xf32>
    %747 = vector.extract_strided_slice %744 {offsets = [0, 64], sizes = [2, 32], strides = [1, 1]} : vector<2x128xf32> to vector<2x32xf32>
    %748 = vector.extract_strided_slice %744 {offsets = [0, 96], sizes = [2, 32], strides = [1, 1]} : vector<2x128xf32> to vector<2x32xf32>
    %749 = arith.mulf %746, %689 : vector<2x32xf32>
    %750 = arith.mulf %745, %747 : vector<2x32xf32>
    %751 = arith.addf %749, %750 : vector<2x32xf32>
    %752 = math.tanh %751 : vector<2x32xf32>
    %753 = arith.mulf %748, %752 : vector<2x32xf32>
    %c6_162 = arith.constant 6 : index
    %c0_163 = arith.constant 0 : index
    %754 = vector.load %arg17[%c6_162, %c0_163] : memref<16x64xf32, #tpu.memory_space<vmem>>, vector<2x32xf32>
    tpu.vector_store %arg17[%c6_162, %c0_163], %727 {strides = array<i32>} : memref<16x64xf32, #tpu.memory_space<vmem>>, vector<2x32xf32>,
    %c8_164 = arith.constant 8 : index
    %c32_165 = arith.constant 32 : index
    %755 = vector.load %arg17[%c8_164, %c32_165] : memref<16x64xf32, #tpu.memory_space<vmem>>, vector<2x32xf32>
    tpu.vector_store %arg17[%c8_164, %c32_165], %753 {strides = array<i32>} : memref<16x64xf32, #tpu.memory_space<vmem>>, vector<2x32xf32>,
    %756 = tpu.concatenate %727, %753 in 1 : vector<2x32xf32>, vector<2x32xf32> -> vector<2x64xf32>
    %757 = vector.extract_strided_slice %511 {offsets = [8, 0], sizes = [2, 128], strides = [1, 1]} : vector<16x256xf32> to vector<2x128xf32>
    %758 = vector.extract_strided_slice %511 {offsets = [6, 128], sizes = [2, 128], strides = [1, 1]} : vector<16x256xf32> to vector<2x128xf32>
    %cst_166 = arith.constant dense<0.000000e+00> : vector<2x256xf32>
    %759 = tpu.matmul %756, %507, %cst_166 {dimension_numbers = #tpu.dot_dimension_numbers<[1], [0], [0], [1], [0, 0, 1, 1], [], []>} : vector<2x64xf32>, vector<64x256xf32>, vector<2x256xf32> -> vector<2x256xf32>
    %760 = vector.extract_strided_slice %759 {offsets = [0, 0], sizes = [2, 128], strides = [1, 1]} : vector<2x256xf32> to vector<2x128xf32>
    %761 = arith.addf %760, %757 : vector<2x128xf32>
    %762 = vector.extract_strided_slice %759 {offsets = [0, 128], sizes = [2, 128], strides = [1, 1]} : vector<2x256xf32> to vector<2x128xf32>
    %763 = arith.addf %762, %758 : vector<2x128xf32>
    %cst_167 = arith.constant 2.000000e+00 : f32
    %764 = vector.broadcast %cst_167 : f32 to vector<2x128xf32>
    %765 = arith.mulf %764, %761 : vector<2x128xf32>
    %766 = vector.shape_cast %5 : vector<1x128xi1> to vector<1x128xi1>
    %767 = vector.broadcast %766 : vector<1x128xi1> to vector<2x128xi1>
    %768 = arith.select %767, %765, %761 : vector<2x128xi1>, vector<2x128xf32>
    %769 = arith.negf %768 : vector<2x128xf32>
    %770 = math.exp %769 : vector<2x128xf32>
    %cst_168 = arith.constant 1.000000e+00 : f32
    %771 = vector.broadcast %cst_168 : f32 to vector<2x128xf32>
    %772 = arith.addf %771, %770 : vector<2x128xf32>
    %773 = arith.divf %771, %772 : vector<2x128xf32>
    %cst_169 = arith.constant 2.000000e+00 : f32
    %774 = vector.broadcast %cst_169 : f32 to vector<2x128xf32>
    %775 = arith.mulf %774, %773 : vector<2x128xf32>
    %cst_170 = arith.constant 1.000000e+00 : f32
    %776 = vector.broadcast %cst_170 : f32 to vector<2x128xf32>
    %777 = arith.subf %775, %776 : vector<2x128xf32>
    %778 = vector.shape_cast %5 : vector<1x128xi1> to vector<1x128xi1>
    %779 = vector.broadcast %778 : vector<1x128xi1> to vector<2x128xi1>
    %780 = arith.select %779, %777, %773 : vector<2x128xi1>, vector<2x128xf32>
    %781 = vector.extract_strided_slice %780 {offsets = [0, 0], sizes = [2, 32], strides = [1, 1]} : vector<2x128xf32> to vector<2x32xf32>
    %782 = vector.extract_strided_slice %780 {offsets = [0, 32], sizes = [2, 32], strides = [1, 1]} : vector<2x128xf32> to vector<2x32xf32>
    %783 = vector.extract_strided_slice %780 {offsets = [0, 64], sizes = [2, 32], strides = [1, 1]} : vector<2x128xf32> to vector<2x32xf32>
    %784 = vector.extract_strided_slice %780 {offsets = [0, 96], sizes = [2, 32], strides = [1, 1]} : vector<2x128xf32> to vector<2x32xf32>
    %785 = arith.mulf %782, %725 : vector<2x32xf32>
    %786 = arith.mulf %781, %783 : vector<2x32xf32>
    %787 = arith.addf %785, %786 : vector<2x32xf32>
    %788 = math.tanh %787 : vector<2x32xf32>
    %789 = arith.mulf %784, %788 : vector<2x32xf32>
    %cst_171 = arith.constant 2.000000e+00 : f32
    %790 = vector.broadcast %cst_171 : f32 to vector<2x128xf32>
    %791 = arith.mulf %790, %763 : vector<2x128xf32>
    %792 = vector.shape_cast %5 : vector<1x128xi1> to vector<1x128xi1>
    %793 = vector.broadcast %792 : vector<1x128xi1> to vector<2x128xi1>
    %794 = arith.select %793, %791, %763 : vector<2x128xi1>, vector<2x128xf32>
    %795 = arith.negf %794 : vector<2x128xf32>
    %796 = math.exp %795 : vector<2x128xf32>
    %cst_172 = arith.constant 1.000000e+00 : f32
    %797 = vector.broadcast %cst_172 : f32 to vector<2x128xf32>
    %798 = arith.addf %797, %796 : vector<2x128xf32>
    %799 = arith.divf %797, %798 : vector<2x128xf32>
    %cst_173 = arith.constant 2.000000e+00 : f32
    %800 = vector.broadcast %cst_173 : f32 to vector<2x128xf32>
    %801 = arith.mulf %800, %799 : vector<2x128xf32>
    %cst_174 = arith.constant 1.000000e+00 : f32
    %802 = vector.broadcast %cst_174 : f32 to vector<2x128xf32>
    %803 = arith.subf %801, %802 : vector<2x128xf32>
    %804 = vector.shape_cast %5 : vector<1x128xi1> to vector<1x128xi1>
    %805 = vector.broadcast %804 : vector<1x128xi1> to vector<2x128xi1>
    %806 = arith.select %805, %803, %799 : vector<2x128xi1>, vector<2x128xf32>
    %807 = vector.extract_strided_slice %806 {offsets = [0, 0], sizes = [2, 32], strides = [1, 1]} : vector<2x128xf32> to vector<2x32xf32>
    %808 = vector.extract_strided_slice %806 {offsets = [0, 32], sizes = [2, 32], strides = [1, 1]} : vector<2x128xf32> to vector<2x32xf32>
    %809 = vector.extract_strided_slice %806 {offsets = [0, 64], sizes = [2, 32], strides = [1, 1]} : vector<2x128xf32> to vector<2x32xf32>
    %810 = vector.extract_strided_slice %806 {offsets = [0, 96], sizes = [2, 32], strides = [1, 1]} : vector<2x128xf32> to vector<2x32xf32>
    %811 = arith.mulf %808, %751 : vector<2x32xf32>
    %812 = arith.mulf %807, %809 : vector<2x32xf32>
    %813 = arith.addf %811, %812 : vector<2x32xf32>
    %814 = math.tanh %813 : vector<2x32xf32>
    %815 = arith.mulf %810, %814 : vector<2x32xf32>
    %c8_175 = arith.constant 8 : index
    %c0_176 = arith.constant 0 : index
    %816 = vector.load %arg17[%c8_175, %c0_176] : memref<16x64xf32, #tpu.memory_space<vmem>>, vector<2x32xf32>
    tpu.vector_store %arg17[%c8_175, %c0_176], %789 {strides = array<i32>} : memref<16x64xf32, #tpu.memory_space<vmem>>, vector<2x32xf32>,
    %c6_177 = arith.constant 6 : index
    %c32_178 = arith.constant 32 : index
    %817 = vector.load %arg17[%c6_177, %c32_178] : memref<16x64xf32, #tpu.memory_space<vmem>>, vector<2x32xf32>
    tpu.vector_store %arg17[%c6_177, %c32_178], %815 {strides = array<i32>} : memref<16x64xf32, #tpu.memory_space<vmem>>, vector<2x32xf32>,
    %818 = tpu.concatenate %789, %815 in 1 : vector<2x32xf32>, vector<2x32xf32> -> vector<2x64xf32>
    %819 = vector.extract_strided_slice %511 {offsets = [10, 0], sizes = [2, 128], strides = [1, 1]} : vector<16x256xf32> to vector<2x128xf32>
    %820 = vector.extract_strided_slice %511 {offsets = [4, 128], sizes = [2, 128], strides = [1, 1]} : vector<16x256xf32> to vector<2x128xf32>
    %cst_179 = arith.constant dense<0.000000e+00> : vector<2x256xf32>
    %821 = tpu.matmul %818, %507, %cst_179 {dimension_numbers = #tpu.dot_dimension_numbers<[1], [0], [0], [1], [0, 0, 1, 1], [], []>} : vector<2x64xf32>, vector<64x256xf32>, vector<2x256xf32> -> vector<2x256xf32>
    %822 = vector.extract_strided_slice %821 {offsets = [0, 0], sizes = [2, 128], strides = [1, 1]} : vector<2x256xf32> to vector<2x128xf32>
    %823 = arith.addf %822, %819 : vector<2x128xf32>
    %824 = vector.extract_strided_slice %821 {offsets = [0, 128], sizes = [2, 128], strides = [1, 1]} : vector<2x256xf32> to vector<2x128xf32>
    %825 = arith.addf %824, %820 : vector<2x128xf32>
    %cst_180 = arith.constant 2.000000e+00 : f32
    %826 = vector.broadcast %cst_180 : f32 to vector<2x128xf32>
    %827 = arith.mulf %826, %823 : vector<2x128xf32>
    %828 = vector.shape_cast %5 : vector<1x128xi1> to vector<1x128xi1>
    %829 = vector.broadcast %828 : vector<1x128xi1> to vector<2x128xi1>
    %830 = arith.select %829, %827, %823 : vector<2x128xi1>, vector<2x128xf32>
    %831 = arith.negf %830 : vector<2x128xf32>
    %832 = math.exp %831 : vector<2x128xf32>
    %cst_181 = arith.constant 1.000000e+00 : f32
    %833 = vector.broadcast %cst_181 : f32 to vector<2x128xf32>
    %834 = arith.addf %833, %832 : vector<2x128xf32>
    %835 = arith.divf %833, %834 : vector<2x128xf32>
    %cst_182 = arith.constant 2.000000e+00 : f32
    %836 = vector.broadcast %cst_182 : f32 to vector<2x128xf32>
    %837 = arith.mulf %836, %835 : vector<2x128xf32>
    %cst_183 = arith.constant 1.000000e+00 : f32
    %838 = vector.broadcast %cst_183 : f32 to vector<2x128xf32>
    %839 = arith.subf %837, %838 : vector<2x128xf32>
    %840 = vector.shape_cast %5 : vector<1x128xi1> to vector<1x128xi1>
    %841 = vector.broadcast %840 : vector<1x128xi1> to vector<2x128xi1>
    %842 = arith.select %841, %839, %835 : vector<2x128xi1>, vector<2x128xf32>
    %843 = vector.extract_strided_slice %842 {offsets = [0, 0], sizes = [2, 32], strides = [1, 1]} : vector<2x128xf32> to vector<2x32xf32>
    %844 = vector.extract_strided_slice %842 {offsets = [0, 32], sizes = [2, 32], strides = [1, 1]} : vector<2x128xf32> to vector<2x32xf32>
    %845 = vector.extract_strided_slice %842 {offsets = [0, 64], sizes = [2, 32], strides = [1, 1]} : vector<2x128xf32> to vector<2x32xf32>
    %846 = vector.extract_strided_slice %842 {offsets = [0, 96], sizes = [2, 32], strides = [1, 1]} : vector<2x128xf32> to vector<2x32xf32>
    %847 = arith.mulf %844, %787 : vector<2x32xf32>
    %848 = arith.mulf %843, %845 : vector<2x32xf32>
    %849 = arith.addf %847, %848 : vector<2x32xf32>
    %850 = math.tanh %849 : vector<2x32xf32>
    %851 = arith.mulf %846, %850 : vector<2x32xf32>
    %cst_184 = arith.constant 2.000000e+00 : f32
    %852 = vector.broadcast %cst_184 : f32 to vector<2x128xf32>
    %853 = arith.mulf %852, %825 : vector<2x128xf32>
    %854 = vector.shape_cast %5 : vector<1x128xi1> to vector<1x128xi1>
    %855 = vector.broadcast %854 : vector<1x128xi1> to vector<2x128xi1>
    %856 = arith.select %855, %853, %825 : vector<2x128xi1>, vector<2x128xf32>
    %857 = arith.negf %856 : vector<2x128xf32>
    %858 = math.exp %857 : vector<2x128xf32>
    %cst_185 = arith.constant 1.000000e+00 : f32
    %859 = vector.broadcast %cst_185 : f32 to vector<2x128xf32>
    %860 = arith.addf %859, %858 : vector<2x128xf32>
    %861 = arith.divf %859, %860 : vector<2x128xf32>
    %cst_186 = arith.constant 2.000000e+00 : f32
    %862 = vector.broadcast %cst_186 : f32 to vector<2x128xf32>
    %863 = arith.mulf %862, %861 : vector<2x128xf32>
    %cst_187 = arith.constant 1.000000e+00 : f32
    %864 = vector.broadcast %cst_187 : f32 to vector<2x128xf32>
    %865 = arith.subf %863, %864 : vector<2x128xf32>
    %866 = vector.shape_cast %5 : vector<1x128xi1> to vector<1x128xi1>
    %867 = vector.broadcast %866 : vector<1x128xi1> to vector<2x128xi1>
    %868 = arith.select %867, %865, %861 : vector<2x128xi1>, vector<2x128xf32>
    %869 = vector.extract_strided_slice %868 {offsets = [0, 0], sizes = [2, 32], strides = [1, 1]} : vector<2x128xf32> to vector<2x32xf32>
    %870 = vector.extract_strided_slice %868 {offsets = [0, 32], sizes = [2, 32], strides = [1, 1]} : vector<2x128xf32> to vector<2x32xf32>
    %871 = vector.extract_strided_slice %868 {offsets = [0, 64], sizes = [2, 32], strides = [1, 1]} : vector<2x128xf32> to vector<2x32xf32>
    %872 = vector.extract_strided_slice %868 {offsets = [0, 96], sizes = [2, 32], strides = [1, 1]} : vector<2x128xf32> to vector<2x32xf32>
    %873 = arith.mulf %870, %813 : vector<2x32xf32>
    %874 = arith.mulf %869, %871 : vector<2x32xf32>
    %875 = arith.addf %873, %874 : vector<2x32xf32>
    %876 = math.tanh %875 : vector<2x32xf32>
    %877 = arith.mulf %872, %876 : vector<2x32xf32>
    %c10_188 = arith.constant 10 : index
    %c0_189 = arith.constant 0 : index
    %878 = vector.load %arg17[%c10_188, %c0_189] : memref<16x64xf32, #tpu.memory_space<vmem>>, vector<2x32xf32>
    tpu.vector_store %arg17[%c10_188, %c0_189], %851 {strides = array<i32>} : memref<16x64xf32, #tpu.memory_space<vmem>>, vector<2x32xf32>,
    %c4_190 = arith.constant 4 : index
    %c32_191 = arith.constant 32 : index
    %879 = vector.load %arg17[%c4_190, %c32_191] : memref<16x64xf32, #tpu.memory_space<vmem>>, vector<2x32xf32>
    tpu.vector_store %arg17[%c4_190, %c32_191], %877 {strides = array<i32>} : memref<16x64xf32, #tpu.memory_space<vmem>>, vector<2x32xf32>,
    %880 = tpu.concatenate %851, %877 in 1 : vector<2x32xf32>, vector<2x32xf32> -> vector<2x64xf32>
    %881 = vector.extract_strided_slice %511 {offsets = [12, 0], sizes = [2, 128], strides = [1, 1]} : vector<16x256xf32> to vector<2x128xf32>
    %882 = vector.extract_strided_slice %511 {offsets = [2, 128], sizes = [2, 128], strides = [1, 1]} : vector<16x256xf32> to vector<2x128xf32>
    %cst_192 = arith.constant dense<0.000000e+00> : vector<2x256xf32>
    %883 = tpu.matmul %880, %507, %cst_192 {dimension_numbers = #tpu.dot_dimension_numbers<[1], [0], [0], [1], [0, 0, 1, 1], [], []>} : vector<2x64xf32>, vector<64x256xf32>, vector<2x256xf32> -> vector<2x256xf32>
    %884 = vector.extract_strided_slice %883 {offsets = [0, 0], sizes = [2, 128], strides = [1, 1]} : vector<2x256xf32> to vector<2x128xf32>
    %885 = arith.addf %884, %881 : vector<2x128xf32>
    %886 = vector.extract_strided_slice %883 {offsets = [0, 128], sizes = [2, 128], strides = [1, 1]} : vector<2x256xf32> to vector<2x128xf32>
    %887 = arith.addf %886, %882 : vector<2x128xf32>
    %cst_193 = arith.constant 2.000000e+00 : f32
    %888 = vector.broadcast %cst_193 : f32 to vector<2x128xf32>
    %889 = arith.mulf %888, %885 : vector<2x128xf32>
    %890 = vector.shape_cast %5 : vector<1x128xi1> to vector<1x128xi1>
    %891 = vector.broadcast %890 : vector<1x128xi1> to vector<2x128xi1>
    %892 = arith.select %891, %889, %885 : vector<2x128xi1>, vector<2x128xf32>
    %893 = arith.negf %892 : vector<2x128xf32>
    %894 = math.exp %893 : vector<2x128xf32>
    %cst_194 = arith.constant 1.000000e+00 : f32
    %895 = vector.broadcast %cst_194 : f32 to vector<2x128xf32>
    %896 = arith.addf %895, %894 : vector<2x128xf32>
    %897 = arith.divf %895, %896 : vector<2x128xf32>
    %cst_195 = arith.constant 2.000000e+00 : f32
    %898 = vector.broadcast %cst_195 : f32 to vector<2x128xf32>
    %899 = arith.mulf %898, %897 : vector<2x128xf32>
    %cst_196 = arith.constant 1.000000e+00 : f32
    %900 = vector.broadcast %cst_196 : f32 to vector<2x128xf32>
    %901 = arith.subf %899, %900 : vector<2x128xf32>
    %902 = vector.shape_cast %5 : vector<1x128xi1> to vector<1x128xi1>
    %903 = vector.broadcast %902 : vector<1x128xi1> to vector<2x128xi1>
    %904 = arith.select %903, %901, %897 : vector<2x128xi1>, vector<2x128xf32>
    %905 = vector.extract_strided_slice %904 {offsets = [0, 0], sizes = [2, 32], strides = [1, 1]} : vector<2x128xf32> to vector<2x32xf32>
    %906 = vector.extract_strided_slice %904 {offsets = [0, 32], sizes = [2, 32], strides = [1, 1]} : vector<2x128xf32> to vector<2x32xf32>
    %907 = vector.extract_strided_slice %904 {offsets = [0, 64], sizes = [2, 32], strides = [1, 1]} : vector<2x128xf32> to vector<2x32xf32>
    %908 = vector.extract_strided_slice %904 {offsets = [0, 96], sizes = [2, 32], strides = [1, 1]} : vector<2x128xf32> to vector<2x32xf32>
    %909 = arith.mulf %906, %849 : vector<2x32xf32>
    %910 = arith.mulf %905, %907 : vector<2x32xf32>
    %911 = arith.addf %909, %910 : vector<2x32xf32>
    %912 = math.tanh %911 : vector<2x32xf32>
    %913 = arith.mulf %908, %912 : vector<2x32xf32>
    %cst_197 = arith.constant 2.000000e+00 : f32
    %914 = vector.broadcast %cst_197 : f32 to vector<2x128xf32>
    %915 = arith.mulf %914, %887 : vector<2x128xf32>
    %916 = vector.shape_cast %5 : vector<1x128xi1> to vector<1x128xi1>
    %917 = vector.broadcast %916 : vector<1x128xi1> to vector<2x128xi1>
    %918 = arith.select %917, %915, %887 : vector<2x128xi1>, vector<2x128xf32>
    %919 = arith.negf %918 : vector<2x128xf32>
    %920 = math.exp %919 : vector<2x128xf32>
    %cst_198 = arith.constant 1.000000e+00 : f32
    %921 = vector.broadcast %cst_198 : f32 to vector<2x128xf32>
    %922 = arith.addf %921, %920 : vector<2x128xf32>
    %923 = arith.divf %921, %922 : vector<2x128xf32>
    %cst_199 = arith.constant 2.000000e+00 : f32
    %924 = vector.broadcast %cst_199 : f32 to vector<2x128xf32>
    %925 = arith.mulf %924, %923 : vector<2x128xf32>
    %cst_200 = arith.constant 1.000000e+00 : f32
    %926 = vector.broadcast %cst_200 : f32 to vector<2x128xf32>
    %927 = arith.subf %925, %926 : vector<2x128xf32>
    %928 = vector.shape_cast %5 : vector<1x128xi1> to vector<1x128xi1>
    %929 = vector.broadcast %928 : vector<1x128xi1> to vector<2x128xi1>
    %930 = arith.select %929, %927, %923 : vector<2x128xi1>, vector<2x128xf32>
    %931 = vector.extract_strided_slice %930 {offsets = [0, 0], sizes = [2, 32], strides = [1, 1]} : vector<2x128xf32> to vector<2x32xf32>
    %932 = vector.extract_strided_slice %930 {offsets = [0, 32], sizes = [2, 32], strides = [1, 1]} : vector<2x128xf32> to vector<2x32xf32>
    %933 = vector.extract_strided_slice %930 {offsets = [0, 64], sizes = [2, 32], strides = [1, 1]} : vector<2x128xf32> to vector<2x32xf32>
    %934 = vector.extract_strided_slice %930 {offsets = [0, 96], sizes = [2, 32], strides = [1, 1]} : vector<2x128xf32> to vector<2x32xf32>
    %935 = arith.mulf %932, %875 : vector<2x32xf32>
    %936 = arith.mulf %931, %933 : vector<2x32xf32>
    %937 = arith.addf %935, %936 : vector<2x32xf32>
    %938 = math.tanh %937 : vector<2x32xf32>
    %939 = arith.mulf %934, %938 : vector<2x32xf32>
    %c12_201 = arith.constant 12 : index
    %c0_202 = arith.constant 0 : index
    %940 = vector.load %arg17[%c12_201, %c0_202] : memref<16x64xf32, #tpu.memory_space<vmem>>, vector<2x32xf32>
    tpu.vector_store %arg17[%c12_201, %c0_202], %913 {strides = array<i32>} : memref<16x64xf32, #tpu.memory_space<vmem>>, vector<2x32xf32>,
    %c2_203 = arith.constant 2 : index
    %c32_204 = arith.constant 32 : index
    %941 = vector.load %arg17[%c2_203, %c32_204] : memref<16x64xf32, #tpu.memory_space<vmem>>, vector<2x32xf32>
    tpu.vector_store %arg17[%c2_203, %c32_204], %939 {strides = array<i32>} : memref<16x64xf32, #tpu.memory_space<vmem>>, vector<2x32xf32>,
    %942 = tpu.concatenate %913, %939 in 1 : vector<2x32xf32>, vector<2x32xf32> -> vector<2x64xf32>
    %943 = vector.extract_strided_slice %511 {offsets = [14, 0], sizes = [2, 128], strides = [1, 1]} : vector<16x256xf32> to vector<2x128xf32>
    %944 = vector.extract_strided_slice %511 {offsets = [0, 128], sizes = [2, 128], strides = [1, 1]} : vector<16x256xf32> to vector<2x128xf32>
    %cst_205 = arith.constant dense<0.000000e+00> : vector<2x256xf32>
    %945 = tpu.matmul %942, %507, %cst_205 {dimension_numbers = #tpu.dot_dimension_numbers<[1], [0], [0], [1], [0, 0, 1, 1], [], []>} : vector<2x64xf32>, vector<64x256xf32>, vector<2x256xf32> -> vector<2x256xf32>
    %946 = vector.extract_strided_slice %945 {offsets = [0, 0], sizes = [2, 128], strides = [1, 1]} : vector<2x256xf32> to vector<2x128xf32>
    %947 = arith.addf %946, %943 : vector<2x128xf32>
    %948 = vector.extract_strided_slice %945 {offsets = [0, 128], sizes = [2, 128], strides = [1, 1]} : vector<2x256xf32> to vector<2x128xf32>
    %949 = arith.addf %948, %944 : vector<2x128xf32>
    %cst_206 = arith.constant 2.000000e+00 : f32
    %950 = vector.broadcast %cst_206 : f32 to vector<2x128xf32>
    %951 = arith.mulf %950, %947 : vector<2x128xf32>
    %952 = vector.shape_cast %5 : vector<1x128xi1> to vector<1x128xi1>
    %953 = vector.broadcast %952 : vector<1x128xi1> to vector<2x128xi1>
    %954 = arith.select %953, %951, %947 : vector<2x128xi1>, vector<2x128xf32>
    %955 = arith.negf %954 : vector<2x128xf32>
    %956 = math.exp %955 : vector<2x128xf32>
    %cst_207 = arith.constant 1.000000e+00 : f32
    %957 = vector.broadcast %cst_207 : f32 to vector<2x128xf32>
    %958 = arith.addf %957, %956 : vector<2x128xf32>
    %959 = arith.divf %957, %958 : vector<2x128xf32>
    %cst_208 = arith.constant 2.000000e+00 : f32
    %960 = vector.broadcast %cst_208 : f32 to vector<2x128xf32>
    %961 = arith.mulf %960, %959 : vector<2x128xf32>
    %cst_209 = arith.constant 1.000000e+00 : f32
    %962 = vector.broadcast %cst_209 : f32 to vector<2x128xf32>
    %963 = arith.subf %961, %962 : vector<2x128xf32>
    %964 = vector.shape_cast %5 : vector<1x128xi1> to vector<1x128xi1>
    %965 = vector.broadcast %964 : vector<1x128xi1> to vector<2x128xi1>
    %966 = arith.select %965, %963, %959 : vector<2x128xi1>, vector<2x128xf32>
    %967 = vector.extract_strided_slice %966 {offsets = [0, 0], sizes = [2, 32], strides = [1, 1]} : vector<2x128xf32> to vector<2x32xf32>
    %968 = vector.extract_strided_slice %966 {offsets = [0, 32], sizes = [2, 32], strides = [1, 1]} : vector<2x128xf32> to vector<2x32xf32>
    %969 = vector.extract_strided_slice %966 {offsets = [0, 64], sizes = [2, 32], strides = [1, 1]} : vector<2x128xf32> to vector<2x32xf32>
    %970 = vector.extract_strided_slice %966 {offsets = [0, 96], sizes = [2, 32], strides = [1, 1]} : vector<2x128xf32> to vector<2x32xf32>
    %971 = arith.mulf %968, %911 : vector<2x32xf32>
    %972 = arith.mulf %967, %969 : vector<2x32xf32>
    %973 = arith.addf %971, %972 : vector<2x32xf32>
    %974 = math.tanh %973 : vector<2x32xf32>
    %975 = arith.mulf %970, %974 : vector<2x32xf32>
    %cst_210 = arith.constant 2.000000e+00 : f32
    %976 = vector.broadcast %cst_210 : f32 to vector<2x128xf32>
    %977 = arith.mulf %976, %949 : vector<2x128xf32>
    %978 = vector.shape_cast %5 : vector<1x128xi1> to vector<1x128xi1>
    %979 = vector.broadcast %978 : vector<1x128xi1> to vector<2x128xi1>
    %980 = arith.select %979, %977, %949 : vector<2x128xi1>, vector<2x128xf32>
    %981 = arith.negf %980 : vector<2x128xf32>
    %982 = math.exp %981 : vector<2x128xf32>
    %cst_211 = arith.constant 1.000000e+00 : f32
    %983 = vector.broadcast %cst_211 : f32 to vector<2x128xf32>
    %984 = arith.addf %983, %982 : vector<2x128xf32>
    %985 = arith.divf %983, %984 : vector<2x128xf32>
    %cst_212 = arith.constant 2.000000e+00 : f32
    %986 = vector.broadcast %cst_212 : f32 to vector<2x128xf32>
    %987 = arith.mulf %986, %985 : vector<2x128xf32>
    %cst_213 = arith.constant 1.000000e+00 : f32
    %988 = vector.broadcast %cst_213 : f32 to vector<2x128xf32>
    %989 = arith.subf %987, %988 : vector<2x128xf32>
    %990 = vector.shape_cast %5 : vector<1x128xi1> to vector<1x128xi1>
    %991 = vector.broadcast %990 : vector<1x128xi1> to vector<2x128xi1>
    %992 = arith.select %991, %989, %985 : vector<2x128xi1>, vector<2x128xf32>
    %993 = vector.extract_strided_slice %992 {offsets = [0, 0], sizes = [2, 32], strides = [1, 1]} : vector<2x128xf32> to vector<2x32xf32>
    %994 = vector.extract_strided_slice %992 {offsets = [0, 32], sizes = [2, 32], strides = [1, 1]} : vector<2x128xf32> to vector<2x32xf32>
    %995 = vector.extract_strided_slice %992 {offsets = [0, 64], sizes = [2, 32], strides = [1, 1]} : vector<2x128xf32> to vector<2x32xf32>
    %996 = vector.extract_strided_slice %992 {offsets = [0, 96], sizes = [2, 32], strides = [1, 1]} : vector<2x128xf32> to vector<2x32xf32>
    %997 = arith.mulf %994, %937 : vector<2x32xf32>
    %998 = arith.mulf %993, %995 : vector<2x32xf32>
    %999 = arith.addf %997, %998 : vector<2x32xf32>
    %1000 = math.tanh %999 : vector<2x32xf32>
    %1001 = arith.mulf %996, %1000 : vector<2x32xf32>
    %c14_214 = arith.constant 14 : index
    %c0_215 = arith.constant 0 : index
    %1002 = vector.load %arg17[%c14_214, %c0_215] : memref<16x64xf32, #tpu.memory_space<vmem>>, vector<2x32xf32>
    tpu.vector_store %arg17[%c14_214, %c0_215], %975 {strides = array<i32>} : memref<16x64xf32, #tpu.memory_space<vmem>>, vector<2x32xf32>,
    %c0_216 = arith.constant 0 : index
    %c32_217 = arith.constant 32 : index
    %1003 = vector.load %arg17[%c0_216, %c32_217] : memref<16x64xf32, #tpu.memory_space<vmem>>, vector<2x32xf32>
    tpu.vector_store %arg17[%c0_216, %c32_217], %1001 {strides = array<i32>} : memref<16x64xf32, #tpu.memory_space<vmem>>, vector<2x32xf32>,
    %c0_218 = arith.constant 0 : index
    %c0_219 = arith.constant 0 : index
    %1004 = vector.load %arg17[%c0_218, %c0_219] : memref<16x64xf32, #tpu.memory_space<vmem>>, vector<16x64xf32>
    %c0_220 = arith.constant 0 : index
    %c0_221 = arith.constant 0 : index
    %1005 = vector.load %arg1[%c0_220, %c0_221] : memref<2x8xf32, #tpu.memory_space<vmem>>, vector<2x8xf32>
    %cst_222 = arith.constant 5.000000e-01 : f32
    %1006 = vector.broadcast %cst_222 : f32 to vector<2x8xf32>
    %1007 = arith.cmpf ogt, %1005, %1006 : vector<2x8xf32>
    %cst_223 = arith.constant -1.000000e+30 : f32
    %cst_224 = arith.constant 0.000000e+00 : f32
    %1008 = vector.broadcast %cst_223 : f32 to vector<2x8xf32>
    %1009 = vector.broadcast %cst_224 : f32 to vector<2x8xf32>
    %1010 = arith.select %1007, %1008, %1009 : vector<2x8xi1>, vector<2x8xf32>
    %c0_225 = arith.constant 0 : index
    %c0_226 = arith.constant 0 : index
    %1011 = vector.load %arg8[%c0_225, %c0_226] : memref<64x32xf32, #tpu.memory_space<vmem>>, vector<64x32xf32>
    %cst_227 = arith.constant dense<0.000000e+00> : vector<16x32xf32>
    %1012 = tpu.matmul %1004, %1011, %cst_227 {dimension_numbers = #tpu.dot_dimension_numbers<[1], [0], [0], [1], [0, 0, 1, 1], [], []>} : vector<16x64xf32>, vector<64x32xf32>, vector<16x32xf32> -> vector<16x32xf32>
    %c0_228 = arith.constant 0 : index
    %c0_229 = arith.constant 0 : index
    %1013 = vector.load %arg9[%c0_228, %c0_229] : memref<64x128xf32, #tpu.memory_space<vmem>>, vector<64x128xf32>
    %cst_230 = arith.constant dense<0.000000e+00> : vector<16x128xf32>
    %1014 = tpu.matmul %1004, %1013, %cst_230 {dimension_numbers = #tpu.dot_dimension_numbers<[1], [0], [0], [1], [0, 0, 1, 1], [], []>} : vector<16x64xf32>, vector<64x128xf32>, vector<16x128xf32> -> vector<16x128xf32>
    %c0_231 = arith.constant 0 : index
    %c0_232 = arith.constant 0 : index
    %1015 = vector.load %arg10[%c0_231, %c0_232] : memref<32x128xf32, #tpu.memory_space<vmem>>, vector<32x128xf32>
    %c0_233 = arith.constant 0 : index
    %c0_234 = arith.constant 0 : index
    %1016 = vector.load %arg11[%c0_233, %c0_234] : memref<1x128xf32, #tpu.memory_space<vmem>>, vector<1x128xf32>
    %c0_235 = arith.constant 0 : index
    %c0_236 = arith.constant 0 : index
    %1017 = vector.load %arg12[%c0_235, %c0_236] : memref<64x128xf32, #tpu.memory_space<vmem>>, vector<64x128xf32>
    %c0_237 = arith.constant 0 : index
    %c0_238 = arith.constant 0 : index
    %1018 = vector.load %arg13[%c0_237, %c0_238] : memref<1x128xf32, #tpu.memory_space<vmem>>, vector<1x128xf32>
    %cst_239 = arith.constant 0.000000e+00 : f32
    %1019 = vector.broadcast %cst_239 : f32 to vector<2x32xf32>
    %cst_240 = arith.constant 0.000000e+00 : f32
    %1020 = vector.broadcast %cst_240 : f32 to vector<2x32xf32>
    %cst_241 = arith.constant 0.000000e+00 : f32
    %1021 = vector.broadcast %cst_241 : f32 to vector<2x32xf32>
    %cst_242 = arith.constant 0.000000e+00 : f32
    %1022 = vector.broadcast %cst_242 : f32 to vector<2x32xf32>
    %1023 = vector.extract_strided_slice %1012 {offsets = [0, 0], sizes = [2, 32], strides = [1, 1]} : vector<16x32xf32> to vector<2x32xf32>
    %1024 = arith.mulf %1023, %1020 : vector<2x32xf32>
    %cst_243 = arith.constant dense<0.000000e+00> : vector<2xf32>
    %1025 = vector.multi_reduction <add>, %1024, %cst_243 [1] : vector<2x32xf32> to vector<2xf32>
    %1026 = vector.shape_cast %1025 : vector<2xf32> to vector<2x1xf32>
    %1027 = vector.extract_strided_slice %1010 {offsets = [0, 0], sizes = [2, 1], strides = [1, 1]} : vector<2x8xf32> to vector<2x1xf32>
    %1028 = arith.addf %1026, %1027 : vector<2x1xf32>
    %1029 = vector.extract_strided_slice %1012 {offsets = [2, 0], sizes = [2, 32], strides = [1, 1]} : vector<16x32xf32> to vector<2x32xf32>
    %1030 = arith.mulf %1029, %1020 : vector<2x32xf32>
    %cst_244 = arith.constant dense<0.000000e+00> : vector<2xf32>
    %1031 = vector.multi_reduction <add>, %1030, %cst_244 [1] : vector<2x32xf32> to vector<2xf32>
    %1032 = vector.shape_cast %1031 : vector<2xf32> to vector<2x1xf32>
    %1033 = vector.extract_strided_slice %1010 {offsets = [0, 1], sizes = [2, 1], strides = [1, 1]} : vector<2x8xf32> to vector<2x1xf32>
    %1034 = arith.addf %1032, %1033 : vector<2x1xf32>
    %1035 = vector.extract_strided_slice %1012 {offsets = [4, 0], sizes = [2, 32], strides = [1, 1]} : vector<16x32xf32> to vector<2x32xf32>
    %1036 = arith.mulf %1035, %1020 : vector<2x32xf32>
    %cst_245 = arith.constant dense<0.000000e+00> : vector<2xf32>
    %1037 = vector.multi_reduction <add>, %1036, %cst_245 [1] : vector<2x32xf32> to vector<2xf32>
    %1038 = vector.shape_cast %1037 : vector<2xf32> to vector<2x1xf32>
    %1039 = vector.extract_strided_slice %1010 {offsets = [0, 2], sizes = [2, 1], strides = [1, 1]} : vector<2x8xf32> to vector<2x1xf32>
    %1040 = arith.addf %1038, %1039 : vector<2x1xf32>
    %1041 = vector.extract_strided_slice %1012 {offsets = [6, 0], sizes = [2, 32], strides = [1, 1]} : vector<16x32xf32> to vector<2x32xf32>
    %1042 = arith.mulf %1041, %1020 : vector<2x32xf32>
    %cst_246 = arith.constant dense<0.000000e+00> : vector<2xf32>
    %1043 = vector.multi_reduction <add>, %1042, %cst_246 [1] : vector<2x32xf32> to vector<2xf32>
    %1044 = vector.shape_cast %1043 : vector<2xf32> to vector<2x1xf32>
    %1045 = vector.extract_strided_slice %1010 {offsets = [0, 3], sizes = [2, 1], strides = [1, 1]} : vector<2x8xf32> to vector<2x1xf32>
    %1046 = arith.addf %1044, %1045 : vector<2x1xf32>
    %1047 = vector.extract_strided_slice %1012 {offsets = [8, 0], sizes = [2, 32], strides = [1, 1]} : vector<16x32xf32> to vector<2x32xf32>
    %1048 = arith.mulf %1047, %1020 : vector<2x32xf32>
    %cst_247 = arith.constant dense<0.000000e+00> : vector<2xf32>
    %1049 = vector.multi_reduction <add>, %1048, %cst_247 [1] : vector<2x32xf32> to vector<2xf32>
    %1050 = vector.shape_cast %1049 : vector<2xf32> to vector<2x1xf32>
    %1051 = vector.extract_strided_slice %1010 {offsets = [0, 4], sizes = [2, 1], strides = [1, 1]} : vector<2x8xf32> to vector<2x1xf32>
    %1052 = arith.addf %1050, %1051 : vector<2x1xf32>
    %1053 = vector.extract_strided_slice %1012 {offsets = [10, 0], sizes = [2, 32], strides = [1, 1]} : vector<16x32xf32> to vector<2x32xf32>
    %1054 = arith.mulf %1053, %1020 : vector<2x32xf32>
    %cst_248 = arith.constant dense<0.000000e+00> : vector<2xf32>
    %1055 = vector.multi_reduction <add>, %1054, %cst_248 [1] : vector<2x32xf32> to vector<2xf32>
    %1056 = vector.shape_cast %1055 : vector<2xf32> to vector<2x1xf32>
    %1057 = vector.extract_strided_slice %1010 {offsets = [0, 5], sizes = [2, 1], strides = [1, 1]} : vector<2x8xf32> to vector<2x1xf32>
    %1058 = arith.addf %1056, %1057 : vector<2x1xf32>
    %1059 = vector.extract_strided_slice %1012 {offsets = [12, 0], sizes = [2, 32], strides = [1, 1]} : vector<16x32xf32> to vector<2x32xf32>
    %1060 = arith.mulf %1059, %1020 : vector<2x32xf32>
    %cst_249 = arith.constant dense<0.000000e+00> : vector<2xf32>
    %1061 = vector.multi_reduction <add>, %1060, %cst_249 [1] : vector<2x32xf32> to vector<2xf32>
    %1062 = vector.shape_cast %1061 : vector<2xf32> to vector<2x1xf32>
    %1063 = vector.extract_strided_slice %1010 {offsets = [0, 6], sizes = [2, 1], strides = [1, 1]} : vector<2x8xf32> to vector<2x1xf32>
    %1064 = arith.addf %1062, %1063 : vector<2x1xf32>
    %1065 = vector.extract_strided_slice %1012 {offsets = [14, 0], sizes = [2, 32], strides = [1, 1]} : vector<16x32xf32> to vector<2x32xf32>
    %1066 = arith.mulf %1065, %1020 : vector<2x32xf32>
    %cst_250 = arith.constant dense<0.000000e+00> : vector<2xf32>
    %1067 = vector.multi_reduction <add>, %1066, %cst_250 [1] : vector<2x32xf32> to vector<2xf32>
    %1068 = vector.shape_cast %1067 : vector<2xf32> to vector<2x1xf32>
    %1069 = vector.extract_strided_slice %1010 {offsets = [0, 7], sizes = [2, 1], strides = [1, 1]} : vector<2x8xf32> to vector<2x1xf32>
    %1070 = arith.addf %1068, %1069 : vector<2x1xf32>
    %1071 = arith.maximumf %1028, %1034 : vector<2x1xf32>
    %1072 = arith.maximumf %1071, %1040 : vector<2x1xf32>
    %1073 = arith.maximumf %1072, %1046 : vector<2x1xf32>
    %1074 = arith.maximumf %1073, %1052 : vector<2x1xf32>
    %1075 = arith.maximumf %1074, %1058 : vector<2x1xf32>
    %1076 = arith.maximumf %1075, %1064 : vector<2x1xf32>
    %1077 = arith.maximumf %1076, %1070 : vector<2x1xf32>
    %1078 = arith.subf %1028, %1077 : vector<2x1xf32>
    %1079 = math.exp %1078 : vector<2x1xf32>
    %1080 = arith.subf %1034, %1077 : vector<2x1xf32>
    %1081 = math.exp %1080 : vector<2x1xf32>
    %1082 = arith.subf %1040, %1077 : vector<2x1xf32>
    %1083 = math.exp %1082 : vector<2x1xf32>
    %1084 = arith.subf %1046, %1077 : vector<2x1xf32>
    %1085 = math.exp %1084 : vector<2x1xf32>
    %1086 = arith.subf %1052, %1077 : vector<2x1xf32>
    %1087 = math.exp %1086 : vector<2x1xf32>
    %1088 = arith.subf %1058, %1077 : vector<2x1xf32>
    %1089 = math.exp %1088 : vector<2x1xf32>
    %1090 = arith.subf %1064, %1077 : vector<2x1xf32>
    %1091 = math.exp %1090 : vector<2x1xf32>
    %1092 = arith.subf %1070, %1077 : vector<2x1xf32>
    %1093 = math.exp %1092 : vector<2x1xf32>
    %1094 = arith.addf %1079, %1081 : vector<2x1xf32>
    %1095 = arith.addf %1094, %1083 : vector<2x1xf32>
    %1096 = arith.addf %1095, %1085 : vector<2x1xf32>
    %1097 = arith.addf %1096, %1087 : vector<2x1xf32>
    %1098 = arith.addf %1097, %1089 : vector<2x1xf32>
    %1099 = arith.addf %1098, %1091 : vector<2x1xf32>
    %1100 = arith.addf %1099, %1093 : vector<2x1xf32>
    %1101 = tpu.reciprocal %1100 {approx = true} : vector<2x1xf32> -> vector<2x1xf32>
    %1102 = arith.mulf %1079, %1101 : vector<2x1xf32>
    %1103 = vector.extract_strided_slice %1014 {offsets = [0, 0], sizes = [2, 128], strides = [1, 1]} : vector<16x128xf32> to vector<2x128xf32>
    %1104 = vector.broadcast %1102 : vector<2x1xf32> to vector<2x128xf32>
    %1105 = arith.mulf %1104, %1103 : vector<2x128xf32>
    %1106 = arith.mulf %1081, %1101 : vector<2x1xf32>
    %1107 = vector.extract_strided_slice %1014 {offsets = [2, 0], sizes = [2, 128], strides = [1, 1]} : vector<16x128xf32> to vector<2x128xf32>
    %1108 = vector.broadcast %1106 : vector<2x1xf32> to vector<2x128xf32>
    %1109 = arith.mulf %1108, %1107 : vector<2x128xf32>
    %1110 = arith.addf %1105, %1109 : vector<2x128xf32>
    %1111 = arith.mulf %1083, %1101 : vector<2x1xf32>
    %1112 = vector.extract_strided_slice %1014 {offsets = [4, 0], sizes = [2, 128], strides = [1, 1]} : vector<16x128xf32> to vector<2x128xf32>
    %1113 = vector.broadcast %1111 : vector<2x1xf32> to vector<2x128xf32>
    %1114 = arith.mulf %1113, %1112 : vector<2x128xf32>
    %1115 = arith.addf %1110, %1114 : vector<2x128xf32>
    %1116 = arith.mulf %1085, %1101 : vector<2x1xf32>
    %1117 = vector.extract_strided_slice %1014 {offsets = [6, 0], sizes = [2, 128], strides = [1, 1]} : vector<16x128xf32> to vector<2x128xf32>
    %1118 = vector.broadcast %1116 : vector<2x1xf32> to vector<2x128xf32>
    %1119 = arith.mulf %1118, %1117 : vector<2x128xf32>
    %1120 = arith.addf %1115, %1119 : vector<2x128xf32>
    %1121 = arith.mulf %1087, %1101 : vector<2x1xf32>
    %1122 = vector.extract_strided_slice %1014 {offsets = [8, 0], sizes = [2, 128], strides = [1, 1]} : vector<16x128xf32> to vector<2x128xf32>
    %1123 = vector.broadcast %1121 : vector<2x1xf32> to vector<2x128xf32>
    %1124 = arith.mulf %1123, %1122 : vector<2x128xf32>
    %1125 = arith.addf %1120, %1124 : vector<2x128xf32>
    %1126 = arith.mulf %1089, %1101 : vector<2x1xf32>
    %1127 = vector.extract_strided_slice %1014 {offsets = [10, 0], sizes = [2, 128], strides = [1, 1]} : vector<16x128xf32> to vector<2x128xf32>
    %1128 = vector.broadcast %1126 : vector<2x1xf32> to vector<2x128xf32>
    %1129 = arith.mulf %1128, %1127 : vector<2x128xf32>
    %1130 = arith.addf %1125, %1129 : vector<2x128xf32>
    %1131 = arith.mulf %1091, %1101 : vector<2x1xf32>
    %1132 = vector.extract_strided_slice %1014 {offsets = [12, 0], sizes = [2, 128], strides = [1, 1]} : vector<16x128xf32> to vector<2x128xf32>
    %1133 = vector.broadcast %1131 : vector<2x1xf32> to vector<2x128xf32>
    %1134 = arith.mulf %1133, %1132 : vector<2x128xf32>
    %1135 = arith.addf %1130, %1134 : vector<2x128xf32>
    %1136 = arith.mulf %1093, %1101 : vector<2x1xf32>
    %1137 = vector.extract_strided_slice %1014 {offsets = [14, 0], sizes = [2, 128], strides = [1, 1]} : vector<16x128xf32> to vector<2x128xf32>
    %1138 = vector.broadcast %1136 : vector<2x1xf32> to vector<2x128xf32>
    %1139 = arith.mulf %1138, %1137 : vector<2x128xf32>
    %1140 = arith.addf %1135, %1139 : vector<2x128xf32>
    %cst_251 = arith.constant dense<0.000000e+00> : vector<2x128xf32>
    %1141 = tpu.matmul %1019, %1015, %cst_251 {dimension_numbers = #tpu.dot_dimension_numbers<[1], [0], [0], [1], [0, 0, 1, 1], [], []>} : vector<2x32xf32>, vector<32x128xf32>, vector<2x128xf32> -> vector<2x128xf32>
    %1142 = arith.addf %1140, %1141 : vector<2x128xf32>
    %1143 = vector.broadcast %1016 : vector<1x128xf32> to vector<2x128xf32>
    %1144 = arith.addf %1142, %1143 : vector<2x128xf32>
    %cst_252 = arith.constant 2.000000e+00 : f32
    %1145 = vector.broadcast %cst_252 : f32 to vector<2x128xf32>
    %1146 = arith.mulf %1145, %1144 : vector<2x128xf32>
    %1147 = vector.shape_cast %5 : vector<1x128xi1> to vector<1x128xi1>
    %1148 = vector.broadcast %1147 : vector<1x128xi1> to vector<2x128xi1>
    %1149 = arith.select %1148, %1146, %1144 : vector<2x128xi1>, vector<2x128xf32>
    %1150 = arith.negf %1149 : vector<2x128xf32>
    %1151 = math.exp %1150 : vector<2x128xf32>
    %cst_253 = arith.constant 1.000000e+00 : f32
    %1152 = vector.broadcast %cst_253 : f32 to vector<2x128xf32>
    %1153 = arith.addf %1152, %1151 : vector<2x128xf32>
    %1154 = arith.divf %1152, %1153 : vector<2x128xf32>
    %cst_254 = arith.constant 2.000000e+00 : f32
    %1155 = vector.broadcast %cst_254 : f32 to vector<2x128xf32>
    %1156 = arith.mulf %1155, %1154 : vector<2x128xf32>
    %cst_255 = arith.constant 1.000000e+00 : f32
    %1157 = vector.broadcast %cst_255 : f32 to vector<2x128xf32>
    %1158 = arith.subf %1156, %1157 : vector<2x128xf32>
    %1159 = vector.shape_cast %5 : vector<1x128xi1> to vector<1x128xi1>
    %1160 = vector.broadcast %1159 : vector<1x128xi1> to vector<2x128xi1>
    %1161 = arith.select %1160, %1158, %1154 : vector<2x128xi1>, vector<2x128xf32>
    %1162 = vector.extract_strided_slice %1161 {offsets = [0, 0], sizes = [2, 32], strides = [1, 1]} : vector<2x128xf32> to vector<2x32xf32>
    %1163 = vector.extract_strided_slice %1161 {offsets = [0, 32], sizes = [2, 32], strides = [1, 1]} : vector<2x128xf32> to vector<2x32xf32>
    %1164 = vector.extract_strided_slice %1161 {offsets = [0, 64], sizes = [2, 32], strides = [1, 1]} : vector<2x128xf32> to vector<2x32xf32>
    %1165 = vector.extract_strided_slice %1161 {offsets = [0, 96], sizes = [2, 32], strides = [1, 1]} : vector<2x128xf32> to vector<2x32xf32>
    %1166 = arith.mulf %1163, %1021 : vector<2x32xf32>
    %1167 = arith.mulf %1162, %1164 : vector<2x32xf32>
    %1168 = arith.addf %1166, %1167 : vector<2x32xf32>
    %1169 = math.tanh %1168 : vector<2x32xf32>
    %1170 = arith.mulf %1165, %1169 : vector<2x32xf32>
    %1171 = tpu.concatenate %1170, %1020 in 1 : vector<2x32xf32>, vector<2x32xf32> -> vector<2x64xf32>
    %cst_256 = arith.constant dense<0.000000e+00> : vector<2x128xf32>
    %1172 = tpu.matmul %1171, %1017, %cst_256 {dimension_numbers = #tpu.dot_dimension_numbers<[1], [0], [0], [1], [0, 0, 1, 1], [], []>} : vector<2x64xf32>, vector<64x128xf32>, vector<2x128xf32> -> vector<2x128xf32>
    %1173 = vector.broadcast %1018 : vector<1x128xf32> to vector<2x128xf32>
    %1174 = arith.addf %1172, %1173 : vector<2x128xf32>
    %cst_257 = arith.constant 2.000000e+00 : f32
    %1175 = vector.broadcast %cst_257 : f32 to vector<2x128xf32>
    %1176 = arith.mulf %1175, %1174 : vector<2x128xf32>
    %1177 = vector.shape_cast %5 : vector<1x128xi1> to vector<1x128xi1>
    %1178 = vector.broadcast %1177 : vector<1x128xi1> to vector<2x128xi1>
    %1179 = arith.select %1178, %1176, %1174 : vector<2x128xi1>, vector<2x128xf32>
    %1180 = arith.negf %1179 : vector<2x128xf32>
    %1181 = math.exp %1180 : vector<2x128xf32>
    %cst_258 = arith.constant 1.000000e+00 : f32
    %1182 = vector.broadcast %cst_258 : f32 to vector<2x128xf32>
    %1183 = arith.addf %1182, %1181 : vector<2x128xf32>
    %1184 = arith.divf %1182, %1183 : vector<2x128xf32>
    %cst_259 = arith.constant 2.000000e+00 : f32
    %1185 = vector.broadcast %cst_259 : f32 to vector<2x128xf32>
    %1186 = arith.mulf %1185, %1184 : vector<2x128xf32>
    %cst_260 = arith.constant 1.000000e+00 : f32
    %1187 = vector.broadcast %cst_260 : f32 to vector<2x128xf32>
    %1188 = arith.subf %1186, %1187 : vector<2x128xf32>
    %1189 = vector.shape_cast %5 : vector<1x128xi1> to vector<1x128xi1>
    %1190 = vector.broadcast %1189 : vector<1x128xi1> to vector<2x128xi1>
    %1191 = arith.select %1190, %1188, %1184 : vector<2x128xi1>, vector<2x128xf32>
    %1192 = vector.extract_strided_slice %1191 {offsets = [0, 0], sizes = [2, 32], strides = [1, 1]} : vector<2x128xf32> to vector<2x32xf32>
    %1193 = vector.extract_strided_slice %1191 {offsets = [0, 32], sizes = [2, 32], strides = [1, 1]} : vector<2x128xf32> to vector<2x32xf32>
    %1194 = vector.extract_strided_slice %1191 {offsets = [0, 64], sizes = [2, 32], strides = [1, 1]} : vector<2x128xf32> to vector<2x32xf32>
    %1195 = vector.extract_strided_slice %1191 {offsets = [0, 96], sizes = [2, 32], strides = [1, 1]} : vector<2x128xf32> to vector<2x32xf32>
    %1196 = arith.mulf %1193, %1022 : vector<2x32xf32>
    %1197 = arith.mulf %1192, %1194 : vector<2x32xf32>
    %1198 = arith.addf %1196, %1197 : vector<2x32xf32>
    %1199 = math.tanh %1198 : vector<2x32xf32>
    %1200 = arith.mulf %1195, %1199 : vector<2x32xf32>
    %c0_261 = arith.constant 0 : index
    %c0_262 = arith.constant 0 : index
    %1201 = vector.load %arg18[%c0_261, %c0_262] : memref<12x32xf32, #tpu.memory_space<vmem>>, vector<2x32xf32>
    tpu.vector_store %arg18[%c0_261, %c0_262], %1200 {strides = array<i32>} : memref<12x32xf32, #tpu.memory_space<vmem>>, vector<2x32xf32>,
    %1202 = vector.extract_strided_slice %1012 {offsets = [0, 0], sizes = [2, 32], strides = [1, 1]} : vector<16x32xf32> to vector<2x32xf32>
    %1203 = arith.mulf %1202, %1200 : vector<2x32xf32>
    %cst_263 = arith.constant dense<0.000000e+00> : vector<2xf32>
    %1204 = vector.multi_reduction <add>, %1203, %cst_263 [1] : vector<2x32xf32> to vector<2xf32>
    %1205 = vector.shape_cast %1204 : vector<2xf32> to vector<2x1xf32>
    %1206 = vector.extract_strided_slice %1010 {offsets = [0, 0], sizes = [2, 1], strides = [1, 1]} : vector<2x8xf32> to vector<2x1xf32>
    %1207 = arith.addf %1205, %1206 : vector<2x1xf32>
    %1208 = vector.extract_strided_slice %1012 {offsets = [2, 0], sizes = [2, 32], strides = [1, 1]} : vector<16x32xf32> to vector<2x32xf32>
    %1209 = arith.mulf %1208, %1200 : vector<2x32xf32>
    %cst_264 = arith.constant dense<0.000000e+00> : vector<2xf32>
    %1210 = vector.multi_reduction <add>, %1209, %cst_264 [1] : vector<2x32xf32> to vector<2xf32>
    %1211 = vector.shape_cast %1210 : vector<2xf32> to vector<2x1xf32>
    %1212 = vector.extract_strided_slice %1010 {offsets = [0, 1], sizes = [2, 1], strides = [1, 1]} : vector<2x8xf32> to vector<2x1xf32>
    %1213 = arith.addf %1211, %1212 : vector<2x1xf32>
    %1214 = vector.extract_strided_slice %1012 {offsets = [4, 0], sizes = [2, 32], strides = [1, 1]} : vector<16x32xf32> to vector<2x32xf32>
    %1215 = arith.mulf %1214, %1200 : vector<2x32xf32>
    %cst_265 = arith.constant dense<0.000000e+00> : vector<2xf32>
    %1216 = vector.multi_reduction <add>, %1215, %cst_265 [1] : vector<2x32xf32> to vector<2xf32>
    %1217 = vector.shape_cast %1216 : vector<2xf32> to vector<2x1xf32>
    %1218 = vector.extract_strided_slice %1010 {offsets = [0, 2], sizes = [2, 1], strides = [1, 1]} : vector<2x8xf32> to vector<2x1xf32>
    %1219 = arith.addf %1217, %1218 : vector<2x1xf32>
    %1220 = vector.extract_strided_slice %1012 {offsets = [6, 0], sizes = [2, 32], strides = [1, 1]} : vector<16x32xf32> to vector<2x32xf32>
    %1221 = arith.mulf %1220, %1200 : vector<2x32xf32>
    %cst_266 = arith.constant dense<0.000000e+00> : vector<2xf32>
    %1222 = vector.multi_reduction <add>, %1221, %cst_266 [1] : vector<2x32xf32> to vector<2xf32>
    %1223 = vector.shape_cast %1222 : vector<2xf32> to vector<2x1xf32>
    %1224 = vector.extract_strided_slice %1010 {offsets = [0, 3], sizes = [2, 1], strides = [1, 1]} : vector<2x8xf32> to vector<2x1xf32>
    %1225 = arith.addf %1223, %1224 : vector<2x1xf32>
    %1226 = vector.extract_strided_slice %1012 {offsets = [8, 0], sizes = [2, 32], strides = [1, 1]} : vector<16x32xf32> to vector<2x32xf32>
    %1227 = arith.mulf %1226, %1200 : vector<2x32xf32>
    %cst_267 = arith.constant dense<0.000000e+00> : vector<2xf32>
    %1228 = vector.multi_reduction <add>, %1227, %cst_267 [1] : vector<2x32xf32> to vector<2xf32>
    %1229 = vector.shape_cast %1228 : vector<2xf32> to vector<2x1xf32>
    %1230 = vector.extract_strided_slice %1010 {offsets = [0, 4], sizes = [2, 1], strides = [1, 1]} : vector<2x8xf32> to vector<2x1xf32>
    %1231 = arith.addf %1229, %1230 : vector<2x1xf32>
    %1232 = vector.extract_strided_slice %1012 {offsets = [10, 0], sizes = [2, 32], strides = [1, 1]} : vector<16x32xf32> to vector<2x32xf32>
    %1233 = arith.mulf %1232, %1200 : vector<2x32xf32>
    %cst_268 = arith.constant dense<0.000000e+00> : vector<2xf32>
    %1234 = vector.multi_reduction <add>, %1233, %cst_268 [1] : vector<2x32xf32> to vector<2xf32>
    %1235 = vector.shape_cast %1234 : vector<2xf32> to vector<2x1xf32>
    %1236 = vector.extract_strided_slice %1010 {offsets = [0, 5], sizes = [2, 1], strides = [1, 1]} : vector<2x8xf32> to vector<2x1xf32>
    %1237 = arith.addf %1235, %1236 : vector<2x1xf32>
    %1238 = vector.extract_strided_slice %1012 {offsets = [12, 0], sizes = [2, 32], strides = [1, 1]} : vector<16x32xf32> to vector<2x32xf32>
    %1239 = arith.mulf %1238, %1200 : vector<2x32xf32>
    %cst_269 = arith.constant dense<0.000000e+00> : vector<2xf32>
    %1240 = vector.multi_reduction <add>, %1239, %cst_269 [1] : vector<2x32xf32> to vector<2xf32>
    %1241 = vector.shape_cast %1240 : vector<2xf32> to vector<2x1xf32>
    %1242 = vector.extract_strided_slice %1010 {offsets = [0, 6], sizes = [2, 1], strides = [1, 1]} : vector<2x8xf32> to vector<2x1xf32>
    %1243 = arith.addf %1241, %1242 : vector<2x1xf32>
    %1244 = vector.extract_strided_slice %1012 {offsets = [14, 0], sizes = [2, 32], strides = [1, 1]} : vector<16x32xf32> to vector<2x32xf32>
    %1245 = arith.mulf %1244, %1200 : vector<2x32xf32>
    %cst_270 = arith.constant dense<0.000000e+00> : vector<2xf32>
    %1246 = vector.multi_reduction <add>, %1245, %cst_270 [1] : vector<2x32xf32> to vector<2xf32>
    %1247 = vector.shape_cast %1246 : vector<2xf32> to vector<2x1xf32>
    %1248 = vector.extract_strided_slice %1010 {offsets = [0, 7], sizes = [2, 1], strides = [1, 1]} : vector<2x8xf32> to vector<2x1xf32>
    %1249 = arith.addf %1247, %1248 : vector<2x1xf32>
    %1250 = arith.maximumf %1207, %1213 : vector<2x1xf32>
    %1251 = arith.maximumf %1250, %1219 : vector<2x1xf32>
    %1252 = arith.maximumf %1251, %1225 : vector<2x1xf32>
    %1253 = arith.maximumf %1252, %1231 : vector<2x1xf32>
    %1254 = arith.maximumf %1253, %1237 : vector<2x1xf32>
    %1255 = arith.maximumf %1254, %1243 : vector<2x1xf32>
    %1256 = arith.maximumf %1255, %1249 : vector<2x1xf32>
    %1257 = arith.subf %1207, %1256 : vector<2x1xf32>
    %1258 = math.exp %1257 : vector<2x1xf32>
    %1259 = arith.subf %1213, %1256 : vector<2x1xf32>
    %1260 = math.exp %1259 : vector<2x1xf32>
    %1261 = arith.subf %1219, %1256 : vector<2x1xf32>
    %1262 = math.exp %1261 : vector<2x1xf32>
    %1263 = arith.subf %1225, %1256 : vector<2x1xf32>
    %1264 = math.exp %1263 : vector<2x1xf32>
    %1265 = arith.subf %1231, %1256 : vector<2x1xf32>
    %1266 = math.exp %1265 : vector<2x1xf32>
    %1267 = arith.subf %1237, %1256 : vector<2x1xf32>
    %1268 = math.exp %1267 : vector<2x1xf32>
    %1269 = arith.subf %1243, %1256 : vector<2x1xf32>
    %1270 = math.exp %1269 : vector<2x1xf32>
    %1271 = arith.subf %1249, %1256 : vector<2x1xf32>
    %1272 = math.exp %1271 : vector<2x1xf32>
    %1273 = arith.addf %1258, %1260 : vector<2x1xf32>
    %1274 = arith.addf %1273, %1262 : vector<2x1xf32>
    %1275 = arith.addf %1274, %1264 : vector<2x1xf32>
    %1276 = arith.addf %1275, %1266 : vector<2x1xf32>
    %1277 = arith.addf %1276, %1268 : vector<2x1xf32>
    %1278 = arith.addf %1277, %1270 : vector<2x1xf32>
    %1279 = arith.addf %1278, %1272 : vector<2x1xf32>
    %1280 = tpu.reciprocal %1279 {approx = true} : vector<2x1xf32> -> vector<2x1xf32>
    %1281 = arith.mulf %1258, %1280 : vector<2x1xf32>
    %1282 = vector.extract_strided_slice %1014 {offsets = [0, 0], sizes = [2, 128], strides = [1, 1]} : vector<16x128xf32> to vector<2x128xf32>
    %1283 = vector.broadcast %1281 : vector<2x1xf32> to vector<2x128xf32>
    %1284 = arith.mulf %1283, %1282 : vector<2x128xf32>
    %1285 = arith.mulf %1260, %1280 : vector<2x1xf32>
    %1286 = vector.extract_strided_slice %1014 {offsets = [2, 0], sizes = [2, 128], strides = [1, 1]} : vector<16x128xf32> to vector<2x128xf32>
    %1287 = vector.broadcast %1285 : vector<2x1xf32> to vector<2x128xf32>
    %1288 = arith.mulf %1287, %1286 : vector<2x128xf32>
    %1289 = arith.addf %1284, %1288 : vector<2x128xf32>
    %1290 = arith.mulf %1262, %1280 : vector<2x1xf32>
    %1291 = vector.extract_strided_slice %1014 {offsets = [4, 0], sizes = [2, 128], strides = [1, 1]} : vector<16x128xf32> to vector<2x128xf32>
    %1292 = vector.broadcast %1290 : vector<2x1xf32> to vector<2x128xf32>
    %1293 = arith.mulf %1292, %1291 : vector<2x128xf32>
    %1294 = arith.addf %1289, %1293 : vector<2x128xf32>
    %1295 = arith.mulf %1264, %1280 : vector<2x1xf32>
    %1296 = vector.extract_strided_slice %1014 {offsets = [6, 0], sizes = [2, 128], strides = [1, 1]} : vector<16x128xf32> to vector<2x128xf32>
    %1297 = vector.broadcast %1295 : vector<2x1xf32> to vector<2x128xf32>
    %1298 = arith.mulf %1297, %1296 : vector<2x128xf32>
    %1299 = arith.addf %1294, %1298 : vector<2x128xf32>
    %1300 = arith.mulf %1266, %1280 : vector<2x1xf32>
    %1301 = vector.extract_strided_slice %1014 {offsets = [8, 0], sizes = [2, 128], strides = [1, 1]} : vector<16x128xf32> to vector<2x128xf32>
    %1302 = vector.broadcast %1300 : vector<2x1xf32> to vector<2x128xf32>
    %1303 = arith.mulf %1302, %1301 : vector<2x128xf32>
    %1304 = arith.addf %1299, %1303 : vector<2x128xf32>
    %1305 = arith.mulf %1268, %1280 : vector<2x1xf32>
    %1306 = vector.extract_strided_slice %1014 {offsets = [10, 0], sizes = [2, 128], strides = [1, 1]} : vector<16x128xf32> to vector<2x128xf32>
    %1307 = vector.broadcast %1305 : vector<2x1xf32> to vector<2x128xf32>
    %1308 = arith.mulf %1307, %1306 : vector<2x128xf32>
    %1309 = arith.addf %1304, %1308 : vector<2x128xf32>
    %1310 = arith.mulf %1270, %1280 : vector<2x1xf32>
    %1311 = vector.extract_strided_slice %1014 {offsets = [12, 0], sizes = [2, 128], strides = [1, 1]} : vector<16x128xf32> to vector<2x128xf32>
    %1312 = vector.broadcast %1310 : vector<2x1xf32> to vector<2x128xf32>
    %1313 = arith.mulf %1312, %1311 : vector<2x128xf32>
    %1314 = arith.addf %1309, %1313 : vector<2x128xf32>
    %1315 = arith.mulf %1272, %1280 : vector<2x1xf32>
    %1316 = vector.extract_strided_slice %1014 {offsets = [14, 0], sizes = [2, 128], strides = [1, 1]} : vector<16x128xf32> to vector<2x128xf32>
    %1317 = vector.broadcast %1315 : vector<2x1xf32> to vector<2x128xf32>
    %1318 = arith.mulf %1317, %1316 : vector<2x128xf32>
    %1319 = arith.addf %1314, %1318 : vector<2x128xf32>
    %cst_271 = arith.constant dense<0.000000e+00> : vector<2x128xf32>
    %1320 = tpu.matmul %1170, %1015, %cst_271 {dimension_numbers = #tpu.dot_dimension_numbers<[1], [0], [0], [1], [0, 0, 1, 1], [], []>} : vector<2x32xf32>, vector<32x128xf32>, vector<2x128xf32> -> vector<2x128xf32>
    %1321 = arith.addf %1319, %1320 : vector<2x128xf32>
    %1322 = vector.broadcast %1016 : vector<1x128xf32> to vector<2x128xf32>
    %1323 = arith.addf %1321, %1322 : vector<2x128xf32>
    %cst_272 = arith.constant 2.000000e+00 : f32
    %1324 = vector.broadcast %cst_272 : f32 to vector<2x128xf32>
    %1325 = arith.mulf %1324, %1323 : vector<2x128xf32>
    %1326 = vector.shape_cast %5 : vector<1x128xi1> to vector<1x128xi1>
    %1327 = vector.broadcast %1326 : vector<1x128xi1> to vector<2x128xi1>
    %1328 = arith.select %1327, %1325, %1323 : vector<2x128xi1>, vector<2x128xf32>
    %1329 = arith.negf %1328 : vector<2x128xf32>
    %1330 = math.exp %1329 : vector<2x128xf32>
    %cst_273 = arith.constant 1.000000e+00 : f32
    %1331 = vector.broadcast %cst_273 : f32 to vector<2x128xf32>
    %1332 = arith.addf %1331, %1330 : vector<2x128xf32>
    %1333 = arith.divf %1331, %1332 : vector<2x128xf32>
    %cst_274 = arith.constant 2.000000e+00 : f32
    %1334 = vector.broadcast %cst_274 : f32 to vector<2x128xf32>
    %1335 = arith.mulf %1334, %1333 : vector<2x128xf32>
    %cst_275 = arith.constant 1.000000e+00 : f32
    %1336 = vector.broadcast %cst_275 : f32 to vector<2x128xf32>
    %1337 = arith.subf %1335, %1336 : vector<2x128xf32>
    %1338 = vector.shape_cast %5 : vector<1x128xi1> to vector<1x128xi1>
    %1339 = vector.broadcast %1338 : vector<1x128xi1> to vector<2x128xi1>
    %1340 = arith.select %1339, %1337, %1333 : vector<2x128xi1>, vector<2x128xf32>
    %1341 = vector.extract_strided_slice %1340 {offsets = [0, 0], sizes = [2, 32], strides = [1, 1]} : vector<2x128xf32> to vector<2x32xf32>
    %1342 = vector.extract_strided_slice %1340 {offsets = [0, 32], sizes = [2, 32], strides = [1, 1]} : vector<2x128xf32> to vector<2x32xf32>
    %1343 = vector.extract_strided_slice %1340 {offsets = [0, 64], sizes = [2, 32], strides = [1, 1]} : vector<2x128xf32> to vector<2x32xf32>
    %1344 = vector.extract_strided_slice %1340 {offsets = [0, 96], sizes = [2, 32], strides = [1, 1]} : vector<2x128xf32> to vector<2x32xf32>
    %1345 = arith.mulf %1342, %1168 : vector<2x32xf32>
    %1346 = arith.mulf %1341, %1343 : vector<2x32xf32>
    %1347 = arith.addf %1345, %1346 : vector<2x32xf32>
    %1348 = math.tanh %1347 : vector<2x32xf32>
    %1349 = arith.mulf %1344, %1348 : vector<2x32xf32>
    %1350 = tpu.concatenate %1349, %1200 in 1 : vector<2x32xf32>, vector<2x32xf32> -> vector<2x64xf32>
    %cst_276 = arith.constant dense<0.000000e+00> : vector<2x128xf32>
    %1351 = tpu.matmul %1350, %1017, %cst_276 {dimension_numbers = #tpu.dot_dimension_numbers<[1], [0], [0], [1], [0, 0, 1, 1], [], []>} : vector<2x64xf32>, vector<64x128xf32>, vector<2x128xf32> -> vector<2x128xf32>
    %1352 = vector.broadcast %1018 : vector<1x128xf32> to vector<2x128xf32>
    %1353 = arith.addf %1351, %1352 : vector<2x128xf32>
    %cst_277 = arith.constant 2.000000e+00 : f32
    %1354 = vector.broadcast %cst_277 : f32 to vector<2x128xf32>
    %1355 = arith.mulf %1354, %1353 : vector<2x128xf32>
    %1356 = vector.shape_cast %5 : vector<1x128xi1> to vector<1x128xi1>
    %1357 = vector.broadcast %1356 : vector<1x128xi1> to vector<2x128xi1>
    %1358 = arith.select %1357, %1355, %1353 : vector<2x128xi1>, vector<2x128xf32>
    %1359 = arith.negf %1358 : vector<2x128xf32>
    %1360 = math.exp %1359 : vector<2x128xf32>
    %cst_278 = arith.constant 1.000000e+00 : f32
    %1361 = vector.broadcast %cst_278 : f32 to vector<2x128xf32>
    %1362 = arith.addf %1361, %1360 : vector<2x128xf32>
    %1363 = arith.divf %1361, %1362 : vector<2x128xf32>
    %cst_279 = arith.constant 2.000000e+00 : f32
    %1364 = vector.broadcast %cst_279 : f32 to vector<2x128xf32>
    %1365 = arith.mulf %1364, %1363 : vector<2x128xf32>
    %cst_280 = arith.constant 1.000000e+00 : f32
    %1366 = vector.broadcast %cst_280 : f32 to vector<2x128xf32>
    %1367 = arith.subf %1365, %1366 : vector<2x128xf32>
    %1368 = vector.shape_cast %5 : vector<1x128xi1> to vector<1x128xi1>
    %1369 = vector.broadcast %1368 : vector<1x128xi1> to vector<2x128xi1>
    %1370 = arith.select %1369, %1367, %1363 : vector<2x128xi1>, vector<2x128xf32>
    %1371 = vector.extract_strided_slice %1370 {offsets = [0, 0], sizes = [2, 32], strides = [1, 1]} : vector<2x128xf32> to vector<2x32xf32>
    %1372 = vector.extract_strided_slice %1370 {offsets = [0, 32], sizes = [2, 32], strides = [1, 1]} : vector<2x128xf32> to vector<2x32xf32>
    %1373 = vector.extract_strided_slice %1370 {offsets = [0, 64], sizes = [2, 32], strides = [1, 1]} : vector<2x128xf32> to vector<2x32xf32>
    %1374 = vector.extract_strided_slice %1370 {offsets = [0, 96], sizes = [2, 32], strides = [1, 1]} : vector<2x128xf32> to vector<2x32xf32>
    %1375 = arith.mulf %1372, %1198 : vector<2x32xf32>
    %1376 = arith.mulf %1371, %1373 : vector<2x32xf32>
    %1377 = arith.addf %1375, %1376 : vector<2x32xf32>
    %1378 = math.tanh %1377 : vector<2x32xf32>
    %1379 = arith.mulf %1374, %1378 : vector<2x32xf32>
    %c2_281 = arith.constant 2 : index
    %c0_282 = arith.constant 0 : index
    %1380 = vector.load %arg18[%c2_281, %c0_282] : memref<12x32xf32, #tpu.memory_space<vmem>>, vector<2x32xf32>
    tpu.vector_store %arg18[%c2_281, %c0_282], %1379 {strides = array<i32>} : memref<12x32xf32, #tpu.memory_space<vmem>>, vector<2x32xf32>,
    %1381 = vector.extract_strided_slice %1012 {offsets = [0, 0], sizes = [2, 32], strides = [1, 1]} : vector<16x32xf32> to vector<2x32xf32>
    %1382 = arith.mulf %1381, %1379 : vector<2x32xf32>
    %cst_283 = arith.constant dense<0.000000e+00> : vector<2xf32>
    %1383 = vector.multi_reduction <add>, %1382, %cst_283 [1] : vector<2x32xf32> to vector<2xf32>
    %1384 = vector.shape_cast %1383 : vector<2xf32> to vector<2x1xf32>
    %1385 = vector.extract_strided_slice %1010 {offsets = [0, 0], sizes = [2, 1], strides = [1, 1]} : vector<2x8xf32> to vector<2x1xf32>
    %1386 = arith.addf %1384, %1385 : vector<2x1xf32>
    %1387 = vector.extract_strided_slice %1012 {offsets = [2, 0], sizes = [2, 32], strides = [1, 1]} : vector<16x32xf32> to vector<2x32xf32>
    %1388 = arith.mulf %1387, %1379 : vector<2x32xf32>
    %cst_284 = arith.constant dense<0.000000e+00> : vector<2xf32>
    %1389 = vector.multi_reduction <add>, %1388, %cst_284 [1] : vector<2x32xf32> to vector<2xf32>
    %1390 = vector.shape_cast %1389 : vector<2xf32> to vector<2x1xf32>
    %1391 = vector.extract_strided_slice %1010 {offsets = [0, 1], sizes = [2, 1], strides = [1, 1]} : vector<2x8xf32> to vector<2x1xf32>
    %1392 = arith.addf %1390, %1391 : vector<2x1xf32>
    %1393 = vector.extract_strided_slice %1012 {offsets = [4, 0], sizes = [2, 32], strides = [1, 1]} : vector<16x32xf32> to vector<2x32xf32>
    %1394 = arith.mulf %1393, %1379 : vector<2x32xf32>
    %cst_285 = arith.constant dense<0.000000e+00> : vector<2xf32>
    %1395 = vector.multi_reduction <add>, %1394, %cst_285 [1] : vector<2x32xf32> to vector<2xf32>
    %1396 = vector.shape_cast %1395 : vector<2xf32> to vector<2x1xf32>
    %1397 = vector.extract_strided_slice %1010 {offsets = [0, 2], sizes = [2, 1], strides = [1, 1]} : vector<2x8xf32> to vector<2x1xf32>
    %1398 = arith.addf %1396, %1397 : vector<2x1xf32>
    %1399 = vector.extract_strided_slice %1012 {offsets = [6, 0], sizes = [2, 32], strides = [1, 1]} : vector<16x32xf32> to vector<2x32xf32>
    %1400 = arith.mulf %1399, %1379 : vector<2x32xf32>
    %cst_286 = arith.constant dense<0.000000e+00> : vector<2xf32>
    %1401 = vector.multi_reduction <add>, %1400, %cst_286 [1] : vector<2x32xf32> to vector<2xf32>
    %1402 = vector.shape_cast %1401 : vector<2xf32> to vector<2x1xf32>
    %1403 = vector.extract_strided_slice %1010 {offsets = [0, 3], sizes = [2, 1], strides = [1, 1]} : vector<2x8xf32> to vector<2x1xf32>
    %1404 = arith.addf %1402, %1403 : vector<2x1xf32>
    %1405 = vector.extract_strided_slice %1012 {offsets = [8, 0], sizes = [2, 32], strides = [1, 1]} : vector<16x32xf32> to vector<2x32xf32>
    %1406 = arith.mulf %1405, %1379 : vector<2x32xf32>
    %cst_287 = arith.constant dense<0.000000e+00> : vector<2xf32>
    %1407 = vector.multi_reduction <add>, %1406, %cst_287 [1] : vector<2x32xf32> to vector<2xf32>
    %1408 = vector.shape_cast %1407 : vector<2xf32> to vector<2x1xf32>
    %1409 = vector.extract_strided_slice %1010 {offsets = [0, 4], sizes = [2, 1], strides = [1, 1]} : vector<2x8xf32> to vector<2x1xf32>
    %1410 = arith.addf %1408, %1409 : vector<2x1xf32>
    %1411 = vector.extract_strided_slice %1012 {offsets = [10, 0], sizes = [2, 32], strides = [1, 1]} : vector<16x32xf32> to vector<2x32xf32>
    %1412 = arith.mulf %1411, %1379 : vector<2x32xf32>
    %cst_288 = arith.constant dense<0.000000e+00> : vector<2xf32>
    %1413 = vector.multi_reduction <add>, %1412, %cst_288 [1] : vector<2x32xf32> to vector<2xf32>
    %1414 = vector.shape_cast %1413 : vector<2xf32> to vector<2x1xf32>
    %1415 = vector.extract_strided_slice %1010 {offsets = [0, 5], sizes = [2, 1], strides = [1, 1]} : vector<2x8xf32> to vector<2x1xf32>
    %1416 = arith.addf %1414, %1415 : vector<2x1xf32>
    %1417 = vector.extract_strided_slice %1012 {offsets = [12, 0], sizes = [2, 32], strides = [1, 1]} : vector<16x32xf32> to vector<2x32xf32>
    %1418 = arith.mulf %1417, %1379 : vector<2x32xf32>
    %cst_289 = arith.constant dense<0.000000e+00> : vector<2xf32>
    %1419 = vector.multi_reduction <add>, %1418, %cst_289 [1] : vector<2x32xf32> to vector<2xf32>
    %1420 = vector.shape_cast %1419 : vector<2xf32> to vector<2x1xf32>
    %1421 = vector.extract_strided_slice %1010 {offsets = [0, 6], sizes = [2, 1], strides = [1, 1]} : vector<2x8xf32> to vector<2x1xf32>
    %1422 = arith.addf %1420, %1421 : vector<2x1xf32>
    %1423 = vector.extract_strided_slice %1012 {offsets = [14, 0], sizes = [2, 32], strides = [1, 1]} : vector<16x32xf32> to vector<2x32xf32>
    %1424 = arith.mulf %1423, %1379 : vector<2x32xf32>
    %cst_290 = arith.constant dense<0.000000e+00> : vector<2xf32>
    %1425 = vector.multi_reduction <add>, %1424, %cst_290 [1] : vector<2x32xf32> to vector<2xf32>
    %1426 = vector.shape_cast %1425 : vector<2xf32> to vector<2x1xf32>
    %1427 = vector.extract_strided_slice %1010 {offsets = [0, 7], sizes = [2, 1], strides = [1, 1]} : vector<2x8xf32> to vector<2x1xf32>
    %1428 = arith.addf %1426, %1427 : vector<2x1xf32>
    %1429 = arith.maximumf %1386, %1392 : vector<2x1xf32>
    %1430 = arith.maximumf %1429, %1398 : vector<2x1xf32>
    %1431 = arith.maximumf %1430, %1404 : vector<2x1xf32>
    %1432 = arith.maximumf %1431, %1410 : vector<2x1xf32>
    %1433 = arith.maximumf %1432, %1416 : vector<2x1xf32>
    %1434 = arith.maximumf %1433, %1422 : vector<2x1xf32>
    %1435 = arith.maximumf %1434, %1428 : vector<2x1xf32>
    %1436 = arith.subf %1386, %1435 : vector<2x1xf32>
    %1437 = math.exp %1436 : vector<2x1xf32>
    %1438 = arith.subf %1392, %1435 : vector<2x1xf32>
    %1439 = math.exp %1438 : vector<2x1xf32>
    %1440 = arith.subf %1398, %1435 : vector<2x1xf32>
    %1441 = math.exp %1440 : vector<2x1xf32>
    %1442 = arith.subf %1404, %1435 : vector<2x1xf32>
    %1443 = math.exp %1442 : vector<2x1xf32>
    %1444 = arith.subf %1410, %1435 : vector<2x1xf32>
    %1445 = math.exp %1444 : vector<2x1xf32>
    %1446 = arith.subf %1416, %1435 : vector<2x1xf32>
    %1447 = math.exp %1446 : vector<2x1xf32>
    %1448 = arith.subf %1422, %1435 : vector<2x1xf32>
    %1449 = math.exp %1448 : vector<2x1xf32>
    %1450 = arith.subf %1428, %1435 : vector<2x1xf32>
    %1451 = math.exp %1450 : vector<2x1xf32>
    %1452 = arith.addf %1437, %1439 : vector<2x1xf32>
    %1453 = arith.addf %1452, %1441 : vector<2x1xf32>
    %1454 = arith.addf %1453, %1443 : vector<2x1xf32>
    %1455 = arith.addf %1454, %1445 : vector<2x1xf32>
    %1456 = arith.addf %1455, %1447 : vector<2x1xf32>
    %1457 = arith.addf %1456, %1449 : vector<2x1xf32>
    %1458 = arith.addf %1457, %1451 : vector<2x1xf32>
    %1459 = tpu.reciprocal %1458 {approx = true} : vector<2x1xf32> -> vector<2x1xf32>
    %1460 = arith.mulf %1437, %1459 : vector<2x1xf32>
    %1461 = vector.extract_strided_slice %1014 {offsets = [0, 0], sizes = [2, 128], strides = [1, 1]} : vector<16x128xf32> to vector<2x128xf32>
    %1462 = vector.broadcast %1460 : vector<2x1xf32> to vector<2x128xf32>
    %1463 = arith.mulf %1462, %1461 : vector<2x128xf32>
    %1464 = arith.mulf %1439, %1459 : vector<2x1xf32>
    %1465 = vector.extract_strided_slice %1014 {offsets = [2, 0], sizes = [2, 128], strides = [1, 1]} : vector<16x128xf32> to vector<2x128xf32>
    %1466 = vector.broadcast %1464 : vector<2x1xf32> to vector<2x128xf32>
    %1467 = arith.mulf %1466, %1465 : vector<2x128xf32>
    %1468 = arith.addf %1463, %1467 : vector<2x128xf32>
    %1469 = arith.mulf %1441, %1459 : vector<2x1xf32>
    %1470 = vector.extract_strided_slice %1014 {offsets = [4, 0], sizes = [2, 128], strides = [1, 1]} : vector<16x128xf32> to vector<2x128xf32>
    %1471 = vector.broadcast %1469 : vector<2x1xf32> to vector<2x128xf32>
    %1472 = arith.mulf %1471, %1470 : vector<2x128xf32>
    %1473 = arith.addf %1468, %1472 : vector<2x128xf32>
    %1474 = arith.mulf %1443, %1459 : vector<2x1xf32>
    %1475 = vector.extract_strided_slice %1014 {offsets = [6, 0], sizes = [2, 128], strides = [1, 1]} : vector<16x128xf32> to vector<2x128xf32>
    %1476 = vector.broadcast %1474 : vector<2x1xf32> to vector<2x128xf32>
    %1477 = arith.mulf %1476, %1475 : vector<2x128xf32>
    %1478 = arith.addf %1473, %1477 : vector<2x128xf32>
    %1479 = arith.mulf %1445, %1459 : vector<2x1xf32>
    %1480 = vector.extract_strided_slice %1014 {offsets = [8, 0], sizes = [2, 128], strides = [1, 1]} : vector<16x128xf32> to vector<2x128xf32>
    %1481 = vector.broadcast %1479 : vector<2x1xf32> to vector<2x128xf32>
    %1482 = arith.mulf %1481, %1480 : vector<2x128xf32>
    %1483 = arith.addf %1478, %1482 : vector<2x128xf32>
    %1484 = arith.mulf %1447, %1459 : vector<2x1xf32>
    %1485 = vector.extract_strided_slice %1014 {offsets = [10, 0], sizes = [2, 128], strides = [1, 1]} : vector<16x128xf32> to vector<2x128xf32>
    %1486 = vector.broadcast %1484 : vector<2x1xf32> to vector<2x128xf32>
    %1487 = arith.mulf %1486, %1485 : vector<2x128xf32>
    %1488 = arith.addf %1483, %1487 : vector<2x128xf32>
    %1489 = arith.mulf %1449, %1459 : vector<2x1xf32>
    %1490 = vector.extract_strided_slice %1014 {offsets = [12, 0], sizes = [2, 128], strides = [1, 1]} : vector<16x128xf32> to vector<2x128xf32>
    %1491 = vector.broadcast %1489 : vector<2x1xf32> to vector<2x128xf32>
    %1492 = arith.mulf %1491, %1490 : vector<2x128xf32>
    %1493 = arith.addf %1488, %1492 : vector<2x128xf32>
    %1494 = arith.mulf %1451, %1459 : vector<2x1xf32>
    %1495 = vector.extract_strided_slice %1014 {offsets = [14, 0], sizes = [2, 128], strides = [1, 1]} : vector<16x128xf32> to vector<2x128xf32>
    %1496 = vector.broadcast %1494 : vector<2x1xf32> to vector<2x128xf32>
    %1497 = arith.mulf %1496, %1495 : vector<2x128xf32>
    %1498 = arith.addf %1493, %1497 : vector<2x128xf32>
    %cst_291 = arith.constant dense<0.000000e+00> : vector<2x128xf32>
    %1499 = tpu.matmul %1349, %1015, %cst_291 {dimension_numbers = #tpu.dot_dimension_numbers<[1], [0], [0], [1], [0, 0, 1, 1], [], []>} : vector<2x32xf32>, vector<32x128xf32>, vector<2x128xf32> -> vector<2x128xf32>
    %1500 = arith.addf %1498, %1499 : vector<2x128xf32>
    %1501 = vector.broadcast %1016 : vector<1x128xf32> to vector<2x128xf32>
    %1502 = arith.addf %1500, %1501 : vector<2x128xf32>
    %cst_292 = arith.constant 2.000000e+00 : f32
    %1503 = vector.broadcast %cst_292 : f32 to vector<2x128xf32>
    %1504 = arith.mulf %1503, %1502 : vector<2x128xf32>
    %1505 = vector.shape_cast %5 : vector<1x128xi1> to vector<1x128xi1>
    %1506 = vector.broadcast %1505 : vector<1x128xi1> to vector<2x128xi1>
    %1507 = arith.select %1506, %1504, %1502 : vector<2x128xi1>, vector<2x128xf32>
    %1508 = arith.negf %1507 : vector<2x128xf32>
    %1509 = math.exp %1508 : vector<2x128xf32>
    %cst_293 = arith.constant 1.000000e+00 : f32
    %1510 = vector.broadcast %cst_293 : f32 to vector<2x128xf32>
    %1511 = arith.addf %1510, %1509 : vector<2x128xf32>
    %1512 = arith.divf %1510, %1511 : vector<2x128xf32>
    %cst_294 = arith.constant 2.000000e+00 : f32
    %1513 = vector.broadcast %cst_294 : f32 to vector<2x128xf32>
    %1514 = arith.mulf %1513, %1512 : vector<2x128xf32>
    %cst_295 = arith.constant 1.000000e+00 : f32
    %1515 = vector.broadcast %cst_295 : f32 to vector<2x128xf32>
    %1516 = arith.subf %1514, %1515 : vector<2x128xf32>
    %1517 = vector.shape_cast %5 : vector<1x128xi1> to vector<1x128xi1>
    %1518 = vector.broadcast %1517 : vector<1x128xi1> to vector<2x128xi1>
    %1519 = arith.select %1518, %1516, %1512 : vector<2x128xi1>, vector<2x128xf32>
    %1520 = vector.extract_strided_slice %1519 {offsets = [0, 0], sizes = [2, 32], strides = [1, 1]} : vector<2x128xf32> to vector<2x32xf32>
    %1521 = vector.extract_strided_slice %1519 {offsets = [0, 32], sizes = [2, 32], strides = [1, 1]} : vector<2x128xf32> to vector<2x32xf32>
    %1522 = vector.extract_strided_slice %1519 {offsets = [0, 64], sizes = [2, 32], strides = [1, 1]} : vector<2x128xf32> to vector<2x32xf32>
    %1523 = vector.extract_strided_slice %1519 {offsets = [0, 96], sizes = [2, 32], strides = [1, 1]} : vector<2x128xf32> to vector<2x32xf32>
    %1524 = arith.mulf %1521, %1347 : vector<2x32xf32>
    %1525 = arith.mulf %1520, %1522 : vector<2x32xf32>
    %1526 = arith.addf %1524, %1525 : vector<2x32xf32>
    %1527 = math.tanh %1526 : vector<2x32xf32>
    %1528 = arith.mulf %1523, %1527 : vector<2x32xf32>
    %1529 = tpu.concatenate %1528, %1379 in 1 : vector<2x32xf32>, vector<2x32xf32> -> vector<2x64xf32>
    %cst_296 = arith.constant dense<0.000000e+00> : vector<2x128xf32>
    %1530 = tpu.matmul %1529, %1017, %cst_296 {dimension_numbers = #tpu.dot_dimension_numbers<[1], [0], [0], [1], [0, 0, 1, 1], [], []>} : vector<2x64xf32>, vector<64x128xf32>, vector<2x128xf32> -> vector<2x128xf32>
    %1531 = vector.broadcast %1018 : vector<1x128xf32> to vector<2x128xf32>
    %1532 = arith.addf %1530, %1531 : vector<2x128xf32>
    %cst_297 = arith.constant 2.000000e+00 : f32
    %1533 = vector.broadcast %cst_297 : f32 to vector<2x128xf32>
    %1534 = arith.mulf %1533, %1532 : vector<2x128xf32>
    %1535 = vector.shape_cast %5 : vector<1x128xi1> to vector<1x128xi1>
    %1536 = vector.broadcast %1535 : vector<1x128xi1> to vector<2x128xi1>
    %1537 = arith.select %1536, %1534, %1532 : vector<2x128xi1>, vector<2x128xf32>
    %1538 = arith.negf %1537 : vector<2x128xf32>
    %1539 = math.exp %1538 : vector<2x128xf32>
    %cst_298 = arith.constant 1.000000e+00 : f32
    %1540 = vector.broadcast %cst_298 : f32 to vector<2x128xf32>
    %1541 = arith.addf %1540, %1539 : vector<2x128xf32>
    %1542 = arith.divf %1540, %1541 : vector<2x128xf32>
    %cst_299 = arith.constant 2.000000e+00 : f32
    %1543 = vector.broadcast %cst_299 : f32 to vector<2x128xf32>
    %1544 = arith.mulf %1543, %1542 : vector<2x128xf32>
    %cst_300 = arith.constant 1.000000e+00 : f32
    %1545 = vector.broadcast %cst_300 : f32 to vector<2x128xf32>
    %1546 = arith.subf %1544, %1545 : vector<2x128xf32>
    %1547 = vector.shape_cast %5 : vector<1x128xi1> to vector<1x128xi1>
    %1548 = vector.broadcast %1547 : vector<1x128xi1> to vector<2x128xi1>
    %1549 = arith.select %1548, %1546, %1542 : vector<2x128xi1>, vector<2x128xf32>
    %1550 = vector.extract_strided_slice %1549 {offsets = [0, 0], sizes = [2, 32], strides = [1, 1]} : vector<2x128xf32> to vector<2x32xf32>
    %1551 = vector.extract_strided_slice %1549 {offsets = [0, 32], sizes = [2, 32], strides = [1, 1]} : vector<2x128xf32> to vector<2x32xf32>
    %1552 = vector.extract_strided_slice %1549 {offsets = [0, 64], sizes = [2, 32], strides = [1, 1]} : vector<2x128xf32> to vector<2x32xf32>
    %1553 = vector.extract_strided_slice %1549 {offsets = [0, 96], sizes = [2, 32], strides = [1, 1]} : vector<2x128xf32> to vector<2x32xf32>
    %1554 = arith.mulf %1551, %1377 : vector<2x32xf32>
    %1555 = arith.mulf %1550, %1552 : vector<2x32xf32>
    %1556 = arith.addf %1554, %1555 : vector<2x32xf32>
    %1557 = math.tanh %1556 : vector<2x32xf32>
    %1558 = arith.mulf %1553, %1557 : vector<2x32xf32>
    %c4_301 = arith.constant 4 : index
    %c0_302 = arith.constant 0 : index
    %1559 = vector.load %arg18[%c4_301, %c0_302] : memref<12x32xf32, #tpu.memory_space<vmem>>, vector<2x32xf32>
    tpu.vector_store %arg18[%c4_301, %c0_302], %1558 {strides = array<i32>} : memref<12x32xf32, #tpu.memory_space<vmem>>, vector<2x32xf32>,
    %1560 = vector.extract_strided_slice %1012 {offsets = [0, 0], sizes = [2, 32], strides = [1, 1]} : vector<16x32xf32> to vector<2x32xf32>
    %1561 = arith.mulf %1560, %1558 : vector<2x32xf32>
    %cst_303 = arith.constant dense<0.000000e+00> : vector<2xf32>
    %1562 = vector.multi_reduction <add>, %1561, %cst_303 [1] : vector<2x32xf32> to vector<2xf32>
    %1563 = vector.shape_cast %1562 : vector<2xf32> to vector<2x1xf32>
    %1564 = vector.extract_strided_slice %1010 {offsets = [0, 0], sizes = [2, 1], strides = [1, 1]} : vector<2x8xf32> to vector<2x1xf32>
    %1565 = arith.addf %1563, %1564 : vector<2x1xf32>
    %1566 = vector.extract_strided_slice %1012 {offsets = [2, 0], sizes = [2, 32], strides = [1, 1]} : vector<16x32xf32> to vector<2x32xf32>
    %1567 = arith.mulf %1566, %1558 : vector<2x32xf32>
    %cst_304 = arith.constant dense<0.000000e+00> : vector<2xf32>
    %1568 = vector.multi_reduction <add>, %1567, %cst_304 [1] : vector<2x32xf32> to vector<2xf32>
    %1569 = vector.shape_cast %1568 : vector<2xf32> to vector<2x1xf32>
    %1570 = vector.extract_strided_slice %1010 {offsets = [0, 1], sizes = [2, 1], strides = [1, 1]} : vector<2x8xf32> to vector<2x1xf32>
    %1571 = arith.addf %1569, %1570 : vector<2x1xf32>
    %1572 = vector.extract_strided_slice %1012 {offsets = [4, 0], sizes = [2, 32], strides = [1, 1]} : vector<16x32xf32> to vector<2x32xf32>
    %1573 = arith.mulf %1572, %1558 : vector<2x32xf32>
    %cst_305 = arith.constant dense<0.000000e+00> : vector<2xf32>
    %1574 = vector.multi_reduction <add>, %1573, %cst_305 [1] : vector<2x32xf32> to vector<2xf32>
    %1575 = vector.shape_cast %1574 : vector<2xf32> to vector<2x1xf32>
    %1576 = vector.extract_strided_slice %1010 {offsets = [0, 2], sizes = [2, 1], strides = [1, 1]} : vector<2x8xf32> to vector<2x1xf32>
    %1577 = arith.addf %1575, %1576 : vector<2x1xf32>
    %1578 = vector.extract_strided_slice %1012 {offsets = [6, 0], sizes = [2, 32], strides = [1, 1]} : vector<16x32xf32> to vector<2x32xf32>
    %1579 = arith.mulf %1578, %1558 : vector<2x32xf32>
    %cst_306 = arith.constant dense<0.000000e+00> : vector<2xf32>
    %1580 = vector.multi_reduction <add>, %1579, %cst_306 [1] : vector<2x32xf32> to vector<2xf32>
    %1581 = vector.shape_cast %1580 : vector<2xf32> to vector<2x1xf32>
    %1582 = vector.extract_strided_slice %1010 {offsets = [0, 3], sizes = [2, 1], strides = [1, 1]} : vector<2x8xf32> to vector<2x1xf32>
    %1583 = arith.addf %1581, %1582 : vector<2x1xf32>
    %1584 = vector.extract_strided_slice %1012 {offsets = [8, 0], sizes = [2, 32], strides = [1, 1]} : vector<16x32xf32> to vector<2x32xf32>
    %1585 = arith.mulf %1584, %1558 : vector<2x32xf32>
    %cst_307 = arith.constant dense<0.000000e+00> : vector<2xf32>
    %1586 = vector.multi_reduction <add>, %1585, %cst_307 [1] : vector<2x32xf32> to vector<2xf32>
    %1587 = vector.shape_cast %1586 : vector<2xf32> to vector<2x1xf32>
    %1588 = vector.extract_strided_slice %1010 {offsets = [0, 4], sizes = [2, 1], strides = [1, 1]} : vector<2x8xf32> to vector<2x1xf32>
    %1589 = arith.addf %1587, %1588 : vector<2x1xf32>
    %1590 = vector.extract_strided_slice %1012 {offsets = [10, 0], sizes = [2, 32], strides = [1, 1]} : vector<16x32xf32> to vector<2x32xf32>
    %1591 = arith.mulf %1590, %1558 : vector<2x32xf32>
    %cst_308 = arith.constant dense<0.000000e+00> : vector<2xf32>
    %1592 = vector.multi_reduction <add>, %1591, %cst_308 [1] : vector<2x32xf32> to vector<2xf32>
    %1593 = vector.shape_cast %1592 : vector<2xf32> to vector<2x1xf32>
    %1594 = vector.extract_strided_slice %1010 {offsets = [0, 5], sizes = [2, 1], strides = [1, 1]} : vector<2x8xf32> to vector<2x1xf32>
    %1595 = arith.addf %1593, %1594 : vector<2x1xf32>
    %1596 = vector.extract_strided_slice %1012 {offsets = [12, 0], sizes = [2, 32], strides = [1, 1]} : vector<16x32xf32> to vector<2x32xf32>
    %1597 = arith.mulf %1596, %1558 : vector<2x32xf32>
    %cst_309 = arith.constant dense<0.000000e+00> : vector<2xf32>
    %1598 = vector.multi_reduction <add>, %1597, %cst_309 [1] : vector<2x32xf32> to vector<2xf32>
    %1599 = vector.shape_cast %1598 : vector<2xf32> to vector<2x1xf32>
    %1600 = vector.extract_strided_slice %1010 {offsets = [0, 6], sizes = [2, 1], strides = [1, 1]} : vector<2x8xf32> to vector<2x1xf32>
    %1601 = arith.addf %1599, %1600 : vector<2x1xf32>
    %1602 = vector.extract_strided_slice %1012 {offsets = [14, 0], sizes = [2, 32], strides = [1, 1]} : vector<16x32xf32> to vector<2x32xf32>
    %1603 = arith.mulf %1602, %1558 : vector<2x32xf32>
    %cst_310 = arith.constant dense<0.000000e+00> : vector<2xf32>
    %1604 = vector.multi_reduction <add>, %1603, %cst_310 [1] : vector<2x32xf32> to vector<2xf32>
    %1605 = vector.shape_cast %1604 : vector<2xf32> to vector<2x1xf32>
    %1606 = vector.extract_strided_slice %1010 {offsets = [0, 7], sizes = [2, 1], strides = [1, 1]} : vector<2x8xf32> to vector<2x1xf32>
    %1607 = arith.addf %1605, %1606 : vector<2x1xf32>
    %1608 = arith.maximumf %1565, %1571 : vector<2x1xf32>
    %1609 = arith.maximumf %1608, %1577 : vector<2x1xf32>
    %1610 = arith.maximumf %1609, %1583 : vector<2x1xf32>
    %1611 = arith.maximumf %1610, %1589 : vector<2x1xf32>
    %1612 = arith.maximumf %1611, %1595 : vector<2x1xf32>
    %1613 = arith.maximumf %1612, %1601 : vector<2x1xf32>
    %1614 = arith.maximumf %1613, %1607 : vector<2x1xf32>
    %1615 = arith.subf %1565, %1614 : vector<2x1xf32>
    %1616 = math.exp %1615 : vector<2x1xf32>
    %1617 = arith.subf %1571, %1614 : vector<2x1xf32>
    %1618 = math.exp %1617 : vector<2x1xf32>
    %1619 = arith.subf %1577, %1614 : vector<2x1xf32>
    %1620 = math.exp %1619 : vector<2x1xf32>
    %1621 = arith.subf %1583, %1614 : vector<2x1xf32>
    %1622 = math.exp %1621 : vector<2x1xf32>
    %1623 = arith.subf %1589, %1614 : vector<2x1xf32>
    %1624 = math.exp %1623 : vector<2x1xf32>
    %1625 = arith.subf %1595, %1614 : vector<2x1xf32>
    %1626 = math.exp %1625 : vector<2x1xf32>
    %1627 = arith.subf %1601, %1614 : vector<2x1xf32>
    %1628 = math.exp %1627 : vector<2x1xf32>
    %1629 = arith.subf %1607, %1614 : vector<2x1xf32>
    %1630 = math.exp %1629 : vector<2x1xf32>
    %1631 = arith.addf %1616, %1618 : vector<2x1xf32>
    %1632 = arith.addf %1631, %1620 : vector<2x1xf32>
    %1633 = arith.addf %1632, %1622 : vector<2x1xf32>
    %1634 = arith.addf %1633, %1624 : vector<2x1xf32>
    %1635 = arith.addf %1634, %1626 : vector<2x1xf32>
    %1636 = arith.addf %1635, %1628 : vector<2x1xf32>
    %1637 = arith.addf %1636, %1630 : vector<2x1xf32>
    %1638 = tpu.reciprocal %1637 {approx = true} : vector<2x1xf32> -> vector<2x1xf32>
    %1639 = arith.mulf %1616, %1638 : vector<2x1xf32>
    %1640 = vector.extract_strided_slice %1014 {offsets = [0, 0], sizes = [2, 128], strides = [1, 1]} : vector<16x128xf32> to vector<2x128xf32>
    %1641 = vector.broadcast %1639 : vector<2x1xf32> to vector<2x128xf32>
    %1642 = arith.mulf %1641, %1640 : vector<2x128xf32>
    %1643 = arith.mulf %1618, %1638 : vector<2x1xf32>
    %1644 = vector.extract_strided_slice %1014 {offsets = [2, 0], sizes = [2, 128], strides = [1, 1]} : vector<16x128xf32> to vector<2x128xf32>
    %1645 = vector.broadcast %1643 : vector<2x1xf32> to vector<2x128xf32>
    %1646 = arith.mulf %1645, %1644 : vector<2x128xf32>
    %1647 = arith.addf %1642, %1646 : vector<2x128xf32>
    %1648 = arith.mulf %1620, %1638 : vector<2x1xf32>
    %1649 = vector.extract_strided_slice %1014 {offsets = [4, 0], sizes = [2, 128], strides = [1, 1]} : vector<16x128xf32> to vector<2x128xf32>
    %1650 = vector.broadcast %1648 : vector<2x1xf32> to vector<2x128xf32>
    %1651 = arith.mulf %1650, %1649 : vector<2x128xf32>
    %1652 = arith.addf %1647, %1651 : vector<2x128xf32>
    %1653 = arith.mulf %1622, %1638 : vector<2x1xf32>
    %1654 = vector.extract_strided_slice %1014 {offsets = [6, 0], sizes = [2, 128], strides = [1, 1]} : vector<16x128xf32> to vector<2x128xf32>
    %1655 = vector.broadcast %1653 : vector<2x1xf32> to vector<2x128xf32>
    %1656 = arith.mulf %1655, %1654 : vector<2x128xf32>
    %1657 = arith.addf %1652, %1656 : vector<2x128xf32>
    %1658 = arith.mulf %1624, %1638 : vector<2x1xf32>
    %1659 = vector.extract_strided_slice %1014 {offsets = [8, 0], sizes = [2, 128], strides = [1, 1]} : vector<16x128xf32> to vector<2x128xf32>
    %1660 = vector.broadcast %1658 : vector<2x1xf32> to vector<2x128xf32>
    %1661 = arith.mulf %1660, %1659 : vector<2x128xf32>
    %1662 = arith.addf %1657, %1661 : vector<2x128xf32>
    %1663 = arith.mulf %1626, %1638 : vector<2x1xf32>
    %1664 = vector.extract_strided_slice %1014 {offsets = [10, 0], sizes = [2, 128], strides = [1, 1]} : vector<16x128xf32> to vector<2x128xf32>
    %1665 = vector.broadcast %1663 : vector<2x1xf32> to vector<2x128xf32>
    %1666 = arith.mulf %1665, %1664 : vector<2x128xf32>
    %1667 = arith.addf %1662, %1666 : vector<2x128xf32>
    %1668 = arith.mulf %1628, %1638 : vector<2x1xf32>
    %1669 = vector.extract_strided_slice %1014 {offsets = [12, 0], sizes = [2, 128], strides = [1, 1]} : vector<16x128xf32> to vector<2x128xf32>
    %1670 = vector.broadcast %1668 : vector<2x1xf32> to vector<2x128xf32>
    %1671 = arith.mulf %1670, %1669 : vector<2x128xf32>
    %1672 = arith.addf %1667, %1671 : vector<2x128xf32>
    %1673 = arith.mulf %1630, %1638 : vector<2x1xf32>
    %1674 = vector.extract_strided_slice %1014 {offsets = [14, 0], sizes = [2, 128], strides = [1, 1]} : vector<16x128xf32> to vector<2x128xf32>
    %1675 = vector.broadcast %1673 : vector<2x1xf32> to vector<2x128xf32>
    %1676 = arith.mulf %1675, %1674 : vector<2x128xf32>
    %1677 = arith.addf %1672, %1676 : vector<2x128xf32>
    %cst_311 = arith.constant dense<0.000000e+00> : vector<2x128xf32>
    %1678 = tpu.matmul %1528, %1015, %cst_311 {dimension_numbers = #tpu.dot_dimension_numbers<[1], [0], [0], [1], [0, 0, 1, 1], [], []>} : vector<2x32xf32>, vector<32x128xf32>, vector<2x128xf32> -> vector<2x128xf32>
    %1679 = arith.addf %1677, %1678 : vector<2x128xf32>
    %1680 = vector.broadcast %1016 : vector<1x128xf32> to vector<2x128xf32>
    %1681 = arith.addf %1679, %1680 : vector<2x128xf32>
    %cst_312 = arith.constant 2.000000e+00 : f32
    %1682 = vector.broadcast %cst_312 : f32 to vector<2x128xf32>
    %1683 = arith.mulf %1682, %1681 : vector<2x128xf32>
    %1684 = vector.shape_cast %5 : vector<1x128xi1> to vector<1x128xi1>
    %1685 = vector.broadcast %1684 : vector<1x128xi1> to vector<2x128xi1>
    %1686 = arith.select %1685, %1683, %1681 : vector<2x128xi1>, vector<2x128xf32>
    %1687 = arith.negf %1686 : vector<2x128xf32>
    %1688 = math.exp %1687 : vector<2x128xf32>
    %cst_313 = arith.constant 1.000000e+00 : f32
    %1689 = vector.broadcast %cst_313 : f32 to vector<2x128xf32>
    %1690 = arith.addf %1689, %1688 : vector<2x128xf32>
    %1691 = arith.divf %1689, %1690 : vector<2x128xf32>
    %cst_314 = arith.constant 2.000000e+00 : f32
    %1692 = vector.broadcast %cst_314 : f32 to vector<2x128xf32>
    %1693 = arith.mulf %1692, %1691 : vector<2x128xf32>
    %cst_315 = arith.constant 1.000000e+00 : f32
    %1694 = vector.broadcast %cst_315 : f32 to vector<2x128xf32>
    %1695 = arith.subf %1693, %1694 : vector<2x128xf32>
    %1696 = vector.shape_cast %5 : vector<1x128xi1> to vector<1x128xi1>
    %1697 = vector.broadcast %1696 : vector<1x128xi1> to vector<2x128xi1>
    %1698 = arith.select %1697, %1695, %1691 : vector<2x128xi1>, vector<2x128xf32>
    %1699 = vector.extract_strided_slice %1698 {offsets = [0, 0], sizes = [2, 32], strides = [1, 1]} : vector<2x128xf32> to vector<2x32xf32>
    %1700 = vector.extract_strided_slice %1698 {offsets = [0, 32], sizes = [2, 32], strides = [1, 1]} : vector<2x128xf32> to vector<2x32xf32>
    %1701 = vector.extract_strided_slice %1698 {offsets = [0, 64], sizes = [2, 32], strides = [1, 1]} : vector<2x128xf32> to vector<2x32xf32>
    %1702 = vector.extract_strided_slice %1698 {offsets = [0, 96], sizes = [2, 32], strides = [1, 1]} : vector<2x128xf32> to vector<2x32xf32>
    %1703 = arith.mulf %1700, %1526 : vector<2x32xf32>
    %1704 = arith.mulf %1699, %1701 : vector<2x32xf32>
    %1705 = arith.addf %1703, %1704 : vector<2x32xf32>
    %1706 = math.tanh %1705 : vector<2x32xf32>
    %1707 = arith.mulf %1702, %1706 : vector<2x32xf32>
    %1708 = tpu.concatenate %1707, %1558 in 1 : vector<2x32xf32>, vector<2x32xf32> -> vector<2x64xf32>
    %cst_316 = arith.constant dense<0.000000e+00> : vector<2x128xf32>
    %1709 = tpu.matmul %1708, %1017, %cst_316 {dimension_numbers = #tpu.dot_dimension_numbers<[1], [0], [0], [1], [0, 0, 1, 1], [], []>} : vector<2x64xf32>, vector<64x128xf32>, vector<2x128xf32> -> vector<2x128xf32>
    %1710 = vector.broadcast %1018 : vector<1x128xf32> to vector<2x128xf32>
    %1711 = arith.addf %1709, %1710 : vector<2x128xf32>
    %cst_317 = arith.constant 2.000000e+00 : f32
    %1712 = vector.broadcast %cst_317 : f32 to vector<2x128xf32>
    %1713 = arith.mulf %1712, %1711 : vector<2x128xf32>
    %1714 = vector.shape_cast %5 : vector<1x128xi1> to vector<1x128xi1>
    %1715 = vector.broadcast %1714 : vector<1x128xi1> to vector<2x128xi1>
    %1716 = arith.select %1715, %1713, %1711 : vector<2x128xi1>, vector<2x128xf32>
    %1717 = arith.negf %1716 : vector<2x128xf32>
    %1718 = math.exp %1717 : vector<2x128xf32>
    %cst_318 = arith.constant 1.000000e+00 : f32
    %1719 = vector.broadcast %cst_318 : f32 to vector<2x128xf32>
    %1720 = arith.addf %1719, %1718 : vector<2x128xf32>
    %1721 = arith.divf %1719, %1720 : vector<2x128xf32>
    %cst_319 = arith.constant 2.000000e+00 : f32
    %1722 = vector.broadcast %cst_319 : f32 to vector<2x128xf32>
    %1723 = arith.mulf %1722, %1721 : vector<2x128xf32>
    %cst_320 = arith.constant 1.000000e+00 : f32
    %1724 = vector.broadcast %cst_320 : f32 to vector<2x128xf32>
    %1725 = arith.subf %1723, %1724 : vector<2x128xf32>
    %1726 = vector.shape_cast %5 : vector<1x128xi1> to vector<1x128xi1>
    %1727 = vector.broadcast %1726 : vector<1x128xi1> to vector<2x128xi1>
    %1728 = arith.select %1727, %1725, %1721 : vector<2x128xi1>, vector<2x128xf32>
    %1729 = vector.extract_strided_slice %1728 {offsets = [0, 0], sizes = [2, 32], strides = [1, 1]} : vector<2x128xf32> to vector<2x32xf32>
    %1730 = vector.extract_strided_slice %1728 {offsets = [0, 32], sizes = [2, 32], strides = [1, 1]} : vector<2x128xf32> to vector<2x32xf32>
    %1731 = vector.extract_strided_slice %1728 {offsets = [0, 64], sizes = [2, 32], strides = [1, 1]} : vector<2x128xf32> to vector<2x32xf32>
    %1732 = vector.extract_strided_slice %1728 {offsets = [0, 96], sizes = [2, 32], strides = [1, 1]} : vector<2x128xf32> to vector<2x32xf32>
    %1733 = arith.mulf %1730, %1556 : vector<2x32xf32>
    %1734 = arith.mulf %1729, %1731 : vector<2x32xf32>
    %1735 = arith.addf %1733, %1734 : vector<2x32xf32>
    %1736 = math.tanh %1735 : vector<2x32xf32>
    %1737 = arith.mulf %1732, %1736 : vector<2x32xf32>
    %c6_321 = arith.constant 6 : index
    %c0_322 = arith.constant 0 : index
    %1738 = vector.load %arg18[%c6_321, %c0_322] : memref<12x32xf32, #tpu.memory_space<vmem>>, vector<2x32xf32>
    tpu.vector_store %arg18[%c6_321, %c0_322], %1737 {strides = array<i32>} : memref<12x32xf32, #tpu.memory_space<vmem>>, vector<2x32xf32>,
    %1739 = vector.extract_strided_slice %1012 {offsets = [0, 0], sizes = [2, 32], strides = [1, 1]} : vector<16x32xf32> to vector<2x32xf32>
    %1740 = arith.mulf %1739, %1737 : vector<2x32xf32>
    %cst_323 = arith.constant dense<0.000000e+00> : vector<2xf32>
    %1741 = vector.multi_reduction <add>, %1740, %cst_323 [1] : vector<2x32xf32> to vector<2xf32>
    %1742 = vector.shape_cast %1741 : vector<2xf32> to vector<2x1xf32>
    %1743 = vector.extract_strided_slice %1010 {offsets = [0, 0], sizes = [2, 1], strides = [1, 1]} : vector<2x8xf32> to vector<2x1xf32>
    %1744 = arith.addf %1742, %1743 : vector<2x1xf32>
    %1745 = vector.extract_strided_slice %1012 {offsets = [2, 0], sizes = [2, 32], strides = [1, 1]} : vector<16x32xf32> to vector<2x32xf32>
    %1746 = arith.mulf %1745, %1737 : vector<2x32xf32>
    %cst_324 = arith.constant dense<0.000000e+00> : vector<2xf32>
    %1747 = vector.multi_reduction <add>, %1746, %cst_324 [1] : vector<2x32xf32> to vector<2xf32>
    %1748 = vector.shape_cast %1747 : vector<2xf32> to vector<2x1xf32>
    %1749 = vector.extract_strided_slice %1010 {offsets = [0, 1], sizes = [2, 1], strides = [1, 1]} : vector<2x8xf32> to vector<2x1xf32>
    %1750 = arith.addf %1748, %1749 : vector<2x1xf32>
    %1751 = vector.extract_strided_slice %1012 {offsets = [4, 0], sizes = [2, 32], strides = [1, 1]} : vector<16x32xf32> to vector<2x32xf32>
    %1752 = arith.mulf %1751, %1737 : vector<2x32xf32>
    %cst_325 = arith.constant dense<0.000000e+00> : vector<2xf32>
    %1753 = vector.multi_reduction <add>, %1752, %cst_325 [1] : vector<2x32xf32> to vector<2xf32>
    %1754 = vector.shape_cast %1753 : vector<2xf32> to vector<2x1xf32>
    %1755 = vector.extract_strided_slice %1010 {offsets = [0, 2], sizes = [2, 1], strides = [1, 1]} : vector<2x8xf32> to vector<2x1xf32>
    %1756 = arith.addf %1754, %1755 : vector<2x1xf32>
    %1757 = vector.extract_strided_slice %1012 {offsets = [6, 0], sizes = [2, 32], strides = [1, 1]} : vector<16x32xf32> to vector<2x32xf32>
    %1758 = arith.mulf %1757, %1737 : vector<2x32xf32>
    %cst_326 = arith.constant dense<0.000000e+00> : vector<2xf32>
    %1759 = vector.multi_reduction <add>, %1758, %cst_326 [1] : vector<2x32xf32> to vector<2xf32>
    %1760 = vector.shape_cast %1759 : vector<2xf32> to vector<2x1xf32>
    %1761 = vector.extract_strided_slice %1010 {offsets = [0, 3], sizes = [2, 1], strides = [1, 1]} : vector<2x8xf32> to vector<2x1xf32>
    %1762 = arith.addf %1760, %1761 : vector<2x1xf32>
    %1763 = vector.extract_strided_slice %1012 {offsets = [8, 0], sizes = [2, 32], strides = [1, 1]} : vector<16x32xf32> to vector<2x32xf32>
    %1764 = arith.mulf %1763, %1737 : vector<2x32xf32>
    %cst_327 = arith.constant dense<0.000000e+00> : vector<2xf32>
    %1765 = vector.multi_reduction <add>, %1764, %cst_327 [1] : vector<2x32xf32> to vector<2xf32>
    %1766 = vector.shape_cast %1765 : vector<2xf32> to vector<2x1xf32>
    %1767 = vector.extract_strided_slice %1010 {offsets = [0, 4], sizes = [2, 1], strides = [1, 1]} : vector<2x8xf32> to vector<2x1xf32>
    %1768 = arith.addf %1766, %1767 : vector<2x1xf32>
    %1769 = vector.extract_strided_slice %1012 {offsets = [10, 0], sizes = [2, 32], strides = [1, 1]} : vector<16x32xf32> to vector<2x32xf32>
    %1770 = arith.mulf %1769, %1737 : vector<2x32xf32>
    %cst_328 = arith.constant dense<0.000000e+00> : vector<2xf32>
    %1771 = vector.multi_reduction <add>, %1770, %cst_328 [1] : vector<2x32xf32> to vector<2xf32>
    %1772 = vector.shape_cast %1771 : vector<2xf32> to vector<2x1xf32>
    %1773 = vector.extract_strided_slice %1010 {offsets = [0, 5], sizes = [2, 1], strides = [1, 1]} : vector<2x8xf32> to vector<2x1xf32>
    %1774 = arith.addf %1772, %1773 : vector<2x1xf32>
    %1775 = vector.extract_strided_slice %1012 {offsets = [12, 0], sizes = [2, 32], strides = [1, 1]} : vector<16x32xf32> to vector<2x32xf32>
    %1776 = arith.mulf %1775, %1737 : vector<2x32xf32>
    %cst_329 = arith.constant dense<0.000000e+00> : vector<2xf32>
    %1777 = vector.multi_reduction <add>, %1776, %cst_329 [1] : vector<2x32xf32> to vector<2xf32>
    %1778 = vector.shape_cast %1777 : vector<2xf32> to vector<2x1xf32>
    %1779 = vector.extract_strided_slice %1010 {offsets = [0, 6], sizes = [2, 1], strides = [1, 1]} : vector<2x8xf32> to vector<2x1xf32>
    %1780 = arith.addf %1778, %1779 : vector<2x1xf32>
    %1781 = vector.extract_strided_slice %1012 {offsets = [14, 0], sizes = [2, 32], strides = [1, 1]} : vector<16x32xf32> to vector<2x32xf32>
    %1782 = arith.mulf %1781, %1737 : vector<2x32xf32>
    %cst_330 = arith.constant dense<0.000000e+00> : vector<2xf32>
    %1783 = vector.multi_reduction <add>, %1782, %cst_330 [1] : vector<2x32xf32> to vector<2xf32>
    %1784 = vector.shape_cast %1783 : vector<2xf32> to vector<2x1xf32>
    %1785 = vector.extract_strided_slice %1010 {offsets = [0, 7], sizes = [2, 1], strides = [1, 1]} : vector<2x8xf32> to vector<2x1xf32>
    %1786 = arith.addf %1784, %1785 : vector<2x1xf32>
    %1787 = arith.maximumf %1744, %1750 : vector<2x1xf32>
    %1788 = arith.maximumf %1787, %1756 : vector<2x1xf32>
    %1789 = arith.maximumf %1788, %1762 : vector<2x1xf32>
    %1790 = arith.maximumf %1789, %1768 : vector<2x1xf32>
    %1791 = arith.maximumf %1790, %1774 : vector<2x1xf32>
    %1792 = arith.maximumf %1791, %1780 : vector<2x1xf32>
    %1793 = arith.maximumf %1792, %1786 : vector<2x1xf32>
    %1794 = arith.subf %1744, %1793 : vector<2x1xf32>
    %1795 = math.exp %1794 : vector<2x1xf32>
    %1796 = arith.subf %1750, %1793 : vector<2x1xf32>
    %1797 = math.exp %1796 : vector<2x1xf32>
    %1798 = arith.subf %1756, %1793 : vector<2x1xf32>
    %1799 = math.exp %1798 : vector<2x1xf32>
    %1800 = arith.subf %1762, %1793 : vector<2x1xf32>
    %1801 = math.exp %1800 : vector<2x1xf32>
    %1802 = arith.subf %1768, %1793 : vector<2x1xf32>
    %1803 = math.exp %1802 : vector<2x1xf32>
    %1804 = arith.subf %1774, %1793 : vector<2x1xf32>
    %1805 = math.exp %1804 : vector<2x1xf32>
    %1806 = arith.subf %1780, %1793 : vector<2x1xf32>
    %1807 = math.exp %1806 : vector<2x1xf32>
    %1808 = arith.subf %1786, %1793 : vector<2x1xf32>
    %1809 = math.exp %1808 : vector<2x1xf32>
    %1810 = arith.addf %1795, %1797 : vector<2x1xf32>
    %1811 = arith.addf %1810, %1799 : vector<2x1xf32>
    %1812 = arith.addf %1811, %1801 : vector<2x1xf32>
    %1813 = arith.addf %1812, %1803 : vector<2x1xf32>
    %1814 = arith.addf %1813, %1805 : vector<2x1xf32>
    %1815 = arith.addf %1814, %1807 : vector<2x1xf32>
    %1816 = arith.addf %1815, %1809 : vector<2x1xf32>
    %1817 = tpu.reciprocal %1816 {approx = true} : vector<2x1xf32> -> vector<2x1xf32>
    %1818 = arith.mulf %1795, %1817 : vector<2x1xf32>
    %1819 = vector.extract_strided_slice %1014 {offsets = [0, 0], sizes = [2, 128], strides = [1, 1]} : vector<16x128xf32> to vector<2x128xf32>
    %1820 = vector.broadcast %1818 : vector<2x1xf32> to vector<2x128xf32>
    %1821 = arith.mulf %1820, %1819 : vector<2x128xf32>
    %1822 = arith.mulf %1797, %1817 : vector<2x1xf32>
    %1823 = vector.extract_strided_slice %1014 {offsets = [2, 0], sizes = [2, 128], strides = [1, 1]} : vector<16x128xf32> to vector<2x128xf32>
    %1824 = vector.broadcast %1822 : vector<2x1xf32> to vector<2x128xf32>
    %1825 = arith.mulf %1824, %1823 : vector<2x128xf32>
    %1826 = arith.addf %1821, %1825 : vector<2x128xf32>
    %1827 = arith.mulf %1799, %1817 : vector<2x1xf32>
    %1828 = vector.extract_strided_slice %1014 {offsets = [4, 0], sizes = [2, 128], strides = [1, 1]} : vector<16x128xf32> to vector<2x128xf32>
    %1829 = vector.broadcast %1827 : vector<2x1xf32> to vector<2x128xf32>
    %1830 = arith.mulf %1829, %1828 : vector<2x128xf32>
    %1831 = arith.addf %1826, %1830 : vector<2x128xf32>
    %1832 = arith.mulf %1801, %1817 : vector<2x1xf32>
    %1833 = vector.extract_strided_slice %1014 {offsets = [6, 0], sizes = [2, 128], strides = [1, 1]} : vector<16x128xf32> to vector<2x128xf32>
    %1834 = vector.broadcast %1832 : vector<2x1xf32> to vector<2x128xf32>
    %1835 = arith.mulf %1834, %1833 : vector<2x128xf32>
    %1836 = arith.addf %1831, %1835 : vector<2x128xf32>
    %1837 = arith.mulf %1803, %1817 : vector<2x1xf32>
    %1838 = vector.extract_strided_slice %1014 {offsets = [8, 0], sizes = [2, 128], strides = [1, 1]} : vector<16x128xf32> to vector<2x128xf32>
    %1839 = vector.broadcast %1837 : vector<2x1xf32> to vector<2x128xf32>
    %1840 = arith.mulf %1839, %1838 : vector<2x128xf32>
    %1841 = arith.addf %1836, %1840 : vector<2x128xf32>
    %1842 = arith.mulf %1805, %1817 : vector<2x1xf32>
    %1843 = vector.extract_strided_slice %1014 {offsets = [10, 0], sizes = [2, 128], strides = [1, 1]} : vector<16x128xf32> to vector<2x128xf32>
    %1844 = vector.broadcast %1842 : vector<2x1xf32> to vector<2x128xf32>
    %1845 = arith.mulf %1844, %1843 : vector<2x128xf32>
    %1846 = arith.addf %1841, %1845 : vector<2x128xf32>
    %1847 = arith.mulf %1807, %1817 : vector<2x1xf32>
    %1848 = vector.extract_strided_slice %1014 {offsets = [12, 0], sizes = [2, 128], strides = [1, 1]} : vector<16x128xf32> to vector<2x128xf32>
    %1849 = vector.broadcast %1847 : vector<2x1xf32> to vector<2x128xf32>
    %1850 = arith.mulf %1849, %1848 : vector<2x128xf32>
    %1851 = arith.addf %1846, %1850 : vector<2x128xf32>
    %1852 = arith.mulf %1809, %1817 : vector<2x1xf32>
    %1853 = vector.extract_strided_slice %1014 {offsets = [14, 0], sizes = [2, 128], strides = [1, 1]} : vector<16x128xf32> to vector<2x128xf32>
    %1854 = vector.broadcast %1852 : vector<2x1xf32> to vector<2x128xf32>
    %1855 = arith.mulf %1854, %1853 : vector<2x128xf32>
    %1856 = arith.addf %1851, %1855 : vector<2x128xf32>
    %cst_331 = arith.constant dense<0.000000e+00> : vector<2x128xf32>
    %1857 = tpu.matmul %1707, %1015, %cst_331 {dimension_numbers = #tpu.dot_dimension_numbers<[1], [0], [0], [1], [0, 0, 1, 1], [], []>} : vector<2x32xf32>, vector<32x128xf32>, vector<2x128xf32> -> vector<2x128xf32>
    %1858 = arith.addf %1856, %1857 : vector<2x128xf32>
    %1859 = vector.broadcast %1016 : vector<1x128xf32> to vector<2x128xf32>
    %1860 = arith.addf %1858, %1859 : vector<2x128xf32>
    %cst_332 = arith.constant 2.000000e+00 : f32
    %1861 = vector.broadcast %cst_332 : f32 to vector<2x128xf32>
    %1862 = arith.mulf %1861, %1860 : vector<2x128xf32>
    %1863 = vector.shape_cast %5 : vector<1x128xi1> to vector<1x128xi1>
    %1864 = vector.broadcast %1863 : vector<1x128xi1> to vector<2x128xi1>
    %1865 = arith.select %1864, %1862, %1860 : vector<2x128xi1>, vector<2x128xf32>
    %1866 = arith.negf %1865 : vector<2x128xf32>
    %1867 = math.exp %1866 : vector<2x128xf32>
    %cst_333 = arith.constant 1.000000e+00 : f32
    %1868 = vector.broadcast %cst_333 : f32 to vector<2x128xf32>
    %1869 = arith.addf %1868, %1867 : vector<2x128xf32>
    %1870 = arith.divf %1868, %1869 : vector<2x128xf32>
    %cst_334 = arith.constant 2.000000e+00 : f32
    %1871 = vector.broadcast %cst_334 : f32 to vector<2x128xf32>
    %1872 = arith.mulf %1871, %1870 : vector<2x128xf32>
    %cst_335 = arith.constant 1.000000e+00 : f32
    %1873 = vector.broadcast %cst_335 : f32 to vector<2x128xf32>
    %1874 = arith.subf %1872, %1873 : vector<2x128xf32>
    %1875 = vector.shape_cast %5 : vector<1x128xi1> to vector<1x128xi1>
    %1876 = vector.broadcast %1875 : vector<1x128xi1> to vector<2x128xi1>
    %1877 = arith.select %1876, %1874, %1870 : vector<2x128xi1>, vector<2x128xf32>
    %1878 = vector.extract_strided_slice %1877 {offsets = [0, 0], sizes = [2, 32], strides = [1, 1]} : vector<2x128xf32> to vector<2x32xf32>
    %1879 = vector.extract_strided_slice %1877 {offsets = [0, 32], sizes = [2, 32], strides = [1, 1]} : vector<2x128xf32> to vector<2x32xf32>
    %1880 = vector.extract_strided_slice %1877 {offsets = [0, 64], sizes = [2, 32], strides = [1, 1]} : vector<2x128xf32> to vector<2x32xf32>
    %1881 = vector.extract_strided_slice %1877 {offsets = [0, 96], sizes = [2, 32], strides = [1, 1]} : vector<2x128xf32> to vector<2x32xf32>
    %1882 = arith.mulf %1879, %1705 : vector<2x32xf32>
    %1883 = arith.mulf %1878, %1880 : vector<2x32xf32>
    %1884 = arith.addf %1882, %1883 : vector<2x32xf32>
    %1885 = math.tanh %1884 : vector<2x32xf32>
    %1886 = arith.mulf %1881, %1885 : vector<2x32xf32>
    %1887 = tpu.concatenate %1886, %1737 in 1 : vector<2x32xf32>, vector<2x32xf32> -> vector<2x64xf32>
    %cst_336 = arith.constant dense<0.000000e+00> : vector<2x128xf32>
    %1888 = tpu.matmul %1887, %1017, %cst_336 {dimension_numbers = #tpu.dot_dimension_numbers<[1], [0], [0], [1], [0, 0, 1, 1], [], []>} : vector<2x64xf32>, vector<64x128xf32>, vector<2x128xf32> -> vector<2x128xf32>
    %1889 = vector.broadcast %1018 : vector<1x128xf32> to vector<2x128xf32>
    %1890 = arith.addf %1888, %1889 : vector<2x128xf32>
    %cst_337 = arith.constant 2.000000e+00 : f32
    %1891 = vector.broadcast %cst_337 : f32 to vector<2x128xf32>
    %1892 = arith.mulf %1891, %1890 : vector<2x128xf32>
    %1893 = vector.shape_cast %5 : vector<1x128xi1> to vector<1x128xi1>
    %1894 = vector.broadcast %1893 : vector<1x128xi1> to vector<2x128xi1>
    %1895 = arith.select %1894, %1892, %1890 : vector<2x128xi1>, vector<2x128xf32>
    %1896 = arith.negf %1895 : vector<2x128xf32>
    %1897 = math.exp %1896 : vector<2x128xf32>
    %cst_338 = arith.constant 1.000000e+00 : f32
    %1898 = vector.broadcast %cst_338 : f32 to vector<2x128xf32>
    %1899 = arith.addf %1898, %1897 : vector<2x128xf32>
    %1900 = arith.divf %1898, %1899 : vector<2x128xf32>
    %cst_339 = arith.constant 2.000000e+00 : f32
    %1901 = vector.broadcast %cst_339 : f32 to vector<2x128xf32>
    %1902 = arith.mulf %1901, %1900 : vector<2x128xf32>
    %cst_340 = arith.constant 1.000000e+00 : f32
    %1903 = vector.broadcast %cst_340 : f32 to vector<2x128xf32>
    %1904 = arith.subf %1902, %1903 : vector<2x128xf32>
    %1905 = vector.shape_cast %5 : vector<1x128xi1> to vector<1x128xi1>
    %1906 = vector.broadcast %1905 : vector<1x128xi1> to vector<2x128xi1>
    %1907 = arith.select %1906, %1904, %1900 : vector<2x128xi1>, vector<2x128xf32>
    %1908 = vector.extract_strided_slice %1907 {offsets = [0, 0], sizes = [2, 32], strides = [1, 1]} : vector<2x128xf32> to vector<2x32xf32>
    %1909 = vector.extract_strided_slice %1907 {offsets = [0, 32], sizes = [2, 32], strides = [1, 1]} : vector<2x128xf32> to vector<2x32xf32>
    %1910 = vector.extract_strided_slice %1907 {offsets = [0, 64], sizes = [2, 32], strides = [1, 1]} : vector<2x128xf32> to vector<2x32xf32>
    %1911 = vector.extract_strided_slice %1907 {offsets = [0, 96], sizes = [2, 32], strides = [1, 1]} : vector<2x128xf32> to vector<2x32xf32>
    %1912 = arith.mulf %1909, %1735 : vector<2x32xf32>
    %1913 = arith.mulf %1908, %1910 : vector<2x32xf32>
    %1914 = arith.addf %1912, %1913 : vector<2x32xf32>
    %1915 = math.tanh %1914 : vector<2x32xf32>
    %1916 = arith.mulf %1911, %1915 : vector<2x32xf32>
    %c8_341 = arith.constant 8 : index
    %c0_342 = arith.constant 0 : index
    %1917 = vector.load %arg18[%c8_341, %c0_342] : memref<12x32xf32, #tpu.memory_space<vmem>>, vector<2x32xf32>
    tpu.vector_store %arg18[%c8_341, %c0_342], %1916 {strides = array<i32>} : memref<12x32xf32, #tpu.memory_space<vmem>>, vector<2x32xf32>,
    %1918 = vector.extract_strided_slice %1012 {offsets = [0, 0], sizes = [2, 32], strides = [1, 1]} : vector<16x32xf32> to vector<2x32xf32>
    %1919 = arith.mulf %1918, %1916 : vector<2x32xf32>
    %cst_343 = arith.constant dense<0.000000e+00> : vector<2xf32>
    %1920 = vector.multi_reduction <add>, %1919, %cst_343 [1] : vector<2x32xf32> to vector<2xf32>
    %1921 = vector.shape_cast %1920 : vector<2xf32> to vector<2x1xf32>
    %1922 = vector.extract_strided_slice %1010 {offsets = [0, 0], sizes = [2, 1], strides = [1, 1]} : vector<2x8xf32> to vector<2x1xf32>
    %1923 = arith.addf %1921, %1922 : vector<2x1xf32>
    %1924 = vector.extract_strided_slice %1012 {offsets = [2, 0], sizes = [2, 32], strides = [1, 1]} : vector<16x32xf32> to vector<2x32xf32>
    %1925 = arith.mulf %1924, %1916 : vector<2x32xf32>
    %cst_344 = arith.constant dense<0.000000e+00> : vector<2xf32>
    %1926 = vector.multi_reduction <add>, %1925, %cst_344 [1] : vector<2x32xf32> to vector<2xf32>
    %1927 = vector.shape_cast %1926 : vector<2xf32> to vector<2x1xf32>
    %1928 = vector.extract_strided_slice %1010 {offsets = [0, 1], sizes = [2, 1], strides = [1, 1]} : vector<2x8xf32> to vector<2x1xf32>
    %1929 = arith.addf %1927, %1928 : vector<2x1xf32>
    %1930 = vector.extract_strided_slice %1012 {offsets = [4, 0], sizes = [2, 32], strides = [1, 1]} : vector<16x32xf32> to vector<2x32xf32>
    %1931 = arith.mulf %1930, %1916 : vector<2x32xf32>
    %cst_345 = arith.constant dense<0.000000e+00> : vector<2xf32>
    %1932 = vector.multi_reduction <add>, %1931, %cst_345 [1] : vector<2x32xf32> to vector<2xf32>
    %1933 = vector.shape_cast %1932 : vector<2xf32> to vector<2x1xf32>
    %1934 = vector.extract_strided_slice %1010 {offsets = [0, 2], sizes = [2, 1], strides = [1, 1]} : vector<2x8xf32> to vector<2x1xf32>
    %1935 = arith.addf %1933, %1934 : vector<2x1xf32>
    %1936 = vector.extract_strided_slice %1012 {offsets = [6, 0], sizes = [2, 32], strides = [1, 1]} : vector<16x32xf32> to vector<2x32xf32>
    %1937 = arith.mulf %1936, %1916 : vector<2x32xf32>
    %cst_346 = arith.constant dense<0.000000e+00> : vector<2xf32>
    %1938 = vector.multi_reduction <add>, %1937, %cst_346 [1] : vector<2x32xf32> to vector<2xf32>
    %1939 = vector.shape_cast %1938 : vector<2xf32> to vector<2x1xf32>
    %1940 = vector.extract_strided_slice %1010 {offsets = [0, 3], sizes = [2, 1], strides = [1, 1]} : vector<2x8xf32> to vector<2x1xf32>
    %1941 = arith.addf %1939, %1940 : vector<2x1xf32>
    %1942 = vector.extract_strided_slice %1012 {offsets = [8, 0], sizes = [2, 32], strides = [1, 1]} : vector<16x32xf32> to vector<2x32xf32>
    %1943 = arith.mulf %1942, %1916 : vector<2x32xf32>
    %cst_347 = arith.constant dense<0.000000e+00> : vector<2xf32>
    %1944 = vector.multi_reduction <add>, %1943, %cst_347 [1] : vector<2x32xf32> to vector<2xf32>
    %1945 = vector.shape_cast %1944 : vector<2xf32> to vector<2x1xf32>
    %1946 = vector.extract_strided_slice %1010 {offsets = [0, 4], sizes = [2, 1], strides = [1, 1]} : vector<2x8xf32> to vector<2x1xf32>
    %1947 = arith.addf %1945, %1946 : vector<2x1xf32>
    %1948 = vector.extract_strided_slice %1012 {offsets = [10, 0], sizes = [2, 32], strides = [1, 1]} : vector<16x32xf32> to vector<2x32xf32>
    %1949 = arith.mulf %1948, %1916 : vector<2x32xf32>
    %cst_348 = arith.constant dense<0.000000e+00> : vector<2xf32>
    %1950 = vector.multi_reduction <add>, %1949, %cst_348 [1] : vector<2x32xf32> to vector<2xf32>
    %1951 = vector.shape_cast %1950 : vector<2xf32> to vector<2x1xf32>
    %1952 = vector.extract_strided_slice %1010 {offsets = [0, 5], sizes = [2, 1], strides = [1, 1]} : vector<2x8xf32> to vector<2x1xf32>
    %1953 = arith.addf %1951, %1952 : vector<2x1xf32>
    %1954 = vector.extract_strided_slice %1012 {offsets = [12, 0], sizes = [2, 32], strides = [1, 1]} : vector<16x32xf32> to vector<2x32xf32>
    %1955 = arith.mulf %1954, %1916 : vector<2x32xf32>
    %cst_349 = arith.constant dense<0.000000e+00> : vector<2xf32>
    %1956 = vector.multi_reduction <add>, %1955, %cst_349 [1] : vector<2x32xf32> to vector<2xf32>
    %1957 = vector.shape_cast %1956 : vector<2xf32> to vector<2x1xf32>
    %1958 = vector.extract_strided_slice %1010 {offsets = [0, 6], sizes = [2, 1], strides = [1, 1]} : vector<2x8xf32> to vector<2x1xf32>
    %1959 = arith.addf %1957, %1958 : vector<2x1xf32>
    %1960 = vector.extract_strided_slice %1012 {offsets = [14, 0], sizes = [2, 32], strides = [1, 1]} : vector<16x32xf32> to vector<2x32xf32>
    %1961 = arith.mulf %1960, %1916 : vector<2x32xf32>
    %cst_350 = arith.constant dense<0.000000e+00> : vector<2xf32>
    %1962 = vector.multi_reduction <add>, %1961, %cst_350 [1] : vector<2x32xf32> to vector<2xf32>
    %1963 = vector.shape_cast %1962 : vector<2xf32> to vector<2x1xf32>
    %1964 = vector.extract_strided_slice %1010 {offsets = [0, 7], sizes = [2, 1], strides = [1, 1]} : vector<2x8xf32> to vector<2x1xf32>
    %1965 = arith.addf %1963, %1964 : vector<2x1xf32>
    %1966 = arith.maximumf %1923, %1929 : vector<2x1xf32>
    %1967 = arith.maximumf %1966, %1935 : vector<2x1xf32>
    %1968 = arith.maximumf %1967, %1941 : vector<2x1xf32>
    %1969 = arith.maximumf %1968, %1947 : vector<2x1xf32>
    %1970 = arith.maximumf %1969, %1953 : vector<2x1xf32>
    %1971 = arith.maximumf %1970, %1959 : vector<2x1xf32>
    %1972 = arith.maximumf %1971, %1965 : vector<2x1xf32>
    %1973 = arith.subf %1923, %1972 : vector<2x1xf32>
    %1974 = math.exp %1973 : vector<2x1xf32>
    %1975 = arith.subf %1929, %1972 : vector<2x1xf32>
    %1976 = math.exp %1975 : vector<2x1xf32>
    %1977 = arith.subf %1935, %1972 : vector<2x1xf32>
    %1978 = math.exp %1977 : vector<2x1xf32>
    %1979 = arith.subf %1941, %1972 : vector<2x1xf32>
    %1980 = math.exp %1979 : vector<2x1xf32>
    %1981 = arith.subf %1947, %1972 : vector<2x1xf32>
    %1982 = math.exp %1981 : vector<2x1xf32>
    %1983 = arith.subf %1953, %1972 : vector<2x1xf32>
    %1984 = math.exp %1983 : vector<2x1xf32>
    %1985 = arith.subf %1959, %1972 : vector<2x1xf32>
    %1986 = math.exp %1985 : vector<2x1xf32>
    %1987 = arith.subf %1965, %1972 : vector<2x1xf32>
    %1988 = math.exp %1987 : vector<2x1xf32>
    %1989 = arith.addf %1974, %1976 : vector<2x1xf32>
    %1990 = arith.addf %1989, %1978 : vector<2x1xf32>
    %1991 = arith.addf %1990, %1980 : vector<2x1xf32>
    %1992 = arith.addf %1991, %1982 : vector<2x1xf32>
    %1993 = arith.addf %1992, %1984 : vector<2x1xf32>
    %1994 = arith.addf %1993, %1986 : vector<2x1xf32>
    %1995 = arith.addf %1994, %1988 : vector<2x1xf32>
    %1996 = tpu.reciprocal %1995 {approx = true} : vector<2x1xf32> -> vector<2x1xf32>
    %1997 = arith.mulf %1974, %1996 : vector<2x1xf32>
    %1998 = vector.extract_strided_slice %1014 {offsets = [0, 0], sizes = [2, 128], strides = [1, 1]} : vector<16x128xf32> to vector<2x128xf32>
    %1999 = vector.broadcast %1997 : vector<2x1xf32> to vector<2x128xf32>
    %2000 = arith.mulf %1999, %1998 : vector<2x128xf32>
    %2001 = arith.mulf %1976, %1996 : vector<2x1xf32>
    %2002 = vector.extract_strided_slice %1014 {offsets = [2, 0], sizes = [2, 128], strides = [1, 1]} : vector<16x128xf32> to vector<2x128xf32>
    %2003 = vector.broadcast %2001 : vector<2x1xf32> to vector<2x128xf32>
    %2004 = arith.mulf %2003, %2002 : vector<2x128xf32>
    %2005 = arith.addf %2000, %2004 : vector<2x128xf32>
    %2006 = arith.mulf %1978, %1996 : vector<2x1xf32>
    %2007 = vector.extract_strided_slice %1014 {offsets = [4, 0], sizes = [2, 128], strides = [1, 1]} : vector<16x128xf32> to vector<2x128xf32>
    %2008 = vector.broadcast %2006 : vector<2x1xf32> to vector<2x128xf32>
    %2009 = arith.mulf %2008, %2007 : vector<2x128xf32>
    %2010 = arith.addf %2005, %2009 : vector<2x128xf32>
    %2011 = arith.mulf %1980, %1996 : vector<2x1xf32>
    %2012 = vector.extract_strided_slice %1014 {offsets = [6, 0], sizes = [2, 128], strides = [1, 1]} : vector<16x128xf32> to vector<2x128xf32>
    %2013 = vector.broadcast %2011 : vector<2x1xf32> to vector<2x128xf32>
    %2014 = arith.mulf %2013, %2012 : vector<2x128xf32>
    %2015 = arith.addf %2010, %2014 : vector<2x128xf32>
    %2016 = arith.mulf %1982, %1996 : vector<2x1xf32>
    %2017 = vector.extract_strided_slice %1014 {offsets = [8, 0], sizes = [2, 128], strides = [1, 1]} : vector<16x128xf32> to vector<2x128xf32>
    %2018 = vector.broadcast %2016 : vector<2x1xf32> to vector<2x128xf32>
    %2019 = arith.mulf %2018, %2017 : vector<2x128xf32>
    %2020 = arith.addf %2015, %2019 : vector<2x128xf32>
    %2021 = arith.mulf %1984, %1996 : vector<2x1xf32>
    %2022 = vector.extract_strided_slice %1014 {offsets = [10, 0], sizes = [2, 128], strides = [1, 1]} : vector<16x128xf32> to vector<2x128xf32>
    %2023 = vector.broadcast %2021 : vector<2x1xf32> to vector<2x128xf32>
    %2024 = arith.mulf %2023, %2022 : vector<2x128xf32>
    %2025 = arith.addf %2020, %2024 : vector<2x128xf32>
    %2026 = arith.mulf %1986, %1996 : vector<2x1xf32>
    %2027 = vector.extract_strided_slice %1014 {offsets = [12, 0], sizes = [2, 128], strides = [1, 1]} : vector<16x128xf32> to vector<2x128xf32>
    %2028 = vector.broadcast %2026 : vector<2x1xf32> to vector<2x128xf32>
    %2029 = arith.mulf %2028, %2027 : vector<2x128xf32>
    %2030 = arith.addf %2025, %2029 : vector<2x128xf32>
    %2031 = arith.mulf %1988, %1996 : vector<2x1xf32>
    %2032 = vector.extract_strided_slice %1014 {offsets = [14, 0], sizes = [2, 128], strides = [1, 1]} : vector<16x128xf32> to vector<2x128xf32>
    %2033 = vector.broadcast %2031 : vector<2x1xf32> to vector<2x128xf32>
    %2034 = arith.mulf %2033, %2032 : vector<2x128xf32>
    %2035 = arith.addf %2030, %2034 : vector<2x128xf32>
    %cst_351 = arith.constant dense<0.000000e+00> : vector<2x128xf32>
    %2036 = tpu.matmul %1886, %1015, %cst_351 {dimension_numbers = #tpu.dot_dimension_numbers<[1], [0], [0], [1], [0, 0, 1, 1], [], []>} : vector<2x32xf32>, vector<32x128xf32>, vector<2x128xf32> -> vector<2x128xf32>
    %2037 = arith.addf %2035, %2036 : vector<2x128xf32>
    %2038 = vector.broadcast %1016 : vector<1x128xf32> to vector<2x128xf32>
    %2039 = arith.addf %2037, %2038 : vector<2x128xf32>
    %cst_352 = arith.constant 2.000000e+00 : f32
    %2040 = vector.broadcast %cst_352 : f32 to vector<2x128xf32>
    %2041 = arith.mulf %2040, %2039 : vector<2x128xf32>
    %2042 = vector.shape_cast %5 : vector<1x128xi1> to vector<1x128xi1>
    %2043 = vector.broadcast %2042 : vector<1x128xi1> to vector<2x128xi1>
    %2044 = arith.select %2043, %2041, %2039 : vector<2x128xi1>, vector<2x128xf32>
    %2045 = arith.negf %2044 : vector<2x128xf32>
    %2046 = math.exp %2045 : vector<2x128xf32>
    %cst_353 = arith.constant 1.000000e+00 : f32
    %2047 = vector.broadcast %cst_353 : f32 to vector<2x128xf32>
    %2048 = arith.addf %2047, %2046 : vector<2x128xf32>
    %2049 = arith.divf %2047, %2048 : vector<2x128xf32>
    %cst_354 = arith.constant 2.000000e+00 : f32
    %2050 = vector.broadcast %cst_354 : f32 to vector<2x128xf32>
    %2051 = arith.mulf %2050, %2049 : vector<2x128xf32>
    %cst_355 = arith.constant 1.000000e+00 : f32
    %2052 = vector.broadcast %cst_355 : f32 to vector<2x128xf32>
    %2053 = arith.subf %2051, %2052 : vector<2x128xf32>
    %2054 = vector.shape_cast %5 : vector<1x128xi1> to vector<1x128xi1>
    %2055 = vector.broadcast %2054 : vector<1x128xi1> to vector<2x128xi1>
    %2056 = arith.select %2055, %2053, %2049 : vector<2x128xi1>, vector<2x128xf32>
    %2057 = vector.extract_strided_slice %2056 {offsets = [0, 0], sizes = [2, 32], strides = [1, 1]} : vector<2x128xf32> to vector<2x32xf32>
    %2058 = vector.extract_strided_slice %2056 {offsets = [0, 32], sizes = [2, 32], strides = [1, 1]} : vector<2x128xf32> to vector<2x32xf32>
    %2059 = vector.extract_strided_slice %2056 {offsets = [0, 64], sizes = [2, 32], strides = [1, 1]} : vector<2x128xf32> to vector<2x32xf32>
    %2060 = vector.extract_strided_slice %2056 {offsets = [0, 96], sizes = [2, 32], strides = [1, 1]} : vector<2x128xf32> to vector<2x32xf32>
    %2061 = arith.mulf %2058, %1884 : vector<2x32xf32>
    %2062 = arith.mulf %2057, %2059 : vector<2x32xf32>
    %2063 = arith.addf %2061, %2062 : vector<2x32xf32>
    %2064 = math.tanh %2063 : vector<2x32xf32>
    %2065 = arith.mulf %2060, %2064 : vector<2x32xf32>
    %2066 = tpu.concatenate %2065, %1916 in 1 : vector<2x32xf32>, vector<2x32xf32> -> vector<2x64xf32>
    %cst_356 = arith.constant dense<0.000000e+00> : vector<2x128xf32>
    %2067 = tpu.matmul %2066, %1017, %cst_356 {dimension_numbers = #tpu.dot_dimension_numbers<[1], [0], [0], [1], [0, 0, 1, 1], [], []>} : vector<2x64xf32>, vector<64x128xf32>, vector<2x128xf32> -> vector<2x128xf32>
    %2068 = vector.broadcast %1018 : vector<1x128xf32> to vector<2x128xf32>
    %2069 = arith.addf %2067, %2068 : vector<2x128xf32>
    %cst_357 = arith.constant 2.000000e+00 : f32
    %2070 = vector.broadcast %cst_357 : f32 to vector<2x128xf32>
    %2071 = arith.mulf %2070, %2069 : vector<2x128xf32>
    %2072 = vector.shape_cast %5 : vector<1x128xi1> to vector<1x128xi1>
    %2073 = vector.broadcast %2072 : vector<1x128xi1> to vector<2x128xi1>
    %2074 = arith.select %2073, %2071, %2069 : vector<2x128xi1>, vector<2x128xf32>
    %2075 = arith.negf %2074 : vector<2x128xf32>
    %2076 = math.exp %2075 : vector<2x128xf32>
    %cst_358 = arith.constant 1.000000e+00 : f32
    %2077 = vector.broadcast %cst_358 : f32 to vector<2x128xf32>
    %2078 = arith.addf %2077, %2076 : vector<2x128xf32>
    %2079 = arith.divf %2077, %2078 : vector<2x128xf32>
    %cst_359 = arith.constant 2.000000e+00 : f32
    %2080 = vector.broadcast %cst_359 : f32 to vector<2x128xf32>
    %2081 = arith.mulf %2080, %2079 : vector<2x128xf32>
    %cst_360 = arith.constant 1.000000e+00 : f32
    %2082 = vector.broadcast %cst_360 : f32 to vector<2x128xf32>
    %2083 = arith.subf %2081, %2082 : vector<2x128xf32>
    %2084 = vector.shape_cast %5 : vector<1x128xi1> to vector<1x128xi1>
    %2085 = vector.broadcast %2084 : vector<1x128xi1> to vector<2x128xi1>
    %2086 = arith.select %2085, %2083, %2079 : vector<2x128xi1>, vector<2x128xf32>
    %2087 = vector.extract_strided_slice %2086 {offsets = [0, 0], sizes = [2, 32], strides = [1, 1]} : vector<2x128xf32> to vector<2x32xf32>
    %2088 = vector.extract_strided_slice %2086 {offsets = [0, 32], sizes = [2, 32], strides = [1, 1]} : vector<2x128xf32> to vector<2x32xf32>
    %2089 = vector.extract_strided_slice %2086 {offsets = [0, 64], sizes = [2, 32], strides = [1, 1]} : vector<2x128xf32> to vector<2x32xf32>
    %2090 = vector.extract_strided_slice %2086 {offsets = [0, 96], sizes = [2, 32], strides = [1, 1]} : vector<2x128xf32> to vector<2x32xf32>
    %2091 = arith.mulf %2088, %1914 : vector<2x32xf32>
    %2092 = arith.mulf %2087, %2089 : vector<2x32xf32>
    %2093 = arith.addf %2091, %2092 : vector<2x32xf32>
    %2094 = math.tanh %2093 : vector<2x32xf32>
    %2095 = arith.mulf %2090, %2094 : vector<2x32xf32>
    %c10_361 = arith.constant 10 : index
    %c0_362 = arith.constant 0 : index
    %2096 = vector.load %arg18[%c10_361, %c0_362] : memref<12x32xf32, #tpu.memory_space<vmem>>, vector<2x32xf32>
    tpu.vector_store %arg18[%c10_361, %c0_362], %2095 {strides = array<i32>} : memref<12x32xf32, #tpu.memory_space<vmem>>, vector<2x32xf32>,
    %c0_363 = arith.constant 0 : index
    %c0_364 = arith.constant 0 : index
    %2097 = vector.load %arg18[%c0_363, %c0_364] : memref<12x32xf32, #tpu.memory_space<vmem>>, vector<12x32xf32>
    %c0_365 = arith.constant 0 : index
    %c0_366 = arith.constant 0 : index
    %2098 = vector.load %arg14[%c0_365, %c0_366] : memref<32x64xf32, #tpu.memory_space<vmem>>, vector<32x64xf32>
    %cst_367 = arith.constant dense<0.000000e+00> : vector<12x64xf32>
    %2099 = tpu.matmul %2097, %2098, %cst_367 {dimension_numbers = #tpu.dot_dimension_numbers<[1], [0], [0], [1], [0, 0, 1, 1], [], []>} : vector<12x32xf32>, vector<32x64xf32>, vector<12x64xf32> -> vector<12x64xf32>
    %c0_368 = arith.constant 0 : index
    %c0_369 = arith.constant 0 : index
    %2100 = vector.load %arg15[%c0_368, %c0_369] : memref<1x64xf32, #tpu.memory_space<vmem>>, vector<1x64xf32>
    %2101 = vector.broadcast %2100 : vector<1x64xf32> to vector<12x64xf32>
    %2102 = arith.addf %2099, %2101 : vector<12x64xf32>
    %c0_370 = arith.constant 0 : index
    %c0_371 = arith.constant 0 : index
    %2103 = vector.load %arg16[%c0_370, %c0_371] : memref<12x64xf32, #tpu.memory_space<vmem>>, vector<12x64xf32>
    tpu.vector_store %arg16[%c0_370, %c0_371], %2102 {strides = array<i32>} : memref<12x64xf32, #tpu.memory_space<vmem>>, vector<12x64xf32>,
    return
  }
}

</mosaic_0001>

<bundles_post_ra>
// kernel: hallucination_net_forward.1
= control target key start
LH: loop header
LB: loop body
LE: loop exit
PB: predicated region body
PF: predicated region fallthrough
CT: control target
= control target key end

     0   :  { %v6794_v3 = vmov 0.0   ;;  %vm92_vm0 = vcmask 130048   ;;  %v53_v9 = vlaneseq  ;;  %vm238_vm4 = vcmask 254976   ;;  %s6800_s17 = smov 123   ;;  %s6801_s18 = smov 122   ;;  %s8538_s2 = inlined_call_operand.vmem [shape: f32[16,256], index: 2, kind: input, shape index: {}]   ;;  %s8539_s0 = inlined_call_operand.vmem [shape: f32[16,16], index: 0, kind: input, shape index: {}]   ;;  %s8540_s4 = inlined_call_operand.vmem [shape: f32[1,256], index: 4, kind: input, shape index: {}]   ;;  %s8541_s3 = inlined_call_operand.vmem [shape: f32[64,256], index: 3, kind: input, shape index: {}]   ;;  %s8542_s5 = inlined_call_operand.vmem [shape: f32[64,256], index: 5, kind: input, shape index: {}]   ;;  %s8543_s7 = inlined_call_operand.vmem [shape: f32[1,256], index: 7, kind: input, shape index: {}]   ;;  %s8544_s6 = inlined_call_operand.vmem [shape: f32[64,256], index: 6, kind: input, shape index: {}]   ;;  %s8545_s8 = inlined_call_operand.vmem [shape: f32[64,32], index: 8, kind: input, shape index: {}]   ;;  %s8546_s9 = inlined_call_operand.vmem [shape: f32[64,128], index: 9, kind: input, shape index: {}]   ;;  %s8547_s1 = inlined_call_operand.vmem [shape: f32[2,8], index: 1, kind: input, shape index: {}]   ;;  %s8548_s10 = inlined_call_operand.vmem [shape: f32[32,128], index: 10, kind: input, shape index: {}]   ;;  %s8549_s11 = inlined_call_operand.vmem [shape: f32[1,128], index: 11, kind: input, shape index: {}]   ;;  %s8550_s12 = inlined_call_operand.vmem [shape: f32[64,128], index: 12, kind: input, shape index: {}]   ;;  %s8551_s13 = inlined_call_operand.vmem [shape: f32[1,128], index: 13, kind: input, shape index: {}]   ;;  %s8552_s14 = inlined_call_operand.vmem [shape: f32[32,64], index: 14, kind: input, shape index: {}]   ;;  %s8553_s15 = inlined_call_operand.vmem [shape: f32[1,64], index: 15, kind: input, shape index: {}]   ;;  %s8554_s16 = inlined_call_operand.vmem [shape: f32[12,64], index: 16, kind: output, shape index: {}]  }
   0x1   :  { %8556 = sst [smem:[#allocation4_spill]] %s8538_s2  ;;  %163 = vmatprep.mubr.f32.mxu0 %v6794_v3  ;;  %320 = vmatprep.mubr.f32.mxu1 %v6794_v3  ;;  %v58_v7 = vld [vmem:[%s8539_s0] sm:$0xff]  ;;  %v59_v8 = vld [vmem:[%s8539_s0 + $0x8] sm:$0xff]  ;;  %s6795_s0 = smov 64   ;;  %v67_v55 = vld [vmem:[%s8541_s3 + $0x18] sm:$0xff]  ;;  %vm250_vm5 = vcmask 261120  }
   0x2   :  { %s8557_s23 = sld [smem:[#allocation4_spill]]  ;;  %v6916_v10 = vshrl.u32 %v53_v9, 7  ;;  %v80_v12 = vld [vmem:[%s8540_s4] sm:$0x3]  ;;  %v54_v14 = vand.u32 127, %v53_v9  ;;  %s6796_s4 = smov 32  }
   0x3   :  { %v65_v54 = vld [vmem:[%s8541_s3 + $0x8] sm:$0xff]  ;;  %v64_v56 = vld [vmem:[%s8541_s3] sm:$0xff]  ;;  %v66_v58 = vld [vmem:[%s8541_s3 + $0x10] sm:$0xff]  ;;  %vm252_vm6 = vcmask 523264   ;;  %vm403_vm7 = vcmask 517376   ;;  %vm244_vm8 = vcmask 523526  }
   0x4   :  { %v84_v11 = vsub.s32 0, %v6916_v10  ;;  %v88_v13 = vsub.s32 1, %v6916_v10  ;;  %vm55_vm1 = vcmp.ge.s32.totalorder %v54_v14, 64  ;;  %vm56_vm2 = vcmp.lt.s32.totalorder %v54_v14, 96  ;;  %v69_v59 = vld [vmem:[%s8541_s3 + $0x28] sm:$0xff]  ;;  %v71_v60 = vld [vmem:[%s8541_s3 + $0x38] sm:$0xff] }
   0x5   :  { %vm6929_vm3 = vmand %vm55_vm1, %vm56_vm2  ;;  %v6980_v57 = vpack.c.bf16 %v67_v55, %v65_v54  ;;  %v6991_v61 = vpack.c.bf16 %v66_v58, %v64_v56  ;;  %v6993_v62 = vpack.c.bf16 %v71_v60, %v69_v59  ;;  %v68_v63 = vld [vmem:[%s8541_s3 + $0x20] sm:$0xff]  ;;  %v77_v9 = vld [vmem:[%s8541_s3 + $0x68] sm:$0xff]  ;;  %s6799_s2 = smov 125   ;;  %vm2718_vm10 = vcmask 259076   ;;  %s6802_s19 = smov 121  }
   0x6   :  { %v85_v15 = vrot.slane %v80_v12, %v84_v11  ;;  %v89_v16 = vrot.slane %v80_v12, %v88_v13  ;;  %v79_v12 = vld [vmem:[%s8541_s3 + $0x78] sm:$0xff]  ;;  %vm2708_vm11 = vcmask 257026   ;;  %vm2727_vm12 = vcmask 261126   ;;  %s6803_s20 = smov 124   ;;  %v5435_v20 = vld [vmem:[%s8552_s14 + $0x8] sm:$0xff] }
   0x7   :  { %6003 = vmatprep.subr.bf16.mxu1 %v6980_v57  ;;  %vm6807_vm13 = vmmov 0   ;;  %vm5527_vm14 = vcmask 519168  }
   0x8   :  { %v61_v0 = vld [vmem:[%s8557_s23 + $0x8] sm:$0xff]  ;;  %v63_v1 = vld [vmem:[%s8557_s23 + $0x18] sm:$0xff]  ;;  %v60_v2 = vld [vmem:[%s8557_s23] sm:$0xff]  ;;  %6005 = vmatpush1.bf16.msra.mxu1 %v6991_v61 }
   0x9   :  { %v5998_v4 = vpack.c.bf16 %v63_v1, %v61_v0  ;;  %v62_v5 = vld [vmem:[%s8557_s23 + $0x10] sm:$0xff]  ;;  %v73_v1 = vld [vmem:[%s8541_s3 + $0x48] sm:$0xff]  ;;  %6007 = vmatprep.subr.bf16.mxu1 %v6993_v62 }
   0xa   :  { %v6000_v6 = vpack.c.bf16 %v62_v5, %v60_v2  ;;  %v70_v0 = vld [vmem:[%s8541_s3 + $0x30] sm:$0xff]  ;;  %v75_v2 = vld [vmem:[%s8541_s3 + $0x58] sm:$0xff] }
   0xb   :  { %5999 = vmatprep.subr.bf16.mxu0 %v5998_v4  ;;  %v7010_v4 = vpack.c.bf16 %v70_v0, %v68_v63 }
   0xc   :  { %6001 = vmatpush1.bf16.msra.mxu0 %v6000_v6  ;;  %v7014_v6 = vpack.c.bf16 %v75_v2, %v73_v1 }
   0xd   :  { %6019 = vmatprep.subr.bf16.mxu0 %v6980_v57  ;;  %6009 = vmatpush1.bf16.msra.mxu1 %v7010_v4 }
   0xe   :  { %6011 = vmatprep.subr.bf16.mxu1 %v7014_v6 }
   0xf   :  { %5533 = vmatmul.mubr.msk.f32.vlgmr.msra.gmra.mrb[0].mxu0 %vm92_vm0, %v58_v7  ;;  %v72_v7 = vld [vmem:[%s8541_s3 + $0x40] sm:$0xff] }
  0x10   :  { %169 = vmatprep.mubr.f32.mxu0 %v6794_v3  ;;  %6021 = vmatpush1.bf16.msra.mxu0 %v6991_v61 }
  0x11   :  { %6023 = vmatprep.subr.bf16.mxu0 %v6993_v62 }
  0x13   :  { %5534 = vmatmul.mubr.msk.f32.gmra.mrb[2].mxu0 %vm92_vm0, %v59_v8  ;;  %v74_v8 = vld [vmem:[%s8541_s3 + $0x50] sm:$0xff] }
  0x14   :  { %473 = vmatprep.mubr.f32.mxu0 %v6794_v3  ;;  %v7031_v14 = vpack.c.bf16 %v74_v8, %v72_v7  ;;  %6025 = vmatpush1.bf16.msra.mxu0 %v7010_v4 }
  0x15   :  { %6027 = vmatprep.subr.bf16.mxu0 %v7014_v6 }
  0x16   :  { %6013 = vmatpush1.bf16.msra.mxu1 %v7031_v14 }
  0x18   :  { %6029 = vmatpush1.bf16.msra.mxu0 %v7031_v14 }
  0xe2   :  { %v165_v17 = vpop.f32.mrb[0].mxu0 }
  0xe3   :  { %v6927_v18 = vadd.f32 %v165_v17, %v85_v15  ;;  %v167_v19 = vpop.f32.mrb[1].mxu0  ;;  %v76_v17 = vld [vmem:[%s8541_s3 + $0x60] sm:$0xff] }
  0xe4   :  { %v6933_v21 = vadd.f32 %v167_v19, %v89_v16  ;;  %v78_v19 = vld [vmem:[%s8541_s3 + $0x70] sm:$0xff] }
  0xe5   :  { %v176_v22 = vmul.f32 2.0, %v6927_v18 }
  0xe6   :  { %v171_v23 = vpop.f32.mrb[2].mxu0 }
  0xe7   :  { %v179_v24 = vsel %vm6929_vm3, %v176_v22, %v6927_v18  ;;  %v6939_v25 = vadd.f32 %v171_v23, %v85_v15  ;;  %v173_v26 = vpop.f32.mrb[3].mxu0  ;;  %v7049_v22 = vpack.c.bf16 %v78_v19, %v76_v17 }
  0xe8   :  { %v5535_v27 = vmul.f32 -1.442695, %v179_v24  ;;  %v6941_v28 = vadd.f32 %v173_v26, %v89_v16  ;;  %v7035_v16 = vpack.c.bf16 %v79_v12, %v77_v9 }
  0xea   :  { %6419 = vpow2.f32 %v5535_v27  ;;  %v206_v29 = vmul.f32 2.0, %v6941_v28  ;;  %6015 = vmatprep.subr.bf16.mxu1 %v7035_v16  ;;  %6031 = vmatprep.subr.bf16.mxu0 %v7035_v16 }
  0xeb   :  { %6017 = vmatpush1.bf16.msra.mxu1 %v7049_v22  ;;  %6033 = vmatpush1.bf16.msra.mxu0 %v7049_v22 }
  0xec   :  { %v207_v30 = vsel %vm6929_vm3, %v206_v29, %v6941_v28  ;;  %6035 = vmatprep.subr.bf16.mxu1 %v6980_v57  ;;  %6051 = vmatprep.subr.bf16.mxu0 %v6980_v57 }
  0xed   :  { %v5537_v31 = vmul.f32 -1.442695, %v207_v30 }
  0xef   :  { %6421 = vpow2.f32 %v5537_v31 }
  0xf4   :  { %v6420_v32 = vpop.eup %6419 }
  0xf5   :  { %v183_v33 = vadd.f32 1.0, %v6420_v32 }
  0xf7   :  { %6423 = vrcp.f32 %v183_v33  ;;  %v328_v33 = vrot.slane %v6927_v18, 2 }
  0xf9   :  { %v6422_v34 = vpop.eup %6421 }
  0xfa   :  { %v211_v35 = vadd.f32 1.0, %v6422_v34 }
  0xfc   :  { %6425 = vrcp.f32 %v211_v35  ;;  %v332_v35 = vrot.slane %v6941_v28, 4 }
 0x101   :  { %v6424_v36 = vpop.eup %6423 }
 0x102   :  { %v186_v39 = vmul.f32 2.0, %v6424_v36 }
 0x104   :  { %v5536_v42 = vadd.f32 -1.0, %v186_v39 }
 0x106   :  { %v6426_v37 = vpop.eup %6425  ;;  %v6955_v43 = vsel %vm6929_vm3, %v5536_v42, %v6424_v36 }
 0x107   :  { %v214_v38 = vmul.f32 2.0, %v6426_v37  ;;  %v189_v51 = vmul.f32 0.0, %v6955_v43 }
 0x109   :  { %v5538_v40 = vadd.f32 -1.0, %v214_v38 }
 0x10b   :  { %v6949_v41 = vsel %vm6929_vm3, %v5538_v40, %v6426_v37 }
 0x10c   :  { %219 = vrot.lane.b32.xlu0 %v6949_v41, %s6795_s0  ;;  %v217_v48 = vmul.f32 0.0, %v6949_v41 }
 0x110   :  { %191 = vrot.lane.b32.xlu0 %v6955_v43, %s6795_s0 }
 0x17e   :  { %v220_v44 = vpop.permute.xlu0 %219 }
 0x17f   :  { %v222_v45 = vmul.f32 %v220_v44, %v6949_v41 }
 0x181   :  { %224 = vrot.lane.b32.xlu1 %v222_v45, %s6796_s4 }
 0x182   :  { %v192_v46 = vpop.permute.xlu0 %191 }
 0x183   :  { %v194_v47 = vmul.f32 %v192_v46, %v6955_v43 }
 0x185   :  { %196 = vrot.lane.b32.xlu1 %v194_v47, %s6796_s4 }
 0x1f3   :  { %v225_v49 = vpop.permute.xlu1 %224 }
 0x1f4   :  { %v6964_v50 = vadd.f32 %v225_v49, %v217_v48 }
 0x1f6   :  { %6427 = vtanh.f32 %v6964_v50  ;;  %v375_v2 = vrot.slane %v6964_v50, 6 }
 0x1f7   :  { %v197_v52 = vpop.permute.xlu1 %196 }
 0x1f8   :  { %v6968_v53 = vadd.f32 %v197_v52, %v189_v51 }
 0x1fa   :  { %6429 = vtanh.f32 %v6968_v53 }
 0x200   :  { %v6428_v5 = vpop.eup %6427 }
 0x201   :  { %230 = vrot.lane.b32.xlu0 %v6428_v5, %s6795_s0 }
 0x204   :  { %v6430_v15 = vpop.eup %6429 }
 0x205   :  { %202 = vrot.lane.b32.xlu1 %v6430_v15, %s6795_s0 }
 0x273   :  { %v231_v23 = vpop.permute.xlu0 %230 }
 0x274   :  { %v7056_v24 = vmul.f32 %v231_v23, %v6949_v41 }
 0x276   :  { %v246_v26 = vrot.slane %v7056_v24, 6 }
 0x277   :  { %v203_v27 = vpop.permute.xlu1 %202 }
 0x278   :  { %v205_v29 = vmul.f32 %v203_v27, %v6955_v43  ;;  %247 = vrot.lane.b32.xlu1 %v246_v26, %s6795_s0 }
 0x27a   :  { %235 = vrot.lane.b32.xlu0 %v205_v29, %s6796_s4 }
 0x2ea   :  { %v248_v30 = vpop.permute.xlu1 %247 }
 0x2ec   :  { %v236_v31 = vpop.permute.xlu0 %235 }
 0x2ed   :  { %239 = vst.msk [vmem:[#allocation2] sm:$0x3] %vm238_vm4, %v236_v31  ;;  %v251_v32 = vsel %vm250_vm5, %v236_v31, %v248_v30  ;;  %v480_v31 = vrot.slane %v6927_v18, 4 }
 0x2ee   :  { %5539 = vmatmul.mubr.msk.f32.vlgmr.msra.gmra.mrb[0].mxu1 %vm252_vm6, %v251_v32 }
 0x2ef   :  { %6037 = vmatpush1.bf16.msra.mxu1 %v6991_v61  ;;  %620 = vmatprep.mubr.f32.mxu1 %v6794_v3 }
 0x2f0   :  { %6039 = vmatprep.subr.bf16.mxu1 %v6993_v62 }
 0x2f3   :  { %6041 = vmatpush1.bf16.msra.mxu1 %v7010_v4 }
 0x2f4   :  { %6043 = vmatprep.subr.bf16.mxu1 %v7014_v6 }
 0x2f7   :  { %6045 = vmatpush1.bf16.msra.mxu1 %v7031_v14 }
 0x2f8   :  { %6047 = vmatprep.subr.bf16.mxu1 %v7035_v16 }
 0x2fb   :  { %6049 = vmatpush1.bf16.msra.mxu1 %v7049_v22 }
 0x2fc   :  { %6067 = vmatprep.subr.bf16.mxu1 %v6980_v57 }
 0x3c1   :  { %v322_v34 = vpop.f32.mrb[0].mxu1 }
 0x3c2   :  { %v330_v36 = vadd.f32 %v328_v33, %v322_v34  ;;  %v324_v37 = vpop.f32.mrb[1].mxu1  ;;  %v483_v33 = vrot.slane %v6941_v28, 2 }
 0x3c3   :  { %v334_v38 = vadd.f32 %v332_v35, %v324_v37 }
 0x3c4   :  { %v335_v39 = vmul.f32 2.0, %v330_v36 }
 0x3c5   :  { %v363_v40 = vmul.f32 2.0, %v334_v38 }
 0x3c6   :  { %v336_v41 = vsel %vm6929_vm3, %v335_v39, %v330_v36 }
 0x3c7   :  { %v5540_v42 = vmul.f32 -1.442695, %v336_v41  ;;  %v364_v43 = vsel %vm6929_vm3, %v363_v40, %v334_v38 }
 0x3c8   :  { %v5542_v44 = vmul.f32 -1.442695, %v364_v43 }
 0x3c9   :  { %6431 = vpow2.f32 %v5540_v42 }
 0x3ca   :  { %6433 = vpow2.f32 %v5542_v44 }
 0x3d3   :  { %v6432_v45 = vpop.eup %6431 }
 0x3d4   :  { %v6434_v46 = vpop.eup %6433  ;;  %v340_v47 = vadd.f32 1.0, %v6432_v45 }
 0x3d5   :  { %v368_v48 = vadd.f32 1.0, %v6434_v46 }
 0x3d6   :  { %6435 = vrcp.f32 %v340_v47 }
 0x3d7   :  { %6437 = vrcp.f32 %v368_v48 }
 0x3e0   :  { %v6436_v49 = vpop.eup %6435 }
 0x3e1   :  { %v6438_v51 = vpop.eup %6437  ;;  %v343_v52 = vmul.f32 2.0, %v6436_v49 }
 0x3e2   :  { %v371_v54 = vmul.f32 2.0, %v6438_v51 }
 0x3e3   :  { %v5541_v55 = vadd.f32 -1.0, %v343_v52 }
 0x3e4   :  { %v5543_v56 = vadd.f32 -1.0, %v371_v54 }
 0x3e5   :  { %v345_v58 = vsel %vm6929_vm3, %v5541_v55, %v6436_v49 }
 0x3e6   :  { %348 = vrot.lane.b32.xlu0 %v345_v58, %s6795_s0  ;;  %v373_v59 = vsel %vm6929_vm3, %v5543_v56, %v6438_v51  ;;  %v346_v5 = vmul.f32 %v345_v58, %v6968_v53 }
 0x3e7   :  { %379 = vrot.lane.b32.xlu1 %v373_v59, %s6795_s0  ;;  %v377_v8 = vmul.f32 %v375_v2, %v373_v59 }
 0x458   :  { %v349_v60 = vpop.permute.xlu0 %348 }
 0x459   :  { %v351_v63 = vmul.f32 %v349_v60, %v345_v58  ;;  %v380_v0 = vpop.permute.xlu1 %379 }
 0x45a   :  { %v382_v1 = vmul.f32 %v380_v0, %v373_v59 }
 0x45b   :  { %353 = vrot.lane.b32.xlu0 %v351_v63, %s6796_s4 }
 0x45c   :  { %384 = vrot.lane.b32.xlu1 %v382_v1, %s6796_s4 }
 0x4cd   :  { %v354_v7 = vpop.permute.xlu0 %353 }
 0x4ce   :  { %v7090_v9 = vadd.f32 %v354_v7, %v346_v5  ;;  %v385_v12 = vpop.permute.xlu1 %384 }
 0x4cf   :  { %v7092_v15 = vadd.f32 %v385_v12, %v377_v8 }
 0x4d0   :  { %6439 = vtanh.f32 %v7090_v9 }
 0x4d1   :  { %6441 = vtanh.f32 %v7092_v15 }
 0x4da   :  { %v6440_v17 = vpop.eup %6439 }
 0x4db   :  { %v6442_v19 = vpop.eup %6441  ;;  %359 = vrot.lane.b32.xlu0 %v6440_v17, %s6795_s0 }
 0x4dc   :  { %390 = vrot.lane.b32.xlu1 %v6442_v19, %s6795_s0 }
 0x54d   :  { %v360_v50 = vpop.permute.xlu0 %359 }
 0x54e   :  { %v362_v23 = vmul.f32 %v360_v50, %v345_v58  ;;  %v391_v53 = vpop.permute.xlu1 %390 }
 0x54f   :  { %v393_v26 = vmul.f32 %v391_v53, %v373_v59 }
 0x550   :  { %395 = vrot.lane.b32.xlu0 %v362_v23, %s6796_s4 }
 0x551   :  { %400 = vrot.lane.b32.xlu1 %v393_v26, %s6795_s0 }
 0x5c2   :  { %v396_v27 = vpop.permute.xlu0 %395 }
 0x5c3   :  { %398 = vst.msk [vmem:[#allocation2 + $0x2] sm:$0x3] %vm238_vm4, %v396_v27  ;;  %v401_v29 = vpop.permute.xlu1 %400 }
 0x5c4   :  { %404 = vst.msk [vmem:[#allocation2 + $0xc] sm:$0x3] %vm403_vm7, %v401_v29  ;;  %v405_v30 = vsel %vm250_vm5, %v396_v27, %v401_v29  ;;  %v627_v27 = vrot.slane %v6927_v18, 6 }
 0x5c5   :  { %5544 = vmatmul.mubr.msk.f32.vlgmr.msra.gmra.mrb[4].mxu0 %vm252_vm6, %v405_v30 }
 0x5c6   :  { %6053 = vmatpush1.bf16.msra.mxu0 %v6991_v61  ;;  %765 = vmatprep.mubr.f32.mxu0 %v6794_v3 }
 0x5c7   :  { %6055 = vmatprep.subr.bf16.mxu0 %v6993_v62 }
 0x5ca   :  { %6057 = vmatpush1.bf16.msra.mxu0 %v7010_v4 }
 0x5cb   :  { %6059 = vmatprep.subr.bf16.mxu0 %v7014_v6 }
 0x5ce   :  { %6061 = vmatpush1.bf16.msra.mxu0 %v7031_v14 }
 0x5cf   :  { %6063 = vmatprep.subr.bf16.mxu0 %v7035_v16 }
 0x5d2   :  { %6065 = vmatpush1.bf16.msra.mxu0 %v7049_v22 }
 0x5d3   :  { %6083 = vmatprep.subr.bf16.mxu0 %v6980_v57 }
 0x698   :  { %v475_v32 = vpop.f32.mrb[4].mxu0 }
 0x699   :  { %v482_v34 = vadd.f32 %v480_v31, %v475_v32  ;;  %v477_v35 = vpop.f32.mrb[5].mxu0 }
 0x69a   :  { %v485_v36 = vadd.f32 %v483_v33, %v477_v35 }
 0x69b   :  { %v486_v37 = vmul.f32 2.0, %v482_v34 }
 0x69c   :  { %v514_v38 = vmul.f32 2.0, %v485_v36 }
 0x69d   :  { %v487_v39 = vsel %vm6929_vm3, %v486_v37, %v482_v34 }
 0x69e   :  { %v5545_v40 = vmul.f32 -1.442695, %v487_v39  ;;  %v515_v41 = vsel %vm6929_vm3, %v514_v38, %v485_v36 }
 0x69f   :  { %v5547_v42 = vmul.f32 -1.442695, %v515_v41 }
 0x6a0   :  { %6443 = vpow2.f32 %v5545_v40 }
 0x6a1   :  { %6445 = vpow2.f32 %v5547_v42 }
 0x6aa   :  { %v6444_v43 = vpop.eup %6443 }
 0x6ab   :  { %v6446_v44 = vpop.eup %6445  ;;  %v491_v45 = vadd.f32 1.0, %v6444_v43 }
 0x6ac   :  { %v519_v46 = vadd.f32 1.0, %v6446_v44 }
 0x6ad   :  { %6447 = vrcp.f32 %v491_v45 }
 0x6ae   :  { %6449 = vrcp.f32 %v519_v46 }
 0x6b7   :  { %v6448_v47 = vpop.eup %6447 }
 0x6b8   :  { %v6450_v48 = vpop.eup %6449  ;;  %v494_v49 = vmul.f32 2.0, %v6448_v47 }
 0x6b9   :  { %v522_v51 = vmul.f32 2.0, %v6450_v48 }
 0x6ba   :  { %v5546_v52 = vadd.f32 -1.0, %v494_v49 }
 0x6bb   :  { %v5548_v54 = vadd.f32 -1.0, %v522_v51 }
 0x6bc   :  { %v496_v55 = vsel %vm6929_vm3, %v5546_v52, %v6448_v47 }
 0x6bd   :  { %499 = vrot.lane.b32.xlu0 %v496_v55, %s6795_s0  ;;  %v524_v56 = vsel %vm6929_vm3, %v5548_v54, %v6450_v48  ;;  %v497_v0 = vmul.f32 %v496_v55, %v7090_v9 }
 0x6be   :  { %527 = vrot.lane.b32.xlu1 %v524_v56, %s6795_s0  ;;  %v525_v2 = vmul.f32 %v524_v56, %v7092_v15 }
 0x72f   :  { %v500_v58 = vpop.permute.xlu0 %499 }
 0x730   :  { %v502_v59 = vmul.f32 %v500_v58, %v496_v55  ;;  %v528_v60 = vpop.permute.xlu1 %527 }
 0x731   :  { %v530_v63 = vmul.f32 %v528_v60, %v524_v56 }
 0x732   :  { %504 = vrot.lane.b32.xlu0 %v502_v59, %s6796_s4 }
 0x733   :  { %532 = vrot.lane.b32.xlu1 %v530_v63, %s6796_s4 }
 0x7a4   :  { %v505_v1 = vpop.permute.xlu0 %504 }
 0x7a5   :  { %v7129_v5 = vadd.f32 %v505_v1, %v497_v0  ;;  %v533_v7 = vpop.permute.xlu1 %532 }
 0x7a6   :  { %v7131_v8 = vadd.f32 %v533_v7, %v525_v2 }
 0x7a7   :  { %6451 = vtanh.f32 %v7129_v5 }
 0x7a8   :  { %6453 = vtanh.f32 %v7131_v8 }
 0x7b1   :  { %v6452_v12 = vpop.eup %6451 }
 0x7b2   :  { %v6454_v17 = vpop.eup %6453  ;;  %510 = vrot.lane.b32.xlu0 %v6452_v12, %s6795_s0 }
 0x7b3   :  { %538 = vrot.lane.b32.xlu1 %v6454_v17, %s6795_s0 }
 0x824   :  { %v511_v19 = vpop.permute.xlu0 %510 }
 0x825   :  { %v513_v9 = vmul.f32 %v511_v19, %v496_v55  ;;  %v539_v50 = vpop.permute.xlu1 %538 }
 0x826   :  { %v541_v23 = vmul.f32 %v539_v50, %v524_v56 }
 0x827   :  { %543 = vrot.lane.b32.xlu0 %v513_v9, %s6796_s4  ;;  %v774_v9 = vrot.slane %v6933_v21, 6 }
 0x828   :  { %548 = vrot.lane.b32.xlu1 %v541_v23, %s6795_s0 }
 0x899   :  { %v544_v15 = vpop.permute.xlu0 %543 }
 0x89a   :  { %546 = vst.msk [vmem:[#allocation2 + $0x4] sm:$0x3] %vm238_vm4, %v544_v15  ;;  %v549_v53 = vpop.permute.xlu1 %548 }
 0x89b   :  { %551 = vst.msk [vmem:[#allocation2 + $0xa] sm:$0x3] %vm403_vm7, %v549_v53  ;;  %v552_v26 = vsel %vm250_vm5, %v544_v15, %v549_v53 }
 0x89c   :  { %5549 = vmatmul.mubr.msk.f32.vlgmr.msra.gmra.mrb[2].mxu1 %vm252_vm6, %v552_v26 }
 0x89d   :  { %6069 = vmatpush1.bf16.msra.mxu1 %v6991_v61  ;;  %911 = vmatprep.mubr.f32.mxu1 %v6794_v3 }
 0x89e   :  { %6071 = vmatprep.subr.bf16.mxu1 %v6993_v62 }
 0x8a1   :  { %6073 = vmatpush1.bf16.msra.mxu1 %v7010_v4 }
 0x8a2   :  { %6075 = vmatprep.subr.bf16.mxu1 %v7014_v6 }
 0x8a5   :  { %6077 = vmatpush1.bf16.msra.mxu1 %v7031_v14 }
 0x8a6   :  { %6079 = vmatprep.subr.bf16.mxu1 %v7035_v16 }
 0x8a9   :  { %6081 = vmatpush1.bf16.msra.mxu1 %v7049_v22 }
 0x8aa   :  { %6099 = vmatprep.subr.bf16.mxu1 %v6980_v57 }
 0x96f   :  { %v622_v29 = vpop.f32.mrb[2].mxu1 }
 0x970   :  { %v629_v30 = vadd.f32 %v627_v27, %v622_v29  ;;  %v624_v31 = vpop.f32.mrb[3].mxu1 }
 0x971   :  { %v630_v32 = vadd.f32 %v624_v31, %v6941_v28 }
 0x972   :  { %v631_v33 = vmul.f32 2.0, %v629_v30 }
 0x973   :  { %v659_v34 = vmul.f32 2.0, %v630_v32 }
 0x974   :  { %v632_v35 = vsel %vm6929_vm3, %v631_v33, %v629_v30 }
 0x975   :  { %v5550_v36 = vmul.f32 -1.442695, %v632_v35  ;;  %v660_v37 = vsel %vm6929_vm3, %v659_v34, %v630_v32 }
 0x976   :  { %v5552_v38 = vmul.f32 -1.442695, %v660_v37 }
 0x977   :  { %6455 = vpow2.f32 %v5550_v36 }
 0x978   :  { %6457 = vpow2.f32 %v5552_v38 }
 0x981   :  { %v6456_v57 = vpop.eup %6455 }
 0x982   :  { %v6458_v39 = vpop.eup %6457  ;;  %v636_v18 = vadd.f32 1.0, %v6456_v57 }
 0x983   :  { %v664_v40 = vadd.f32 1.0, %v6458_v39 }
 0x984   :  { %6459 = vrcp.f32 %v636_v18 }
 0x985   :  { %6461 = vrcp.f32 %v664_v40 }
 0x98e   :  { %v6460_v41 = vpop.eup %6459 }
 0x98f   :  { %v6462_v28 = vpop.eup %6461  ;;  %v639_v42 = vmul.f32 2.0, %v6460_v41 }
 0x990   :  { %v667_v43 = vmul.f32 2.0, %v6462_v28 }
 0x991   :  { %v5551_v44 = vadd.f32 -1.0, %v639_v42 }
 0x992   :  { %v5553_v45 = vadd.f32 -1.0, %v667_v43 }
 0x993   :  { %v641_v46 = vsel %vm6929_vm3, %v5551_v44, %v6460_v41 }
 0x994   :  { %644 = vrot.lane.b32.xlu0 %v641_v46, %s6795_s0  ;;  %v669_v47 = vsel %vm6929_vm3, %v5553_v45, %v6462_v28  ;;  %v642_v54 = vmul.f32 %v641_v46, %v7129_v5 }
 0x995   :  { %672 = vrot.lane.b32.xlu1 %v669_v47, %s6795_s0  ;;  %v670_v56 = vmul.f32 %v669_v47, %v7131_v8 }
 0xa06   :  { %v645_v48 = vpop.permute.xlu0 %644 }
 0xa07   :  { %v647_v49 = vmul.f32 %v645_v48, %v641_v46  ;;  %v673_v51 = vpop.permute.xlu1 %672 }
 0xa08   :  { %v675_v52 = vmul.f32 %v673_v51, %v669_v47 }
 0xa09   :  { %649 = vrot.lane.b32.xlu0 %v647_v49, %s6796_s4 }
 0xa0a   :  { %677 = vrot.lane.b32.xlu1 %v675_v52, %s6796_s4 }
 0xa7b   :  { %v650_v55 = vpop.permute.xlu0 %649 }
 0xa7c   :  { %v7168_v58 = vadd.f32 %v650_v55, %v642_v54  ;;  %v678_v59 = vpop.permute.xlu1 %677 }
 0xa7d   :  { %v7170_v60 = vadd.f32 %v678_v59, %v670_v56 }
 0xa7e   :  { %6463 = vtanh.f32 %v7168_v58 }
 0xa7f   :  { %6465 = vtanh.f32 %v7170_v60 }
 0xa88   :  { %v6464_v63 = vpop.eup %6463 }
 0xa89   :  { %v6466_v0 = vpop.eup %6465  ;;  %655 = vrot.lane.b32.xlu0 %v6464_v63, %s6795_s0 }
 0xa8a   :  { %683 = vrot.lane.b32.xlu1 %v6466_v0, %s6795_s0 }
 0xafb   :  { %v656_v1 = vpop.permute.xlu0 %655 }
 0xafc   :  { %v658_v2 = vmul.f32 %v656_v1, %v641_v46  ;;  %v684_v5 = vpop.permute.xlu1 %683  ;;  %v919_v1 = vrot.slane %v6939_v25, 2 }
 0xafd   :  { %v686_v7 = vmul.f32 %v684_v5, %v669_v47  ;;  %v922_v5 = vrot.slane %v6933_v21, 4 }
 0xafe   :  { %688 = vrot.lane.b32.xlu0 %v658_v2, %s6796_s4 }
 0xaff   :  { %693 = vrot.lane.b32.xlu1 %v686_v7, %s6795_s0 }
 0xb70   :  { %v689_v8 = vpop.permute.xlu0 %688 }
 0xb71   :  { %691 = vst.msk [vmem:[#allocation2 + $0x6] sm:$0x3] %vm238_vm4, %v689_v8  ;;  %v694_v12 = vpop.permute.xlu1 %693 }
 0xb72   :  { %696 = vst.msk [vmem:[#allocation2 + $0x8] sm:$0x3] %vm403_vm7, %v694_v12  ;;  %v697_v17 = vsel %vm250_vm5, %v689_v8, %v694_v12 }
 0xb73   :  { %5554 = vmatmul.mubr.msk.f32.vlgmr.msra.gmra.mrb[6].mxu0 %vm252_vm6, %v697_v17 }
 0xb74   :  { %6085 = vmatpush1.bf16.msra.mxu0 %v6991_v61  ;;  %1059 = vmatprep.mubr.f32.mxu0 %v6794_v3 }
 0xb75   :  { %6087 = vmatprep.subr.bf16.mxu0 %v6993_v62 }
 0xb78   :  { %6089 = vmatpush1.bf16.msra.mxu0 %v7010_v4 }
 0xb79   :  { %6091 = vmatprep.subr.bf16.mxu0 %v7014_v6 }
 0xb7c   :  { %6093 = vmatpush1.bf16.msra.mxu0 %v7031_v14 }
 0xb7d   :  { %6095 = vmatprep.subr.bf16.mxu0 %v7035_v16 }
 0xb80   :  { %6097 = vmatpush1.bf16.msra.mxu0 %v7049_v22 }
 0xc46   :  { %v767_v19 = vpop.f32.mrb[6].mxu0 }
 0xc47   :  { %v772_v50 = vadd.f32 %v767_v19, %v6939_v25  ;;  %v769_v23 = vpop.f32.mrb[7].mxu0 }
 0xc48   :  { %v776_v15 = vadd.f32 %v774_v9, %v769_v23 }
 0xc49   :  { %v777_v53 = vmul.f32 2.0, %v772_v50 }
 0xc4a   :  { %v805_v26 = vmul.f32 2.0, %v776_v15 }
 0xc4b   :  { %v778_v27 = vsel %vm6929_vm3, %v777_v53, %v772_v50 }
 0xc4c   :  { %v5555_v29 = vmul.f32 -1.442695, %v778_v27  ;;  %v806_v30 = vsel %vm6929_vm3, %v805_v26, %v776_v15 }
 0xc4d   :  { %v5557_v31 = vmul.f32 -1.442695, %v806_v30 }
 0xc4e   :  { %6467 = vpow2.f32 %v5555_v29 }
 0xc4f   :  { %6469 = vpow2.f32 %v5557_v31 }
 0xc58   :  { %v6468_v32 = vpop.eup %6467 }
 0xc59   :  { %v6470_v33 = vpop.eup %6469  ;;  %v782_v34 = vadd.f32 1.0, %v6468_v32 }
 0xc5a   :  { %v810_v35 = vadd.f32 1.0, %v6470_v33 }
 0xc5b   :  { %6471 = vrcp.f32 %v782_v34 }
 0xc5c   :  { %6473 = vrcp.f32 %v810_v35 }
 0xc65   :  { %v6472_v36 = vpop.eup %6471 }
 0xc66   :  { %v6474_v37 = vpop.eup %6473  ;;  %v785_v38 = vmul.f32 2.0, %v6472_v36 }
 0xc67   :  { %v813_v57 = vmul.f32 2.0, %v6474_v37 }
 0xc68   :  { %v5556_v39 = vadd.f32 -1.0, %v785_v38 }
 0xc69   :  { %v5558_v18 = vadd.f32 -1.0, %v813_v57 }
 0xc6a   :  { %v787_v40 = vsel %vm6929_vm3, %v5556_v39, %v6472_v36 }
 0xc6b   :  { %790 = vrot.lane.b32.xlu0 %v787_v40, %s6795_s0  ;;  %v815_v41 = vsel %vm6929_vm3, %v5558_v18, %v6474_v37  ;;  %v788_v45 = vmul.f32 %v787_v40, %v7168_v58 }
 0xc6c   :  { %818 = vrot.lane.b32.xlu1 %v815_v41, %s6795_s0  ;;  %v816_v47 = vmul.f32 %v815_v41, %v7170_v60 }
 0xcdd   :  { %v791_v28 = vpop.permute.xlu0 %790 }
 0xcde   :  { %v793_v42 = vmul.f32 %v791_v28, %v787_v40  ;;  %v819_v43 = vpop.permute.xlu1 %818 }
 0xcdf   :  { %v821_v44 = vmul.f32 %v819_v43, %v815_v41 }
 0xce0   :  { %795 = vrot.lane.b32.xlu0 %v793_v42, %s6796_s4 }
 0xce1   :  { %823 = vrot.lane.b32.xlu1 %v821_v44, %s6796_s4 }
 0xd52   :  { %v796_v46 = vpop.permute.xlu0 %795 }
 0xd53   :  { %v7206_v48 = vadd.f32 %v796_v46, %v788_v45  ;;  %v824_v49 = vpop.permute.xlu1 %823 }
 0xd54   :  { %v7208_v51 = vadd.f32 %v824_v49, %v816_v47  ;;  %v1066_v47 = vrot.slane %v6939_v25, 4  ;;  %v1069_v49 = vrot.slane %v6933_v21, 2 }
 0xd55   :  { %6475 = vtanh.f32 %v7206_v48 }
 0xd56   :  { %6477 = vtanh.f32 %v7208_v51 }
 0xd5f   :  { %v6476_v52 = vpop.eup %6475 }
 0xd60   :  { %v6478_v54 = vpop.eup %6477  ;;  %801 = vrot.lane.b32.xlu0 %v6476_v52, %s6795_s0 }
 0xd61   :  { %829 = vrot.lane.b32.xlu1 %v6478_v54, %s6795_s0 }
 0xdd2   :  { %v802_v55 = vpop.permute.xlu0 %801 }
 0xdd3   :  { %v804_v56 = vmul.f32 %v802_v55, %v787_v40  ;;  %v830_v58 = vpop.permute.xlu1 %829 }
 0xdd4   :  { %v832_v59 = vmul.f32 %v830_v58, %v815_v41 }
 0xdd5   :  { %834 = vrot.lane.b32.xlu0 %v804_v56, %s6796_s4 }
 0xdd6   :  { %839 = vrot.lane.b32.xlu1 %v832_v59, %s6795_s0 }
 0xe47   :  { %v835_v60 = vpop.permute.xlu0 %834 }
 0xe48   :  { %837 = vst.msk [vmem:[#allocation2 + $0x8] sm:$0x3] %vm238_vm4, %v835_v60  ;;  %v840_v63 = vpop.permute.xlu1 %839 }
 0xe49   :  { %842 = vst.msk [vmem:[#allocation2 + $0x6] sm:$0x3] %vm403_vm7, %v840_v63  ;;  %v843_v0 = vsel %vm250_vm5, %v835_v60, %v840_v63 }
 0xe4a   :  { %5559 = vmatmul.mubr.msk.f32.vlgmr.msra.gmra.mrb[4].mxu1 %vm252_vm6, %v843_v0 }
 0xe4b   :  { %6101 = vmatpush1.bf16.msra.mxu1 %v6991_v61  ;;  %1206 = vmatprep.mubr.f32.mxu1 %v6794_v3 }
 0xe4c   :  { %6103 = vmatprep.subr.bf16.mxu1 %v6993_v62 }
 0xe4f   :  { %6105 = vmatpush1.bf16.msra.mxu1 %v7010_v4 }
 0xe50   :  { %6107 = vmatprep.subr.bf16.mxu1 %v7014_v6 }
 0xe53   :  { %6109 = vmatpush1.bf16.msra.mxu1 %v7031_v14 }
 0xe54   :  { %6111 = vmatprep.subr.bf16.mxu1 %v7035_v16 }
 0xe57   :  { %6113 = vmatpush1.bf16.msra.mxu1 %v7049_v22 }
 0xf1d   :  { %v913_v2 = vpop.f32.mrb[4].mxu1 }
 0xf1e   :  { %v921_v61 = vadd.f32 %v919_v1, %v913_v2  ;;  %v915_v7 = vpop.f32.mrb[5].mxu1 }
 0xf1f   :  { %v924_v8 = vadd.f32 %v922_v5, %v915_v7 }
 0xf20   :  { %v925_v12 = vmul.f32 2.0, %v921_v61 }
 0xf21   :  { %v953_v62 = vmul.f32 2.0, %v924_v8 }
 0xf22   :  { %v926_v4 = vsel %vm6929_vm3, %v925_v12, %v921_v61 }
 0xf23   :  { %v5560_v6 = vmul.f32 -1.442695, %v926_v4  ;;  %v954_v14 = vsel %vm6929_vm3, %v953_v62, %v924_v8 }
 0xf24   :  { %v5562_v16 = vmul.f32 -1.442695, %v954_v14 }
 0xf25   :  { %6479 = vpow2.f32 %v5560_v6 }
 0xf26   :  { %6481 = vpow2.f32 %v5562_v16 }
 0xf2f   :  { %v6480_v22 = vpop.eup %6479 }
 0xf30   :  { %v6482_v17 = vpop.eup %6481  ;;  %v930_v19 = vadd.f32 1.0, %v6480_v22 }
 0xf31   :  { %v958_v9 = vadd.f32 1.0, %v6482_v17 }
 0xf32   :  { %6483 = vrcp.f32 %v930_v19 }
 0xf33   :  { %6485 = vrcp.f32 %v958_v9 }
 0xf3c   :  { %v6484_v50 = vpop.eup %6483 }
 0xf3d   :  { %v6486_v23 = vpop.eup %6485  ;;  %v933_v15 = vmul.f32 2.0, %v6484_v50 }
 0xf3e   :  { %v961_v53 = vmul.f32 2.0, %v6486_v23 }
 0xf3f   :  { %v5561_v26 = vadd.f32 -1.0, %v933_v15 }
 0xf40   :  { %v5563_v27 = vadd.f32 -1.0, %v961_v53 }
 0xf41   :  { %v935_v29 = vsel %vm6929_vm3, %v5561_v26, %v6484_v50 }
 0xf42   :  { %938 = vrot.lane.b32.xlu0 %v935_v29, %s6795_s0  ;;  %v963_v30 = vsel %vm6929_vm3, %v5563_v27, %v6486_v23  ;;  %v936_v35 = vmul.f32 %v935_v29, %v7206_v48 }
 0xf43   :  { %966 = vrot.lane.b32.xlu1 %v963_v30, %s6795_s0  ;;  %v964_v37 = vmul.f32 %v963_v30, %v7208_v51 }
 0xfb4   :  { %v939_v31 = vpop.permute.xlu0 %938 }
 0xfb5   :  { %v941_v32 = vmul.f32 %v939_v31, %v935_v29  ;;  %v967_v33 = vpop.permute.xlu1 %966 }
 0xfb6   :  { %v969_v34 = vmul.f32 %v967_v33, %v963_v30 }
 0xfb7   :  { %943 = vrot.lane.b32.xlu0 %v941_v32, %s6796_s4 }
 0xfb8   :  { %971 = vrot.lane.b32.xlu1 %v969_v34, %s6796_s4 }
0x1029   :  { %v944_v36 = vpop.permute.xlu0 %943 }
0x102a   :  { %v946_v38 = vadd.f32 %v944_v36, %v936_v35  ;;  %v972_v57 = vpop.permute.xlu1 %971 }
0x102b   :  { %v974_v39 = vadd.f32 %v972_v57, %v964_v37  ;;  %v1213_v37 = vrot.slane %v6939_v25, 6 }
0x102c   :  { %6487 = vtanh.f32 %v946_v38 }
0x102d   :  { %6489 = vtanh.f32 %v974_v39 }
0x1036   :  { %v6488_v18 = vpop.eup %6487 }
0x1037   :  { %v6490_v40 = vpop.eup %6489  ;;  %949 = vrot.lane.b32.xlu0 %v6488_v18, %s6795_s0 }
0x1038   :  { %977 = vrot.lane.b32.xlu1 %v6490_v40, %s6795_s0 }
0x10a9   :  { %v950_v41 = vpop.permute.xlu0 %949 }
0x10aa   :  { %v952_v28 = vmul.f32 %v950_v41, %v935_v29  ;;  %v978_v42 = vpop.permute.xlu1 %977 }
0x10ab   :  { %v980_v43 = vmul.f32 %v978_v42, %v963_v30 }
0x10ac   :  { %982 = vrot.lane.b32.xlu0 %v952_v28, %s6796_s4 }
0x10ad   :  { %987 = vrot.lane.b32.xlu1 %v980_v43, %s6795_s0 }
0x111e   :  { %v983_v44 = vpop.permute.xlu0 %982 }
0x111f   :  { %985 = vst.msk [vmem:[#allocation2 + $0xa] sm:$0x3] %vm238_vm4, %v983_v44  ;;  %v988_v45 = vpop.permute.xlu1 %987 }
0x1120   :  { %990 = vst.msk [vmem:[#allocation2 + $0x4] sm:$0x3] %vm403_vm7, %v988_v45  ;;  %v991_v46 = vsel %vm250_vm5, %v983_v44, %v988_v45 }
0x1121   :  { %5564 = vmatmul.mubr.msk.f32.vlgmr.msra.gmra.mrb[8].mxu0 %vm252_vm6, %v991_v46 }
0x1122   :  { %1399 = vmatprep.mubr.f32.mxu0 %v6794_v3 }
0x11f4   :  { %v1061_v48 = vpop.f32.mrb[8].mxu0 }
0x11f5   :  { %v1068_v51 = vadd.f32 %v1066_v47, %v1061_v48  ;;  %v1063_v52 = vpop.f32.mrb[9].mxu0 }
0x11f6   :  { %v1071_v54 = vadd.f32 %v1069_v49, %v1063_v52 }
0x11f7   :  { %v1072_v55 = vmul.f32 2.0, %v1068_v51 }
0x11f8   :  { %v1100_v56 = vmul.f32 2.0, %v1071_v54 }
0x11f9   :  { %v1073_v58 = vsel %vm6929_vm3, %v1072_v55, %v1068_v51 }
0x11fa   :  { %v5565_v59 = vmul.f32 -1.442695, %v1073_v58  ;;  %v1101_v60 = vsel %vm6929_vm3, %v1100_v56, %v1071_v54 }
0x11fb   :  { %v5567_v63 = vmul.f32 -1.442695, %v1101_v60 }
0x11fc   :  { %6491 = vpow2.f32 %v5565_v59 }
0x11fd   :  { %6493 = vpow2.f32 %v5567_v63 }
0x1206   :  { %v6492_v0 = vpop.eup %6491 }
0x1207   :  { %v6494_v1 = vpop.eup %6493  ;;  %v1077_v2 = vadd.f32 1.0, %v6492_v0 }
0x1208   :  { %v1105_v5 = vadd.f32 1.0, %v6494_v1 }
0x1209   :  { %6495 = vrcp.f32 %v1077_v2 }
0x120a   :  { %6497 = vrcp.f32 %v1105_v5 }
0x1213   :  { %v6496_v61 = vpop.eup %6495 }
0x1214   :  { %v6498_v7 = vpop.eup %6497  ;;  %v1080_v8 = vmul.f32 2.0, %v6496_v61 }
0x1215   :  { %v1108_v12 = vmul.f32 2.0, %v6498_v7 }
0x1216   :  { %v5566_v62 = vadd.f32 -1.0, %v1080_v8  ;;  %v1286_v8 = vld [vmem:[%s8542_s5 + $0x8] sm:$0xff] }
0x1217   :  { %v5568_v4 = vadd.f32 -1.0, %v1108_v12  ;;  %v1288_v12 = vld [vmem:[%s8542_s5 + $0x18] sm:$0xff] }
0x1218   :  { %v1082_v6 = vsel %vm6929_vm3, %v5566_v62, %v6496_v61  ;;  %v1285_v62 = vld [vmem:[%s8542_s5] sm:$0xff] }
0x1219   :  { %1085 = vrot.lane.b32.xlu0 %v1082_v6, %s6795_s0  ;;  %v1110_v14 = vsel %vm6929_vm3, %v5568_v4, %v6498_v7  ;;  %v1083_v9 = vmul.f32 %v1082_v6, %v946_v38  ;;  %v6114_v4 = vpack.c.bf16 %v1288_v12, %v1286_v8 }
0x121a   :  { %1113 = vrot.lane.b32.xlu1 %v1110_v14, %s6795_s0  ;;  %v1111_v23 = vmul.f32 %v1110_v14, %v974_v39 }
0x121b   :  { %6115 = vmatprep.subr.bf16.mxu0 %v6114_v4 }
0x128b   :  { %v1086_v16 = vpop.permute.xlu0 %1085 }
0x128c   :  { %v1088_v22 = vmul.f32 %v1086_v16, %v1082_v6  ;;  %v1114_v17 = vpop.permute.xlu1 %1113  ;;  %v1292_v16 = vld [vmem:[%s8542_s5 + $0x38] sm:$0xff] }
0x128d   :  { %v1116_v19 = vmul.f32 %v1114_v17, %v1110_v14 }
0x128e   :  { %1090 = vrot.lane.b32.xlu0 %v1088_v22, %s6796_s4 }
0x128f   :  { %1118 = vrot.lane.b32.xlu1 %v1116_v19, %s6796_s4  ;;  %v1289_v19 = vld [vmem:[%s8542_s5 + $0x20] sm:$0xff] }
0x1300   :  { %v1091_v50 = vpop.permute.xlu0 %1090 }
0x1301   :  { %v1093_v15 = vadd.f32 %v1091_v50, %v1083_v9  ;;  %v1119_v53 = vpop.permute.xlu1 %1118  ;;  %v1291_v9 = vld [vmem:[%s8542_s5 + $0x30] sm:$0xff] }
0x1302   :  { %v1121_v26 = vadd.f32 %v1119_v53, %v1111_v23  ;;  %v6120_v23 = vpack.c.bf16 %v1291_v9, %v1289_v19  ;;  %v1294_v53 = vld [vmem:[%s8542_s5 + $0x48] sm:$0xff] }
0x1303   :  { %6499 = vtanh.f32 %v1093_v15 }
0x1304   :  { %6501 = vtanh.f32 %v1121_v26 }
0x130d   :  { %v6500_v27 = vpop.eup %6499 }
0x130e   :  { %v6502_v29 = vpop.eup %6501  ;;  %1096 = vrot.lane.b32.xlu0 %v6500_v27, %s6795_s0 }
0x130f   :  { %1124 = vrot.lane.b32.xlu1 %v6502_v29, %s6795_s0  ;;  %v1293_v29 = vld [vmem:[%s8542_s5 + $0x40] sm:$0xff] }
0x1380   :  { %v1097_v30 = vpop.permute.xlu0 %1096 }
0x1381   :  { %v1099_v31 = vmul.f32 %v1097_v30, %v1082_v6  ;;  %v1125_v32 = vpop.permute.xlu1 %1124  ;;  %v1287_v6 = vld [vmem:[%s8542_s5 + $0x10] sm:$0xff] }
0x1382   :  { %v1127_v33 = vmul.f32 %v1125_v32, %v1110_v14  ;;  %v1290_v14 = vld [vmem:[%s8542_s5 + $0x28] sm:$0xff]  ;;  %v6116_v22 = vpack.c.bf16 %v1287_v6, %v1285_v62  ;;  %v1295_v30 = vld [vmem:[%s8542_s5 + $0x50] sm:$0xff]  ;;  %v1300_v32 = vld [vmem:[%s8542_s5 + $0x78] sm:$0xff] }
0x1383   :  { %1129 = vrot.lane.b32.xlu0 %v1099_v31, %s6796_s4  ;;  %v6118_v17 = vpack.c.bf16 %v1292_v16, %v1290_v14  ;;  %v6124_v31 = vpack.c.bf16 %v1295_v30, %v1293_v29  ;;  %v1306_v29 = vld [vmem:[%s8544_s6 + $0x28] sm:$0xff]  ;;  %v1308_v30 = vld [vmem:[%s8544_s6 + $0x38] sm:$0xff] }
0x1384   :  { %1134 = vrot.lane.b32.xlu1 %v1127_v33, %s6795_s0  ;;  %6117 = vmatpush1.bf16.msra.mxu0 %v6116_v22 }
0x1385   :  { %6119 = vmatprep.subr.bf16.mxu0 %v6118_v17 }
0x1388   :  { %6121 = vmatpush1.bf16.msra.mxu0 %v6120_v23  ;;  %v1302_v23 = vld [vmem:[%s8544_s6 + $0x8] sm:$0xff] }
0x13f5   :  { %v1130_v34 = vpop.permute.xlu0 %1129 }
0x13f6   :  { %1132 = vst.msk [vmem:[#allocation2 + $0xc] sm:$0x3] %vm238_vm4, %v1130_v34  ;;  %v1135_v35 = vpop.permute.xlu1 %1134 }
0x13f7   :  { %1137 = vst.msk [vmem:[#allocation2 + $0x2] sm:$0x3] %vm403_vm7, %v1135_v35  ;;  %v1138_v36 = vsel %vm250_vm5, %v1130_v34, %v1135_v35  ;;  %v1297_v34 = vld [vmem:[%s8542_s5 + $0x60] sm:$0xff]  ;;  %v1299_v35 = vld [vmem:[%s8542_s5 + $0x70] sm:$0xff] }
0x13f8   :  { %5569 = vmatmul.mubr.msk.f32.vlgmr.msra.gmra.mrb[6].mxu1 %vm252_vm6, %v1138_v36  ;;  %v6128_v36 = vpack.c.bf16 %v1299_v35, %v1297_v34  ;;  %v1307_v34 = vld [vmem:[%s8544_s6 + $0x30] sm:$0xff] }
0x13f9   :  { %1550 = vmatprep.mubr.f32.mxu1 %v6794_v3 }
0x14cb   :  { %v1208_v38 = vpop.f32.mrb[6].mxu1 }
0x14cc   :  { %v1215_v57 = vadd.f32 %v1213_v37, %v1208_v38  ;;  %v1210_v39 = vpop.f32.mrb[7].mxu1 }
0x14cd   :  { %v1216_v18 = vadd.f32 %v1210_v39, %v6933_v21 }
0x14ce   :  { %v1217_v40 = vmul.f32 2.0, %v1215_v57 }
0x14cf   :  { %v1245_v41 = vmul.f32 2.0, %v1216_v18 }
0x14d0   :  { %v1218_v28 = vsel %vm6929_vm3, %v1217_v40, %v1215_v57 }
0x14d1   :  { %v5570_v42 = vmul.f32 -1.442695, %v1218_v28  ;;  %v1246_v43 = vsel %vm6929_vm3, %v1245_v41, %v1216_v18 }
0x14d2   :  { %v5572_v44 = vmul.f32 -1.442695, %v1246_v43  ;;  %v1317_v43 = vld [vmem:[%s8543_s7] sm:$0x3] }
0x14d3   :  { %6503 = vpow2.f32 %v5570_v42 }
0x14d4   :  { %6505 = vpow2.f32 %v5572_v44  ;;  %v1322_v44 = vrot.slane %v1317_v43, %v84_v11 }
0x14dd   :  { %v6504_v45 = vpop.eup %6503 }
0x14de   :  { %v6506_v46 = vpop.eup %6505  ;;  %v1222_v25 = vadd.f32 1.0, %v6504_v45  ;;  %v1326_v45 = vrot.slane %v1317_v43, %v88_v13 }
0x14df   :  { %v1250_v47 = vadd.f32 1.0, %v6506_v46 }
0x14e0   :  { %6507 = vrcp.f32 %v1222_v25 }
0x14e1   :  { %6509 = vrcp.f32 %v1250_v47 }
0x14ea   :  { %v6508_v48 = vpop.eup %6507 }
0x14eb   :  { %v6510_v21 = vpop.eup %6509  ;;  %v1225_v49 = vmul.f32 2.0, %v6508_v48 }
0x14ec   :  { %v1253_v51 = vmul.f32 2.0, %v6510_v21 }
0x14ed   :  { %v5571_v52 = vadd.f32 -1.0, %v1225_v49 }
0x14ee   :  { %v5573_v54 = vadd.f32 -1.0, %v1253_v51 }
0x14ef   :  { %v7284_v55 = vsel %vm6929_vm3, %v5571_v52, %v6508_v48 }
0x14f0   :  { %1230 = vrot.lane.b32.xlu1 %v7284_v55, %s6795_s0  ;;  %v1255_v56 = vsel %vm6929_vm3, %v5573_v54, %v6510_v21  ;;  %v1228_v0 = vmul.f32 %v7284_v55, %v1093_v15 }
0x14f1   :  { %1258 = vrot.lane.b32.xlu0 %v1255_v56, %s6795_s0  ;;  %v1256_v2 = vmul.f32 %v1255_v56, %v1121_v26  ;;  %v1296_v26 = vld [vmem:[%s8542_s5 + $0x58] sm:$0xff] }
0x14f2   :  { %v6122_v27 = vpack.c.bf16 %v1296_v26, %v1294_v53  ;;  %v1301_v53 = vld [vmem:[%s8544_s6] sm:$0xff] }
0x14f4   :  { %6123 = vmatprep.subr.bf16.mxu0 %v6122_v27  ;;  %v1303_v27 = vld [vmem:[%s8544_s6 + $0x10] sm:$0xff] }
0x14f5   :  { %6125 = vmatpush1.bf16.msra.mxu0 %v6124_v31 }
0x1562   :  { %v1231_v58 = vpop.permute.xlu1 %1230 }
0x1563   :  { %v1233_v59 = vmul.f32 %v1231_v58, %v7284_v55  ;;  %v1259_v60 = vpop.permute.xlu0 %1258 }
0x1564   :  { %v1261_v63 = vmul.f32 %v1259_v60, %v1255_v56 }
0x1565   :  { %1235 = vrot.lane.b32.xlu1 %v1233_v59, %s6796_s4 }
0x1566   :  { %1263 = vrot.lane.b32.xlu0 %v1261_v63, %s6796_s4 }
0x15d7   :  { %v1236_v1 = vpop.permute.xlu1 %1235 }
0x15d8   :  { %v1238_v5 = vadd.f32 %v1236_v1, %v1228_v0  ;;  %v1264_v61 = vpop.permute.xlu0 %1263 }
0x15d9   :  { %v1266_v7 = vadd.f32 %v1264_v61, %v1256_v2 }
0x15da   :  { %6511 = vtanh.f32 %v1238_v5 }
0x15db   :  { %6513 = vtanh.f32 %v1266_v7 }
0x15e4   :  { %v6512_v50 = vpop.eup %6511 }
0x15e5   :  { %v6514_v15 = vpop.eup %6513  ;;  %1241 = vrot.lane.b32.xlu1 %v6512_v50, %s6795_s0 }
0x15e6   :  { %1269 = vrot.lane.b32.xlu0 %v6514_v15, %s6795_s0  ;;  %v1304_v15 = vld [vmem:[%s8544_s6 + $0x18] sm:$0xff] }
0x15e7   :  { %v7413_v26 = vpack.c.bf16 %v1304_v15, %v1302_v23 }
0x15e9   :  { %241 = vrot.lane.b32.xlu1 %v7056_v24, %s6795_s0  ;;  %v1298_v24 = vld [vmem:[%s8542_s5 + $0x68] sm:$0xff]  ;;  %6131 = vmatprep.subr.bf16.mxu1 %v7413_v26 }
0x15ea   :  { %v6126_v33 = vpack.c.bf16 %v1300_v32, %v1298_v24  ;;  %v7424_v24 = vpack.c.bf16 %v1303_v27, %v1301_v53  ;;  %v7426_v32 = vpack.c.bf16 %v1308_v30, %v1306_v29 }
0x15ec   :  { %6127 = vmatprep.subr.bf16.mxu0 %v6126_v33  ;;  %v1305_v33 = vld [vmem:[%s8544_s6 + $0x20] sm:$0xff]  ;;  %6133 = vmatpush1.bf16.msra.mxu1 %v7424_v24 }
0x15ed   :  { %6129 = vmatpush1.bf16.msra.mxu0 %v6128_v36  ;;  %v7437_v35 = vpack.c.bf16 %v1307_v34, %v1305_v33  ;;  %6135 = vmatprep.subr.bf16.mxu1 %v7426_v32 }
0x15ee   :  { %6147 = vmatprep.subr.bf16.mxu0 %v7413_v26 }
0x15f0   :  { %6137 = vmatpush1.bf16.msra.mxu1 %v7437_v35 }
0x1657   :  { %v1242_v37 = vpop.permute.xlu1 %1241 }
0x1658   :  { %v1270_v38 = vpop.permute.xlu0 %1269  ;;  %v1244_v18 = vmul.f32 %v1242_v37, %v7284_v55  ;;  %v1310_v37 = vld [vmem:[%s8544_s6 + $0x48] sm:$0xff] }
0x1659   :  { %v1272_v57 = vmul.f32 %v1270_v38, %v1255_v56  ;;  %v1312_v38 = vld [vmem:[%s8544_s6 + $0x58] sm:$0xff] }
0x165b   :  { %v242_v39 = vpop.permute.xlu1 %241  ;;  %1279 = vrot.lane.b32.xlu0 %v1272_v57, %s6795_s0  ;;  %v7452_v57 = vpack.c.bf16 %v1312_v38, %v1310_v37 }
0x165c   :  { %245 = vst.msk [vmem:[#allocation2 + $0x8] sm:$0xc0] %vm244_vm8, %v242_v39  ;;  %v1309_v39 = vld [vmem:[%s8544_s6 + $0x40] sm:$0xff] }
0x165d   :  { %6139 = vmatprep.subr.bf16.mxu1 %v7452_v57 }
0x165f   :  { %1274 = vrot.lane.b32.xlu0 %v1244_v18, %s6796_s4  ;;  %v1311_v18 = vld [vmem:[%s8544_s6 + $0x50] sm:$0xff] }
0x16cd   :  { %v1280_v40 = vpop.permute.xlu0 %1279 }
0x16ce   :  { %1282 = vst.msk [vmem:[#allocation2] sm:$0x3] %vm403_vm7, %v1280_v40  ;;  %v7460_v40 = vpack.c.bf16 %v1311_v18, %v1309_v39 }
0x16d0   :  { %6141 = vmatpush1.bf16.msra.mxu1 %v7460_v40 }
0x16d1   :  { %v1275_v41 = vpop.permute.xlu0 %1274 }
0x16d2   :  { %1277 = vst.msk [vmem:[#allocation2 + $0xe] sm:$0x3] %vm238_vm4, %v1275_v41  ;;  %v1314_v41 = vld [vmem:[%s8544_s6 + $0x68] sm:$0xff] }
0x16d5   :  { %v1283_v28 = vld [vmem:[#allocation2] sm:$0xff] }
0x16d6   :  { %5574 = vmatmul.mubr.msk.f32.vlgmr.msra.gmra.mrb[10].mxu0 %vm252_vm6, %v1283_v28  ;;  %v1316_v28 = vld [vmem:[%s8544_s6 + $0x78] sm:$0xff] }
0x16d7   :  { %1405 = vmatprep.mubr.f32.mxu0 %v6794_v3  ;;  %6149 = vmatpush1.bf16.msra.mxu0 %v7424_v24  ;;  %v7474_v43 = vpack.c.bf16 %v1316_v28, %v1314_v41 }
0x16d8   :  { %6151 = vmatprep.subr.bf16.mxu0 %v7426_v32 }
0x16d9   :  { %v1284_v42 = vld [vmem:[#allocation2 + $0x8] sm:$0xff]  ;;  %6143 = vmatprep.subr.bf16.mxu1 %v7474_v43 }
0x16da   :  { %5575 = vmatmul.mubr.msk.f32.gmra.mrb[12].mxu0 %vm252_vm6, %v1284_v42  ;;  %v1313_v42 = vld [vmem:[%s8544_s6 + $0x60] sm:$0xff] }
0x16db   :  { %1702 = vmatprep.mubr.f32.mxu0 %v6794_v3  ;;  %6153 = vmatpush1.bf16.msra.mxu0 %v7437_v35 }
0x16dc   :  { %6155 = vmatprep.subr.bf16.mxu0 %v7452_v57 }
0x16df   :  { %6157 = vmatpush1.bf16.msra.mxu0 %v7460_v40 }
0x16e0   :  { %6159 = vmatprep.subr.bf16.mxu0 %v7474_v43 }
0x17a9   :  { %v1401_v46 = vpop.f32.mrb[10].mxu0 }
0x17aa   :  { %v7364_v25 = vadd.f32 %v1401_v46, %v1322_v44  ;;  %v1403_v47 = vpop.f32.mrb[11].mxu0 }
0x17ab   :  { %v7366_v48 = vadd.f32 %v1403_v47, %v1326_v45 }
0x17ac   :  { %v1412_v21 = vmul.f32 2.0, %v7364_v25 }
0x17ad   :  { %v1407_v49 = vpop.f32.mrb[12].mxu0 }
0x17ae   :  { %v1413_v51 = vsel %vm6929_vm3, %v1412_v21, %v7364_v25  ;;  %v7372_v52 = vadd.f32 %v1407_v49, %v1322_v44  ;;  %v1409_v54 = vpop.f32.mrb[13].mxu0  ;;  %v1315_v44 = vld [vmem:[%s8544_s6 + $0x70] sm:$0xff]  ;;  %s6804_s6 = smov 4  }
0x17af   :  { %v5576_v11 = vmul.f32 -1.442695, %v1413_v51  ;;  %v7374_v55 = vadd.f32 %v1409_v54, %v1326_v45  ;;  %v7480_v45 = vpack.c.bf16 %v1315_v44, %v1313_v42 }
0x17b1   :  { %6515 = vpow2.f32 %v5576_v11  ;;  %v1440_v10 = vmul.f32 2.0, %v7374_v55  ;;  %6145 = vmatpush1.bf16.msra.mxu1 %v7480_v45  ;;  %6161 = vmatpush1.bf16.msra.mxu0 %v7480_v45 }
0x17b2   :  { %6163 = vmatprep.subr.bf16.mxu1 %v7413_v26  ;;  %6179 = vmatprep.subr.bf16.mxu0 %v7413_v26 }
0x17b3   :  { %v1441_v13 = vsel %vm6929_vm3, %v1440_v10, %v7374_v55 }
0x17b4   :  { %v5578_v56 = vmul.f32 -1.442695, %v1441_v13  ;;  %v1558_v13 = vrot.slane %v7364_v25, 2 }
0x17b6   :  { %6517 = vpow2.f32 %v5578_v56 }
0x17bb   :  { %v6516_v58 = vpop.eup %6515 }
0x17bc   :  { %v1417_v59 = vadd.f32 1.0, %v6516_v58  ;;  %v1562_v58 = vrot.slane %v7374_v55, 4 }
0x17be   :  { %6519 = vrcp.f32 %v1417_v59 }
0x17c0   :  { %v6518_v60 = vpop.eup %6517 }
0x17c1   :  { %v1445_v63 = vadd.f32 1.0, %v6518_v60 }
0x17c3   :  { %6521 = vrcp.f32 %v1445_v63 }
0x17c8   :  { %v6520_v0 = vpop.eup %6519 }
0x17c9   :  { %v1420_v1 = vmul.f32 2.0, %v6520_v0 }
0x17cb   :  { %v5577_v2 = vadd.f32 -1.0, %v1420_v1 }
0x17cd   :  { %v6522_v5 = vpop.eup %6521  ;;  %v7382_v61 = vsel %vm6929_vm3, %v5577_v2, %v6520_v0 }
0x17ce   :  { %1425 = vrot.lane.b32.xlu0 %v7382_v61, %s6795_s0  ;;  %v1448_v7 = vmul.f32 2.0, %v6522_v5  ;;  %v1423_v16 = vmul.f32 0.0, %v7382_v61 }
0x17d0   :  { %v5579_v8 = vadd.f32 -1.0, %v1448_v7 }
0x17d2   :  { %v7388_v12 = vsel %vm6929_vm3, %v5579_v8, %v6522_v5 }
0x17d3   :  { %1453 = vrot.lane.b32.xlu1 %v7388_v12, %s6795_s0  ;;  %v1451_v19 = vmul.f32 0.0, %v7388_v12 }
0x1840   :  { %v1426_v62 = vpop.permute.xlu0 %1425 }
0x1841   :  { %v1428_v4 = vmul.f32 %v1426_v62, %v7382_v61 }
0x1843   :  { %1430 = vrot.lane.b32.xlu0 %v1428_v4, %s6796_s4 }
0x1845   :  { %v1454_v6 = vpop.permute.xlu1 %1453 }
0x1846   :  { %v1456_v14 = vmul.f32 %v1454_v6, %v7388_v12 }
0x1848   :  { %1458 = vrot.lane.b32.xlu1 %v1456_v14, %s6796_s4 }
0x18b5   :  { %v1431_v22 = vpop.permute.xlu0 %1430 }
0x18b6   :  { %v7397_v17 = vadd.f32 %v1431_v22, %v1423_v16 }
0x18b8   :  { %6523 = vtanh.f32 %v7397_v17 }
0x18ba   :  { %v1459_v9 = vpop.permute.xlu1 %1458 }
0x18bb   :  { %v7401_v50 = vadd.f32 %v1459_v9, %v1451_v19 }
0x18bd   :  { %6525 = vtanh.f32 %v7401_v50 }
0x18c2   :  { %v6524_v31 = vpop.eup %6523 }
0x18c3   :  { %1436 = vrot.lane.b32.xlu0 %v6524_v31, %s6795_s0  ;;  %v1605_v31 = vrot.slane %v7401_v50, 6 }
0x18c7   :  { %v6526_v36 = vpop.eup %6525 }
0x18c8   :  { %1464 = vrot.lane.b32.xlu1 %v6526_v36, %s6795_s0 }
0x1935   :  { %v1437_v46 = vpop.permute.xlu0 %1436 }
0x1936   :  { %v1439_v47 = vmul.f32 %v1437_v46, %v7382_v61 }
0x1938   :  { %1469 = vrot.lane.b32.xlu1 %v1439_v47, %s6796_s4 }
0x193a   :  { %v1465_v21 = vpop.permute.xlu1 %1464 }
0x193b   :  { %v7491_v49 = vmul.f32 %v1465_v21, %v7388_v12  ;;  %v1709_v21 = vrot.slane %v7364_v25, 4 }
0x193d   :  { %v1478_v51 = vrot.slane %v7491_v49, 6 }
0x193f   :  { %1479 = vrot.lane.b32.xlu0 %v1478_v51, %s6795_s0 }
0x19aa   :  { %v1470_v54 = vpop.permute.xlu1 %1469 }
0x19ab   :  { %1472 = vst.msk [vmem:[#allocation2] sm:$0x3] %vm238_vm4, %v1470_v54 }
0x19b1   :  { %v1480_v11 = vpop.permute.xlu0 %1479 }
0x19b2   :  { %v1482_v10 = vsel %vm250_vm5, %v1470_v54, %v1480_v11  ;;  %v1712_v54 = vrot.slane %v7374_v55, 2 }
0x19b3   :  { %5580 = vmatmul.mubr.msk.f32.vlgmr.msra.gmra.mrb[8].mxu1 %vm252_vm6, %v1482_v10 }
0x19b4   :  { %6165 = vmatpush1.bf16.msra.mxu1 %v7424_v24  ;;  %1849 = vmatprep.mubr.f32.mxu1 %v6794_v3 }
0x19b5   :  { %6167 = vmatprep.subr.bf16.mxu1 %v7426_v32 }
0x19b8   :  { %6169 = vmatpush1.bf16.msra.mxu1 %v7437_v35 }
0x19b9   :  { %6171 = vmatprep.subr.bf16.mxu1 %v7452_v57 }
0x19bc   :  { %6173 = vmatpush1.bf16.msra.mxu1 %v7460_v40 }
0x19bd   :  { %6175 = vmatprep.subr.bf16.mxu1 %v7474_v43 }
0x19c0   :  { %6177 = vmatpush1.bf16.msra.mxu1 %v7480_v45 }
0x19c1   :  { %6195 = vmatprep.subr.bf16.mxu1 %v7413_v26 }
0x1a86   :  { %v1552_v56 = vpop.f32.mrb[8].mxu1 }
0x1a87   :  { %v1560_v59 = vadd.f32 %v1558_v13, %v1552_v56  ;;  %v1554_v60 = vpop.f32.mrb[9].mxu1 }
0x1a88   :  { %v1564_v63 = vadd.f32 %v1562_v58, %v1554_v60 }
0x1a89   :  { %v1565_v0 = vmul.f32 2.0, %v1560_v59 }
0x1a8a   :  { %v1593_v1 = vmul.f32 2.0, %v1564_v63 }
0x1a8b   :  { %v1566_v2 = vsel %vm6929_vm3, %v1565_v0, %v1560_v59 }
0x1a8c   :  { %v5581_v5 = vmul.f32 -1.442695, %v1566_v2  ;;  %v1594_v61 = vsel %vm6929_vm3, %v1593_v1, %v1564_v63 }
0x1a8d   :  { %v5583_v7 = vmul.f32 -1.442695, %v1594_v61 }
0x1a8e   :  { %6527 = vpow2.f32 %v5581_v5 }
0x1a8f   :  { %6529 = vpow2.f32 %v5583_v7 }
0x1a98   :  { %v6528_v8 = vpop.eup %6527 }
0x1a99   :  { %v6530_v12 = vpop.eup %6529  ;;  %v1570_v62 = vadd.f32 1.0, %v6528_v8 }
0x1a9a   :  { %v1598_v4 = vadd.f32 1.0, %v6530_v12 }
0x1a9b   :  { %6531 = vrcp.f32 %v1570_v62 }
0x1a9c   :  { %6533 = vrcp.f32 %v1598_v4 }
0x1aa5   :  { %v6532_v6 = vpop.eup %6531 }
0x1aa6   :  { %v6534_v14 = vpop.eup %6533  ;;  %v1573_v16 = vmul.f32 2.0, %v6532_v6 }
0x1aa7   :  { %v1601_v22 = vmul.f32 2.0, %v6534_v14 }
0x1aa8   :  { %v5582_v19 = vadd.f32 -1.0, %v1573_v16 }
0x1aa9   :  { %v5584_v9 = vadd.f32 -1.0, %v1601_v22 }
0x1aaa   :  { %v1575_v23 = vsel %vm6929_vm3, %v5582_v19, %v6532_v6 }
0x1aab   :  { %1578 = vrot.lane.b32.xlu1 %v1575_v23, %s6795_s0  ;;  %v1603_v15 = vsel %vm6929_vm3, %v5584_v9, %v6534_v14  ;;  %v1576_v33 = vmul.f32 %v1575_v23, %v7397_v17 }
0x1aac   :  { %1609 = vrot.lane.b32.xlu0 %v1603_v15, %s6795_s0  ;;  %v1607_v36 = vmul.f32 %v1605_v31, %v1603_v15 }
0x1b1d   :  { %v1579_v53 = vpop.permute.xlu1 %1578 }
0x1b1e   :  { %v1581_v27 = vmul.f32 %v1579_v53, %v1575_v23  ;;  %v1610_v29 = vpop.permute.xlu0 %1609 }
0x1b1f   :  { %v1612_v30 = vmul.f32 %v1610_v29, %v1603_v15 }
0x1b20   :  { %1583 = vrot.lane.b32.xlu1 %v1581_v27, %s6796_s4 }
0x1b21   :  { %1614 = vrot.lane.b32.xlu0 %v1612_v30, %s6796_s4 }
0x1b92   :  { %v1584_v34 = vpop.permute.xlu1 %1583 }
0x1b93   :  { %v7523_v37 = vadd.f32 %v1584_v34, %v1576_v33  ;;  %v1615_v38 = vpop.permute.xlu0 %1614 }
0x1b94   :  { %v7525_v39 = vadd.f32 %v1615_v38, %v1607_v36 }
0x1b95   :  { %6535 = vtanh.f32 %v7523_v37 }
0x1b96   :  { %6537 = vtanh.f32 %v7525_v39 }
0x1b9f   :  { %v6536_v18 = vpop.eup %6535 }
0x1ba0   :  { %v6538_v41 = vpop.eup %6537  ;;  %1589 = vrot.lane.b32.xlu1 %v6536_v18, %s6795_s0 }
0x1ba1   :  { %1620 = vrot.lane.b32.xlu0 %v6538_v41, %s6795_s0 }
0x1c12   :  { %v1590_v50 = vpop.permute.xlu1 %1589 }
0x1c13   :  { %v1592_v28 = vmul.f32 %v1590_v50, %v1575_v23  ;;  %v1621_v17 = vpop.permute.xlu0 %1620 }
0x1c14   :  { %v1623_v42 = vmul.f32 %v1621_v17, %v1603_v15 }
0x1c15   :  { %1625 = vrot.lane.b32.xlu1 %v1592_v28, %s6796_s4  ;;  %v1856_v28 = vrot.slane %v7364_v25, 6 }
0x1c16   :  { %1630 = vrot.lane.b32.xlu0 %v1623_v42, %s6795_s0 }
0x1c87   :  { %v1626_v44 = vpop.permute.xlu1 %1625 }
0x1c88   :  { %1628 = vst.msk [vmem:[#allocation2 + $0x2] sm:$0x3] %vm238_vm4, %v1626_v44  ;;  %v1631_v46 = vpop.permute.xlu0 %1630 }
0x1c89   :  { %1633 = vst.msk [vmem:[#allocation2 + $0xc] sm:$0x3] %vm403_vm7, %v1631_v46  ;;  %v1634_v47 = vsel %vm250_vm5, %v1626_v44, %v1631_v46 }
0x1c8a   :  { %5585 = vmatmul.mubr.msk.f32.vlgmr.msra.gmra.mrb[14].mxu0 %vm252_vm6, %v1634_v47 }
0x1c8b   :  { %6181 = vmatpush1.bf16.msra.mxu0 %v7424_v24  ;;  %1994 = vmatprep.mubr.f32.mxu0 %v6794_v3 }
0x1c8c   :  { %6183 = vmatprep.subr.bf16.mxu0 %v7426_v32 }
0x1c8f   :  { %6185 = vmatpush1.bf16.msra.mxu0 %v7437_v35 }
0x1c90   :  { %6187 = vmatprep.subr.bf16.mxu0 %v7452_v57 }
0x1c93   :  { %6189 = vmatpush1.bf16.msra.mxu0 %v7460_v40 }
0x1c94   :  { %6191 = vmatprep.subr.bf16.mxu0 %v7474_v43 }
0x1c97   :  { %6193 = vmatpush1.bf16.msra.mxu0 %v7480_v45 }
0x1c98   :  { %6211 = vmatprep.subr.bf16.mxu0 %v7413_v26 }
0x1d5d   :  { %v1704_v51 = vpop.f32.mrb[14].mxu0 }
0x1d5e   :  { %v1711_v11 = vadd.f32 %v1709_v21, %v1704_v51  ;;  %v1706_v10 = vpop.f32.mrb[15].mxu0 }
0x1d5f   :  { %v1714_v13 = vadd.f32 %v1712_v54, %v1706_v10 }
0x1d60   :  { %v1715_v56 = vmul.f32 2.0, %v1711_v11 }
0x1d61   :  { %v1743_v58 = vmul.f32 2.0, %v1714_v13 }
0x1d62   :  { %v1716_v59 = vsel %vm6929_vm3, %v1715_v56, %v1711_v11 }
0x1d63   :  { %v5586_v60 = vmul.f32 -1.442695, %v1716_v59  ;;  %v1744_v63 = vsel %vm6929_vm3, %v1743_v58, %v1714_v13 }
0x1d64   :  { %v5588_v0 = vmul.f32 -1.442695, %v1744_v63 }
0x1d65   :  { %6539 = vpow2.f32 %v5586_v60 }
0x1d66   :  { %6541 = vpow2.f32 %v5588_v0 }
0x1d6f   :  { %v6540_v1 = vpop.eup %6539 }
0x1d70   :  { %v6542_v2 = vpop.eup %6541  ;;  %v1720_v5 = vadd.f32 1.0, %v6540_v1 }
0x1d71   :  { %v1748_v61 = vadd.f32 1.0, %v6542_v2 }
0x1d72   :  { %6543 = vrcp.f32 %v1720_v5 }
0x1d73   :  { %6545 = vrcp.f32 %v1748_v61 }
0x1d7c   :  { %v6544_v7 = vpop.eup %6543 }
0x1d7d   :  { %v6546_v8 = vpop.eup %6545  ;;  %v1723_v12 = vmul.f32 2.0, %v6544_v7 }
0x1d7e   :  { %v1751_v62 = vmul.f32 2.0, %v6546_v8 }
0x1d7f   :  { %v5587_v4 = vadd.f32 -1.0, %v1723_v12 }
0x1d80   :  { %v5589_v6 = vadd.f32 -1.0, %v1751_v62 }
0x1d81   :  { %v1725_v14 = vsel %vm6929_vm3, %v5587_v4, %v6544_v7 }
0x1d82   :  { %1728 = vrot.lane.b32.xlu1 %v1725_v14, %s6795_s0  ;;  %v1753_v16 = vsel %vm6929_vm3, %v5589_v6, %v6546_v8  ;;  %v1726_v15 = vmul.f32 %v1725_v14, %v7523_v37 }
0x1d83   :  { %1756 = vrot.lane.b32.xlu0 %v1753_v16, %s6795_s0  ;;  %v1754_v27 = vmul.f32 %v1753_v16, %v7525_v39 }
0x1df4   :  { %v1729_v22 = vpop.permute.xlu1 %1728 }
0x1df5   :  { %v1731_v19 = vmul.f32 %v1729_v22, %v1725_v14  ;;  %v1757_v9 = vpop.permute.xlu0 %1756 }
0x1df6   :  { %v1759_v23 = vmul.f32 %v1757_v9, %v1753_v16 }
0x1df7   :  { %1733 = vrot.lane.b32.xlu1 %v1731_v19, %s6796_s4 }
0x1df8   :  { %1761 = vrot.lane.b32.xlu0 %v1759_v23, %s6796_s4 }
0x1e69   :  { %v1734_v53 = vpop.permute.xlu1 %1733 }
0x1e6a   :  { %v7562_v29 = vadd.f32 %v1734_v53, %v1726_v15  ;;  %v1762_v30 = vpop.permute.xlu0 %1761 }
0x1e6b   :  { %v7564_v31 = vadd.f32 %v1762_v30, %v1754_v27 }
0x1e6c   :  { %6547 = vtanh.f32 %v7562_v29 }
0x1e6d   :  { %6549 = vtanh.f32 %v7564_v31 }
0x1e76   :  { %v6548_v33 = vpop.eup %6547 }
0x1e77   :  { %v6550_v34 = vpop.eup %6549  ;;  %1739 = vrot.lane.b32.xlu1 %v6548_v33, %s6795_s0  ;;  %v2003_v33 = vrot.slane %v7366_v48, 6 }
0x1e78   :  { %1767 = vrot.lane.b32.xlu0 %v6550_v34, %s6795_s0 }
0x1ee9   :  { %v1740_v36 = vpop.permute.xlu1 %1739 }
0x1eea   :  { %v1742_v37 = vmul.f32 %v1740_v36, %v1725_v14  ;;  %v1768_v38 = vpop.permute.xlu0 %1767 }
0x1eeb   :  { %v1770_v18 = vmul.f32 %v1768_v38, %v1753_v16 }
0x1eec   :  { %1772 = vrot.lane.b32.xlu1 %v1742_v37, %s6796_s4 }
0x1eed   :  { %1777 = vrot.lane.b32.xlu0 %v1770_v18, %s6795_s0 }
0x1f5e   :  { %v1773_v39 = vpop.permute.xlu1 %1772 }
0x1f5f   :  { %1775 = vst.msk [vmem:[#allocation2 + $0x4] sm:$0x3] %vm238_vm4, %v1773_v39  ;;  %v1778_v41 = vpop.permute.xlu0 %1777 }
0x1f60   :  { %1780 = vst.msk [vmem:[#allocation2 + $0xa] sm:$0x3] %vm403_vm7, %v1778_v41  ;;  %v1781_v50 = vsel %vm250_vm5, %v1773_v39, %v1778_v41 }
0x1f61   :  { %5590 = vmatmul.mubr.msk.f32.vlgmr.msra.gmra.mrb[10].mxu1 %vm252_vm6, %v1781_v50 }
0x1f62   :  { %6197 = vmatpush1.bf16.msra.mxu1 %v7424_v24  ;;  %2140 = vmatprep.mubr.f32.mxu1 %v6794_v3 }
0x1f63   :  { %6199 = vmatprep.subr.bf16.mxu1 %v7426_v32 }
0x1f66   :  { %6201 = vmatpush1.bf16.msra.mxu1 %v7437_v35 }
0x1f67   :  { %6203 = vmatprep.subr.bf16.mxu1 %v7452_v57 }
0x1f6a   :  { %6205 = vmatpush1.bf16.msra.mxu1 %v7460_v40 }
0x1f6b   :  { %6207 = vmatprep.subr.bf16.mxu1 %v7474_v43 }
0x1f6e   :  { %6209 = vmatpush1.bf16.msra.mxu1 %v7480_v45 }
0x1f6f   :  { %6227 = vmatprep.subr.bf16.mxu1 %v7413_v26 }
0x2034   :  { %v1851_v17 = vpop.f32.mrb[10].mxu1 }
0x2035   :  { %v1858_v42 = vadd.f32 %v1856_v28, %v1851_v17  ;;  %v1853_v44 = vpop.f32.mrb[11].mxu1 }
0x2036   :  { %v1859_v46 = vadd.f32 %v1853_v44, %v7374_v55 }
0x2037   :  { %v1860_v47 = vmul.f32 2.0, %v1858_v42 }
0x2038   :  { %v1888_v21 = vmul.f32 2.0, %v1859_v46 }
0x2039   :  { %v1861_v51 = vsel %vm6929_vm3, %v1860_v47, %v1858_v42 }
0x203a   :  { %v5591_v54 = vmul.f32 -1.442695, %v1861_v51  ;;  %v1889_v11 = vsel %vm6929_vm3, %v1888_v21, %v1859_v46 }
0x203b   :  { %v5593_v10 = vmul.f32 -1.442695, %v1889_v11 }
0x203c   :  { %6551 = vpow2.f32 %v5591_v54 }
0x203d   :  { %6553 = vpow2.f32 %v5593_v10 }
0x2046   :  { %v6552_v26 = vpop.eup %6551 }
0x2047   :  { %v6554_v13 = vpop.eup %6553  ;;  %v1865_v25 = vadd.f32 1.0, %v6552_v26 }
0x2048   :  { %v1893_v56 = vadd.f32 1.0, %v6554_v13 }
0x2049   :  { %6555 = vrcp.f32 %v1865_v25 }
0x204a   :  { %6557 = vrcp.f32 %v1893_v56 }
0x2053   :  { %v6556_v58 = vpop.eup %6555 }
0x2054   :  { %v6558_v55 = vpop.eup %6557  ;;  %v1868_v59 = vmul.f32 2.0, %v6556_v58 }
0x2055   :  { %v1896_v60 = vmul.f32 2.0, %v6558_v55 }
0x2056   :  { %v5592_v63 = vadd.f32 -1.0, %v1868_v59 }
0x2057   :  { %v5594_v0 = vadd.f32 -1.0, %v1896_v60 }
0x2058   :  { %v1870_v1 = vsel %vm6929_vm3, %v5592_v63, %v6556_v58 }
0x2059   :  { %1873 = vrot.lane.b32.xlu1 %v1870_v1, %s6795_s0  ;;  %v1898_v2 = vsel %vm6929_vm3, %v5594_v0, %v6558_v55  ;;  %v1871_v12 = vmul.f32 %v1870_v1, %v7562_v29 }
0x205a   :  { %1901 = vrot.lane.b32.xlu0 %v1898_v2, %s6795_s0  ;;  %v1899_v4 = vmul.f32 %v1898_v2, %v7564_v31 }
0x20cb   :  { %v1874_v5 = vpop.permute.xlu1 %1873 }
0x20cc   :  { %v1876_v61 = vmul.f32 %v1874_v5, %v1870_v1  ;;  %v1902_v7 = vpop.permute.xlu0 %1901 }
0x20cd   :  { %v1904_v8 = vmul.f32 %v1902_v7, %v1898_v2 }
0x20ce   :  { %1878 = vrot.lane.b32.xlu1 %v1876_v61, %s6796_s4 }
0x20cf   :  { %1906 = vrot.lane.b32.xlu0 %v1904_v8, %s6796_s4 }
0x2140   :  { %v1879_v62 = vpop.permute.xlu1 %1878 }
0x2141   :  { %v7601_v6 = vadd.f32 %v1879_v62, %v1871_v12  ;;  %v1907_v14 = vpop.permute.xlu0 %1906 }
0x2142   :  { %v7603_v16 = vadd.f32 %v1907_v14, %v1899_v4 }
0x2143   :  { %6559 = vtanh.f32 %v7601_v6 }
0x2144   :  { %6561 = vtanh.f32 %v7603_v16 }
0x214d   :  { %v6560_v22 = vpop.eup %6559 }
0x214e   :  { %v6562_v19 = vpop.eup %6561  ;;  %1884 = vrot.lane.b32.xlu1 %v6560_v22, %s6795_s0 }
0x214f   :  { %1912 = vrot.lane.b32.xlu0 %v6562_v19, %s6795_s0  ;;  %v2151_v19 = vrot.slane %v7366_v48, 4 }
0x21c0   :  { %v1885_v9 = vpop.permute.xlu1 %1884 }
0x21c1   :  { %v1887_v23 = vmul.f32 %v1885_v9, %v1870_v1  ;;  %v1913_v15 = vpop.permute.xlu0 %1912 }
0x21c2   :  { %v1915_v53 = vmul.f32 %v1913_v15, %v1898_v2 }
0x21c3   :  { %1917 = vrot.lane.b32.xlu1 %v1887_v23, %s6796_s4 }
0x21c4   :  { %1922 = vrot.lane.b32.xlu0 %v1915_v53, %s6795_s0 }
0x2235   :  { %v1918_v27 = vpop.permute.xlu1 %1917 }
0x2236   :  { %1920 = vst.msk [vmem:[#allocation2 + $0x6] sm:$0x3] %vm238_vm4, %v1918_v27  ;;  %v1923_v29 = vpop.permute.xlu0 %1922 }
0x2237   :  { %1925 = vst.msk [vmem:[#allocation2 + $0x8] sm:$0x3] %vm403_vm7, %v1923_v29  ;;  %v1926_v30 = vsel %vm250_vm5, %v1918_v27, %v1923_v29 }
0x2238   :  { %5595 = vmatmul.mubr.msk.f32.vlgmr.msra.gmra.mrb[16].mxu0 %vm252_vm6, %v1926_v30 }
0x2239   :  { %6213 = vmatpush1.bf16.msra.mxu0 %v7424_v24  ;;  %2288 = vmatprep.mubr.f32.mxu0 %v6794_v3 }
0x223a   :  { %6215 = vmatprep.subr.bf16.mxu0 %v7426_v32 }
0x223d   :  { %6217 = vmatpush1.bf16.msra.mxu0 %v7437_v35 }
0x223e   :  { %6219 = vmatprep.subr.bf16.mxu0 %v7452_v57 }
0x2241   :  { %6221 = vmatpush1.bf16.msra.mxu0 %v7460_v40 }
0x2242   :  { %6223 = vmatprep.subr.bf16.mxu0 %v7474_v43 }
0x2245   :  { %6225 = vmatpush1.bf16.msra.mxu0 %v7480_v45 }
0x230b   :  { %v1996_v31 = vpop.f32.mrb[16].mxu0 }
0x230c   :  { %v2001_v34 = vadd.f32 %v1996_v31, %v7372_v52  ;;  %v1998_v36 = vpop.f32.mrb[17].mxu0 }
0x230d   :  { %v2005_v37 = vadd.f32 %v2003_v33, %v1998_v36 }
0x230e   :  { %v2006_v38 = vmul.f32 2.0, %v2001_v34 }
0x230f   :  { %v2034_v18 = vmul.f32 2.0, %v2005_v37 }
0x2310   :  { %v2007_v39 = vsel %vm6929_vm3, %v2006_v38, %v2001_v34 }
0x2311   :  { %v5596_v41 = vmul.f32 -1.442695, %v2007_v39  ;;  %v2035_v50 = vsel %vm6929_vm3, %v2034_v18, %v2005_v37 }
0x2312   :  { %v5598_v28 = vmul.f32 -1.442695, %v2035_v50 }
0x2313   :  { %6563 = vpow2.f32 %v5596_v41 }
0x2314   :  { %6565 = vpow2.f32 %v5598_v28 }
0x231d   :  { %v6564_v17 = vpop.eup %6563 }
0x231e   :  { %v6566_v42 = vpop.eup %6565  ;;  %v2011_v44 = vadd.f32 1.0, %v6564_v17 }
0x231f   :  { %v2039_v46 = vadd.f32 1.0, %v6566_v42 }
0x2320   :  { %6567 = vrcp.f32 %v2011_v44 }
0x2321   :  { %6569 = vrcp.f32 %v2039_v46 }
0x232a   :  { %v6568_v47 = vpop.eup %6567 }
0x232b   :  { %v6570_v21 = vpop.eup %6569  ;;  %v2014_v51 = vmul.f32 2.0, %v6568_v47 }
0x232c   :  { %v2042_v54 = vmul.f32 2.0, %v6570_v21 }
0x232d   :  { %v5597_v11 = vadd.f32 -1.0, %v2014_v51 }
0x232e   :  { %v5599_v10 = vadd.f32 -1.0, %v2042_v54 }
0x232f   :  { %v2016_v26 = vsel %vm6929_vm3, %v5597_v11, %v6568_v47 }
0x2330   :  { %2019 = vrot.lane.b32.xlu1 %v2016_v26, %s6795_s0  ;;  %v2044_v13 = vsel %vm6929_vm3, %v5599_v10, %v6570_v21  ;;  %v2017_v59 = vmul.f32 %v2016_v26, %v7601_v6 }
0x2331   :  { %2047 = vrot.lane.b32.xlu0 %v2044_v13, %s6795_s0  ;;  %v2045_v63 = vmul.f32 %v2044_v13, %v7603_v16  ;;  %v2148_v16 = vrot.slane %v7372_v52, 2 }
0x23a2   :  { %v2020_v25 = vpop.permute.xlu1 %2019 }
0x23a3   :  { %v2022_v56 = vmul.f32 %v2020_v25, %v2016_v26  ;;  %v2048_v58 = vpop.permute.xlu0 %2047 }
0x23a4   :  { %v2050_v55 = vmul.f32 %v2048_v58, %v2044_v13 }
0x23a5   :  { %2024 = vrot.lane.b32.xlu1 %v2022_v56, %s6796_s4 }
0x23a6   :  { %2052 = vrot.lane.b32.xlu0 %v2050_v55, %s6796_s4  ;;  %v2295_v55 = vrot.slane %v7372_v52, 4 }
0x2417   :  { %v2025_v60 = vpop.permute.xlu1 %2024 }
0x2418   :  { %v7639_v0 = vadd.f32 %v2025_v60, %v2017_v59  ;;  %v2053_v1 = vpop.permute.xlu0 %2052  ;;  %v2298_v60 = vrot.slane %v7366_v48, 2 }
0x2419   :  { %v7641_v2 = vadd.f32 %v2053_v1, %v2045_v63 }
0x241a   :  { %6571 = vtanh.f32 %v7639_v0 }
0x241b   :  { %6573 = vtanh.f32 %v7641_v2 }
0x2424   :  { %v6572_v5 = vpop.eup %6571 }
0x2425   :  { %v6574_v61 = vpop.eup %6573  ;;  %2030 = vrot.lane.b32.xlu1 %v6572_v5, %s6795_s0 }
0x2426   :  { %2058 = vrot.lane.b32.xlu0 %v6574_v61, %s6795_s0 }
0x2497   :  { %v2031_v7 = vpop.permute.xlu1 %2030 }
0x2498   :  { %v2033_v8 = vmul.f32 %v2031_v7, %v2016_v26  ;;  %v2059_v12 = vpop.permute.xlu0 %2058 }
0x2499   :  { %v2061_v62 = vmul.f32 %v2059_v12, %v2044_v13 }
0x249a   :  { %2063 = vrot.lane.b32.xlu1 %v2033_v8, %s6796_s4 }
0x249b   :  { %2068 = vrot.lane.b32.xlu0 %v2061_v62, %s6795_s0 }
0x250c   :  { %v2064_v4 = vpop.permute.xlu1 %2063 }
0x250d   :  { %2066 = vst.msk [vmem:[#allocation2 + $0x8] sm:$0x3] %vm238_vm4, %v2064_v4  ;;  %v2069_v6 = vpop.permute.xlu0 %2068 }
0x250e   :  { %2071 = vst.msk [vmem:[#allocation2 + $0x6] sm:$0x3] %vm403_vm7, %v2069_v6  ;;  %v2072_v14 = vsel %vm250_vm5, %v2064_v4, %v2069_v6 }
0x250f   :  { %5600 = vmatmul.mubr.msk.f32.vlgmr.msra.gmra.mrb[12].mxu1 %vm252_vm6, %v2072_v14 }
0x2510   :  { %6229 = vmatpush1.bf16.msra.mxu1 %v7424_v24  ;;  %2435 = vmatprep.mubr.f32.mxu1 %v6794_v3 }
0x2511   :  { %6231 = vmatprep.subr.bf16.mxu1 %v7426_v32 }
0x2514   :  { %6233 = vmatpush1.bf16.msra.mxu1 %v7437_v35 }
0x2515   :  { %6235 = vmatprep.subr.bf16.mxu1 %v7452_v57 }
0x2518   :  { %6237 = vmatpush1.bf16.msra.mxu1 %v7460_v40 }
0x2519   :  { %6239 = vmatprep.subr.bf16.mxu1 %v7474_v43 }
0x251c   :  { %6241 = vmatpush1.bf16.msra.mxu1 %v7480_v45 }
0x25e2   :  { %v2142_v22 = vpop.f32.mrb[12].mxu1 }
0x25e3   :  { %v2150_v24 = vadd.f32 %v2148_v16, %v2142_v22  ;;  %v2144_v9 = vpop.f32.mrb[13].mxu1 }
0x25e4   :  { %v2153_v23 = vadd.f32 %v2151_v19, %v2144_v9 }
0x25e5   :  { %v2154_v15 = vmul.f32 2.0, %v2150_v24 }
0x25e6   :  { %v2182_v32 = vmul.f32 2.0, %v2153_v23 }
0x25e7   :  { %v2155_v35 = vsel %vm6929_vm3, %v2154_v15, %v2150_v24 }
0x25e8   :  { %v5601_v57 = vmul.f32 -1.442695, %v2155_v35  ;;  %v2183_v40 = vsel %vm6929_vm3, %v2182_v32, %v2153_v23 }
0x25e9   :  { %v5603_v43 = vmul.f32 -1.442695, %v2183_v40 }
0x25ea   :  { %6575 = vpow2.f32 %v5601_v57 }
0x25eb   :  { %6577 = vpow2.f32 %v5603_v43 }
0x25f4   :  { %v6576_v45 = vpop.eup %6575 }
0x25f5   :  { %v6578_v53 = vpop.eup %6577  ;;  %v2159_v27 = vadd.f32 1.0, %v6576_v45 }
0x25f6   :  { %v2187_v29 = vadd.f32 1.0, %v6578_v53 }
0x25f7   :  { %6579 = vrcp.f32 %v2159_v27 }
0x25f8   :  { %6581 = vrcp.f32 %v2187_v29 }
0x2601   :  { %v6580_v30 = vpop.eup %6579 }
0x2602   :  { %v6582_v31 = vpop.eup %6581  ;;  %v2162_v33 = vmul.f32 2.0, %v6580_v30 }
0x2603   :  { %v2190_v34 = vmul.f32 2.0, %v6582_v31 }
0x2604   :  { %v5602_v36 = vadd.f32 -1.0, %v2162_v33 }
0x2605   :  { %v5604_v37 = vadd.f32 -1.0, %v2190_v34 }
0x2606   :  { %v2164_v38 = vsel %vm6929_vm3, %v5602_v36, %v6580_v30 }
0x2607   :  { %2167 = vrot.lane.b32.xlu1 %v2164_v38, %s6795_s0  ;;  %v2192_v18 = vsel %vm6929_vm3, %v5604_v37, %v6582_v31  ;;  %v2165_v17 = vmul.f32 %v2164_v38, %v7639_v0 }
0x2608   :  { %2195 = vrot.lane.b32.xlu0 %v2192_v18, %s6795_s0  ;;  %v2193_v44 = vmul.f32 %v2192_v18, %v7641_v2 }
0x2679   :  { %v2168_v39 = vpop.permute.xlu1 %2167 }
0x267a   :  { %v2170_v41 = vmul.f32 %v2168_v39, %v2164_v38  ;;  %v2196_v50 = vpop.permute.xlu0 %2195 }
0x267b   :  { %v2198_v28 = vmul.f32 %v2196_v50, %v2192_v18 }
0x267c   :  { %2172 = vrot.lane.b32.xlu1 %v2170_v41, %s6796_s4 }
0x267d   :  { %2200 = vrot.lane.b32.xlu0 %v2198_v28, %s6796_s4  ;;  %v2442_v28 = vrot.slane %v7372_v52, 6 }
0x26ee   :  { %v2173_v42 = vpop.permute.xlu1 %2172 }
0x26ef   :  { %v2175_v46 = vadd.f32 %v2173_v42, %v2165_v17  ;;  %v2201_v47 = vpop.permute.xlu0 %2200 }
0x26f0   :  { %v2203_v21 = vadd.f32 %v2201_v47, %v2193_v44 }
0x26f1   :  { %6583 = vtanh.f32 %v2175_v46 }
0x26f2   :  { %6585 = vtanh.f32 %v2203_v21 }
0x26fb   :  { %v6584_v51 = vpop.eup %6583 }
0x26fc   :  { %v6586_v54 = vpop.eup %6585  ;;  %2178 = vrot.lane.b32.xlu1 %v6584_v51, %s6795_s0 }
0x26fd   :  { %2206 = vrot.lane.b32.xlu0 %v6586_v54, %s6795_s0 }
0x276e   :  { %v2179_v11 = vpop.permute.xlu1 %2178 }
0x276f   :  { %v2181_v10 = vmul.f32 %v2179_v11, %v2164_v38  ;;  %v2207_v26 = vpop.permute.xlu0 %2206 }
0x2770   :  { %v2209_v13 = vmul.f32 %v2207_v26, %v2192_v18 }
0x2771   :  { %2211 = vrot.lane.b32.xlu1 %v2181_v10, %s6796_s4 }
0x2772   :  { %2216 = vrot.lane.b32.xlu0 %v2209_v13, %s6795_s0 }
0x27e3   :  { %v2212_v25 = vpop.permute.xlu1 %2211 }
0x27e4   :  { %2214 = vst.msk [vmem:[#allocation2 + $0xa] sm:$0x3] %vm238_vm4, %v2212_v25  ;;  %v2217_v56 = vpop.permute.xlu0 %2216 }
0x27e5   :  { %2219 = vst.msk [vmem:[#allocation2 + $0x4] sm:$0x3] %vm403_vm7, %v2217_v56  ;;  %v2220_v58 = vsel %vm250_vm5, %v2212_v25, %v2217_v56 }
0x27e6   :  { %5605 = vmatmul.mubr.msk.f32.vlgmr.msra.gmra.mrb[18].mxu0 %vm252_vm6, %v2220_v58 }
0x28b9   :  { %v2290_v59 = vpop.f32.mrb[18].mxu0 }
0x28ba   :  { %v2297_v63 = vadd.f32 %v2295_v55, %v2290_v59  ;;  %v2292_v0 = vpop.f32.mrb[19].mxu0 }
0x28bb   :  { %v2300_v1 = vadd.f32 %v2298_v60, %v2292_v0 }
0x28bc   :  { %v2301_v2 = vmul.f32 2.0, %v2297_v63 }
0x28bd   :  { %v2329_v5 = vmul.f32 2.0, %v2300_v1 }
0x28be   :  { %v2302_v61 = vsel %vm6929_vm3, %v2301_v2, %v2297_v63 }
0x28bf   :  { %v5606_v7 = vmul.f32 -1.442695, %v2302_v61  ;;  %v2330_v8 = vsel %vm6929_vm3, %v2329_v5, %v2300_v1 }
0x28c0   :  { %v5608_v12 = vmul.f32 -1.442695, %v2330_v8 }
0x28c1   :  { %6587 = vpow2.f32 %v5606_v7 }
0x28c2   :  { %6589 = vpow2.f32 %v5608_v12 }
0x28cb   :  { %v6588_v62 = vpop.eup %6587 }
0x28cc   :  { %v6590_v4 = vpop.eup %6589  ;;  %v2306_v6 = vadd.f32 1.0, %v6588_v62 }
0x28cd   :  { %v2334_v14 = vadd.f32 1.0, %v6590_v4 }
0x28ce   :  { %6591 = vrcp.f32 %v2306_v6 }
0x28cf   :  { %6593 = vrcp.f32 %v2334_v14  ;;  %v2517_v14 = vld [vmem:[%s8545_s8] sm:$0xff] }
0x28d8   :  { %v6592_v16 = vpop.eup %6591 }
0x28d9   :  { %v6594_v22 = vpop.eup %6593  ;;  %v2309_v19 = vmul.f32 2.0, %v6592_v16 }
0x28da   :  { %v2337_v24 = vmul.f32 2.0, %v6594_v22 }
0x28db   :  { %v5607_v9 = vadd.f32 -1.0, %v2309_v19 }
0x28dc   :  { %v5609_v23 = vadd.f32 -1.0, %v2337_v24  ;;  %v2607_v24 = vld [vmem:[%s8546_s9 + $0x8] sm:$0xff] }
0x28dd   :  { %v2311_v15 = vsel %vm6929_vm3, %v5607_v9, %v6592_v16  ;;  %v2518_v16 = vld [vmem:[%s8545_s8 + $0x8] sm:$0xff]  ;;  %v2519_v9 = vld [vmem:[%s8545_s8 + $0x10] sm:$0xff] }
0x28de   :  { %2314 = vrot.lane.b32.xlu1 %v2311_v15, %s6795_s0  ;;  %v2339_v32 = vsel %vm6929_vm3, %v5609_v23, %v6594_v22  ;;  %v2312_v45 = vmul.f32 %v2311_v15, %v2175_v46  ;;  %v2606_v22 = vld [vmem:[%s8546_s9] sm:$0xff]  ;;  %v6242_v19 = vpack.c.bf16 %v2518_v16, %v2517_v14  ;;  %v2520_v23 = vld [vmem:[%s8545_s8 + $0x18] sm:$0xff] }
0x28df   :  { %2342 = vrot.lane.b32.xlu0 %v2339_v32, %s6795_s0  ;;  %v2340_v27 = vmul.f32 %v2339_v32, %v2203_v21 }
0x28e0   :  { %6243 = vmatprep.subr.bf16.mxu0 %v6242_v19 }
0x28e1   :  { %6245 = vmatpush3.bf16.msra.mxu0 %v6242_v19 }
0x2950   :  { %v2315_v35 = vpop.permute.xlu1 %2314 }
0x2951   :  { %v2317_v57 = vmul.f32 %v2315_v35, %v2311_v15  ;;  %v2343_v40 = vpop.permute.xlu0 %2342  ;;  %v2608_v35 = vld [vmem:[%s8546_s9 + $0x10] sm:$0xff] }
0x2952   :  { %v2345_v43 = vmul.f32 %v2343_v40, %v2339_v32 }
0x2953   :  { %2319 = vrot.lane.b32.xlu1 %v2317_v57, %s6796_s4  ;;  %v2609_v57 = vld [vmem:[%s8546_s9 + $0x18] sm:$0xff] }
0x2954   :  { %2347 = vrot.lane.b32.xlu0 %v2345_v43, %s6796_s4  ;;  %v6262_v40 = vpack.c.bf16 %v2609_v57, %v2608_v35 }
0x29c5   :  { %v2320_v53 = vpop.permute.xlu1 %2319 }
0x29c6   :  { %v2322_v29 = vadd.f32 %v2320_v53, %v2312_v45  ;;  %v2348_v30 = vpop.permute.xlu0 %2347  ;;  %v2521_v53 = vld [vmem:[%s8545_s8 + $0x20] sm:$0xff] }
0x29c7   :  { %v2350_v31 = vadd.f32 %v2348_v30, %v2340_v27  ;;  %v2522_v27 = vld [vmem:[%s8545_s8 + $0x28] sm:$0xff] }
0x29c8   :  { %6595 = vtanh.f32 %v2322_v29  ;;  %v6250_v30 = vpack.c.bf16 %v2522_v27, %v2521_v53 }
0x29c9   :  { %6597 = vtanh.f32 %v2350_v31 }
0x29d2   :  { %v6596_v33 = vpop.eup %6595 }
0x29d3   :  { %v6598_v34 = vpop.eup %6597  ;;  %2325 = vrot.lane.b32.xlu1 %v6596_v33, %s6795_s0 }
0x29d4   :  { %2353 = vrot.lane.b32.xlu0 %v6598_v34, %s6795_s0  ;;  %v2524_v34 = vld [vmem:[%s8545_s8 + $0x38] sm:$0xff] }
0x2a45   :  { %v2326_v36 = vpop.permute.xlu1 %2325 }
0x2a46   :  { %v2328_v37 = vmul.f32 %v2326_v36, %v2311_v15  ;;  %v2354_v38 = vpop.permute.xlu0 %2353  ;;  %v6258_v15 = vpack.c.bf16 %v2607_v24, %v2606_v22  ;;  %v2612_v36 = vld [vmem:[%s8546_s9 + $0x30] sm:$0xff] }
0x2a47   :  { %v2356_v18 = vmul.f32 %v2354_v38, %v2339_v32  ;;  %v6246_v32 = vpack.c.bf16 %v2520_v23, %v2519_v9  ;;  %v2613_v38 = vld [vmem:[%s8546_s9 + $0x38] sm:$0xff] }
0x2a48   :  { %2358 = vrot.lane.b32.xlu1 %v2328_v37, %s6796_s4  ;;  %6259 = vmatprep.subr.bf16.mxu1 %v6258_v15 }
0x2a49   :  { %2363 = vrot.lane.b32.xlu0 %v2356_v18, %s6795_s0  ;;  %6247 = vmatprep.subr.bf16.mxu0 %v6246_v32  ;;  %v6270_v18 = vpack.c.bf16 %v2613_v38, %v2612_v36 }
0x2a4a   :  { %6249 = vmatpush3.bf16.msra.mxu0 %v6246_v32 }
0x2a4b   :  { %6251 = vmatprep.subr.bf16.mxu0 %v6250_v30 }
0x2a4e   :  { %6253 = vmatpush3.bf16.msra.mxu0 %v6250_v30 }
0x2aba   :  { %v2359_v39 = vpop.permute.xlu1 %2358 }
0x2abb   :  { %2361 = vst.msk [vmem:[#allocation2 + $0xc] sm:$0x3] %vm238_vm4, %v2359_v39  ;;  %v2364_v41 = vpop.permute.xlu0 %2363 }
0x2abc   :  { %2366 = vst.msk [vmem:[#allocation2 + $0x2] sm:$0x3] %vm403_vm7, %v2364_v41  ;;  %v2367_v50 = vsel %vm250_vm5, %v2359_v39, %v2364_v41 }
0x2abd   :  { %5610 = vmatmul.mubr.msk.f32.vlgmr.msra.gmra.mrb[14].mxu1 %vm252_vm6, %v2367_v50 }
0x2abe   :  { %6261 = vmatpush3.bf16.msra.mxu1 %v6258_v15 }
0x2abf   :  { %6263 = vmatprep.subr.bf16.mxu1 %v6262_v40 }
0x2ac2   :  { %6265 = vmatpush3.bf16.msra.mxu1 %v6262_v40 }
0x2b90   :  { %v2437_v17 = vpop.f32.mrb[14].mxu1 }
0x2b91   :  { %v2444_v42 = vadd.f32 %v2442_v28, %v2437_v17  ;;  %v2439_v44 = vpop.f32.mrb[15].mxu1  ;;  %v2514_v28 = vld [vmem:[%s8547_s1] sm:$0x3]  ;;  %s6798_s1 = smov 126  }
0x2b92   :  { %v2445_v46 = vadd.f32 %v2439_v44, %v7366_v48  ;;  %vm2515_vm9 = vcmp.gt.f32.partialorder %v2514_v28, 0.5 }
0x2b93   :  { %v2446_v47 = vmul.f32 2.0, %v2444_v42 }
0x2b94   :  { %v2474_v21 = vmul.f32 2.0, %v2445_v46 }
0x2b95   :  { %v2447_v51 = vsel %vm6929_vm3, %v2446_v47, %v2444_v42  ;;  %v7790_v42 = vsel %vm2515_vm9, -1e+30, %v6794_v3 }
0x2b96   :  { %v5611_v54 = vmul.f32 -1.442695, %v2447_v51  ;;  %v2475_v11 = vsel %vm6929_vm3, %v2474_v21, %v2445_v46  ;;  %v2713_v44 = vrot.slane %v7790_v42, 6  ;;  %v2722_v46 = vrot.slane %v7790_v42, 4 }
0x2b97   :  { %v5613_v10 = vmul.f32 -1.442695, %v2475_v11  ;;  %v2731_v21 = vrot.slane %v7790_v42, 2 }
0x2b98   :  { %6599 = vpow2.f32 %v5611_v54 }
0x2b99   :  { %6601 = vpow2.f32 %v5613_v10 }
0x2ba2   :  { %v6600_v26 = vpop.eup %6599 }
0x2ba3   :  { %v6602_v13 = vpop.eup %6601  ;;  %v2451_v52 = vadd.f32 1.0, %v6600_v26 }
0x2ba4   :  { %v2479_v25 = vadd.f32 1.0, %v6602_v13 }
0x2ba5   :  { %6603 = vrcp.f32 %v2451_v52 }
0x2ba6   :  { %6605 = vrcp.f32 %v2479_v25 }
0x2baf   :  { %v6604_v56 = vpop.eup %6603 }
0x2bb0   :  { %v6606_v48 = vpop.eup %6605  ;;  %v2454_v58 = vmul.f32 2.0, %v6604_v56 }
0x2bb1   :  { %v2482_v55 = vmul.f32 2.0, %v6606_v48 }
0x2bb2   :  { %v5612_v59 = vadd.f32 -1.0, %v2454_v58 }
0x2bb3   :  { %v5614_v60 = vadd.f32 -1.0, %v2482_v55 }
0x2bb4   :  { %v7715_v63 = vsel %vm6929_vm3, %v5612_v59, %v6604_v56 }
0x2bb5   :  { %2459 = vrot.lane.b32.xlu0 %v7715_v63, %s6795_s0  ;;  %v7721_v0 = vsel %vm6929_vm3, %v5614_v60, %v6606_v48  ;;  %v2457_v7 = vmul.f32 %v7715_v63, %v2322_v29  ;;  %v2610_v29 = vld [vmem:[%s8546_s9 + $0x20] sm:$0xff] }
0x2bb6   :  { %2487 = vrot.lane.b32.xlu1 %v7721_v0, %s6795_s0  ;;  %v2485_v12 = vmul.f32 %v7721_v0, %v2350_v31  ;;  %v2611_v31 = vld [vmem:[%s8546_s9 + $0x28] sm:$0xff]  ;;  %s6797_s9 = smov 127  }
0x2bb7   :  { %v6266_v33 = vpack.c.bf16 %v2611_v31, %v2610_v29 }
0x2bb9   :  { %6267 = vmatprep.subr.bf16.mxu1 %v6266_v33 }
0x2bba   :  { %6269 = vmatpush3.bf16.msra.mxu1 %v6266_v33 }
0x2bbb   :  { %6271 = vmatprep.subr.bf16.mxu1 %v6270_v18 }
0x2bbe   :  { %6273 = vmatpush3.bf16.msra.mxu1 %v6270_v18 }
0x2c27   :  { %v2460_v1 = vpop.permute.xlu0 %2459 }
0x2c28   :  { %v2462_v2 = vmul.f32 %v2460_v1, %v7715_v63  ;;  %v2488_v5 = vpop.permute.xlu1 %2487 }
0x2c29   :  { %v2490_v61 = vmul.f32 %v2488_v5, %v7721_v0 }
0x2c2a   :  { %2464 = vrot.lane.b32.xlu0 %v2462_v2, %s6796_s4 }
0x2c2b   :  { %2492 = vrot.lane.b32.xlu1 %v2490_v61, %s6796_s4 }
0x2c9c   :  { %v2465_v8 = vpop.permute.xlu0 %2464 }
0x2c9d   :  { %v2467_v62 = vadd.f32 %v2465_v8, %v2457_v7  ;;  %v2493_v4 = vpop.permute.xlu1 %2492 }
0x2c9e   :  { %v2495_v6 = vadd.f32 %v2493_v4, %v2485_v12 }
0x2c9f   :  { %6607 = vtanh.f32 %v2467_v62 }
0x2ca0   :  { %6609 = vtanh.f32 %v2495_v6 }
0x2ca9   :  { %v6608_v43 = vpop.eup %6607 }
0x2caa   :  { %v6610_v45 = vpop.eup %6609  ;;  %2470 = vrot.lane.b32.xlu0 %v6608_v43, %s6795_s0 }
0x2cab   :  { %2498 = vrot.lane.b32.xlu1 %v6610_v45, %s6795_s0 }
0x2caf   :  { %1474 = vrot.lane.b32.xlu1 %v7491_v49, %s6795_s0  ;;  %v2523_v49 = vld [vmem:[%s8545_s8 + $0x30] sm:$0xff] }
0x2cb0   :  { %v6254_v37 = vpack.c.bf16 %v2524_v34, %v2523_v49 }
0x2cb2   :  { %6255 = vmatprep.subr.bf16.mxu0 %v6254_v37 }
0x2cb3   :  { %6257 = vmatpush3.bf16.msra.mxu0 %v6254_v37 }
0x2d1c   :  { %v2471_v39 = vpop.permute.xlu0 %2470 }
0x2d1d   :  { %v2473_v41 = vmul.f32 %v2471_v39, %v7715_v63  ;;  %v2499_v50 = vpop.permute.xlu1 %2498 }
0x2d1e   :  { %v2501_v17 = vmul.f32 %v2499_v50, %v7721_v0 }
0x2d1f   :  { %2503 = vrot.lane.b32.xlu1 %v2473_v41, %s6796_s4 }
0x2d20   :  { %2508 = vrot.lane.b32.xlu0 %v2501_v17, %s6795_s0 }
0x2d21   :  { %v1475_v47 = vpop.permute.xlu1 %1474 }
0x2d22   :  { %1477 = vst.msk [vmem:[#allocation2 + $0x8] sm:$0xc0] %vm244_vm8, %v1475_v47 }
0x2d23   :  { %2714 = vrot.lane.b32.xlu1 %v2713_v44, %s6797_s9 }
0x2d24   :  { %2723 = vrot.lane.b32.xlu0 %v2722_v46, %s6798_s1 }
0x2d27   :  { %2732 = vrot.lane.b32.xlu1 %v2731_v21, %s6799_s2 }
0x2d2b   :  { %2744 = vrot.lane.b32.xlu1 %v2713_v44, %s6800_s17 }
0x2d91   :  { %v2504_v51 = vpop.permute.xlu1 %2503 }
0x2d92   :  { %2506 = vst.msk [vmem:[#allocation2 + $0xe] sm:$0x3] %vm238_vm4, %v2504_v51  ;;  %v2509_v54 = vpop.permute.xlu0 %2508 }
0x2d93   :  { %2511 = vst.msk [vmem:[#allocation2] sm:$0x3] %vm403_vm7, %v2509_v54 }
0x2d95   :  { %v7828_v8 = vpop.permute.xlu1 %2714 }
0x2d96   :  { %v7821_v5 = vpop.permute.xlu0 %2723 }
0x2d99   :  { %v2513_v10 = vld [vmem:[#allocation2 + $0x8] sm:$0xff]  ;;  %v7832_v62 = vpop.permute.xlu1 %2732 }
0x2d9a   :  { %v2512_v11 = vld [vmem:[#allocation2] sm:$0xff] }
0x2d9b   :  { %5785 = vmatprep.mubr.msk.f32.mxu0 %vm252_vm6, %v2512_v11  ;;  %5804 = vmatprep.mubr.msk.f32.mxu1 %vm252_vm6, %v2512_v11 }
0x2d9c   :  { %5786 = vmatmul.mubr.msk.f32.vlgmr.msra.gmra.mrb[20].mxu0 %vm252_vm6, %v2513_v10  ;;  %5805 = vmatmul.mubr.msk.f32.vlgmr.msra.gmra.mrb[16].mxu1 %vm252_vm6, %v2513_v10 }
0x2d9d   :  { %v7834_v6 = vpop.permute.xlu1 %2744  ;;  %5815 = vmatprep.mubr.msk.f32.mxu0 %vm6807_vm13, %v6794_v3  ;;  %5845 = vmatprep.mubr.msk.f32.mxu1 %vm6807_vm13, %v6794_v3 }
0x2e6f   :  { %v7803_v26 = vpop.f32.mrb[20].mxu0  ;;  %v7805_v13 = vpop.f32.mrb[16].mxu1 }
0x2e70   :  { %v7807_v52 = vpop.f32.mrb[21].mxu0  ;;  %v7809_v25 = vpop.f32.mrb[17].mxu1  ;;  %v2736_v56 = vmul.f32 0.0, %v7803_v26 }
0x2e71   :  { %v2703_v55 = vmul.f32 0.0, %v7807_v52 }
0x2e72   :  { %v2748_v48 = vsel %vm2718_vm10, %v2736_v56, 0.0  ;;  %v2737_v58 = vsel %vm238_vm4, %v2736_v56, 0.0  ;;  %v2741_v63 = vsel %vm2708_vm11, %v2736_v56, 0.0  ;;  %v2755_v0 = vsel %vm2727_vm12, %v2736_v56, 0.0 }
0x2e73   :  { %2749 = vadd.xlane.f32.xlu1 %v2748_v48  ;;  %2738 = vadd.xlane.f32.xlu0 %v2737_v58  ;;  %v2709_v59 = vsel %vm2708_vm11, %v2703_v55, 0.0  ;;  %v2728_v60 = vsel %vm2727_vm12, %v2703_v55, 0.0  ;;  %v2704_v1 = vsel %vm238_vm4, %v2703_v55, 0.0  ;;  %v2719_v2 = vsel %vm2718_vm10, %v2703_v55, 0.0 }
0x2e77   :  { %2710 = vadd.xlane.f32.xlu1 %v2709_v59 }
0x2e7b   :  { %2729 = vadd.xlane.f32.xlu1 %v2728_v60 }
0x2e89   :  { %2751 = vrot.lane.b32.xlu0 %v2722_v46, %s6801_s18 }
0x2ea8   :  { %2742 = vadd.xlane.f32.xlu0 %v2741_v63 }
0x2eac   :  { %2756 = vadd.xlane.f32.xlu0 %v2755_v0 }
0x2eb0   :  { %2705 = vadd.xlane.f32.xlu0 %v2704_v1 }
0x2eb4   :  { %2720 = vadd.xlane.f32.xlu0 %v2719_v2 }
0x2eca   :  { %2758 = vrot.lane.b32.xlu0 %v2731_v21, %s6802_s19 }
0x2f00   :  { %v2739_v61 = vpop.xlane.xlu0 %2738  ;;  %v2750_v16 = vpop.xlane.xlu1 %2749 }
0x2f01   :  { %v7824_v7 = vadd.f32 %v2739_v61, %v7790_v42 }
0x2f03   :  { %2775 = vrot.lane.b32.xlu1 %v7824_v7, %s6803_s20 }
0x2f04   :  { %v7830_v12 = vpop.permute.xlu0 %2751  ;;  %v2711_v19 = vpop.xlane.xlu1 %2710 }
0x2f05   :  { %v2717_v9 = vadd.f32 %v7828_v8, %v2711_v19  ;;  %v7846_v30 = vadd.f32 %v7830_v12, %v2750_v16  ;;  %v6805_v19 = vmov 0  }
0x2f06   :  { %6406 = vset.pattern.permute.xlu0 %v6805_v19  ;;  %6405 = vset.pattern.permute.xlu1 %v6805_v19 }
0x2f07   :  { %v2763_v35 = vrot.slane %v2717_v9, 2  ;;  %v2784_v37 = vrot.slane %v7846_v30, 4 }
0x2f08   :  { %v2730_v32 = vpop.xlane.xlu1 %2729 }
0x2f09   :  { %v2735_v40 = vadd.f32 %v7832_v62, %v2730_v32  ;;  %v2692_v32 = vld [vmem:[%s8548_s10 + $0x18] sm:$0xff] }
0x2f0b   :  { %v2771_v53 = vrot.slane %v2735_v40, 6 }
0x2f35   :  { %v2743_v4 = vpop.xlane.xlu0 %2742 }
0x2f36   :  { %v7841_v27 = vadd.f32 %v7834_v6, %v2743_v4 }
0x2f38   :  { %v2780_v49 = vrot.slane %v7841_v27, 2 }
0x2f39   :  { %v2757_v14 = vpop.xlane.xlu0 %2756 }
0x2f3d   :  { %v2706_v22 = vpop.xlane.xlu0 %2705 }
0x2f3e   :  { %v2707_v15 = vadd.f32 %v2706_v22, %v7790_v42 }
0x2f40   :  { %v2765_v43 = vmax.f32 %v2707_v15, %v2763_v35 }
0x2f41   :  { %v2721_v24 = vpop.xlane.xlu0 %2720 }
0x2f42   :  { %v2726_v23 = vadd.f32 %v7821_v5, %v2721_v24  ;;  %v6806_v24 = vmov 0.0|0.0  }
0x2f43   :  { %6274 = vmatprep.subr.bf16.mxu0 %v6806_v24  ;;  %6292 = vmatprep.subr.bf16.mxu1 %v6806_v24 }
0x2f44   :  { %v2767_v57 = vrot.slane %v2726_v23, 4 }
0x2f45   :  { %v7843_v29 = vpop.permute.xlu0 %2758 }
0x2f46   :  { %v2769_v45 = vmax.f32 %v2765_v43, %v2767_v57  ;;  %v2761_v34 = vadd.f32 %v7843_v29, %v2757_v14 }
0x2f48   :  { %v2773_v31 = vmax.f32 %v2769_v45, %v2771_v53  ;;  %v2788_v39 = vrot.slane %v2761_v34, 6 }
0x2f75   :  { %v2776_v33 = vpop.permute.xlu1 %2775 }
0x2f76   :  { %v2778_v36 = vmax.f32 %v2773_v31, %v2776_v33 }
0x2f78   :  { %v2782_v38 = vmax.f32 %v2778_v36, %v2780_v49 }
0x2f7a   :  { %v2786_v18 = vmax.f32 %v2782_v38, %v2784_v37 }
0x2f7c   :  { %v7851_v41 = vmax.f32 %v2786_v18, %v2788_v39 }
0x2f7e   :  { %v2800_v50 = vrot.slane %v7851_v41, 4  ;;  %v2805_v28 = vrot.slane %v7851_v41, 2  ;;  %2810 = vrot.lane.b32.xlu1 %v7851_v41, %s6804_s6  ;;  %v2791_v17 = vsub.f32 %v2707_v15, %v7851_v41  ;;  %v2795_v44 = vrot.slane %v7851_v41, 6 }
0x2f80   :  { %v2802_v46 = vsub.f32 %v2726_v23, %v2800_v50  ;;  %v2822_v47 = vsub.f32 %v2761_v34, %v2805_v28  ;;  %v2797_v21 = vsub.f32 %v2717_v9, %v2795_v44  ;;  %v2807_v51 = vsub.f32 %v2735_v40, %v2805_v28  ;;  %v2689_v9 = vld [vmem:[%s8548_s10] sm:$0xff]  ;;  %v2691_v23 = vld [vmem:[%s8548_s10 + $0x10] sm:$0xff] }
0x2f81   :  { %v2792_v10 = vmul.f32 1.442695, %v2791_v17  ;;  %v7899_v35 = vpack.c.bf16 %v2692_v32, %v2691_v23  ;;  %v2816_v57 = vsub.f32 %v7841_v27, %v2795_v44  ;;  %v2819_v40 = vsub.f32 %v7846_v30, %v2800_v50 }
0x2f82   :  { %v2803_v54 = vmul.f32 1.442695, %v2802_v46  ;;  %v2798_v11 = vmul.f32 1.442695, %v2797_v21  ;;  %v2808_v56 = vmul.f32 1.442695, %v2807_v51 }
0x2f83   :  { %v2817_v43 = vmul.f32 1.442695, %v2816_v57  ;;  %v2820_v45 = vmul.f32 1.442695, %v2819_v40  ;;  %v2823_v53 = vmul.f32 1.442695, %v2822_v47 }
0x2f84   :  { %6611 = vpow2.f32 %v2803_v54 }
0x2f85   :  { %6613 = vpow2.f32 %v2798_v11  ;;  %v6808_v11 = vmov 4  }
0x2f86   :  { %6615 = vpow2.f32 %v2792_v10 }
0x2f87   :  { %6617 = vpow2.f32 %v2808_v56 }
0x2f8e   :  { %v7859_v48 = vpop.eup %6611 }
0x2f8f   :  { %v7861_v58 = vpop.eup %6613  ;;  %v2830_v0 = vrot.slane %v7859_v48, 4 }
0x2f90   :  { %v7863_v55 = vpop.eup %6615  ;;  %v2826_v59 = vrot.slane %v7861_v58, 2 }
0x2f91   :  { %v7866_v60 = vpop.eup %6617 }
0x2f92   :  { %v2828_v63 = vadd.f32 %v7863_v55, %v2826_v59  ;;  %v2834_v2 = vrot.slane %v7866_v60, 6 }
0x2f94   :  { %v2832_v1 = vadd.f32 %v2830_v0, %v2828_v63 }
0x2f96   :  { %v2836_v61 = vadd.f32 %v2834_v2, %v2832_v1 }
0x2ff0   :  { %v2811_v4 = vpop.permute.xlu1 %2810 }
0x2ff1   :  { %v2813_v14 = vsub.f32 %v7824_v7, %v2811_v4  ;;  %v2690_v7 = vld [vmem:[%s8548_s10 + $0x8] sm:$0xff] }
0x2ff2   :  { %v7890_v15 = vpack.c.bf16 %v2690_v7, %v2689_v9 }
0x2ff3   :  { %v2814_v16 = vmul.f32 1.442695, %v2813_v14 }
0x2ff4   :  { %6276 = vmatpush3.bf16.msra.mxu0 %v7890_v15  ;;  %6294 = vmatpush3.bf16.msra.mxu1 %v7890_v15 }
0x2ff5   :  { %6619 = vpow2.f32 %v2814_v16  ;;  %6277 = vmatprep.subr.bf16.mxu0 %v6806_v24  ;;  %6295 = vmatprep.subr.bf16.mxu1 %v6806_v24 }
0x2ff6   :  { %6621 = vpow2.f32 %v2817_v43 }
0x2ff7   :  { %6623 = vpow2.f32 %v2820_v45 }
0x2ff8   :  { %6279 = vmatpush3.bf16.msra.mxu0 %v7899_v35  ;;  %6297 = vmatpush3.bf16.msra.mxu1 %v7899_v35  ;;  %6625 = vpow2.f32 %v2823_v53 }
0x2ff9   :  { %6280 = vmatprep.subr.bf16.mxu0 %v6806_v24  ;;  %6298 = vmatprep.subr.bf16.mxu1 %v6806_v24 }
0x2ffb   :  { %5816 = vmatmul.mubr.f32.vlgmr.msra.gmra.mrb[22].mxu0 %v6794_v3 }
0x2ffc   :  { %5834 = vmatprep.mubr.msk.f32.mxu0 %vm6807_vm13, %v6794_v3 }
0x2fff   :  { %v7872_v22 = vpop.eup %6619 }
0x3000   :  { %2838 = vrot.lane.b32.xlu0 %v7872_v22, %s6803_s20  ;;  %v6622_v31 = vpop.eup %6621 }
0x3001   :  { %v6624_v33 = vpop.eup %6623  ;;  %v2843_v36 = vrot.slane %v6622_v31, 2 }
0x3002   :  { %v6626_v37 = vpop.eup %6625  ;;  %v2847_v18 = vrot.slane %v6624_v33, 4 }
0x3003   :  { %v2851_v41 = vrot.slane %v6626_v37, 6 }
0x3072   :  { %v2839_v49 = vpop.permute.xlu0 %2838 }
0x3073   :  { %v2841_v34 = vadd.f32 %v2839_v49, %v2836_v61 }
0x3075   :  { %v2845_v38 = vadd.f32 %v2843_v36, %v2841_v34 }
0x3077   :  { %v2849_v39 = vadd.f32 %v2847_v18, %v2845_v38 }
0x3079   :  { %v2853_v28 = vadd.f32 %v2851_v41, %v2849_v39  ;;  %v7932_v41 = vld [vmem:[%s8549_s11] ss:$0 sm:$0xff] }
0x307b   :  { %6627 = vrcp.f32 %v2853_v28 }
0x3085   :  { %v6628_v27 = vpop.eup %6627 }
0x3086   :  { %2902 = vrot.lane.b32.xlu1 %v6628_v27, %s6804_s6  ;;  %v2863_v30 = vrot.slane %v6628_v27, 6  ;;  %v2855_v50 = vmul.f32 %v6628_v27, %v7863_v55  ;;  %v2889_v17 = vrot.slane %v6628_v27, 2  ;;  %v2876_v44 = vrot.slane %v6628_v27, 4 }
0x3088   :  { %v2865_v46 = vmul.f32 %v7861_v58, %v2863_v30  ;;  %v2891_v47 = vmul.f32 %v7866_v60, %v2889_v17  ;;  %v2878_v21 = vmul.f32 %v7859_v48, %v2876_v44  ;;  %v2913_v51 = vmul.f32 %v6622_v31, %v2863_v30 }
0x3089   :  { %v2935_v54 = vmul.f32 %v6626_v37, %v2889_v17  ;;  %v2924_v58 = vmul.f32 %v6624_v33, %v2876_v44 }
0x308a   :  { %2868 = vperm.xlu0 %6406, %v2865_v46   ;;  %2858 = vperm.xlu1 %6405, %v2855_v50  }
0x308e   :  { %2894 = vperm.xlu0 %6406, %v2891_v47   ;;  %2881 = vperm.xlu1 %6405, %v2878_v21  }
0x3092   :  { %2916 = vperm.xlu0 %6406, %v2913_v51   ;;  %6407 = vset.pattern.permute.xlu1 %v6808_v11 }
0x3096   :  { %2938 = vperm.xlu0 %6406, %v2935_v54  }
0x30ce   :  { %v3015_v48 = vpop.f32.mrb[22].mxu0 }
0x30cf   :  { %v5817_v55 = vpop.f32.mrb[23].mxu0 }
0x30f8   :  { %v2903_v10 = vpop.permute.xlu1 %2902 }
0x30f9   :  { %v2905_v56 = vmul.f32 %v7872_v22, %v2903_v10 }
0x30fb   :  { %2908 = vperm.xlu1 %6407, %v2905_v56  }
0x30ff   :  { %6408 = vset.pattern.permute.xlu1 %v6805_v19 }
0x3100   :  { %2927 = vperm.xlu1 %6408, %v2924_v58  }
0x3109   :  { %v2859_v59 = vpop.permute.xlu1 %2858  ;;  %v2869_v60 = vpop.permute.xlu0 %2868 }
0x310a   :  { %v2871_v0 = vmul.f32 %v2869_v60, %v7809_v25  ;;  %v2861_v4 = vmul.f32 %v2859_v59, %v7809_v25  ;;  %v2694_v59 = vld [vmem:[%s8550_s12] sm:$0xff]  ;;  %v2695_v60 = vld [vmem:[%s8550_s12 + $0x8] sm:$0xff] }
0x310c   :  { %v2873_v61 = vrot.slane %v2871_v0, 2  ;;  %v7953_v0 = vpack.c.bf16 %v2695_v60, %v2694_v59 }
0x310d   :  { %v2882_v63 = vpop.permute.xlu1 %2881  ;;  %v2895_v2 = vpop.permute.xlu0 %2894 }
0x310e   :  { %v2884_v1 = vmul.f32 %v2882_v63, %v7809_v25  ;;  %v2875_v16 = vadd.f32 %v2873_v61, %v2861_v4  ;;  %v2897_v22 = vmul.f32 %v2895_v2, %v7809_v25  ;;  %v2696_v63 = vld [vmem:[%s8550_s12 + $0x10] sm:$0xff]  ;;  %6282 = vmatpush3.bf16.msra.mxu0 %v7953_v0  ;;  %v2698_v61 = vld [vmem:[%s8550_s12 + $0x20] sm:$0xff]  ;;  %v2699_v4 = vld [vmem:[%s8550_s12 + $0x28] sm:$0xff] }
0x310f   :  { %6283 = vmatprep.subr.bf16.mxu0 %v6806_v24 }
0x3110   :  { %v2886_v14 = vrot.slane %v2884_v1, 4  ;;  %v2899_v23 = vrot.slane %v2897_v22, 6  ;;  %v2697_v1 = vld [vmem:[%s8550_s12 + $0x18] sm:$0xff] }
0x3111   :  { %v2917_v9 = vpop.permute.xlu0 %2916  ;;  %v7959_v2 = vpack.c.bf16 %v2697_v1, %v2696_v63  ;;  %v2701_v22 = vld [vmem:[%s8550_s12 + $0x38] sm:$0xff] }
0x3112   :  { %v2888_v7 = vadd.f32 %v2886_v14, %v2875_v16  ;;  %v2919_v32 = vmul.f32 %v7805_v13, %v2917_v9  ;;  %v7969_v14 = vpack.c.bf16 %v2699_v4, %v2698_v61  ;;  %v2700_v16 = vld [vmem:[%s8550_s12 + $0x30] sm:$0xff] }
0x3113   :  { %6285 = vmatpush3.bf16.msra.mxu0 %v7959_v2 }
0x3114   :  { %v2901_v40 = vadd.f32 %v2899_v23, %v2888_v7  ;;  %v2921_v45 = vrot.slane %v2919_v32, 2  ;;  %6286 = vmatprep.subr.bf16.mxu0 %v6806_v24  ;;  %v7980_v7 = vpack.c.bf16 %v2701_v22, %v2700_v16 }
0x3115   :  { %v2939_v53 = vpop.permute.xlu0 %2938 }
0x3116   :  { %v2941_v34 = vmul.f32 %v7805_v13, %v2939_v53 }
0x3117   :  { %6288 = vmatpush3.bf16.msra.mxu0 %v7969_v14 }
0x3118   :  { %v2943_v38 = vrot.slane %v2941_v34, 6  ;;  %6289 = vmatprep.subr.bf16.mxu0 %v6806_v24 }
0x311b   :  { %6291 = vmatpush3.bf16.msra.mxu0 %v7980_v7 }
0x311c   :  { %6310 = vmatprep.subr.bf16.mxu0 %v6806_v24 }
0x317a   :  { %v2909_v57 = vpop.permute.xlu1 %2908 }
0x317b   :  { %v2911_v43 = vmul.f32 %v7805_v13, %v2909_v57 }
0x317d   :  { %v2912_v31 = vadd.f32 %v2911_v43, %v2901_v40  ;;  %v8008_v43 = vld [vmem:[%s8551_s13] ss:$0 sm:$0xff] }
0x317f   :  { %v2923_v33 = vadd.f32 %v2921_v45, %v2912_v31  ;;  %v2928_v49 = vpop.permute.xlu1 %2927 }
0x3180   :  { %v2930_v36 = vmul.f32 %v7805_v13, %v2928_v49 }
0x3182   :  { %v2932_v37 = vrot.slane %v2930_v36, 4 }
0x3184   :  { %v2934_v18 = vadd.f32 %v2932_v37, %v2923_v33 }
0x3186   :  { %v2945_v39 = vadd.f32 %v2943_v38, %v2934_v18 }
0x3188   :  { %v3019_v28 = vadd.f32 %v3015_v48, %v2945_v39 }
0x318a   :  { %v3026_v27 = vadd.f32 %v7932_v41, %v3019_v28 }
0x318c   :  { %v3027_v30 = vmul.f32 2.0, %v3026_v27 }
0x318e   :  { %v3028_v50 = vsel %vm6929_vm3, %v3027_v30, %v3026_v27 }
0x318f   :  { %v5620_v17 = vmul.f32 -1.442695, %v3028_v50 }
0x3191   :  { %6629 = vpow2.f32 %v5620_v17 }
0x319b   :  { %v6630_v44 = vpop.eup %6629 }
0x319c   :  { %v3032_v46 = vadd.f32 1.0, %v6630_v44 }
0x319e   :  { %6631 = vrcp.f32 %v3032_v46 }
0x31a8   :  { %v6632_v47 = vpop.eup %6631 }
0x31a9   :  { %v3035_v21 = vmul.f32 2.0, %v6632_v47 }
0x31ab   :  { %v5621_v51 = vadd.f32 -1.0, %v3035_v21 }
0x31ad   :  { %v3037_v54 = vsel %vm6929_vm3, %v5621_v51, %v6632_v47 }
0x31ae   :  { %3040 = vrot.lane.b32.xlu1 %v3037_v54, %s6795_s0  ;;  %v3038_v58 = vmul.f32 0.0, %v3037_v54 }
0x3220   :  { %v3041_v10 = vpop.permute.xlu1 %3040 }
0x3221   :  { %v3043_v56 = vmul.f32 %v3041_v10, %v3037_v54 }
0x3223   :  { %3045 = vrot.lane.b32.xlu0 %v3043_v56, %s6796_s4 }
0x3295   :  { %v3046_v48 = vpop.permute.xlu0 %3045 }
0x3296   :  { %v7941_v55 = vadd.f32 %v3046_v48, %v3038_v58 }
0x3298   :  { %6633 = vtanh.f32 %v7941_v55 }
0x32a2   :  { %v6634_v9 = vpop.eup %6633 }
0x32a3   :  { %3051 = vrot.lane.b32.xlu1 %v6634_v9, %s6795_s0 }
0x3315   :  { %v3052_v23 = vpop.permute.xlu1 %3051 }
0x3316   :  { %v3054_v32 = vmul.f32 %v3052_v23, %v3037_v54 }
0x3318   :  { %3056 = vrot.lane.b32.xlu0 %v3054_v32, %s6796_s4 }
0x338a   :  { %v3057_v57 = vpop.permute.xlu0 %3056 }
0x338b   :  { %v3059_v40 = vsel %vm250_vm5, %v3057_v57, 0.0  ;;  %5846 = vmatmul.mubr.msk.f32.vlgmr.msra.gmra.mrb[18].mxu1 %vm250_vm5, %v3057_v57 }
0x338c   :  { %5835 = vmatmul.mubr.msk.f32.vlgmr.msra.gmra.mrb[24].mxu0 %vm252_vm6, %v3059_v40  ;;  %6300 = vmatpush3.bf16.msra.mxu1 %v7953_v0 }
0x338d   :  { %6301 = vmatprep.subr.bf16.mxu1 %v6806_v24  ;;  %6312 = vmatpush3.bf16.msra.mxu0 %v7890_v15 }
0x338e   :  { %6313 = vmatprep.subr.bf16.mxu0 %v6806_v24  ;;  %5875 = vmatprep.mubr.msk.f32.mxu0 %vm6807_vm13, %v6794_v3 }
0x338f   :  { %5864 = vmatprep.mubr.msk.f32.mxu1 %vm6807_vm13, %v6794_v3 }
0x3390   :  { %6303 = vmatpush3.bf16.msra.mxu1 %v7959_v2 }
0x3391   :  { %6304 = vmatprep.subr.bf16.mxu1 %v6806_v24  ;;  %6315 = vmatpush3.bf16.msra.mxu0 %v7899_v35 }
0x3392   :  { %6316 = vmatprep.subr.bf16.mxu0 %v6806_v24 }
0x3394   :  { %6306 = vmatpush3.bf16.msra.mxu1 %v7969_v14 }
0x3395   :  { %6307 = vmatprep.subr.bf16.mxu1 %v6806_v24 }
0x3398   :  { %6309 = vmatpush3.bf16.msra.mxu1 %v7980_v7 }
0x3399   :  { %6328 = vmatprep.subr.bf16.mxu1 %v6806_v24 }
0x345e   :  { %v8010_v45 = vpop.f32.mrb[18].mxu1 }
0x345f   :  { %v3135_v53 = vpop.f32.mrb[24].mxu0  ;;  %v5847_v31 = vpop.f32.mrb[19].mxu1 }
0x3460   :  { %v3136_v33 = vadd.f32 %v8008_v43, %v3135_v53  ;;  %v5836_v49 = vpop.f32.mrb[25].mxu0 }
0x3462   :  { %v3139_v34 = vmul.f32 2.0, %v3136_v33 }
0x3464   :  { %v3140_v36 = vsel %vm6929_vm3, %v3139_v34, %v3136_v33 }
0x3465   :  { %v5624_v37 = vmul.f32 -1.442695, %v3140_v36 }
0x3467   :  { %6635 = vpow2.f32 %v5624_v37 }
0x3471   :  { %v6636_v38 = vpop.eup %6635 }
0x3472   :  { %v3144_v18 = vadd.f32 1.0, %v6636_v38 }
0x3474   :  { %6637 = vrcp.f32 %v3144_v18 }
0x347e   :  { %v6638_v39 = vpop.eup %6637 }
0x347f   :  { %v3147_v28 = vmul.f32 2.0, %v6638_v39 }
0x3481   :  { %v5625_v27 = vadd.f32 -1.0, %v3147_v28 }
0x3483   :  { %v3149_v30 = vsel %vm6929_vm3, %v5625_v27, %v6638_v39 }
0x3484   :  { %3152 = vrot.lane.b32.xlu1 %v3149_v30, %s6795_s0  ;;  %v3150_v44 = vmul.f32 0.0, %v3149_v30 }
0x34f6   :  { %v3153_v50 = vpop.permute.xlu1 %3152 }
0x34f7   :  { %v3155_v17 = vmul.f32 %v3153_v50, %v3149_v30 }
0x34f9   :  { %3157 = vrot.lane.b32.xlu0 %v3155_v17, %s6796_s4 }
0x356b   :  { %v3158_v46 = vpop.permute.xlu0 %3157 }
0x356c   :  { %v8019_v47 = vadd.f32 %v3158_v46, %v3150_v44 }
0x356e   :  { %6639 = vtanh.f32 %v8019_v47 }
0x3578   :  { %v6640_v21 = vpop.eup %6639 }
0x3579   :  { %3163 = vrot.lane.b32.xlu1 %v6640_v21, %s6795_s0 }
0x35eb   :  { %v3164_v51 = vpop.permute.xlu1 %3163 }
0x35ec   :  { %v8023_v54 = vmul.f32 %v3164_v51, %v3149_v30 }
0x35ee   :  { %3168 = vrot.lane.b32.xlu0 %v8023_v54, %s6796_s4  ;;  %v3177_v10 = vrot.slane %v8023_v54, 6  ;;  %v3186_v56 = vrot.slane %v8023_v54, 4  ;;  %v3195_v58 = vrot.slane %v8023_v54, 2 }
0x35f0   :  { %3178 = vrot.lane.b32.xlu1 %v3177_v10, %s6796_s4 }
0x35f2   :  { %3187 = vrot.lane.b32.xlu0 %v3186_v56, %s6796_s4 }
0x35f4   :  { %3196 = vrot.lane.b32.xlu1 %v3195_v58, %s6796_s4 }
0x3660   :  { %v3169_v48 = vpop.permute.xlu0 %3168 }
0x3661   :  { %3171 = vst.msk [vmem:[#allocation3] sm:$0x3] %vm238_vm4, %v3169_v48  ;;  %v3204_v59 = vmul.f32 %v7803_v26, %v3169_v48  ;;  %v3172_v61 = vmul.f32 %v3169_v48, %v7807_v52 }
0x3662   :  { %v3179_v60 = vpop.permute.xlu1 %3178 }
0x3663   :  { %v3181_v63 = vmul.f32 %v3179_v60, %v7807_v52  ;;  %v3205_v1 = vsel %vm238_vm4, %v3204_v59, 0.0  ;;  %v3173_v32 = vsel %vm238_vm4, %v3172_v61, 0.0  ;;  %v3209_v53 = vmul.f32 %v7803_v26, %v3179_v60 }
0x3664   :  { %3206 = vadd.xlane.f32.xlu0 %v3205_v1  ;;  %v3188_v4 = vpop.permute.xlu0 %3187 }
0x3665   :  { %v3182_v16 = vsel %vm2708_vm11, %v3181_v63, 0.0  ;;  %v3190_v9 = vmul.f32 %v3188_v4, %v7807_v52  ;;  %v3214_v57 = vmul.f32 %v7803_v26, %v3188_v4  ;;  %v3210_v34 = vsel %vm2708_vm11, %v3209_v53, 0.0 }
0x3666   :  { %3183 = vadd.xlane.f32.xlu1 %v3182_v16  ;;  %v3197_v22 = vpop.permute.xlu1 %3196 }
0x3667   :  { %v3199_v23 = vmul.f32 %v3197_v22, %v7807_v52  ;;  %v3191_v31 = vsel %vm2718_vm10, %v3190_v9, 0.0  ;;  %v3215_v33 = vsel %vm2718_vm10, %v3214_v57, 0.0  ;;  %v3219_v49 = vmul.f32 %v7803_v26, %v3197_v22 }
0x3668   :  { %3174 = vadd.xlane.f32.xlu0 %v3173_v32 }
0x3669   :  { %v3200_v40 = vsel %vm2727_vm12, %v3199_v23, 0.0  ;;  %v3220_v36 = vsel %vm2727_vm12, %v3219_v49, 0.0 }
0x366a   :  { %3201 = vadd.xlane.f32.xlu1 %v3200_v40 }
0x366c   :  { %3192 = vadd.xlane.f32.xlu0 %v3191_v31 }
0x366e   :  { %3216 = vadd.xlane.f32.xlu1 %v3215_v33 }
0x3670   :  { %3211 = vadd.xlane.f32.xlu0 %v3210_v34 }
0x3674   :  { %3221 = vadd.xlane.f32.xlu0 %v3220_v36 }
0x36f1   :  { %v3207_v37 = vpop.xlane.xlu0 %3206 }
0x36f2   :  { %v3208_v38 = vadd.f32 %v3207_v37, %v7790_v42 }
0x36f3   :  { %v3184_v39 = vpop.xlane.xlu1 %3183 }
0x36f4   :  { %3237 = vrot.lane.b32.xlu1 %v3208_v38, %s6803_s20  ;;  %v3185_v27 = vadd.f32 %v3184_v39, %v7828_v8 }
0x36f5   :  { %v3175_v18 = vpop.xlane.xlu0 %3174 }
0x36f6   :  { %v3225_v50 = vrot.slane %v3185_v27, 2  ;;  %v3176_v17 = vadd.f32 %v3175_v18, %v7790_v42 }
0x36f7   :  { %v3202_v44 = vpop.xlane.xlu1 %3201 }
0x36f8   :  { %v3227_v51 = vmax.f32 %v3176_v17, %v3225_v50  ;;  %v3203_v10 = vadd.f32 %v3202_v44, %v7832_v62 }
0x36f9   :  { %v3193_v28 = vpop.xlane.xlu0 %3192 }
0x36fa   :  { %v3194_v30 = vadd.f32 %v3193_v28, %v7821_v5  ;;  %v3233_v48 = vrot.slane %v3203_v10, 6 }
0x36fb   :  { %v3217_v58 = vpop.xlane.xlu1 %3216 }
0x36fc   :  { %v3229_v46 = vrot.slane %v3194_v30, 4  ;;  %v3218_v63 = vadd.f32 %v3217_v58, %v7830_v12 }
0x36fd   :  { %v3212_v21 = vpop.xlane.xlu0 %3211 }
0x36fe   :  { %v3231_v56 = vmax.f32 %v3227_v51, %v3229_v46  ;;  %v3213_v59 = vadd.f32 %v3212_v21, %v7834_v6  ;;  %v3246_v9 = vrot.slane %v3218_v63, 4 }
0x3700   :  { %v3235_v1 = vmax.f32 %v3231_v56, %v3233_v48  ;;  %v3242_v4 = vrot.slane %v3213_v59, 2 }
0x3701   :  { %v3222_v60 = vpop.xlane.xlu0 %3221 }
0x3702   :  { %v3223_v16 = vadd.f32 %v3222_v60, %v7843_v29 }
0x3704   :  { %v3250_v32 = vrot.slane %v3223_v16, 6 }
0x3766   :  { %v3238_v61 = vpop.permute.xlu1 %3237 }
0x3767   :  { %v3240_v22 = vmax.f32 %v3235_v1, %v3238_v61 }
0x3769   :  { %v3244_v23 = vmax.f32 %v3240_v22, %v3242_v4 }
0x376b   :  { %v3248_v57 = vmax.f32 %v3244_v23, %v3246_v9 }
0x376d   :  { %v3252_v40 = vmax.f32 %v3248_v57, %v3250_v32 }
0x376f   :  { %3272 = vrot.lane.b32.xlu0 %v3252_v40, %s6804_s6  ;;  %v3257_v34 = vrot.slane %v3252_v40, 6  ;;  %v3262_v37 = vrot.slane %v3252_v40, 4  ;;  %v3253_v39 = vsub.f32 %v3176_v17, %v3252_v40  ;;  %v3267_v50 = vrot.slane %v3252_v40, 2 }
0x3771   :  { %v3259_v36 = vsub.f32 %v3185_v27, %v3257_v34  ;;  %v3264_v28 = vsub.f32 %v3194_v30, %v3262_v37  ;;  %v3254_v44 = vmul.f32 1.442695, %v3253_v39  ;;  %v3269_v21 = vsub.f32 %v3203_v10, %v3267_v50 }
0x3772   :  { %v3278_v51 = vsub.f32 %v3213_v59, %v3257_v34  ;;  %v3281_v56 = vsub.f32 %v3218_v63, %v3262_v37  ;;  %v3284_v60 = vsub.f32 %v3223_v16, %v3267_v50 }
0x3773   :  { %v3260_v18 = vmul.f32 1.442695, %v3259_v36  ;;  %v3265_v46 = vmul.f32 1.442695, %v3264_v28 }
0x3774   :  { %v3279_v48 = vmul.f32 1.442695, %v3278_v51  ;;  %v3282_v1 = vmul.f32 1.442695, %v3281_v56  ;;  %v3285_v61 = vmul.f32 1.442695, %v3284_v60 }
0x37e1   :  { %v3273_v53 = vpop.permute.xlu0 %3272 }
0x37e2   :  { %v3275_v31 = vsub.f32 %v3208_v38, %v3273_v53  ;;  %v3270_v38 = vmul.f32 1.442695, %v3269_v21 }
0x37e4   :  { %v3276_v33 = vmul.f32 1.442695, %v3275_v31 }
0x37e6   :  { %6641 = vpow2.f32 %v3276_v33 }
0x37e7   :  { %6643 = vpow2.f32 %v3260_v18 }
0x37e8   :  { %6645 = vpow2.f32 %v3254_v44 }
0x37e9   :  { %6647 = vpow2.f32 %v3265_v46 }
0x37ea   :  { %6649 = vpow2.f32 %v3270_v38 }
0x37eb   :  { %6651 = vpow2.f32 %v3279_v48 }
0x37ec   :  { %6653 = vpow2.f32 %v3282_v1 }
0x37ed   :  { %6655 = vpow2.f32 %v3285_v61 }
0x37f0   :  { %v8060_v49 = vpop.eup %6641 }
0x37f1   :  { %3300 = vrot.lane.b32.xlu1 %v8060_v49, %s6803_s20  ;;  %v6644_v58 = vpop.eup %6643 }
0x37f2   :  { %v3288_v27 = vrot.slane %v6644_v58, 2  ;;  %v6646_v17 = vpop.eup %6645 }
0x37f3   :  { %v6648_v30 = vpop.eup %6647 }
0x37f4   :  { %v3290_v4 = vadd.f32 %v6646_v17, %v3288_v27  ;;  %v3292_v22 = vrot.slane %v6648_v30, 4  ;;  %v6650_v10 = vpop.eup %6649 }
0x37f5   :  { %v3296_v23 = vrot.slane %v6650_v10, 6  ;;  %v6652_v32 = vpop.eup %6651 }
0x37f6   :  { %v3294_v9 = vadd.f32 %v3292_v22, %v3290_v4  ;;  %v6654_v63 = vpop.eup %6653  ;;  %v3305_v53 = vrot.slane %v6652_v32, 2 }
0x37f7   :  { %v6656_v16 = vpop.eup %6655  ;;  %v3309_v33 = vrot.slane %v6654_v63, 4 }
0x37f8   :  { %v3298_v59 = vadd.f32 %v3296_v23, %v3294_v9  ;;  %v3313_v36 = vrot.slane %v6656_v16, 6 }
0x3863   :  { %v3301_v57 = vpop.permute.xlu1 %3300 }
0x3864   :  { %v3303_v40 = vadd.f32 %v3301_v57, %v3298_v59 }
0x3866   :  { %v3307_v31 = vadd.f32 %v3305_v53, %v3303_v40 }
0x3868   :  { %v3311_v34 = vadd.f32 %v3309_v33, %v3307_v31 }
0x386a   :  { %v3315_v37 = vadd.f32 %v3313_v36, %v3311_v34 }
0x386c   :  { %6657 = vrcp.f32 %v3315_v37 }
0x3876   :  { %v6658_v18 = vpop.eup %6657 }
0x3877   :  { %3364 = vrot.lane.b32.xlu1 %v6658_v18, %s6804_s6  ;;  %v3325_v39 = vrot.slane %v6658_v18, 6  ;;  %v3317_v50 = vmul.f32 %v6658_v18, %v6646_v17  ;;  %v3338_v44 = vrot.slane %v6658_v18, 4  ;;  %v3351_v46 = vrot.slane %v6658_v18, 2 }
0x3879   :  { %v3327_v28 = vmul.f32 %v6644_v58, %v3325_v39  ;;  %v3340_v21 = vmul.f32 %v6648_v30, %v3338_v44  ;;  %v3353_v38 = vmul.f32 %v6650_v10, %v3351_v46  ;;  %v3375_v51 = vmul.f32 %v6652_v32, %v3325_v39 }
0x387a   :  { %v3386_v56 = vmul.f32 %v6654_v63, %v3338_v44  ;;  %v3397_v58 = vmul.f32 %v6656_v16, %v3351_v46 }
0x387b   :  { %3330 = vperm.xlu0 %6406, %v3327_v28   ;;  %3320 = vperm.xlu1 %6408, %v3317_v50  }
0x387f   :  { %3343 = vperm.xlu0 %6406, %v3340_v21   ;;  %3356 = vperm.xlu1 %6408, %v3353_v38  }
0x3883   :  { %3378 = vperm.xlu1 %6408, %v3375_v51   ;;  %6409 = vset.pattern.permute.xlu0 %v6808_v11 }
0x3887   :  { %3389 = vperm.xlu1 %6408, %v3386_v56  }
0x38e9   :  { %v3365_v48 = vpop.permute.xlu1 %3364 }
0x38ea   :  { %v3367_v60 = vmul.f32 %v8060_v49, %v3365_v48 }
0x38ec   :  { %3370 = vperm.xlu0 %6409, %v3367_v60  }
0x38f0   :  { %6410 = vset.pattern.permute.xlu0 %v6805_v19 }
0x38f1   :  { %3400 = vperm.xlu0 %6410, %v3397_v58  }
0x38fa   :  { %v3331_v1 = vpop.permute.xlu0 %3330  ;;  %v3321_v27 = vpop.permute.xlu1 %3320 }
0x38fb   :  { %v3333_v30 = vmul.f32 %v3331_v1, %v7809_v25  ;;  %v3323_v9 = vmul.f32 %v3321_v27, %v7809_v25 }
0x38fd   :  { %v3335_v22 = vrot.slane %v3333_v30, 2 }
0x38fe   :  { %v3344_v61 = vpop.permute.xlu0 %3343  ;;  %v3357_v17 = vpop.permute.xlu1 %3356 }
0x38ff   :  { %v3346_v4 = vmul.f32 %v3344_v61, %v7809_v25  ;;  %v3337_v32 = vadd.f32 %v3335_v22, %v3323_v9  ;;  %v3359_v49 = vmul.f32 %v3357_v17, %v7809_v25 }
0x3901   :  { %v3348_v23 = vrot.slane %v3346_v4, 4  ;;  %v3361_v57 = vrot.slane %v3359_v49, 6 }
0x3902   :  { %v3379_v10 = vpop.permute.xlu1 %3378 }
0x3903   :  { %v3350_v59 = vadd.f32 %v3348_v23, %v3337_v32  ;;  %v3381_v40 = vmul.f32 %v7805_v13, %v3379_v10 }
0x3905   :  { %v3363_v16 = vadd.f32 %v3361_v57, %v3350_v59  ;;  %v3383_v34 = vrot.slane %v3381_v40, 2 }
0x3906   :  { %v3390_v63 = vpop.permute.xlu1 %3389 }
0x3907   :  { %v3392_v31 = vmul.f32 %v7805_v13, %v3390_v63 }
0x3909   :  { %v3394_v37 = vrot.slane %v3392_v31, 4 }
0x396b   :  { %v3371_v53 = vpop.permute.xlu0 %3370 }
0x396c   :  { %v3373_v33 = vmul.f32 %v7805_v13, %v3371_v53 }
0x396e   :  { %v3374_v36 = vadd.f32 %v3373_v33, %v3363_v16 }
0x3970   :  { %v3385_v18 = vadd.f32 %v3383_v34, %v3374_v36  ;;  %v3401_v39 = vpop.permute.xlu0 %3400 }
0x3971   :  { %v3403_v28 = vmul.f32 %v7805_v13, %v3401_v39 }
0x3972   :  { %v3396_v50 = vadd.f32 %v3394_v37, %v3385_v18 }
0x3973   :  { %v3405_v44 = vrot.slane %v3403_v28, 6 }
0x3975   :  { %v3407_v46 = vadd.f32 %v3405_v44, %v3396_v50 }
0x3977   :  { %v3480_v21 = vadd.f32 %v8010_v45, %v3407_v46 }
0x3979   :  { %v3481_v38 = vadd.f32 %v7932_v41, %v3480_v21 }
0x397b   :  { %v3482_v51 = vmul.f32 2.0, %v3481_v38 }
0x397d   :  { %v3483_v56 = vsel %vm6929_vm3, %v3482_v51, %v3481_v38 }
0x397e   :  { %v5627_v48 = vmul.f32 -1.442695, %v3483_v56 }
0x3980   :  { %6659 = vpow2.f32 %v5627_v48 }
0x398a   :  { %v6660_v60 = vpop.eup %6659 }
0x398b   :  { %v3487_v58 = vadd.f32 1.0, %v6660_v60 }
0x398d   :  { %6661 = vrcp.f32 %v3487_v58 }
0x3997   :  { %v6662_v1 = vpop.eup %6661 }
0x3998   :  { %v3490_v27 = vmul.f32 2.0, %v6662_v1 }
0x399a   :  { %v5628_v61 = vadd.f32 -1.0, %v3490_v27 }
0x399c   :  { %v3492_v17 = vsel %vm6929_vm3, %v5628_v61, %v6662_v1 }
0x399d   :  { %3495 = vrot.lane.b32.xlu1 %v3492_v17, %s6795_s0  ;;  %v3493_v41 = vmul.f32 %v3492_v17, %v7941_v55 }
0x3a0f   :  { %v3496_v45 = vpop.permute.xlu1 %3495 }
0x3a10   :  { %v3498_v30 = vmul.f32 %v3496_v45, %v3492_v17 }
0x3a12   :  { %3500 = vrot.lane.b32.xlu1 %v3498_v30, %s6796_s4 }
0x3a84   :  { %v3501_v4 = vpop.permute.xlu1 %3500 }
0x3a85   :  { %v8085_v22 = vadd.f32 %v3501_v4, %v3493_v41 }
0x3a87   :  { %6663 = vtanh.f32 %v8085_v22 }
0x3a91   :  { %v6664_v10 = vpop.eup %6663 }
0x3a92   :  { %3506 = vrot.lane.b32.xlu0 %v6664_v10, %s6795_s0 }
0x3a96   :  { %3514 = vrot.lane.b32.xlu0 %v8023_v54, %s6795_s0 }
0x3b04   :  { %v3507_v9 = vpop.permute.xlu0 %3506 }
0x3b05   :  { %v3509_v23 = vmul.f32 %v3507_v9, %v3492_v17 }
0x3b07   :  { %3511 = vrot.lane.b32.xlu1 %v3509_v23, %s6796_s4 }
0x3b08   :  { %v3515_v32 = vpop.permute.xlu0 %3514 }
0x3b79   :  { %v3512_v49 = vpop.permute.xlu1 %3511 }
0x3b7a   :  { %v3517_v59 = vsel %vm250_vm5, %v3512_v49, %v3515_v32  ;;  %5876 = vmatmul.mubr.msk.f32.vlgmr.msra.gmra.mrb[26].mxu0 %vm250_vm5, %v3512_v49 }
0x3b7b   :  { %5865 = vmatmul.mubr.msk.f32.vlgmr.msra.gmra.mrb[20].mxu1 %vm252_vm6, %v3517_v59  ;;  %6318 = vmatpush3.bf16.msra.mxu0 %v7953_v0 }
0x3b7c   :  { %6319 = vmatprep.subr.bf16.mxu0 %v6806_v24  ;;  %6330 = vmatpush3.bf16.msra.mxu1 %v7890_v15 }
0x3b7d   :  { %6331 = vmatprep.subr.bf16.mxu1 %v6806_v24  ;;  %5905 = vmatprep.mubr.msk.f32.mxu1 %vm6807_vm13, %v6794_v3 }
0x3b7e   :  { %5894 = vmatprep.mubr.msk.f32.mxu0 %vm6807_vm13, %v6794_v3 }
0x3b7f   :  { %6321 = vmatpush3.bf16.msra.mxu0 %v7959_v2 }
0x3b80   :  { %6322 = vmatprep.subr.bf16.mxu0 %v6806_v24  ;;  %6333 = vmatpush3.bf16.msra.mxu1 %v7899_v35 }
0x3b81   :  { %6334 = vmatprep.subr.bf16.mxu1 %v6806_v24 }
0x3b83   :  { %6324 = vmatpush3.bf16.msra.mxu0 %v7969_v14 }
0x3b84   :  { %6325 = vmatprep.subr.bf16.mxu0 %v6806_v24 }
0x3b87   :  { %6327 = vmatpush3.bf16.msra.mxu0 %v7980_v7 }
0x3b88   :  { %6346 = vmatprep.subr.bf16.mxu0 %v6806_v24 }
0x3c4d   :  { %v8111_v55 = vpop.f32.mrb[26].mxu0 }
0x3c4e   :  { %v3587_v54 = vpop.f32.mrb[20].mxu1  ;;  %v5877_v63 = vpop.f32.mrb[27].mxu0 }
0x3c4f   :  { %v3588_v57 = vadd.f32 %v8008_v43, %v3587_v54  ;;  %v5866_v40 = vpop.f32.mrb[21].mxu1 }
0x3c51   :  { %v3591_v53 = vmul.f32 2.0, %v3588_v57 }
0x3c53   :  { %v3592_v16 = vsel %vm6929_vm3, %v3591_v53, %v3588_v57 }
0x3c54   :  { %v5630_v31 = vmul.f32 -1.442695, %v3592_v16 }
0x3c56   :  { %6665 = vpow2.f32 %v5630_v31 }
0x3c60   :  { %v6666_v33 = vpop.eup %6665 }
0x3c61   :  { %v3596_v34 = vadd.f32 1.0, %v6666_v33 }
0x3c63   :  { %6667 = vrcp.f32 %v3596_v34 }
0x3c6d   :  { %v6668_v36 = vpop.eup %6667 }
0x3c6e   :  { %v3599_v37 = vmul.f32 2.0, %v6668_v36 }
0x3c70   :  { %v5631_v18 = vadd.f32 -1.0, %v3599_v37 }
0x3c72   :  { %v3601_v39 = vsel %vm6929_vm3, %v5631_v18, %v6668_v36 }
0x3c73   :  { %3604 = vrot.lane.b32.xlu1 %v3601_v39, %s6795_s0  ;;  %v3602_v44 = vmul.f32 %v3601_v39, %v8019_v47 }
0x3ce5   :  { %v3605_v28 = vpop.permute.xlu1 %3604 }
0x3ce6   :  { %v3607_v50 = vmul.f32 %v3605_v28, %v3601_v39 }
0x3ce8   :  { %3609 = vrot.lane.b32.xlu0 %v3607_v50, %s6796_s4 }
0x3d5a   :  { %v3610_v46 = vpop.permute.xlu0 %3609 }
0x3d5b   :  { %v8121_v21 = vadd.f32 %v3610_v46, %v3602_v44 }
0x3d5d   :  { %6669 = vtanh.f32 %v8121_v21 }
0x3d67   :  { %v6670_v38 = vpop.eup %6669 }
0x3d68   :  { %3615 = vrot.lane.b32.xlu1 %v6670_v38, %s6795_s0 }
0x3dda   :  { %v3616_v51 = vpop.permute.xlu1 %3615 }
0x3ddb   :  { %v8125_v56 = vmul.f32 %v3616_v51, %v3601_v39 }
0x3ddd   :  { %3620 = vrot.lane.b32.xlu0 %v8125_v56, %s6796_s4  ;;  %v3629_v48 = vrot.slane %v8125_v56, 6  ;;  %v3638_v47 = vrot.slane %v8125_v56, 4  ;;  %v3647_v60 = vrot.slane %v8125_v56, 2 }
0x3ddf   :  { %3630 = vrot.lane.b32.xlu1 %v3629_v48, %s6796_s4 }
0x3de1   :  { %3639 = vrot.lane.b32.xlu0 %v3638_v47, %s6796_s4 }
0x3de3   :  { %3648 = vrot.lane.b32.xlu1 %v3647_v60, %s6796_s4 }
0x3e4f   :  { %v3621_v58 = vpop.permute.xlu0 %3620 }
0x3e50   :  { %3623 = vst.msk [vmem:[#allocation3 + $0x2] sm:$0x3] %vm238_vm4, %v3621_v58  ;;  %v3656_v1 = vmul.f32 %v7803_v26, %v3621_v58  ;;  %v3624_v45 = vmul.f32 %v3621_v58, %v7807_v52 }
0x3e51   :  { %v3631_v27 = vpop.permute.xlu1 %3630 }
0x3e52   :  { %v3633_v61 = vmul.f32 %v3631_v27, %v7807_v52  ;;  %v3657_v17 = vsel %vm238_vm4, %v3656_v1, 0.0  ;;  %v3625_v23 = vsel %vm238_vm4, %v3624_v45, 0.0  ;;  %v3661_v59 = vmul.f32 %v7803_v26, %v3631_v27 }
0x3e53   :  { %3658 = vadd.xlane.f32.xlu0 %v3657_v17  ;;  %v3640_v30 = vpop.permute.xlu0 %3639 }
0x3e54   :  { %v3634_v41 = vsel %vm2708_vm11, %v3633_v61, 0.0  ;;  %v3642_v10 = vmul.f32 %v3640_v30, %v7807_v52  ;;  %v3666_v32 = vmul.f32 %v7803_v26, %v3640_v30  ;;  %v3662_v40 = vsel %vm2708_vm11, %v3661_v59, 0.0 }
0x3e55   :  { %3635 = vadd.xlane.f32.xlu1 %v3634_v41  ;;  %v3649_v4 = vpop.permute.xlu1 %3648 }
0x3e56   :  { %v3651_v9 = vmul.f32 %v3649_v4, %v7807_v52  ;;  %v3643_v54 = vsel %vm2718_vm10, %v3642_v10, 0.0  ;;  %v3667_v63 = vsel %vm2718_vm10, %v3666_v32, 0.0  ;;  %v3671_v57 = vmul.f32 %v7803_v26, %v3649_v4 }
0x3e57   :  { %3626 = vadd.xlane.f32.xlu0 %v3625_v23 }
0x3e58   :  { %v3652_v49 = vsel %vm2727_vm12, %v3651_v9, 0.0  ;;  %v3672_v53 = vsel %vm2727_vm12, %v3671_v57, 0.0 }
0x3e59   :  { %3653 = vadd.xlane.f32.xlu1 %v3652_v49 }
0x3e5b   :  { %3644 = vadd.xlane.f32.xlu0 %v3643_v54 }
0x3e5d   :  { %3668 = vadd.xlane.f32.xlu1 %v3667_v63 }
0x3e5f   :  { %3663 = vadd.xlane.f32.xlu0 %v3662_v40 }
0x3e63   :  { %3673 = vadd.xlane.f32.xlu0 %v3672_v53 }
0x3ee0   :  { %v3659_v16 = vpop.xlane.xlu0 %3658 }
0x3ee1   :  { %v3660_v31 = vadd.f32 %v3659_v16, %v7790_v42 }
0x3ee2   :  { %v3636_v34 = vpop.xlane.xlu1 %3635 }
0x3ee3   :  { %3689 = vrot.lane.b32.xlu1 %v3660_v31, %s6803_s20  ;;  %v3637_v37 = vadd.f32 %v3636_v34, %v7828_v8 }
0x3ee4   :  { %v3627_v33 = vpop.xlane.xlu0 %3626 }
0x3ee5   :  { %v3677_v39 = vrot.slane %v3637_v37, 2  ;;  %v3628_v28 = vadd.f32 %v3627_v33, %v7790_v42 }
0x3ee6   :  { %v3654_v50 = vpop.xlane.xlu1 %3653 }
0x3ee7   :  { %v3679_v38 = vmax.f32 %v3628_v28, %v3677_v39  ;;  %v3655_v51 = vadd.f32 %v3654_v50, %v7832_v62 }
0x3ee8   :  { %v3645_v36 = vpop.xlane.xlu0 %3644 }
0x3ee9   :  { %v3646_v18 = vadd.f32 %v3645_v36, %v7821_v5  ;;  %v3685_v60 = vrot.slane %v3655_v51, 6 }
0x3eea   :  { %v3669_v47 = vpop.xlane.xlu1 %3668 }
0x3eeb   :  { %v3681_v44 = vrot.slane %v3646_v18, 4  ;;  %v3670_v27 = vadd.f32 %v3669_v47, %v7830_v12 }
0x3eec   :  { %v3664_v46 = vpop.xlane.xlu0 %3663 }
0x3eed   :  { %v3683_v48 = vmax.f32 %v3679_v38, %v3681_v44  ;;  %v3665_v58 = vadd.f32 %v3664_v46, %v7834_v6  ;;  %v3698_v4 = vrot.slane %v3670_v27, 4 }
0x3eef   :  { %v3687_v61 = vmax.f32 %v3683_v48, %v3685_v60  ;;  %v3694_v45 = vrot.slane %v3665_v58, 2 }
0x3ef0   :  { %v3674_v1 = vpop.xlane.xlu0 %3673 }
0x3ef1   :  { %v3675_v30 = vadd.f32 %v3674_v1, %v7843_v29 }
0x3ef3   :  { %v3702_v9 = vrot.slane %v3675_v30, 6 }
0x3f55   :  { %v3690_v17 = vpop.permute.xlu1 %3689 }
0x3f56   :  { %v3692_v41 = vmax.f32 %v3687_v61, %v3690_v17 }
0x3f58   :  { %v3696_v10 = vmax.f32 %v3692_v41, %v3694_v45 }
0x3f5a   :  { %v3700_v23 = vmax.f32 %v3696_v10, %v3698_v4 }
0x3f5c   :  { %v3704_v32 = vmax.f32 %v3700_v23, %v3702_v9 }
0x3f5e   :  { %3724 = vrot.lane.b32.xlu0 %v3704_v32, %s6804_s6  ;;  %v3709_v57 = vrot.slane %v3704_v32, 6  ;;  %v3714_v53 = vrot.slane %v3704_v32, 4  ;;  %v3705_v33 = vsub.f32 %v3628_v28, %v3704_v32  ;;  %v3719_v36 = vrot.slane %v3704_v32, 2 }
0x3f60   :  { %v3711_v40 = vsub.f32 %v3637_v37, %v3709_v57  ;;  %v3716_v34 = vsub.f32 %v3646_v18, %v3714_v53  ;;  %v3706_v39 = vmul.f32 1.442695, %v3705_v33  ;;  %v3721_v44 = vsub.f32 %v3655_v51, %v3719_v36 }
0x3f61   :  { %v3730_v46 = vsub.f32 %v3665_v58, %v3709_v57  ;;  %v3733_v38 = vsub.f32 %v3670_v27, %v3714_v53  ;;  %v3736_v60 = vsub.f32 %v3675_v30, %v3719_v36 }
0x3f62   :  { %v3712_v16 = vmul.f32 1.442695, %v3711_v40  ;;  %v3717_v50 = vmul.f32 1.442695, %v3716_v34 }
0x3f63   :  { %v3731_v47 = vmul.f32 1.442695, %v3730_v46  ;;  %v3734_v1 = vmul.f32 1.442695, %v3733_v38  ;;  %v3737_v61 = vmul.f32 1.442695, %v3736_v60 }
0x3fd0   :  { %v3725_v49 = vpop.permute.xlu0 %3724 }
0x3fd1   :  { %v3727_v59 = vsub.f32 %v3660_v31, %v3725_v49  ;;  %v3722_v31 = vmul.f32 1.442695, %v3721_v44 }
0x3fd3   :  { %v3728_v54 = vmul.f32 1.442695, %v3727_v59 }
0x3fd5   :  { %6671 = vpow2.f32 %v3728_v54 }
0x3fd6   :  { %6673 = vpow2.f32 %v3712_v16 }
0x3fd7   :  { %6675 = vpow2.f32 %v3706_v39 }
0x3fd8   :  { %6677 = vpow2.f32 %v3717_v50 }
0x3fd9   :  { %6679 = vpow2.f32 %v3722_v31 }
0x3fda   :  { %6681 = vpow2.f32 %v3731_v47 }
0x3fdb   :  { %6683 = vpow2.f32 %v3734_v1 }
0x3fdc   :  { %6685 = vpow2.f32 %v3737_v61 }
0x3fdf   :  { %v8162_v63 = vpop.eup %6671 }
0x3fe0   :  { %3752 = vrot.lane.b32.xlu1 %v8162_v63, %s6803_s20  ;;  %v6674_v48 = vpop.eup %6673 }
0x3fe1   :  { %v3740_v37 = vrot.slane %v6674_v48, 2  ;;  %v6676_v28 = vpop.eup %6675 }
0x3fe2   :  { %v6678_v18 = vpop.eup %6677 }
0x3fe3   :  { %v3742_v17 = vadd.f32 %v6676_v28, %v3740_v37  ;;  %v3744_v45 = vrot.slane %v6678_v18, 4  ;;  %v6680_v51 = vpop.eup %6679 }
0x3fe4   :  { %v3748_v4 = vrot.slane %v6680_v51, 6  ;;  %v6682_v10 = vpop.eup %6681 }
0x3fe5   :  { %v3746_v41 = vadd.f32 %v3744_v45, %v3742_v17  ;;  %v6684_v27 = vpop.eup %6683  ;;  %v3757_v32 = vrot.slane %v6682_v10, 2 }
0x3fe6   :  { %v6686_v30 = vpop.eup %6685  ;;  %v3761_v59 = vrot.slane %v6684_v27, 4 }
0x3fe7   :  { %v3750_v58 = vadd.f32 %v3748_v4, %v3746_v41  ;;  %v3765_v57 = vrot.slane %v6686_v30, 6 }
0x4052   :  { %v3753_v9 = vpop.permute.xlu1 %3752 }
0x4053   :  { %v3755_v23 = vadd.f32 %v3753_v9, %v3750_v58 }
0x4055   :  { %v3759_v49 = vadd.f32 %v3757_v32, %v3755_v23 }
0x4057   :  { %v3763_v54 = vadd.f32 %v3761_v59, %v3759_v49 }
0x4059   :  { %v3767_v40 = vadd.f32 %v3765_v57, %v3763_v54 }
0x405b   :  { %6687 = vrcp.f32 %v3767_v40 }
0x4065   :  { %v6688_v53 = vpop.eup %6687 }
0x4066   :  { %3816 = vrot.lane.b32.xlu1 %v6688_v53, %s6804_s6  ;;  %v3777_v16 = vrot.slane %v6688_v53, 6  ;;  %v3769_v34 = vmul.f32 %v6688_v53, %v6676_v28  ;;  %v3790_v36 = vrot.slane %v6688_v53, 4  ;;  %v3803_v39 = vrot.slane %v6688_v53, 2 }
0x4068   :  { %v3779_v33 = vmul.f32 %v6674_v48, %v3777_v16  ;;  %v3792_v50 = vmul.f32 %v6678_v18, %v3790_v36  ;;  %v3805_v44 = vmul.f32 %v6680_v51, %v3803_v39  ;;  %v3827_v31 = vmul.f32 %v6682_v10, %v3777_v16 }
0x4069   :  { %v3838_v46 = vmul.f32 %v6684_v27, %v3790_v36  ;;  %v3849_v48 = vmul.f32 %v6686_v30, %v3803_v39 }
0x406a   :  { %3782 = vperm.xlu0 %6410, %v3779_v33   ;;  %3772 = vperm.xlu1 %6408, %v3769_v34  }
0x406e   :  { %3795 = vperm.xlu0 %6410, %v3792_v50   ;;  %3808 = vperm.xlu1 %6408, %v3805_v44   ;;  %v8182_v50 = vld [vmem:[%s8549_s11] ss:$0 sm:$0xff] }
0x4072   :  { %3830 = vperm.xlu1 %6408, %v3827_v31   ;;  %6411 = vset.pattern.permute.xlu0 %v6808_v11 }
0x4076   :  { %3841 = vperm.xlu1 %6408, %v3838_v46  }
0x40d8   :  { %v3817_v38 = vpop.permute.xlu1 %3816 }
0x40d9   :  { %v3819_v47 = vmul.f32 %v8162_v63, %v3817_v38 }
0x40db   :  { %3822 = vperm.xlu0 %6411, %v3819_v47  }
0x40df   :  { %6412 = vset.pattern.permute.xlu0 %v6805_v19 }
0x40e0   :  { %3852 = vperm.xlu0 %6412, %v3849_v48  }
0x40e9   :  { %v3783_v60 = vpop.permute.xlu0 %3782  ;;  %v3773_v1 = vpop.permute.xlu1 %3772 }
0x40ea   :  { %v3785_v28 = vmul.f32 %v3783_v60, %v7809_v25  ;;  %v3775_v51 = vmul.f32 %v3773_v1, %v7809_v25 }
0x40ec   :  { %v3787_v17 = vrot.slane %v3785_v28, 2 }
0x40ed   :  { %v3796_v37 = vpop.permute.xlu0 %3795  ;;  %v3809_v61 = vpop.permute.xlu1 %3808 }
0x40ee   :  { %v3798_v18 = vmul.f32 %v3796_v37, %v7809_v25  ;;  %v3789_v4 = vadd.f32 %v3787_v17, %v3775_v51  ;;  %v3811_v63 = vmul.f32 %v3809_v61, %v7809_v25 }
0x40f0   :  { %v3800_v41 = vrot.slane %v3798_v18, 4  ;;  %v3813_v27 = vrot.slane %v3811_v63, 6 }
0x40f1   :  { %v3831_v45 = vpop.permute.xlu1 %3830 }
0x40f2   :  { %v3802_v10 = vadd.f32 %v3800_v41, %v3789_v4  ;;  %v3833_v9 = vmul.f32 %v7805_v13, %v3831_v45 }
0x40f4   :  { %v3815_v32 = vadd.f32 %v3813_v27, %v3802_v10  ;;  %v3835_v59 = vrot.slane %v3833_v9, 2 }
0x40f5   :  { %v3842_v58 = vpop.permute.xlu1 %3841 }
0x40f6   :  { %v3844_v30 = vmul.f32 %v7805_v13, %v3842_v58 }
0x40f8   :  { %v3846_v57 = vrot.slane %v3844_v30, 4 }
0x415a   :  { %v3823_v23 = vpop.permute.xlu0 %3822 }
0x415b   :  { %v3825_v49 = vmul.f32 %v7805_v13, %v3823_v23 }
0x415d   :  { %v3826_v54 = vadd.f32 %v3825_v49, %v3815_v32 }
0x415f   :  { %v3837_v40 = vadd.f32 %v3835_v59, %v3826_v54  ;;  %v3853_v53 = vpop.permute.xlu0 %3852 }
0x4160   :  { %v3855_v16 = vmul.f32 %v7805_v13, %v3853_v53 }
0x4161   :  { %v3848_v33 = vadd.f32 %v3846_v57, %v3837_v40 }
0x4162   :  { %v3857_v34 = vrot.slane %v3855_v16, 6 }
0x4164   :  { %v3859_v36 = vadd.f32 %v3857_v34, %v3848_v33 }
0x4166   :  { %v3932_v39 = vadd.f32 %v8111_v55, %v3859_v36 }
0x4168   :  { %v3933_v44 = vadd.f32 %v8182_v50, %v3932_v39 }
0x416a   :  { %v3934_v31 = vmul.f32 2.0, %v3933_v44 }
0x416c   :  { %v3935_v46 = vsel %vm6929_vm3, %v3934_v31, %v3933_v44 }
0x416d   :  { %v5633_v38 = vmul.f32 -1.442695, %v3935_v46 }
0x416f   :  { %6689 = vpow2.f32 %v5633_v38 }
0x4179   :  { %v6690_v47 = vpop.eup %6689 }
0x417a   :  { %v3939_v48 = vadd.f32 1.0, %v6690_v47 }
0x417c   :  { %6691 = vrcp.f32 %v3939_v48 }
0x4186   :  { %v6692_v60 = vpop.eup %6691 }
0x4187   :  { %v3942_v1 = vmul.f32 2.0, %v6692_v60 }
0x4189   :  { %v5634_v37 = vadd.f32 -1.0, %v3942_v1 }
0x418b   :  { %v3944_v55 = vsel %vm6929_vm3, %v5634_v37, %v6692_v60 }
0x418c   :  { %3947 = vrot.lane.b32.xlu1 %v3944_v55, %s6795_s0  ;;  %v3945_v18 = vmul.f32 %v3944_v55, %v8085_v22 }
0x41fe   :  { %v3948_v61 = vpop.permute.xlu1 %3947 }
0x41ff   :  { %v3950_v28 = vmul.f32 %v3948_v61, %v3944_v55 }
0x4201   :  { %3952 = vrot.lane.b32.xlu1 %v3950_v28, %s6796_s4 }
0x4273   :  { %v3953_v17 = vpop.permute.xlu1 %3952 }
0x4274   :  { %v8192_v45 = vadd.f32 %v3953_v17, %v3945_v18 }
0x4276   :  { %6693 = vtanh.f32 %v8192_v45 }
0x4280   :  { %v6694_v51 = vpop.eup %6693 }
0x4281   :  { %3958 = vrot.lane.b32.xlu0 %v6694_v51, %s6795_s0 }
0x4285   :  { %3966 = vrot.lane.b32.xlu0 %v8125_v56, %s6795_s0 }
0x42f3   :  { %v3959_v41 = vpop.permute.xlu0 %3958 }
0x42f4   :  { %v3961_v4 = vmul.f32 %v3959_v41, %v3944_v55 }
0x42f6   :  { %3963 = vrot.lane.b32.xlu1 %v3961_v4, %s6796_s4 }
0x42f7   :  { %v3967_v63 = vpop.permute.xlu0 %3966 }
0x4368   :  { %v3964_v10 = vpop.permute.xlu1 %3963 }
0x4369   :  { %v3969_v58 = vsel %vm250_vm5, %v3964_v10, %v3967_v63  ;;  %5906 = vmatmul.mubr.msk.f32.vlgmr.msra.gmra.mrb[22].mxu1 %vm250_vm5, %v3964_v10 }
0x436a   :  { %5895 = vmatmul.mubr.msk.f32.vlgmr.msra.gmra.mrb[28].mxu0 %vm252_vm6, %v3969_v58  ;;  %6336 = vmatpush3.bf16.msra.mxu1 %v7953_v0 }
0x436b   :  { %6337 = vmatprep.subr.bf16.mxu1 %v6806_v24  ;;  %6348 = vmatpush3.bf16.msra.mxu0 %v7890_v15 }
0x436c   :  { %6349 = vmatprep.subr.bf16.mxu0 %v6806_v24  ;;  %5935 = vmatprep.mubr.msk.f32.mxu0 %vm6807_vm13, %v6794_v3 }
0x436d   :  { %5924 = vmatprep.mubr.msk.f32.mxu1 %vm6807_vm13, %v6794_v3 }
0x436e   :  { %6339 = vmatpush3.bf16.msra.mxu1 %v7959_v2 }
0x436f   :  { %6340 = vmatprep.subr.bf16.mxu1 %v6806_v24  ;;  %6351 = vmatpush3.bf16.msra.mxu0 %v7899_v35 }
0x4370   :  { %6352 = vmatprep.subr.bf16.mxu0 %v6806_v24 }
0x4372   :  { %6342 = vmatpush3.bf16.msra.mxu1 %v7969_v14 }
0x4373   :  { %6343 = vmatprep.subr.bf16.mxu1 %v6806_v24 }
0x4376   :  { %6345 = vmatpush3.bf16.msra.mxu1 %v7980_v7 }
0x4377   :  { %6364 = vmatprep.subr.bf16.mxu1 %v6806_v24 }
0x443c   :  { %v8218_v22 = vpop.f32.mrb[22].mxu1 }
0x443d   :  { %v4039_v56 = vpop.f32.mrb[28].mxu0  ;;  %v5907_v27 = vpop.f32.mrb[23].mxu1 }
0x443e   :  { %v4040_v9 = vadd.f32 %v8008_v43, %v4039_v56  ;;  %v5896_v23 = vpop.f32.mrb[29].mxu0 }
0x4440   :  { %v4043_v32 = vmul.f32 2.0, %v4040_v9 }
0x4442   :  { %v4044_v30 = vsel %vm6929_vm3, %v4043_v32, %v4040_v9 }
0x4443   :  { %v5636_v49 = vmul.f32 -1.442695, %v4044_v30 }
0x4445   :  { %6695 = vpow2.f32 %v5636_v49 }
0x444f   :  { %v6696_v59 = vpop.eup %6695 }
0x4450   :  { %v4048_v54 = vadd.f32 1.0, %v6696_v59 }
0x4452   :  { %6697 = vrcp.f32 %v4048_v54 }
0x445c   :  { %v6698_v57 = vpop.eup %6697 }
0x445d   :  { %v4051_v40 = vmul.f32 2.0, %v6698_v57 }
0x445f   :  { %v5637_v53 = vadd.f32 -1.0, %v4051_v40 }
0x4461   :  { %v4053_v16 = vsel %vm6929_vm3, %v5637_v53, %v6698_v57 }
0x4462   :  { %4056 = vrot.lane.b32.xlu1 %v4053_v16, %s6795_s0  ;;  %v4054_v34 = vmul.f32 %v4053_v16, %v8121_v21 }
0x44d4   :  { %v4057_v33 = vpop.permute.xlu1 %4056 }
0x44d5   :  { %v4059_v43 = vmul.f32 %v4057_v33, %v4053_v16 }
0x44d7   :  { %4061 = vrot.lane.b32.xlu0 %v4059_v43, %s6796_s4 }
0x4549   :  { %v4062_v36 = vpop.permute.xlu0 %4061 }
0x454a   :  { %v8228_v39 = vadd.f32 %v4062_v36, %v4054_v34 }
0x454c   :  { %6699 = vtanh.f32 %v8228_v39 }
0x4556   :  { %v6700_v44 = vpop.eup %6699 }
0x4557   :  { %4067 = vrot.lane.b32.xlu1 %v6700_v44, %s6795_s0 }
0x45c9   :  { %v4068_v31 = vpop.permute.xlu1 %4067 }
0x45ca   :  { %v8232_v46 = vmul.f32 %v4068_v31, %v4053_v16 }
0x45cc   :  { %4072 = vrot.lane.b32.xlu0 %v8232_v46, %s6796_s4  ;;  %v4081_v38 = vrot.slane %v8232_v46, 6  ;;  %v4090_v21 = vrot.slane %v8232_v46, 4  ;;  %v4099_v47 = vrot.slane %v8232_v46, 2 }
0x45ce   :  { %4082 = vrot.lane.b32.xlu1 %v4081_v38, %s6796_s4 }
0x45d0   :  { %4091 = vrot.lane.b32.xlu0 %v4090_v21, %s6796_s4 }
0x45d2   :  { %4100 = vrot.lane.b32.xlu1 %v4099_v47, %s6796_s4 }
0x463e   :  { %v4073_v48 = vpop.permute.xlu0 %4072 }
0x463f   :  { %4075 = vst.msk [vmem:[#allocation3 + $0x4] sm:$0x3] %vm238_vm4, %v4073_v48  ;;  %v4108_v60 = vmul.f32 %v7803_v26, %v4073_v48  ;;  %v4076_v37 = vmul.f32 %v4073_v48, %v7807_v52 }
0x4640   :  { %v4083_v1 = vpop.permute.xlu1 %4082 }
0x4641   :  { %v4085_v55 = vmul.f32 %v4083_v1, %v7807_v52  ;;  %v4109_v61 = vsel %vm238_vm4, %v4108_v60, 0.0  ;;  %v4077_v4 = vsel %vm238_vm4, %v4076_v37, 0.0  ;;  %v4113_v58 = vmul.f32 %v7803_v26, %v4083_v1 }
0x4642   :  { %4110 = vadd.xlane.f32.xlu0 %v4109_v61  ;;  %v4092_v28 = vpop.permute.xlu0 %4091 }
0x4643   :  { %v4086_v18 = vsel %vm2708_vm11, %v4085_v55, 0.0  ;;  %v4094_v51 = vmul.f32 %v4092_v28, %v7807_v52  ;;  %v4118_v63 = vmul.f32 %v7803_v26, %v4092_v28  ;;  %v4114_v23 = vsel %vm2708_vm11, %v4113_v58, 0.0 }
0x4644   :  { %4087 = vadd.xlane.f32.xlu1 %v4086_v18  ;;  %v4101_v17 = vpop.permute.xlu1 %4100 }
0x4645   :  { %v4103_v41 = vmul.f32 %v4101_v17, %v7807_v52  ;;  %v4095_v56 = vsel %vm2718_vm10, %v4094_v51, 0.0  ;;  %v4119_v27 = vsel %vm2718_vm10, %v4118_v63, 0.0  ;;  %v4123_v9 = vmul.f32 %v7803_v26, %v4101_v17 }
0x4646   :  { %4078 = vadd.xlane.f32.xlu0 %v4077_v4 }
0x4647   :  { %v4104_v10 = vsel %vm2727_vm12, %v4103_v41, 0.0  ;;  %v4124_v32 = vsel %vm2727_vm12, %v4123_v9, 0.0 }
0x4648   :  { %4105 = vadd.xlane.f32.xlu1 %v4104_v10 }
0x464a   :  { %4096 = vadd.xlane.f32.xlu0 %v4095_v56 }
0x464c   :  { %4120 = vadd.xlane.f32.xlu1 %v4119_v27 }
0x464e   :  { %4115 = vadd.xlane.f32.xlu0 %v4114_v23 }
0x4652   :  { %4125 = vadd.xlane.f32.xlu0 %v4124_v32 }
0x46cf   :  { %v4111_v30 = vpop.xlane.xlu0 %4110 }
0x46d0   :  { %v4112_v49 = vadd.f32 %v4111_v30, %v7790_v42 }
0x46d1   :  { %v4088_v54 = vpop.xlane.xlu1 %4087 }
0x46d2   :  { %4141 = vrot.lane.b32.xlu1 %v4112_v49, %s6803_s20  ;;  %v4089_v40 = vadd.f32 %v4088_v54, %v7828_v8 }
0x46d3   :  { %v4079_v59 = vpop.xlane.xlu0 %4078 }
0x46d4   :  { %v4129_v16 = vrot.slane %v4089_v40, 2  ;;  %v4080_v33 = vadd.f32 %v4079_v59, %v7790_v42 }
0x46d5   :  { %v4106_v43 = vpop.xlane.xlu1 %4105 }
0x46d6   :  { %v4131_v44 = vmax.f32 %v4080_v33, %v4129_v16  ;;  %v4107_v31 = vadd.f32 %v4106_v43, %v7832_v62 }
0x46d7   :  { %v4097_v57 = vpop.xlane.xlu0 %4096 }
0x46d8   :  { %v4098_v53 = vadd.f32 %v4097_v57, %v7821_v5  ;;  %v4137_v47 = vrot.slane %v4107_v31, 6 }
0x46d9   :  { %v4121_v21 = vpop.xlane.xlu1 %4120 }
0x46da   :  { %v4133_v34 = vrot.slane %v4098_v53, 4  ;;  %v4122_v1 = vadd.f32 %v4121_v21, %v7830_v12 }
0x46db   :  { %v4116_v36 = vpop.xlane.xlu0 %4115 }
0x46dc   :  { %v4135_v38 = vmax.f32 %v4131_v44, %v4133_v34  ;;  %v4117_v48 = vadd.f32 %v4116_v36, %v7834_v6  ;;  %v4150_v17 = vrot.slane %v4122_v1, 4 }
0x46de   :  { %v4139_v37 = vmax.f32 %v4135_v38, %v4137_v47  ;;  %v4146_v61 = vrot.slane %v4117_v48, 2 }
0x46df   :  { %v4126_v60 = vpop.xlane.xlu0 %4125 }
0x46e0   :  { %v4127_v28 = vadd.f32 %v4126_v60, %v7843_v29 }
0x46e2   :  { %v4154_v41 = vrot.slane %v4127_v28, 6 }
0x4744   :  { %v4142_v55 = vpop.permute.xlu1 %4141 }
0x4745   :  { %v4144_v18 = vmax.f32 %v4139_v37, %v4142_v55 }
0x4747   :  { %v4148_v51 = vmax.f32 %v4144_v18, %v4146_v61 }
0x4749   :  { %v4152_v4 = vmax.f32 %v4148_v51, %v4150_v17 }
0x474b   :  { %v4156_v63 = vmax.f32 %v4152_v4, %v4154_v41 }
0x474d   :  { %4176 = vrot.lane.b32.xlu0 %v4156_v63, %s6804_s6  ;;  %v4161_v9 = vrot.slane %v4156_v63, 6  ;;  %v4166_v32 = vrot.slane %v4156_v63, 4  ;;  %v4157_v59 = vsub.f32 %v4080_v33, %v4156_v63  ;;  %v4171_v57 = vrot.slane %v4156_v63, 2 }
0x474f   :  { %v4163_v23 = vsub.f32 %v4089_v40, %v4161_v9  ;;  %v4168_v54 = vsub.f32 %v4098_v53, %v4166_v32  ;;  %v4158_v16 = vmul.f32 1.442695, %v4157_v59  ;;  %v4173_v34 = vsub.f32 %v4107_v31, %v4171_v57 }
0x4750   :  { %v4182_v36 = vsub.f32 %v4117_v48, %v4161_v9  ;;  %v4185_v44 = vsub.f32 %v4122_v1, %v4166_v32  ;;  %v4188_v47 = vsub.f32 %v4127_v28, %v4171_v57 }
0x4751   :  { %v4164_v30 = vmul.f32 1.442695, %v4163_v23  ;;  %v4169_v43 = vmul.f32 1.442695, %v4168_v54 }
0x4752   :  { %v4183_v21 = vmul.f32 1.442695, %v4182_v36  ;;  %v4186_v60 = vmul.f32 1.442695, %v4185_v44  ;;  %v4189_v37 = vmul.f32 1.442695, %v4188_v47 }
0x47bf   :  { %v4177_v10 = vpop.permute.xlu0 %4176 }
0x47c0   :  { %v4179_v58 = vsub.f32 %v4112_v49, %v4177_v10  ;;  %v4174_v49 = vmul.f32 1.442695, %v4173_v34 }
0x47c2   :  { %v4180_v56 = vmul.f32 1.442695, %v4179_v58 }
0x47c4   :  { %6701 = vpow2.f32 %v4180_v56 }
0x47c5   :  { %6703 = vpow2.f32 %v4164_v30 }
0x47c6   :  { %6705 = vpow2.f32 %v4158_v16 }
0x47c7   :  { %6707 = vpow2.f32 %v4169_v43 }
0x47c8   :  { %6709 = vpow2.f32 %v4174_v49 }
0x47c9   :  { %6711 = vpow2.f32 %v4183_v21 }
0x47ca   :  { %6713 = vpow2.f32 %v4186_v60 }
0x47cb   :  { %6715 = vpow2.f32 %v4189_v37 }
0x47ce   :  { %v8269_v27 = vpop.eup %6701 }
0x47cf   :  { %4204 = vrot.lane.b32.xlu1 %v8269_v27, %s6803_s20  ;;  %v6704_v38 = vpop.eup %6703 }
0x47d0   :  { %v4192_v40 = vrot.slane %v6704_v38, 2  ;;  %v6706_v33 = vpop.eup %6705 }
0x47d1   :  { %v6708_v53 = vpop.eup %6707 }
0x47d2   :  { %v4194_v55 = vadd.f32 %v6706_v33, %v4192_v40  ;;  %v4196_v61 = vrot.slane %v6708_v53, 4  ;;  %v6710_v31 = vpop.eup %6709 }
0x47d3   :  { %v4200_v17 = vrot.slane %v6710_v31, 6  ;;  %v6712_v51 = vpop.eup %6711 }
0x47d4   :  { %v4198_v18 = vadd.f32 %v4196_v61, %v4194_v55  ;;  %v6714_v1 = vpop.eup %6713  ;;  %v4209_v63 = vrot.slane %v6712_v51, 2 }
0x47d5   :  { %v6716_v28 = vpop.eup %6715  ;;  %v4213_v58 = vrot.slane %v6714_v1, 4 }
0x47d6   :  { %v4202_v48 = vadd.f32 %v4200_v17, %v4198_v18  ;;  %v4217_v9 = vrot.slane %v6716_v28, 6 }
0x4841   :  { %v4205_v41 = vpop.permute.xlu1 %4204 }
0x4842   :  { %v4207_v4 = vadd.f32 %v4205_v41, %v4202_v48 }
0x4844   :  { %v4211_v10 = vadd.f32 %v4209_v63, %v4207_v4 }
0x4846   :  { %v4215_v56 = vadd.f32 %v4213_v58, %v4211_v10 }
0x4848   :  { %v4219_v23 = vadd.f32 %v4217_v9, %v4215_v56 }
0x484a   :  { %6717 = vrcp.f32 %v4219_v23 }
0x4854   :  { %v6718_v32 = vpop.eup %6717 }
0x4855   :  { %4268 = vrot.lane.b32.xlu1 %v6718_v32, %s6804_s6  ;;  %v4229_v30 = vrot.slane %v6718_v32, 6  ;;  %v4221_v54 = vmul.f32 %v6718_v32, %v6706_v33  ;;  %v4242_v57 = vrot.slane %v6718_v32, 4  ;;  %v4255_v16 = vrot.slane %v6718_v32, 2 }
0x4857   :  { %v4231_v59 = vmul.f32 %v6704_v38, %v4229_v30  ;;  %v4244_v43 = vmul.f32 %v6708_v53, %v4242_v57  ;;  %v4257_v34 = vmul.f32 %v6710_v31, %v4255_v16  ;;  %v4279_v49 = vmul.f32 %v6712_v51, %v4229_v30 }
0x4858   :  { %v4290_v36 = vmul.f32 %v6714_v1, %v4242_v57  ;;  %v4301_v38 = vmul.f32 %v6716_v28, %v4255_v16 }
0x4859   :  { %4234 = vperm.xlu0 %6412, %v4231_v59   ;;  %4224 = vperm.xlu1 %6408, %v4221_v54  }
0x485d   :  { %4247 = vperm.xlu0 %6412, %v4244_v43   ;;  %4260 = vperm.xlu1 %6408, %v4257_v34  }
0x4861   :  { %4282 = vperm.xlu1 %6408, %v4279_v49   ;;  %6413 = vset.pattern.permute.xlu0 %v6808_v11 }
0x4865   :  { %4293 = vperm.xlu1 %6408, %v4290_v36  }
0x48c7   :  { %v4269_v44 = vpop.permute.xlu1 %4268 }
0x48c8   :  { %v4271_v21 = vmul.f32 %v8269_v27, %v4269_v44 }
0x48ca   :  { %4274 = vperm.xlu0 %6413, %v4271_v21  }
0x48ce   :  { %6414 = vset.pattern.permute.xlu0 %v6805_v19 }
0x48cf   :  { %4304 = vperm.xlu0 %6414, %v4301_v38  }
0x48d8   :  { %v4235_v47 = vpop.permute.xlu0 %4234  ;;  %v4225_v60 = vpop.permute.xlu1 %4224 }
0x48d9   :  { %v4237_v33 = vmul.f32 %v4235_v47, %v7809_v25  ;;  %v4227_v31 = vmul.f32 %v4225_v60, %v7809_v25 }
0x48db   :  { %v4239_v55 = vrot.slane %v4237_v33, 2 }
0x48dc   :  { %v4248_v40 = vpop.permute.xlu0 %4247  ;;  %v4261_v37 = vpop.permute.xlu1 %4260 }
0x48dd   :  { %v4250_v53 = vmul.f32 %v4248_v40, %v7809_v25  ;;  %v4241_v17 = vadd.f32 %v4239_v55, %v4227_v31  ;;  %v4263_v27 = vmul.f32 %v4261_v37, %v7809_v25 }
0x48df   :  { %v4252_v18 = vrot.slane %v4250_v53, 4  ;;  %v4265_v1 = vrot.slane %v4263_v27, 6 }
0x48e0   :  { %v4283_v61 = vpop.permute.xlu1 %4282 }
0x48e1   :  { %v4254_v51 = vadd.f32 %v4252_v18, %v4241_v17  ;;  %v4285_v41 = vmul.f32 %v7805_v13, %v4283_v61 }
0x48e3   :  { %v4267_v63 = vadd.f32 %v4265_v1, %v4254_v51  ;;  %v4287_v58 = vrot.slane %v4285_v41, 2 }
0x48e4   :  { %v4294_v48 = vpop.permute.xlu1 %4293 }
0x48e5   :  { %v4296_v28 = vmul.f32 %v7805_v13, %v4294_v48  ;;  %v8324_v48 = vld [vmem:[%s8551_s13] ss:$0 sm:$0xff] }
0x48e7   :  { %v4298_v9 = vrot.slane %v4296_v28, 4 }
0x4949   :  { %v4275_v4 = vpop.permute.xlu0 %4274 }
0x494a   :  { %v4277_v10 = vmul.f32 %v7805_v13, %v4275_v4 }
0x494c   :  { %v4278_v56 = vadd.f32 %v4277_v10, %v4267_v63 }
0x494e   :  { %v4289_v23 = vadd.f32 %v4287_v58, %v4278_v56  ;;  %v4305_v32 = vpop.permute.xlu0 %4304 }
0x494f   :  { %v4307_v30 = vmul.f32 %v7805_v13, %v4305_v32 }
0x4950   :  { %v4300_v59 = vadd.f32 %v4298_v9, %v4289_v23 }
0x4951   :  { %v4309_v54 = vrot.slane %v4307_v30, 6 }
0x4953   :  { %v4311_v57 = vadd.f32 %v4309_v54, %v4300_v59 }
0x4955   :  { %v4384_v16 = vadd.f32 %v8218_v22, %v4311_v57 }
0x4957   :  { %v4385_v43 = vadd.f32 %v8182_v50, %v4384_v16 }
0x4959   :  { %v4386_v34 = vmul.f32 2.0, %v4385_v43 }
0x495b   :  { %v4387_v49 = vsel %vm6929_vm3, %v4386_v34, %v4385_v43 }
0x495c   :  { %v5639_v36 = vmul.f32 -1.442695, %v4387_v49 }
0x495e   :  { %6719 = vpow2.f32 %v5639_v36 }
0x4968   :  { %v6720_v44 = vpop.eup %6719 }
0x4969   :  { %v4391_v21 = vadd.f32 1.0, %v6720_v44 }
0x496b   :  { %6721 = vrcp.f32 %v4391_v21 }
0x4975   :  { %v6722_v38 = vpop.eup %6721 }
0x4976   :  { %v4394_v47 = vmul.f32 2.0, %v6722_v38 }
0x4978   :  { %v5640_v60 = vadd.f32 -1.0, %v4394_v47 }
0x497a   :  { %v4396_v40 = vsel %vm6929_vm3, %v5640_v60, %v6722_v38 }
0x497b   :  { %4399 = vrot.lane.b32.xlu1 %v4396_v40, %s6795_s0  ;;  %v4397_v33 = vmul.f32 %v4396_v40, %v8192_v45 }
0x49ed   :  { %v4400_v22 = vpop.permute.xlu1 %4399 }
0x49ee   :  { %v4402_v37 = vmul.f32 %v4400_v22, %v4396_v40 }
0x49f0   :  { %4404 = vrot.lane.b32.xlu1 %v4402_v37, %s6796_s4 }
0x4a62   :  { %v4405_v53 = vpop.permute.xlu1 %4404 }
0x4a63   :  { %v8294_v55 = vadd.f32 %v4405_v53, %v4397_v33 }
0x4a65   :  { %6723 = vtanh.f32 %v8294_v55 }
0x4a6f   :  { %v6724_v61 = vpop.eup %6723 }
0x4a70   :  { %4410 = vrot.lane.b32.xlu0 %v6724_v61, %s6795_s0 }
0x4a74   :  { %4418 = vrot.lane.b32.xlu0 %v8232_v46, %s6795_s0 }
0x4ae2   :  { %v4411_v31 = vpop.permute.xlu0 %4410 }
0x4ae3   :  { %v4413_v18 = vmul.f32 %v4411_v31, %v4396_v40 }
0x4ae5   :  { %4415 = vrot.lane.b32.xlu1 %v4413_v18, %s6796_s4 }
0x4ae6   :  { %v4419_v17 = vpop.permute.xlu0 %4418 }
0x4b57   :  { %v4416_v27 = vpop.permute.xlu1 %4415 }
0x4b58   :  { %v4421_v51 = vsel %vm250_vm5, %v4416_v27, %v4419_v17  ;;  %5936 = vmatmul.mubr.msk.f32.vlgmr.msra.gmra.mrb[30].mxu0 %vm250_vm5, %v4416_v27 }
0x4b59   :  { %5925 = vmatmul.mubr.msk.f32.vlgmr.msra.gmra.mrb[24].mxu1 %vm252_vm6, %v4421_v51  ;;  %6354 = vmatpush3.bf16.msra.mxu0 %v7953_v0 }
0x4b5a   :  { %6355 = vmatprep.subr.bf16.mxu0 %v6806_v24  ;;  %6366 = vmatpush3.bf16.msra.mxu1 %v7890_v15 }
0x4b5b   :  { %6367 = vmatprep.subr.bf16.mxu1 %v6806_v24  ;;  %5965 = vmatprep.mubr.msk.f32.mxu1 %vm6807_vm13, %v6794_v3 }
0x4b5c   :  { %5954 = vmatprep.mubr.msk.f32.mxu0 %vm6807_vm13, %v6794_v3 }
0x4b5d   :  { %6357 = vmatpush3.bf16.msra.mxu0 %v7959_v2 }
0x4b5e   :  { %6358 = vmatprep.subr.bf16.mxu0 %v6806_v24  ;;  %6369 = vmatpush3.bf16.msra.mxu1 %v7899_v35 }
0x4b5f   :  { %6370 = vmatprep.subr.bf16.mxu1 %v6806_v24 }
0x4b61   :  { %6360 = vmatpush3.bf16.msra.mxu0 %v7969_v14 }
0x4b62   :  { %6361 = vmatprep.subr.bf16.mxu0 %v6806_v24 }
0x4b65   :  { %6363 = vmatpush3.bf16.msra.mxu0 %v7980_v7 }
0x4c2b   :  { %v8319_v15 = vpop.f32.mrb[30].mxu0 }
0x4c2c   :  { %v4491_v45 = vpop.f32.mrb[24].mxu1  ;;  %v5937_v46 = vpop.f32.mrb[31].mxu0 }
0x4c2d   :  { %v4492_v1 = vadd.f32 %v8324_v48, %v4491_v45  ;;  %v5926_v35 = vpop.f32.mrb[25].mxu1 }
0x4c2f   :  { %v4495_v41 = vmul.f32 2.0, %v4492_v1 }
0x4c31   :  { %v4496_v4 = vsel %vm6929_vm3, %v4495_v41, %v4492_v1 }
0x4c32   :  { %v5642_v63 = vmul.f32 -1.442695, %v4496_v4 }
0x4c34   :  { %6725 = vpow2.f32 %v5642_v63 }
0x4c3e   :  { %v6726_v28 = vpop.eup %6725 }
0x4c3f   :  { %v4500_v10 = vadd.f32 1.0, %v6726_v28 }
0x4c41   :  { %6727 = vrcp.f32 %v4500_v10 }
0x4c4b   :  { %v6728_v58 = vpop.eup %6727 }
0x4c4c   :  { %v4503_v56 = vmul.f32 2.0, %v6728_v58 }
0x4c4e   :  { %v5643_v9 = vadd.f32 -1.0, %v4503_v56 }
0x4c50   :  { %v4505_v23 = vsel %vm6929_vm3, %v5643_v9, %v6728_v58 }
0x4c51   :  { %4508 = vrot.lane.b32.xlu1 %v4505_v23, %s6795_s0  ;;  %v4506_v59 = vmul.f32 %v4505_v23, %v8228_v39 }
0x4cc3   :  { %v4509_v32 = vpop.permute.xlu1 %4508 }
0x4cc4   :  { %v4511_v30 = vmul.f32 %v4509_v32, %v4505_v23 }
0x4cc6   :  { %4513 = vrot.lane.b32.xlu0 %v4511_v30, %s6796_s4 }
0x4d38   :  { %v4514_v54 = vpop.permute.xlu0 %4513 }
0x4d39   :  { %v8334_v57 = vadd.f32 %v4514_v54, %v4506_v59 }
0x4d3b   :  { %6729 = vtanh.f32 %v8334_v57 }
0x4d45   :  { %v6730_v16 = vpop.eup %6729 }
0x4d46   :  { %4519 = vrot.lane.b32.xlu1 %v6730_v16, %s6795_s0 }
0x4db8   :  { %v4520_v43 = vpop.permute.xlu1 %4519 }
0x4db9   :  { %v8338_v34 = vmul.f32 %v4520_v43, %v4505_v23 }
0x4dbb   :  { %4524 = vrot.lane.b32.xlu0 %v8338_v34, %s6796_s4  ;;  %v4533_v49 = vrot.slane %v8338_v34, 6  ;;  %v4542_v39 = vrot.slane %v8338_v34, 4  ;;  %v4551_v36 = vrot.slane %v8338_v34, 2 }
0x4dbd   :  { %4534 = vrot.lane.b32.xlu1 %v4533_v49, %s6796_s4 }
0x4dbf   :  { %4543 = vrot.lane.b32.xlu0 %v4542_v39, %s6796_s4 }
0x4dc1   :  { %4552 = vrot.lane.b32.xlu1 %v4551_v36, %s6796_s4 }
0x4e2d   :  { %v4525_v44 = vpop.permute.xlu0 %4524 }
0x4e2e   :  { %4527 = vst.msk [vmem:[#allocation3 + $0x6] sm:$0x3] %vm238_vm4, %v4525_v44  ;;  %v4560_v21 = vmul.f32 %v7803_v26, %v4525_v44  ;;  %v4528_v47 = vmul.f32 %v4525_v44, %v7807_v52 }
0x4e2f   :  { %v4535_v38 = vpop.permute.xlu1 %4534 }
0x4e30   :  { %v4537_v60 = vmul.f32 %v4535_v38, %v7807_v52  ;;  %v4561_v40 = vsel %vm238_vm4, %v4560_v21, 0.0  ;;  %v4529_v31 = vsel %vm238_vm4, %v4528_v47, 0.0  ;;  %v4565_v27 = vmul.f32 %v7803_v26, %v4535_v38 }
0x4e31   :  { %4562 = vadd.xlane.f32.xlu0 %v4561_v40  ;;  %v4544_v22 = vpop.permute.xlu0 %4543 }
0x4e32   :  { %v4538_v37 = vsel %vm2708_vm11, %v4537_v60, 0.0  ;;  %v4546_v53 = vmul.f32 %v4544_v22, %v7807_v52  ;;  %v4570_v18 = vmul.f32 %v7803_v26, %v4544_v22  ;;  %v4566_v1 = vsel %vm2708_vm11, %v4565_v27, 0.0 }
0x4e33   :  { %4539 = vadd.xlane.f32.xlu1 %v4538_v37  ;;  %v4553_v33 = vpop.permute.xlu1 %4552 }
0x4e34   :  { %v4555_v61 = vmul.f32 %v4553_v33, %v7807_v52  ;;  %v4547_v51 = vsel %vm2718_vm10, %v4546_v53, 0.0  ;;  %v4571_v45 = vsel %vm2718_vm10, %v4570_v18, 0.0  ;;  %v4575_v46 = vmul.f32 %v7803_v26, %v4553_v33 }
0x4e35   :  { %4530 = vadd.xlane.f32.xlu0 %v4529_v31 }
0x4e36   :  { %v4556_v17 = vsel %vm2727_vm12, %v4555_v61, 0.0  ;;  %v4576_v35 = vsel %vm2727_vm12, %v4575_v46, 0.0 }
0x4e37   :  { %4557 = vadd.xlane.f32.xlu1 %v4556_v17 }
0x4e39   :  { %4548 = vadd.xlane.f32.xlu0 %v4547_v51 }
0x4e3b   :  { %4572 = vadd.xlane.f32.xlu1 %v4571_v45 }
0x4e3d   :  { %4567 = vadd.xlane.f32.xlu0 %v4566_v1 }
0x4e41   :  { %4577 = vadd.xlane.f32.xlu0 %v4576_v35 }
0x4ebe   :  { %v4563_v41 = vpop.xlane.xlu0 %4562 }
0x4ebf   :  { %v4564_v4 = vadd.f32 %v4563_v41, %v7790_v42 }
0x4ec0   :  { %v4540_v28 = vpop.xlane.xlu1 %4539 }
0x4ec1   :  { %4593 = vrot.lane.b32.xlu1 %v4564_v4, %s6803_s20  ;;  %v4541_v58 = vadd.f32 %v4540_v28, %v7828_v8 }
0x4ec2   :  { %v4531_v63 = vpop.xlane.xlu0 %4530 }
0x4ec3   :  { %v4581_v9 = vrot.slane %v4541_v58, 2  ;;  %v4532_v23 = vadd.f32 %v4531_v63, %v7790_v42 }
0x4ec4   :  { %v4558_v32 = vpop.xlane.xlu1 %4557 }
0x4ec5   :  { %v4583_v54 = vmax.f32 %v4532_v23, %v4581_v9  ;;  %v4559_v16 = vadd.f32 %v4558_v32, %v7832_v62 }
0x4ec6   :  { %v4549_v10 = vpop.xlane.xlu0 %4548 }
0x4ec7   :  { %v4550_v56 = vadd.f32 %v4549_v10, %v7821_v5  ;;  %v4589_v39 = vrot.slane %v4559_v16, 6 }
0x4ec8   :  { %v4573_v49 = vpop.xlane.xlu1 %4572 }
0x4ec9   :  { %v4585_v30 = vrot.slane %v4550_v56, 4  ;;  %v4574_v21 = vadd.f32 %v4573_v49, %v7830_v12 }
0x4eca   :  { %v4568_v59 = vpop.xlane.xlu0 %4567 }
0x4ecb   :  { %v4587_v43 = vmax.f32 %v4583_v54, %v4585_v30  ;;  %v4569_v36 = vadd.f32 %v4568_v59, %v7834_v6  ;;  %v4602_v37 = vrot.slane %v4574_v21, 4 }
0x4ecd   :  { %v4591_v38 = vmax.f32 %v4587_v43, %v4589_v39  ;;  %v4598_v60 = vrot.slane %v4569_v36, 2 }
0x4ece   :  { %v4578_v44 = vpop.xlane.xlu0 %4577 }
0x4ecf   :  { %v4579_v40 = vadd.f32 %v4578_v44, %v7843_v29 }
0x4ed1   :  { %v4606_v53 = vrot.slane %v4579_v40, 6 }
0x4f33   :  { %v4594_v47 = vpop.permute.xlu1 %4593 }
0x4f34   :  { %v4596_v22 = vmax.f32 %v4591_v38, %v4594_v47 }
0x4f36   :  { %v4600_v33 = vmax.f32 %v4596_v22, %v4598_v60 }
0x4f38   :  { %v4604_v61 = vmax.f32 %v4600_v33, %v4602_v37 }
0x4f3a   :  { %v4608_v31 = vmax.f32 %v4604_v61, %v4606_v53 }
0x4f3c   :  { %4628 = vrot.lane.b32.xlu0 %v4608_v31, %s6804_s6  ;;  %v4613_v45 = vrot.slane %v4608_v31, 6  ;;  %v4618_v1 = vrot.slane %v4608_v31, 4  ;;  %v4609_v41 = vsub.f32 %v4532_v23, %v4608_v31  ;;  %v4623_v28 = vrot.slane %v4608_v31, 2 }
0x4f3e   :  { %v4615_v46 = vsub.f32 %v4541_v58, %v4613_v45  ;;  %v4620_v63 = vsub.f32 %v4550_v56, %v4618_v1  ;;  %v4610_v10 = vmul.f32 1.442695, %v4609_v41  ;;  %v4625_v32 = vsub.f32 %v4559_v16, %v4623_v28 }
0x4f3f   :  { %v4634_v30 = vsub.f32 %v4569_v36, %v4613_v45  ;;  %v4637_v59 = vsub.f32 %v4574_v21, %v4618_v1  ;;  %v4640_v49 = vsub.f32 %v4579_v40, %v4623_v28 }
0x4f40   :  { %v4616_v35 = vmul.f32 1.442695, %v4615_v46  ;;  %v4621_v9 = vmul.f32 1.442695, %v4620_v63 }
0x4f41   :  { %v4635_v43 = vmul.f32 1.442695, %v4634_v30  ;;  %v4638_v39 = vmul.f32 1.442695, %v4637_v59  ;;  %v4641_v44 = vmul.f32 1.442695, %v4640_v49 }
0x4fae   :  { %v4629_v18 = vpop.permute.xlu0 %4628 }
0x4faf   :  { %v4631_v17 = vsub.f32 %v4564_v4, %v4629_v18  ;;  %v4626_v4 = vmul.f32 1.442695, %v4625_v32 }
0x4fb1   :  { %v4632_v27 = vmul.f32 1.442695, %v4631_v17 }
0x4fb3   :  { %6731 = vpow2.f32 %v4632_v27 }
0x4fb4   :  { %6733 = vpow2.f32 %v4616_v35 }
0x4fb5   :  { %6735 = vpow2.f32 %v4610_v10 }
0x4fb6   :  { %6737 = vpow2.f32 %v4621_v9 }
0x4fb7   :  { %6739 = vpow2.f32 %v4626_v4 }
0x4fb8   :  { %6741 = vpow2.f32 %v4635_v43 }
0x4fb9   :  { %6743 = vpow2.f32 %v4638_v39 }
0x4fba   :  { %6745 = vpow2.f32 %v4641_v44 }
0x4fbd   :  { %v8375_v51 = vpop.eup %6731 }
0x4fbe   :  { %4656 = vrot.lane.b32.xlu1 %v8375_v51, %s6803_s20  ;;  %v6734_v54 = vpop.eup %6733 }
0x4fbf   :  { %v4644_v58 = vrot.slane %v6734_v54, 2  ;;  %v6736_v23 = vpop.eup %6735 }
0x4fc0   :  { %v6738_v56 = vpop.eup %6737 }
0x4fc1   :  { %v4646_v38 = vadd.f32 %v6736_v23, %v4644_v58  ;;  %v4648_v47 = vrot.slane %v6738_v56, 4  ;;  %v6740_v16 = vpop.eup %6739 }
0x4fc2   :  { %v4652_v22 = vrot.slane %v6740_v16, 6  ;;  %v6742_v37 = vpop.eup %6741 }
0x4fc3   :  { %v4650_v60 = vadd.f32 %v4648_v47, %v4646_v38  ;;  %v6744_v21 = vpop.eup %6743  ;;  %v4661_v61 = vrot.slane %v6742_v37, 2 }
0x4fc4   :  { %v6746_v40 = vpop.eup %6745  ;;  %v4665_v18 = vrot.slane %v6744_v21, 4 }
0x4fc5   :  { %v4654_v36 = vadd.f32 %v4652_v22, %v4650_v60  ;;  %v4669_v27 = vrot.slane %v6746_v40, 6 }
0x5030   :  { %v4657_v33 = vpop.permute.xlu1 %4656 }
0x5031   :  { %v4659_v53 = vadd.f32 %v4657_v33, %v4654_v36 }
0x5033   :  { %v4663_v31 = vadd.f32 %v4661_v61, %v4659_v53 }
0x5035   :  { %v4667_v17 = vadd.f32 %v4665_v18, %v4663_v31 }
0x5037   :  { %v4671_v45 = vadd.f32 %v4669_v27, %v4667_v17 }
0x5039   :  { %6747 = vrcp.f32 %v4671_v45 }
0x5043   :  { %v6748_v46 = vpop.eup %6747 }
0x5044   :  { %4720 = vrot.lane.b32.xlu1 %v6748_v46, %s6804_s6  ;;  %v4681_v1 = vrot.slane %v6748_v46, 6  ;;  %v4673_v41 = vmul.f32 %v6748_v46, %v6736_v23  ;;  %v4694_v63 = vrot.slane %v6748_v46, 4  ;;  %v4707_v28 = vrot.slane %v6748_v46, 2 }
0x5046   :  { %v4683_v35 = vmul.f32 %v6734_v54, %v4681_v1  ;;  %v4696_v10 = vmul.f32 %v6738_v56, %v4694_v63  ;;  %v4709_v9 = vmul.f32 %v6740_v16, %v4707_v28  ;;  %v4731_v32 = vmul.f32 %v6742_v37, %v4681_v1 }
0x5047   :  { %v4742_v4 = vmul.f32 %v6744_v21, %v4694_v63  ;;  %v4753_v54 = vmul.f32 %v6746_v40, %v4707_v28 }
0x5048   :  { %4686 = vperm.xlu0 %6414, %v4683_v35   ;;  %4676 = vperm.xlu1 %6408, %v4673_v41  }
0x504c   :  { %4699 = vperm.xlu0 %6414, %v4696_v10   ;;  %4712 = vperm.xlu1 %6408, %v4709_v9  }
0x5050   :  { %4734 = vperm.xlu1 %6408, %v4731_v32   ;;  %6415 = vset.pattern.permute.xlu0 %v6808_v11 }
0x5054   :  { %4745 = vperm.xlu1 %6408, %v4742_v4  }
0x50b6   :  { %v4721_v30 = vpop.permute.xlu1 %4720 }
0x50b7   :  { %v4723_v59 = vmul.f32 %v8375_v51, %v4721_v30 }
0x50b9   :  { %4726 = vperm.xlu0 %6415, %v4723_v59  }
0x50bd   :  { %6416 = vset.pattern.permute.xlu0 %v6805_v19 }
0x50be   :  { %4756 = vperm.xlu0 %6416, %v4753_v54  }
0x50c7   :  { %v4687_v43 = vpop.permute.xlu0 %4686  ;;  %v4677_v49 = vpop.permute.xlu1 %4676 }
0x50c8   :  { %v4689_v44 = vmul.f32 %v4687_v43, %v7809_v25  ;;  %v4679_v47 = vmul.f32 %v4677_v49, %v7809_v25 }
0x50ca   :  { %v4691_v56 = vrot.slane %v4689_v44, 2 }
0x50cb   :  { %v4700_v39 = vpop.permute.xlu0 %4699  ;;  %v4713_v58 = vpop.permute.xlu1 %4712 }
0x50cc   :  { %v4702_v23 = vmul.f32 %v4700_v39, %v7809_v25  ;;  %v4693_v60 = vadd.f32 %v4691_v56, %v4679_v47  ;;  %v4715_v51 = vmul.f32 %v4713_v58, %v7809_v25 }
0x50ce   :  { %v4704_v16 = vrot.slane %v4702_v23, 4  ;;  %v4717_v36 = vrot.slane %v4715_v51, 6 }
0x50cf   :  { %v4735_v38 = vpop.permute.xlu1 %4734 }
0x50d0   :  { %v4706_v22 = vadd.f32 %v4704_v16, %v4693_v60  ;;  %v4737_v21 = vmul.f32 %v7805_v13, %v4735_v38 }
0x50d2   :  { %v4719_v53 = vadd.f32 %v4717_v36, %v4706_v22  ;;  %v4739_v31 = vrot.slane %v4737_v21, 2 }
0x50d3   :  { %v4746_v37 = vpop.permute.xlu1 %4745 }
0x50d4   :  { %v4748_v61 = vmul.f32 %v7805_v13, %v4746_v37 }
0x50d6   :  { %v4750_v17 = vrot.slane %v4748_v61, 4 }
0x5138   :  { %v4727_v33 = vpop.permute.xlu0 %4726 }
0x5139   :  { %v4729_v40 = vmul.f32 %v7805_v13, %v4727_v33 }
0x513b   :  { %v4730_v18 = vadd.f32 %v4729_v40, %v4719_v53 }
0x513d   :  { %v4741_v27 = vadd.f32 %v4739_v31, %v4730_v18  ;;  %v4757_v45 = vpop.permute.xlu0 %4756 }
0x513e   :  { %v4759_v46 = vmul.f32 %v7805_v13, %v4757_v45 }
0x513f   :  { %v4752_v1 = vadd.f32 %v4750_v17, %v4741_v27 }
0x5140   :  { %v4761_v35 = vrot.slane %v4759_v46, 6 }
0x5142   :  { %v4763_v41 = vadd.f32 %v4761_v35, %v4752_v1 }
0x5144   :  { %v4836_v63 = vadd.f32 %v8319_v15, %v4763_v41 }
0x5146   :  { %v4837_v28 = vadd.f32 %v8182_v50, %v4836_v63 }
0x5148   :  { %v4838_v10 = vmul.f32 2.0, %v4837_v28 }
0x514a   :  { %v4839_v9 = vsel %vm6929_vm3, %v4838_v10, %v4837_v28 }
0x514b   :  { %v5645_v32 = vmul.f32 -1.442695, %v4839_v9 }
0x514d   :  { %6749 = vpow2.f32 %v5645_v32 }
0x5157   :  { %v6750_v4 = vpop.eup %6749 }
0x5158   :  { %v4843_v30 = vadd.f32 1.0, %v6750_v4 }
0x515a   :  { %6751 = vrcp.f32 %v4843_v30 }
0x5164   :  { %v6752_v59 = vpop.eup %6751 }
0x5165   :  { %v4846_v54 = vmul.f32 2.0, %v6752_v59 }
0x5167   :  { %v5646_v43 = vadd.f32 -1.0, %v4846_v54 }
0x5169   :  { %v4848_v49 = vsel %vm6929_vm3, %v5646_v43, %v6752_v59 }
0x516a   :  { %4851 = vrot.lane.b32.xlu1 %v4848_v49, %s6795_s0  ;;  %v4849_v50 = vmul.f32 %v4848_v49, %v8294_v55  ;;  %v5432_v55 = vld [vmem:[#allocation3] sm:$0xff] }
0x51dc   :  { %v4852_v15 = vpop.permute.xlu1 %4851 }
0x51dd   :  { %v4854_v39 = vmul.f32 %v4852_v15, %v4848_v49 }
0x51df   :  { %4856 = vrot.lane.b32.xlu1 %v4854_v39, %s6796_s4 }
0x5251   :  { %v4857_v58 = vpop.permute.xlu1 %4856 }
0x5252   :  { %v8400_v44 = vadd.f32 %v4857_v58, %v4849_v50 }
0x5254   :  { %6753 = vtanh.f32 %v8400_v44 }
0x525e   :  { %v6754_v23 = vpop.eup %6753 }
0x525f   :  { %4862 = vrot.lane.b32.xlu0 %v6754_v23, %s6795_s0 }
0x5263   :  { %4870 = vrot.lane.b32.xlu0 %v8338_v34, %s6795_s0 }
0x52d1   :  { %v4863_v56 = vpop.permute.xlu0 %4862 }
0x52d2   :  { %v4865_v38 = vmul.f32 %v4863_v56, %v4848_v49 }
0x52d4   :  { %4867 = vrot.lane.b32.xlu1 %v4865_v38, %s6796_s4 }
0x52d5   :  { %v4871_v47 = vpop.permute.xlu0 %4870 }
0x5346   :  { %v4868_v16 = vpop.permute.xlu1 %4867 }
0x5347   :  { %v4873_v60 = vsel %vm250_vm5, %v4868_v16, %v4871_v47  ;;  %5966 = vmatmul.mubr.msk.f32.vlgmr.msra.gmra.mrb[26].mxu1 %vm250_vm5, %v4868_v16 }
0x5348   :  { %5955 = vmatmul.mubr.msk.f32.vlgmr.msra.gmra.mrb[32].mxu0 %vm252_vm6, %v4873_v60  ;;  %6372 = vmatpush3.bf16.msra.mxu1 %v7953_v0 }
0x5349   :  { %5995 = vmatprep.mubr.msk.f32.mxu0 %vm250_vm5, %v5432_v55  ;;  %6373 = vmatprep.subr.bf16.mxu1 %v6806_v24 }
0x534a   :  { %5984 = vmatprep.mubr.msk.f32.mxu1 %vm6807_vm13, %v6794_v3 }
0x534c   :  { %6375 = vmatpush3.bf16.msra.mxu1 %v7959_v2 }
0x534d   :  { %6376 = vmatprep.subr.bf16.mxu1 %v6806_v24 }
0x5350   :  { %6378 = vmatpush3.bf16.msra.mxu1 %v7969_v14 }
0x5351   :  { %6379 = vmatprep.subr.bf16.mxu1 %v6806_v24 }
0x5354   :  { %6381 = vmatpush3.bf16.msra.mxu1 %v7980_v7 }
0x541a   :  { %v8420_v34 = vpop.f32.mrb[26].mxu1 }
0x541b   :  { %v4943_v0 = vpop.f32.mrb[32].mxu0  ;;  %v5967_v51 = vpop.f32.mrb[27].mxu1 }
0x541c   :  { %v4944_v22 = vadd.f32 %v8324_v48, %v4943_v0  ;;  %v5956_v37 = vpop.f32.mrb[33].mxu0 }
0x541e   :  { %v4947_v36 = vmul.f32 2.0, %v4944_v22 }
0x5420   :  { %v4948_v3 = vsel %vm6929_vm3, %v4947_v36, %v4944_v22 }
0x5421   :  { %v5648_v2 = vmul.f32 -1.442695, %v4948_v3 }
0x5423   :  { %6755 = vpow2.f32 %v5648_v2 }
0x542d   :  { %v6756_v21 = vpop.eup %6755 }
0x542e   :  { %v4952_v33 = vadd.f32 1.0, %v6756_v21 }
0x5430   :  { %6757 = vrcp.f32 %v4952_v33 }
0x543a   :  { %v6758_v14 = vpop.eup %6757 }
0x543b   :  { %v4955_v24 = vmul.f32 2.0, %v6758_v14 }
0x543d   :  { %v5649_v53 = vadd.f32 -1.0, %v4955_v24 }
0x543f   :  { %v4957_v7 = vsel %vm6929_vm3, %v5649_v53, %v6758_v14 }
0x5440   :  { %4960 = vrot.lane.b32.xlu1 %v4957_v7, %s6795_s0  ;;  %v4958_v31 = vmul.f32 %v4957_v7, %v8334_v57 }
0x54b2   :  { %v4961_v61 = vpop.permute.xlu1 %4960 }
0x54b3   :  { %v4963_v40 = vmul.f32 %v4961_v61, %v4957_v7 }
0x54b5   :  { %4965 = vrot.lane.b32.xlu0 %v4963_v40, %s6796_s4 }
0x5527   :  { %v4966_v18 = vpop.permute.xlu0 %4965 }
0x5528   :  { %v8430_v17 = vadd.f32 %v4966_v18, %v4958_v31 }
0x552a   :  { %6759 = vtanh.f32 %v8430_v17 }
0x5534   :  { %v6760_v27 = vpop.eup %6759 }
0x5535   :  { %4971 = vrot.lane.b32.xlu1 %v6760_v27, %s6795_s0 }
0x55a7   :  { %v4972_v45 = vpop.permute.xlu1 %4971 }
0x55a8   :  { %v8434_v46 = vmul.f32 %v4972_v45, %v4957_v7 }
0x55aa   :  { %4976 = vrot.lane.b32.xlu0 %v8434_v46, %s6796_s4  ;;  %v4985_v1 = vrot.slane %v8434_v46, 6  ;;  %v4994_v57 = vrot.slane %v8434_v46, 4  ;;  %v5003_v35 = vrot.slane %v8434_v46, 2 }
0x55ac   :  { %4986 = vrot.lane.b32.xlu1 %v4985_v1, %s6796_s4 }
0x55ae   :  { %4995 = vrot.lane.b32.xlu0 %v4994_v57, %s6796_s4 }
0x55b0   :  { %5004 = vrot.lane.b32.xlu1 %v5003_v35, %s6796_s4 }
0x561c   :  { %v4977_v41 = vpop.permute.xlu0 %4976 }
0x561d   :  { %4979 = vst.msk [vmem:[#allocation3 + $0x8] sm:$0x3] %vm238_vm4, %v4977_v41  ;;  %v5012_v63 = vmul.f32 %v7803_v26, %v4977_v41  ;;  %v4980_v10 = vmul.f32 %v4977_v41, %v7807_v52 }
0x561e   :  { %v4987_v28 = vpop.permute.xlu1 %4986 }
0x561f   :  { %v4989_v9 = vmul.f32 %v4987_v28, %v7807_v52  ;;  %v5013_v32 = vsel %vm238_vm4, %v5012_v63, 0.0  ;;  %v4981_v49 = vsel %vm238_vm4, %v4980_v10, 0.0  ;;  %v5017_v50 = vmul.f32 %v7803_v26, %v4987_v28 }
0x5620   :  { %5014 = vadd.xlane.f32.xlu0 %v5013_v32  ;;  %v4996_v4 = vpop.permute.xlu0 %4995 }
0x5621   :  { %v4990_v30 = vsel %vm2708_vm11, %v4989_v9, 0.0  ;;  %v4998_v54 = vmul.f32 %v4996_v4, %v7807_v52  ;;  %v5022_v15 = vmul.f32 %v7803_v26, %v4996_v4 }
0x5622   :  { %4991 = vadd.xlane.f32.xlu1 %v4990_v30  ;;  %v5005_v59 = vpop.permute.xlu1 %5004 }
0x5623   :  { %v5007_v43 = vmul.f32 %v5005_v59, %v7807_v52  ;;  %v4999_v58 = vsel %vm2718_vm10, %v4998_v54, 0.0  ;;  %v5023_v23 = vsel %vm2718_vm10, %v5022_v15, 0.0  ;;  %v5027_v56 = vmul.f32 %v7803_v26, %v5005_v59 }
0x5624   :  { %4982 = vadd.xlane.f32.xlu0 %v4981_v49  ;;  %v5018_v52 = vsel %vm2708_vm11, %v5017_v50, 0.0 }
0x5625   :  { %v5008_v39 = vsel %vm2727_vm12, %v5007_v43, 0.0  ;;  %v5028_v38 = vsel %vm2727_vm12, %v5027_v56, 0.0 }
0x5626   :  { %5009 = vadd.xlane.f32.xlu1 %v5008_v39 }
0x5628   :  { %5000 = vadd.xlane.f32.xlu0 %v4999_v58 }
0x562a   :  { %5024 = vadd.xlane.f32.xlu1 %v5023_v23 }
0x562c   :  { %5019 = vadd.xlane.f32.xlu0 %v5018_v52 }
0x5630   :  { %5029 = vadd.xlane.f32.xlu0 %v5028_v38 }
0x56ad   :  { %v5015_v47 = vpop.xlane.xlu0 %5014 }
0x56ae   :  { %v5016_v16 = vadd.f32 %v5015_v47, %v7790_v42 }
0x56af   :  { %v4992_v55 = vpop.xlane.xlu1 %4991 }
0x56b0   :  { %5045 = vrot.lane.b32.xlu1 %v5016_v16, %s6803_s20  ;;  %v4993_v51 = vadd.f32 %v4992_v55, %v7828_v8 }
0x56b1   :  { %v4983_v60 = vpop.xlane.xlu0 %4982 }
0x56b2   :  { %v5033_v37 = vrot.slane %v4993_v51, 2  ;;  %v4984_v26 = vadd.f32 %v4983_v60, %v7790_v42 }
0x56b3   :  { %v5010_v36 = vpop.xlane.xlu1 %5009 }
0x56b4   :  { %v5035_v21 = vmax.f32 %v4984_v26, %v5033_v37  ;;  %v5011_v33 = vadd.f32 %v5010_v36, %v7832_v62 }
0x56b5   :  { %v5001_v0 = vpop.xlane.xlu0 %5000 }
0x56b6   :  { %v5002_v22 = vadd.f32 %v5001_v0, %v7821_v5  ;;  %v5041_v53 = vrot.slane %v5011_v33, 6 }
0x56b7   :  { %v5025_v24 = vpop.xlane.xlu1 %5024 }
0x56b8   :  { %v5037_v3 = vrot.slane %v5002_v22, 4  ;;  %v5026_v40 = vadd.f32 %v5025_v24, %v7830_v12 }
0x56b9   :  { %v5020_v2 = vpop.xlane.xlu0 %5019 }
0x56ba   :  { %v5039_v14 = vmax.f32 %v5035_v21, %v5037_v3  ;;  %v5021_v7 = vadd.f32 %v5020_v2, %v7834_v6  ;;  %v5054_v27 = vrot.slane %v5026_v40, 4 }
0x56bc   :  { %v5043_v8 = vmax.f32 %v5039_v14, %v5041_v53  ;;  %v5050_v5 = vrot.slane %v5021_v7, 2 }
0x56bd   :  { %v5030_v61 = vpop.xlane.xlu0 %5029 }
0x56be   :  { %v5031_v18 = vadd.f32 %v5030_v61, %v7843_v29 }
0x56c0   :  { %v5058_v1 = vrot.slane %v5031_v18, 6 }
0x5722   :  { %v5046_v31 = vpop.permute.xlu1 %5045 }
0x5723   :  { %v5048_v42 = vmax.f32 %v5043_v8, %v5046_v31 }
0x5725   :  { %v5052_v45 = vmax.f32 %v5048_v42, %v5050_v5 }
0x5727   :  { %v5056_v57 = vmax.f32 %v5052_v45, %v5054_v27 }
0x5729   :  { %v5060_v35 = vmax.f32 %v5056_v57, %v5058_v1 }
0x572b   :  { %5080 = vrot.lane.b32.xlu0 %v5060_v35, %s6804_s6  ;;  %v5065_v12 = vrot.slane %v5060_v35, 6  ;;  %v5070_v29 = vrot.slane %v5060_v35, 4  ;;  %v5061_v9 = vsub.f32 %v4984_v26, %v5060_v35  ;;  %v5075_v4 = vrot.slane %v5060_v35, 2 }
0x572d   :  { %v5067_v28 = vsub.f32 %v4993_v51, %v5065_v12  ;;  %v5072_v32 = vsub.f32 %v5002_v22, %v5070_v29  ;;  %v5062_v30 = vmul.f32 1.442695, %v5061_v9  ;;  %v5077_v54 = vsub.f32 %v5011_v33, %v5075_v4 }
0x572e   :  { %v5086_v49 = vsub.f32 %v5021_v7, %v5065_v12  ;;  %v5089_v15 = vsub.f32 %v5026_v40, %v5070_v29  ;;  %v5092_v58 = vsub.f32 %v5031_v18, %v5075_v4 }
0x572f   :  { %v5068_v10 = vmul.f32 1.442695, %v5067_v28  ;;  %v5073_v59 = vmul.f32 1.442695, %v5072_v32  ;;  %v5078_v43 = vmul.f32 1.442695, %v5077_v54 }
0x5730   :  { %v5087_v50 = vmul.f32 1.442695, %v5086_v49  ;;  %v5090_v23 = vmul.f32 1.442695, %v5089_v15  ;;  %v5093_v52 = vmul.f32 1.442695, %v5092_v58 }
0x579d   :  { %v5081_v62 = vpop.permute.xlu0 %5080 }
0x579e   :  { %v5083_v41 = vsub.f32 %v5016_v16, %v5081_v62 }
0x57a0   :  { %v5084_v63 = vmul.f32 1.442695, %v5083_v41 }
0x57a2   :  { %6761 = vpow2.f32 %v5084_v63 }
0x57a3   :  { %6763 = vpow2.f32 %v5068_v10 }
0x57a4   :  { %6765 = vpow2.f32 %v5062_v30 }
0x57a5   :  { %6767 = vpow2.f32 %v5073_v59 }
0x57a6   :  { %6769 = vpow2.f32 %v5078_v43 }
0x57a7   :  { %6771 = vpow2.f32 %v5087_v50 }
0x57a8   :  { %6773 = vpow2.f32 %v5090_v23 }
0x57a9   :  { %6775 = vpow2.f32 %v5093_v52 }
0x57ac   :  { %v8471_v6 = vpop.eup %6761 }
0x57ad   :  { %5108 = vrot.lane.b32.xlu1 %v8471_v6, %s6803_s20  ;;  %v6764_v39 = vpop.eup %6763 }
0x57ae   :  { %v5096_v56 = vrot.slane %v6764_v39, 2  ;;  %v6766_v38 = vpop.eup %6765 }
0x57af   :  { %v6768_v47 = vpop.eup %6767 }
0x57b0   :  { %v5098_v16 = vadd.f32 %v6766_v38, %v5096_v56  ;;  %v5100_v60 = vrot.slane %v6768_v47, 4  ;;  %v6770_v55 = vpop.eup %6769 }
0x57b1   :  { %v5104_v51 = vrot.slane %v6770_v55, 6  ;;  %v6772_v22 = vpop.eup %6771 }
0x57b2   :  { %v5102_v0 = vadd.f32 %v5100_v60, %v5098_v16  ;;  %v6774_v26 = vpop.eup %6773  ;;  %v5113_v2 = vrot.slane %v6772_v22, 2 }
0x57b3   :  { %v6776_v21 = vpop.eup %6775  ;;  %v5117_v14 = vrot.slane %v6774_v26, 4 }
0x57b4   :  { %v5106_v37 = vadd.f32 %v5104_v51, %v5102_v0  ;;  %v5121_v53 = vrot.slane %v6776_v21, 6  ;;  %v6793_v0 = vld [vmem:[%s8549_s11] ss:$0 sm:$0xff] }
0x581f   :  { %v5109_v36 = vpop.permute.xlu1 %5108 }
0x5820   :  { %v5111_v3 = vadd.f32 %v5109_v36, %v5106_v37 }
0x5822   :  { %v5115_v33 = vadd.f32 %v5113_v2, %v5111_v3 }
0x5824   :  { %v5119_v24 = vadd.f32 %v5117_v14, %v5115_v33 }
0x5826   :  { %v5123_v7 = vadd.f32 %v5121_v53, %v5119_v24 }
0x5828   :  { %6777 = vrcp.f32 %v5123_v7 }
0x5832   :  { %v6778_v61 = vpop.eup %6777 }
0x5833   :  { %5172 = vrot.lane.b32.xlu1 %v6778_v61, %s6804_s6  ;;  %v5133_v40 = vrot.slane %v6778_v61, 6  ;;  %v5125_v31 = vmul.f32 %v6778_v61, %v6766_v38  ;;  %v5146_v5 = vrot.slane %v6778_v61, 4  ;;  %v5159_v18 = vrot.slane %v6778_v61, 2 }
0x5835   :  { %v5135_v8 = vmul.f32 %v6764_v39, %v5133_v40  ;;  %v5148_v42 = vmul.f32 %v6768_v47, %v5146_v5  ;;  %v5161_v27 = vmul.f32 %v6770_v55, %v5159_v18  ;;  %v5183_v45 = vmul.f32 %v6772_v22, %v5133_v40 }
0x5836   :  { %v5194_v1 = vmul.f32 %v6774_v26, %v5146_v5  ;;  %v5205_v62 = vmul.f32 %v6776_v21, %v5159_v18 }
0x5837   :  { %5138 = vperm.xlu0 %6416, %v5135_v8   ;;  %5128 = vperm.xlu1 %6408, %v5125_v31  }
0x583b   :  { %5151 = vperm.xlu0 %6416, %v5148_v42   ;;  %5164 = vperm.xlu1 %6408, %v5161_v27  }
0x583f   :  { %5186 = vperm.xlu1 %6408, %v5183_v45   ;;  %6417 = vset.pattern.permute.xlu0 %v6808_v11 }
0x5843   :  { %5197 = vperm.xlu1 %6408, %v5194_v1  }
0x58a5   :  { %v5173_v57 = vpop.permute.xlu1 %5172 }
0x58a6   :  { %v5175_v35 = vmul.f32 %v8471_v6, %v5173_v57 }
0x58a8   :  { %5178 = vperm.xlu0 %6417, %v5175_v35  }
0x58ac   :  { %6418 = vset.pattern.permute.xlu0 %v6805_v19 }
0x58ad   :  { %5208 = vperm.xlu0 %6418, %v5205_v62  }
0x58b6   :  { %v5139_v41 = vpop.permute.xlu0 %5138  ;;  %v5129_v63 = vpop.permute.xlu1 %5128 }
0x58b7   :  { %v5141_v29 = vmul.f32 %v5139_v41, %v7809_v25  ;;  %v5131_v32 = vmul.f32 %v5129_v63, %v7809_v25 }
0x58b9   :  { %v5143_v9 = vrot.slane %v5141_v29, 2 }
0x58ba   :  { %v5152_v12 = vpop.permute.xlu0 %5151  ;;  %v5165_v28 = vpop.permute.xlu1 %5164 }
0x58bb   :  { %v5154_v10 = vmul.f32 %v5152_v12, %v7809_v25  ;;  %v5145_v30 = vadd.f32 %v5143_v9, %v5131_v32  ;;  %v5167_v6 = vmul.f32 %v5165_v28, %v7809_v25  ;;  %v5434_v32 = vld [vmem:[%s8552_s14] sm:$0xff] }
0x58bd   :  { %v5156_v4 = vrot.slane %v5154_v10, 4  ;;  %v5169_v19 = vrot.slane %v5167_v6, 6 }
0x58be   :  { %v5187_v11 = vpop.permute.xlu1 %5186 }
0x58bf   :  { %v5158_v59 = vadd.f32 %v5156_v4, %v5145_v30  ;;  %v5189_v43 = vmul.f32 %v7805_v13, %v5187_v11  ;;  %v5436_v4 = vld [vmem:[%s8552_s14 + $0x10] sm:$0xff]  ;;  %v6382_v30 = vpack.c.bf16 %v5435_v20, %v5434_v32 }
0x58c1   :  { %v5171_v15 = vadd.f32 %v5169_v19, %v5158_v59  ;;  %v5191_v58 = vrot.slane %v5189_v43, 2  ;;  %6383 = vmatprep.subr.bf16.mxu0 %v6382_v30 }
0x58c2   :  { %v5198_v54 = vpop.permute.xlu1 %5197  ;;  %6385 = vmatpush3.bf16.msra.mxu0 %v6382_v30 }
0x58c3   :  { %v5200_v39 = vmul.f32 %v7805_v13, %v5198_v54 }
0x58c5   :  { %v5202_v56 = vrot.slane %v5200_v39, 4 }
0x5927   :  { %v5179_v49 = vpop.permute.xlu0 %5178 }
0x5928   :  { %v5181_v50 = vmul.f32 %v7805_v13, %v5179_v49  ;;  %v5656_v49 = vld [vmem:[%s8553_s15] ss:$0 sm:$0xff] }
0x592a   :  { %v5182_v23 = vadd.f32 %v5181_v50, %v5171_v15 }
0x592c   :  { %v5193_v52 = vadd.f32 %v5191_v58, %v5182_v23  ;;  %v5209_v38 = vpop.permute.xlu0 %5208 }
0x592d   :  { %v5211_v47 = vmul.f32 %v7805_v13, %v5209_v38 }
0x592e   :  { %v5204_v16 = vadd.f32 %v5202_v56, %v5193_v52 }
0x592f   :  { %v5213_v25 = vrot.slane %v5211_v47, 6 }
0x5931   :  { %v5215_v60 = vadd.f32 %v5213_v25, %v5204_v16 }
0x5933   :  { %v5288_v55 = vadd.f32 %v8420_v34, %v5215_v60 }
0x5935   :  { %v5289_v51 = vadd.f32 %v6793_v0, %v5288_v55 }
0x5937   :  { %v5290_v22 = vmul.f32 2.0, %v5289_v51 }
0x5939   :  { %v5291_v37 = vsel %vm6929_vm3, %v5290_v22, %v5289_v51 }
0x593a   :  { %v5651_v26 = vmul.f32 -1.442695, %v5291_v37 }
0x593c   :  { %6779 = vpow2.f32 %v5651_v26 }
0x5946   :  { %v6780_v36 = vpop.eup %6779 }
0x5947   :  { %v5295_v3 = vadd.f32 1.0, %v6780_v36 }
0x5949   :  { %6781 = vrcp.f32 %v5295_v3 }
0x5953   :  { %v6782_v13 = vpop.eup %6781 }
0x5954   :  { %v5298_v2 = vmul.f32 2.0, %v6782_v13 }
0x5956   :  { %v5652_v21 = vadd.f32 -1.0, %v5298_v2 }
0x5958   :  { %v5300_v34 = vsel %vm6929_vm3, %v5652_v21, %v6782_v13 }
0x5959   :  { %5303 = vrot.lane.b32.xlu1 %v5300_v34, %s6795_s0  ;;  %v5301_v24 = vmul.f32 %v5300_v34, %v8400_v44 }
0x59cb   :  { %v5304_v33 = vpop.permute.xlu1 %5303 }
0x59cc   :  { %v5306_v14 = vmul.f32 %v5304_v33, %v5300_v34 }
0x59ce   :  { %5308 = vrot.lane.b32.xlu1 %v5306_v14, %s6796_s4 }
0x5a40   :  { %v5309_v53 = vpop.permute.xlu1 %5308 }
0x5a41   :  { %v5311_v7 = vadd.f32 %v5309_v53, %v5301_v24 }
0x5a43   :  { %6783 = vtanh.f32 %v5311_v7 }
0x5a4d   :  { %v6784_v61 = vpop.eup %6783 }
0x5a4e   :  { %5314 = vrot.lane.b32.xlu0 %v6784_v61, %s6795_s0 }
0x5a52   :  { %5322 = vrot.lane.b32.xlu0 %v8434_v46, %s6795_s0 }
0x5ac0   :  { %v5315_v40 = vpop.permute.xlu0 %5314 }
0x5ac1   :  { %v5317_v8 = vmul.f32 %v5315_v40, %v5300_v34 }
0x5ac3   :  { %5319 = vrot.lane.b32.xlu1 %v5317_v8, %s6796_s4 }
0x5ac4   :  { %v5323_v31 = vpop.permute.xlu0 %5322 }
0x5b35   :  { %v5320_v5 = vpop.permute.xlu1 %5319 }
0x5b36   :  { %v5325_v18 = vsel %vm250_vm5, %v5320_v5, %v5323_v31 }
0x5b37   :  { %5985 = vmatmul.mubr.msk.f32.vlgmr.msra.gmra.mrb[28].mxu1 %vm252_vm6, %v5325_v18 }
0x5c0a   :  { %v5395_v44 = vpop.f32.mrb[28].mxu1 }
0x5c0b   :  { %v5396_v42 = vadd.f32 %v8324_v48, %v5395_v44  ;;  %v5986_v27 = vpop.f32.mrb[29].mxu1 }
0x5c0d   :  { %v5399_v45 = vmul.f32 2.0, %v5396_v42 }
0x5c0f   :  { %v5400_v1 = vsel %vm6929_vm3, %v5399_v45, %v5396_v42 }
0x5c10   :  { %v5654_v57 = vmul.f32 -1.442695, %v5400_v1 }
0x5c12   :  { %6785 = vpow2.f32 %v5654_v57 }
0x5c1c   :  { %v6786_v46 = vpop.eup %6785 }
0x5c1d   :  { %v5404_v35 = vadd.f32 1.0, %v6786_v46 }
0x5c1f   :  { %6787 = vrcp.f32 %v5404_v35 }
0x5c29   :  { %v6788_v62 = vpop.eup %6787 }
0x5c2a   :  { %v5407_v41 = vmul.f32 2.0, %v6788_v62 }
0x5c2c   :  { %v5655_v63 = vadd.f32 -1.0, %v5407_v41 }
0x5c2e   :  { %v5409_v12 = vsel %vm6929_vm3, %v5655_v63, %v6788_v62 }
0x5c2f   :  { %5412 = vrot.lane.b32.xlu1 %v5409_v12, %s6795_s0  ;;  %v5410_v29 = vmul.f32 %v5409_v12, %v8430_v17  ;;  %v5437_v17 = vld [vmem:[%s8552_s14 + $0x18] sm:$0xff] }
0x5c30   :  { %v6386_v6 = vpack.c.bf16 %v5437_v17, %v5436_v4 }
0x5c32   :  { %6387 = vmatprep.subr.bf16.mxu0 %v6386_v6 }
0x5c33   :  { %6389 = vmatpush3.bf16.msra.mxu0 %v6386_v6 }
0x5ca1   :  { %v5413_v28 = vpop.permute.xlu1 %5412 }
0x5ca2   :  { %v5415_v48 = vmul.f32 %v5413_v28, %v5409_v12 }
0x5ca4   :  { %5417 = vrot.lane.b32.xlu0 %v5415_v48, %s6796_s4 }
0x5d16   :  { %v5418_v10 = vpop.permute.xlu0 %5417 }
0x5d17   :  { %v5420_v9 = vadd.f32 %v5418_v10, %v5410_v29 }
0x5d19   :  { %6789 = vtanh.f32 %v5420_v9 }
0x5d23   :  { %v6790_v11 = vpop.eup %6789 }
0x5d24   :  { %5423 = vrot.lane.b32.xlu1 %v6790_v11, %s6795_s0 }
0x5d96   :  { %v5424_v59 = vpop.permute.xlu1 %5423 }
0x5d97   :  { %v5426_v54 = vmul.f32 %v5424_v59, %v5409_v12 }
0x5d99   :  { %5428 = vrot.lane.b32.xlu0 %v5426_v54, %s6796_s4 }
0x5e0b   :  { %v5429_v19 = vpop.permute.xlu0 %5428 }
0x5e0c   :  { %5431 = vst.msk [vmem:[#allocation3 + $0xa] sm:$0x3] %vm238_vm4, %v5429_v19 }
0x5e13   :  { %v5433_v43 = vld [vmem:[#allocation3 + $0x8] sm:$0xf] }
0x5e14   :  { %5996 = vmatmul.mubr.msk.f32.vlgmr.msra.gmra.mrb[34].mxu0 %vm250_vm5, %v5433_v43 }
0x5ee7   :  { %v5997_v15 = vpop.f32.mrb[34].mxu0 }
0x5ee8   :  { %v5523_v39 = vadd.f32 %v5997_v15, %v5656_v49  ;;  %v5517_v50 = vpop.f32.mrb[35].mxu0 }
0x5ee9   :  { %v5518_v58 = vadd.f32 %v5656_v49, %v5517_v50 }
0x5eea   :  { %5528 = vst.msk [vmem:[%s8554_s16 + $0x8] sm:$0xf] %vm5527_vm14, %v5523_v39 }
0x5eeb   :  { %5526 = vst.msk [vmem:[%s8554_s16] sm:$0xff] %vm252_vm6, %v5518_v58 }

</bundles_post_ra>
